<compile_context>
chip_gen: v6e
topology: v6e:2x2x1
jax: 0.10.0
libtpu: 0.0.40
codegen_flags: <defaults>
</compile_context>

<pallas_src>
import math

import jax
import jax.numpy as jnp
from jax.experimental import pallas as pl
from jax.experimental.pallas import tpu as pltpu

BN_EPS = 1e-5


def _round_up(x, m):
    return (x + m - 1) // m * m


def _pick_tile(dim, max_tile, align):
    """Largest multiple of `align` dividing `dim` that is <= max_tile."""
    if dim <= max_tile:
        return dim
    best = align
    t = align
    while t <= max_tile:
        if dim % t == 0:
            best = t
        t += align
    return best


# ----------------------------- Pallas kernel --------------------------------

def _make_fused_matmul_kernel(has_bias, has_residual, apply_relu):
    """relu?((A@B) [+bias] [+residual]); f32 accumulation over the K grid axis."""

    def kernel(*refs):
        idx = 0
        a_ref = refs[idx]; idx += 1
        b_ref = refs[idx]; idx += 1
        bias_ref = None
        res_ref = None
        if has_bias:
            bias_ref = refs[idx]; idx += 1
        if has_residual:
            res_ref = refs[idx]; idx += 1
        o_ref = refs[idx]; idx += 1
        acc_ref = refs[idx]

        k = pl.program_id(2)

        @pl.when(k == 0)
        def _():
            acc_ref[...] = jnp.zeros_like(acc_ref)

        acc_ref[...] += jnp.dot(a_ref[...], b_ref[...],
                                preferred_element_type=jnp.float32)

        @pl.when(k == pl.num_programs(2) - 1)
        def _():
            out = acc_ref[...]
            if has_bias:
                out = out + bias_ref[...].astype(jnp.float32)
            if has_residual:
                out = out + res_ref[...].astype(jnp.float32)
            if apply_relu:
                out = jnp.maximum(out, 0.0)
            o_ref[...] = out.astype(o_ref.dtype)

    return kernel


def fused_matmul(a, b, bias=None, residual=None, relu=False,
                 out_dtype=jnp.bfloat16):
    """a:(M,K) @ b:(K,N) (+ bias) (+ residual) (+ relu) -> (M,N) out_dtype.

    bf16 MXU inputs, f32 accumulator in VMEM scratch, tiled K-reduction grid.
    """
    M, K = a.shape
    K2, N = b.shape
    assert K == K2

    Mp = _round_up(M, 8)
    Kp = _round_up(K, 128)
    Np = _round_up(N, 128)

    # M is tiny at this batch size -> keep all rows in one tile (no M tiling);
    # tile N/K for pipelining and to match the MXU-native widths.
    tm = _pick_tile(Mp, 512, 8)
    tn = _pick_tile(Np, 256, 128)
    tk = _pick_tile(Kp, 1024, 128)

    a_p = jnp.pad(a.astype(jnp.bfloat16), ((0, Mp - M), (0, Kp - K)))
    b_p = jnp.pad(b.astype(jnp.bfloat16), ((0, Kp - K), (0, Np - N)))

    operands = [a_p, b_p]
    in_specs = [
        pl.BlockSpec((tm, tk), lambda i, j, k: (i, k)),   # activations/patches
        pl.BlockSpec((tk, tn), lambda i, j, k: (k, j)),   # weights
    ]

    has_bias = bias is not None
    if has_bias:
        bias_p = jnp.pad(bias.astype(jnp.float32).reshape(1, N),
                         ((0, 0), (0, Np - N)))
        operands.append(bias_p)
        in_specs.append(pl.BlockSpec((1, tn), lambda i, j, k: (0, j)))

    has_residual = residual is not None
    if has_residual:
        res_p = jnp.pad(residual.astype(jnp.bfloat16),
                        ((0, Mp - M), (0, Np - N)))
        operands.append(res_p)
        in_specs.append(pl.BlockSpec((tm, tn), lambda i, j, k: (i, j)))

    kernel = _make_fused_matmul_kernel(has_bias, has_residual, relu)

    out = pl.pallas_call(
        kernel,
        out_shape=jax.ShapeDtypeStruct((Mp, Np), out_dtype),
        grid=(Mp // tm, Np // tn, Kp // tk),
        in_specs=in_specs,
        out_specs=pl.BlockSpec((tm, tn), lambda i, j, k: (i, j)),
        scratch_shapes=[pltpu.VMEM((tm, tn), jnp.float32)],
        compiler_params=pltpu.CompilerParams(
            dimension_semantics=("parallel", "parallel", "arbitrary")),
    )(*operands)
    return out[:M, :N]


# ----------------------------- glue (im2col etc.) ----------------------------

def im2col(x, kh, kw, stride, padding):
    """x: NHWC -> (N*OH*OW, kh*kw*C) patches matrix (bf16)."""
    # TODO(synk): patches are still materialized in HBM (~kh*kw activation
    # blowup); folding the shifted-window gather into the kernel index_map
    # needs stride-aware Element blocks and is left for a follow-up.
    n, h, w, c = x.shape
    xp = jnp.pad(x, ((0, 0), (padding, padding), (padding, padding), (0, 0)))
    oh = (h + 2 * padding - kh) // stride + 1
    ow = (w + 2 * padding - kw) // stride + 1
    cols = []
    for i in range(kh):
        for j in range(kw):
            cols.append(jax.lax.slice(
                xp, (0, i, j, 0),
                (n, i + (oh - 1) * stride + 1, j + (ow - 1) * stride + 1, c),
                (1, stride, stride, 1)))                 # (n, oh, ow, c)
    patches = jnp.stack(cols, axis=3)                    # (n, oh, ow, kh*kw, c)
    return patches.reshape(n * oh * ow, kh * kw * c), oh, ow


def conv_bn(x, w_oihw, stride, padding, relu, residual=None,
            out_dtype=jnp.bfloat16):
    """conv (bias=False) + eval-mode BatchNorm2d (+ residual) (+ relu)."""
    oc, ic, kh, kw = w_oihw.shape
    patches, oh, ow = im2col(x, kh, kw, stride, padding)
    # PyTorch conv weight (OC, IC, KH, KW) -> (KH*KW*IC, OC) to match patches.
    w_mat = jnp.transpose(w_oihw, (2, 3, 1, 0)).reshape(kh * kw * ic, oc)
    # BN eval mode (gamma=1, beta=0, mean=0, var=1): y = x / sqrt(1 + eps)
    # -> fold the per-channel scale into the weights before the bf16 cast.
    w_mat = w_mat * (1.0 / math.sqrt(1.0 + BN_EPS))
    out = fused_matmul(patches, w_mat, bias=None, residual=residual,
                       relu=relu, out_dtype=out_dtype)
    return out.reshape(x.shape[0], oh, ow, oc)


def maxpool2d(x, k=3, stride=2, padding=1):
    """nn.MaxPool2d(3, 2, 1) on NHWC: jnp.maximum tree over the 9 shifted
    strided slices (fuses under jit; no stacked HBM intermediate)."""
    n, h, w, c = x.shape
    neg = jnp.finfo(x.dtype).min
    xp = jnp.pad(x, ((0, 0), (padding, padding), (padding, padding), (0, 0)),
                 constant_values=neg)
    oh = (h + 2 * padding - k) // stride + 1
    ow = (w + 2 * padding - k) // stride + 1
    out = None
    for i in range(k):
        for j in range(k):
            s = jax.lax.slice(
                xp, (0, i, j, 0),
                (n, i + (oh - 1) * stride + 1, j + (ow - 1) * stride + 1, c),
                (1, stride, stride, 1))
            out = s if out is None else jnp.maximum(out, s)
    return out


def basic_block(x, blk, stride):
    n = x.shape[0]
    if "down_w" in blk:
        identity = conv_bn(x, blk["down_w"], stride=stride, padding=0,
                           relu=False)
    else:
        identity = x
    h = conv_bn(x, blk["w1"], stride=stride, padding=1, relu=True)
    _, oh, ow, oc = h.shape
    # conv2 + bn2 + residual add + final relu, all fused in one kernel call.
    out = conv_bn(h, blk["w2"], stride=1, padding=1, relu=True,
                  residual=identity.reshape(n * oh * ow, oc))
    return out


def resnet_forward(params, x_nchw):
    x = jnp.transpose(x_nchw, (0, 2, 3, 1)).astype(jnp.bfloat16)  # NCHW->NHWC
    x = conv_bn(x, params["stem_w"], stride=2, padding=3, relu=True)
    x = maxpool2d(x, k=3, stride=2, padding=1)
    for si, blocks in enumerate(params["stages"]):
        for bi, blk in enumerate(blocks):
            stride = 2 if (si > 0 and bi == 0) else 1   # static: stage layout
            x = basic_block(x, blk, stride)
    # AdaptiveAvgPool2d((1,1)) + flatten, reduced in f32.
    feat = jnp.mean(x.astype(jnp.float32), axis=(1, 2))
    logits = fused_matmul(feat, params["fc_w"].T, bias=params["fc_b"],
                          residual=None, relu=False, out_dtype=jnp.float32)
    return logits


resnet_forward_jit = jax.jit(resnet_forward)


# ----------------------------- parameter init --------------------------------

def kaiming_conv(key, oc, ic, kh, kw):
    # kaiming_normal_(mode='fan_out', nonlinearity='relu')
    fan_out = oc * kh * kw
    std = math.sqrt(2.0 / fan_out)
    return std * jax.random.normal(key, (oc, ic, kh, kw), jnp.float32)


def init_params(key, layers=(1, 1, 1, 1), num_classes=10):
    keys = list(jax.random.split(key, 64))
    it = iter(keys)
    params = {"stem_w": kaiming_conv(next(it), 64, 3, 7, 7)}
    inplanes = 64
    stages = []
    for planes, nblocks, stage_stride in zip((64, 128, 256, 512), layers,
                                             (1, 2, 2, 2)):
        blocks = []
        for b in range(nblocks):
            s = stage_stride if b == 0 else 1
            blk = {
                "w1": kaiming_conv(next(it), planes, inplanes, 3, 3),
                "w2": kaiming_conv(next(it), planes, planes, 3, 3),
            }
            if s != 1 or inplanes != planes:               # 1x1 downsample conv
                blk["down_w"] = kaiming_conv(next(it), planes, inplanes, 1, 1)
            inplanes = planes
            blocks.append(blk)
        stages.append(blocks)
    params["stages"] = stages
    fan_in = 512  # BasicBlock.expansion == 1
    bound = 1.0 / math.sqrt(fan_in)
    params["fc_w"] = jax.random.uniform(next(it), (num_classes, fan_in),
                                        jnp.float32, -bound, bound)
    params["fc_b"] = jax.random.uniform(next(it), (num_classes,),
                                        jnp.float32, -bound, bound)
    return params


# TODO(synk): BatchNorm is implemented in inference (eval) mode with the
# module's deterministic init (gamma=1, beta=0, running stats 0/1); training-
# mode batch statistics are not reproduced.

if __name__ == "__main__":
    key = jax.random.PRNGKey(0)
    k_param, k_x = jax.random.split(key)
    params = init_params(k_param, layers=(1, 1, 1, 1), num_classes=10)
    x = jax.random.normal(k_x, (2, 3, 32, 32), jnp.float32)   # NCHW, like PyTorch
    logits = resnet_forward_jit(params, x)
    logits = jax.block_until_ready(logits)
    assert logits.shape == (2, 10)
    assert bool(jnp.all(jnp.isfinite(logits)))
    print("KERNEL_OK")
</pallas_src>

<mosaic_0001>
module attributes {stable_mosaic.version = 11 : i64} {
  func.func @kernel(%arg0: i32, %arg1: i32, %arg2: i32, %arg3: memref<512x256xbf16, #tpu.memory_space<vmem>>, %arg4: memref<256x128xbf16, #tpu.memory_space<vmem>>, %arg5: memref<512x128xbf16, #tpu.memory_space<vmem>>, %arg6: memref<512x128xf32, #tpu.memory_space<vmem>>) attributes {dimension_semantics = [#tpu.dimension_semantics<parallel>, #tpu.dimension_semantics<parallel>, #tpu.dimension_semantics<arbitrary>], iteration_bounds = array<i64: 1, 1, 1>, scalar_prefetch = 0 : i64, scratch_operands = 1 : i64, tpu.core_type = #tpu.core_type<tc>, window_params = [{transform_indices = @transform_0, window_bounds = array<i64: 512, 256>}, {transform_indices = @transform_1, window_bounds = array<i64: 256, 128>}, {transform_indices = @transform_2, window_bounds = array<i64: 512, 128>}]} {
    %c0_i32 = arith.constant 0 : i32
    %0 = arith.cmpi eq, %arg2, %c0_i32 : i32
    %1 = arith.extui %0 : i1 to i32
    %c0_i32_0 = arith.constant 0 : i32
    %2 = arith.cmpi ne, %1, %c0_i32_0 : i32
    scf.if %2 {
      %cst_10 = arith.constant 0.000000e+00 : f32
      %12 = vector.broadcast %cst_10 : f32 to vector<512x128xf32>
      %c0_11 = arith.constant 0 : index
      %c0_12 = arith.constant 0 : index
      %13 = vector.load %arg6[%c0_11, %c0_12] : memref<512x128xf32, #tpu.memory_space<vmem>>, vector<512x128xf32>
      tpu.vector_store %arg6[%c0_11, %c0_12], %12 {strides = array<i32>} : memref<512x128xf32, #tpu.memory_space<vmem>>, vector<512x128xf32>,
    } else {
    }
    %c0 = arith.constant 0 : index
    %c0_1 = arith.constant 0 : index
    %3 = vector.load %arg6[%c0, %c0_1] : memref<512x128xf32, #tpu.memory_space<vmem>>, vector<512x128xf32>
    %c0_2 = arith.constant 0 : index
    %c0_3 = arith.constant 0 : index
    %4 = vector.load %arg3[%c0_2, %c0_3] : memref<512x256xbf16, #tpu.memory_space<vmem>>, vector<512x256xbf16>
    %c0_4 = arith.constant 0 : index
    %c0_5 = arith.constant 0 : index
    %5 = vector.load %arg4[%c0_4, %c0_5] : memref<256x128xbf16, #tpu.memory_space<vmem>>, vector<256x128xbf16>
    %cst = arith.constant dense<0.000000e+00> : vector<512x128xf32>
    %6 = tpu.matmul %4, %5, %cst {dimension_numbers = #tpu.dot_dimension_numbers<[1], [0], [0], [1], [0, 0, 1, 1], [], []>} : vector<512x256xbf16>, vector<256x128xbf16>, vector<512x128xf32> -> vector<512x128xf32>
    %7 = arith.addf %3, %6 : vector<512x128xf32>
    %c0_6 = arith.constant 0 : index
    %c0_7 = arith.constant 0 : index
    %8 = vector.load %arg6[%c0_6, %c0_7] : memref<512x128xf32, #tpu.memory_space<vmem>>, vector<512x128xf32>
    tpu.vector_store %arg6[%c0_6, %c0_7], %7 {strides = array<i32>} : memref<512x128xf32, #tpu.memory_space<vmem>>, vector<512x128xf32>,
    %c0_i32_8 = arith.constant 0 : i32
    %9 = arith.cmpi eq, %arg2, %c0_i32_8 : i32
    %10 = arith.extui %9 : i1 to i32
    %c0_i32_9 = arith.constant 0 : i32
    %11 = arith.cmpi ne, %10, %c0_i32_9 : i32
    scf.if %11 {
      %c0_10 = arith.constant 0 : index
      %c0_11 = arith.constant 0 : index
      %12 = vector.load %arg6[%c0_10, %c0_11] : memref<512x128xf32, #tpu.memory_space<vmem>>, vector<512x128xf32>
      %cst_12 = arith.constant 0.000000e+00 : f32
      %13 = vector.broadcast %cst_12 : f32 to vector<512x128xf32>
      %14 = arith.maximumf %12, %13 : vector<512x128xf32>
      %15 = arith.truncf %14 : vector<512x128xf32> to vector<512x128xbf16>
      %c0_13 = arith.constant 0 : index
      %c0_14 = arith.constant 0 : index
      %16 = vector.load %arg5[%c0_13, %c0_14] : memref<512x128xbf16, #tpu.memory_space<vmem>>, vector<512x128xbf16>
      tpu.vector_store %arg5[%c0_13, %c0_14], %15 {strides = array<i32>} : memref<512x128xbf16, #tpu.memory_space<vmem>>, vector<512x128xbf16>,
    } else {
    }
    return
  }
  func.func @transform_0(%arg0: i32, %arg1: i32, %arg2: i32) -> (i32, i32) {
    %c0_i32 = arith.constant 0 : i32
    return %arg0, %arg2 : i32, i32
  }
  func.func @transform_1(%arg0: i32, %arg1: i32, %arg2: i32) -> (i32, i32) {
    %c0_i32 = arith.constant 0 : i32
    return %arg2, %arg1 : i32, i32
  }
  func.func @transform_2(%arg0: i32, %arg1: i32, %arg2: i32) -> (i32, i32) {
    %c0_i32 = arith.constant 0 : i32
    return %arg0, %arg1 : i32, i32
  }
}

module attributes {stable_mosaic.version = 11 : i64} {
  func.func @kernel(%arg0: i32, %arg1: i32, %arg2: i32, %arg3: memref<128x640xbf16, #tpu.memory_space<vmem>>, %arg4: memref<640x128xbf16, #tpu.memory_space<vmem>>, %arg5: memref<128x128xbf16, #tpu.memory_space<vmem>>, %arg6: memref<128x128xf32, #tpu.memory_space<vmem>>) attributes {dimension_semantics = [#tpu.dimension_semantics<parallel>, #tpu.dimension_semantics<parallel>, #tpu.dimension_semantics<arbitrary>], iteration_bounds = array<i64: 1, 1, 1>, scalar_prefetch = 0 : i64, scratch_operands = 1 : i64, tpu.core_type = #tpu.core_type<tc>, window_params = [{transform_indices = @transform_0, window_bounds = array<i64: 128, 640>}, {transform_indices = @transform_1, window_bounds = array<i64: 640, 128>}, {transform_indices = @transform_2, window_bounds = array<i64: 128, 128>}]} {
    %c0_i32 = arith.constant 0 : i32
    %0 = arith.cmpi eq, %arg2, %c0_i32 : i32
    %1 = arith.extui %0 : i1 to i32
    %c0_i32_0 = arith.constant 0 : i32
    %2 = arith.cmpi ne, %1, %c0_i32_0 : i32
    scf.if %2 {
      %cst_10 = arith.constant 0.000000e+00 : f32
      %12 = vector.broadcast %cst_10 : f32 to vector<128x128xf32>
      %c0_11 = arith.constant 0 : index
      %c0_12 = arith.constant 0 : index
      %13 = vector.load %arg6[%c0_11, %c0_12] : memref<128x128xf32, #tpu.memory_space<vmem>>, vector<128x128xf32>
      tpu.vector_store %arg6[%c0_11, %c0_12], %12 {strides = array<i32>} : memref<128x128xf32, #tpu.memory_space<vmem>>, vector<128x128xf32>,
    } else {
    }
    %c0 = arith.constant 0 : index
    %c0_1 = arith.constant 0 : index
    %3 = vector.load %arg6[%c0, %c0_1] : memref<128x128xf32, #tpu.memory_space<vmem>>, vector<128x128xf32>
    %c0_2 = arith.constant 0 : index
    %c0_3 = arith.constant 0 : index
    %4 = vector.load %arg3[%c0_2, %c0_3] : memref<128x640xbf16, #tpu.memory_space<vmem>>, vector<128x640xbf16>
    %c0_4 = arith.constant 0 : index
    %c0_5 = arith.constant 0 : index
    %5 = vector.load %arg4[%c0_4, %c0_5] : memref<640x128xbf16, #tpu.memory_space<vmem>>, vector<640x128xbf16>
    %cst = arith.constant dense<0.000000e+00> : vector<128x128xf32>
    %6 = tpu.matmul %4, %5, %cst {dimension_numbers = #tpu.dot_dimension_numbers<[1], [0], [0], [1], [0, 0, 1, 1], [], []>} : vector<128x640xbf16>, vector<640x128xbf16>, vector<128x128xf32> -> vector<128x128xf32>
    %7 = arith.addf %3, %6 : vector<128x128xf32>
    %c0_6 = arith.constant 0 : index
    %c0_7 = arith.constant 0 : index
    %8 = vector.load %arg6[%c0_6, %c0_7] : memref<128x128xf32, #tpu.memory_space<vmem>>, vector<128x128xf32>
    tpu.vector_store %arg6[%c0_6, %c0_7], %7 {strides = array<i32>} : memref<128x128xf32, #tpu.memory_space<vmem>>, vector<128x128xf32>,
    %c0_i32_8 = arith.constant 0 : i32
    %9 = arith.cmpi eq, %arg2, %c0_i32_8 : i32
    %10 = arith.extui %9 : i1 to i32
    %c0_i32_9 = arith.constant 0 : i32
    %11 = arith.cmpi ne, %10, %c0_i32_9 : i32
    scf.if %11 {
      %c0_10 = arith.constant 0 : index
      %c0_11 = arith.constant 0 : index
      %12 = vector.load %arg6[%c0_10, %c0_11] : memref<128x128xf32, #tpu.memory_space<vmem>>, vector<128x128xf32>
      %cst_12 = arith.constant 0.000000e+00 : f32
      %13 = vector.broadcast %cst_12 : f32 to vector<128x128xf32>
      %14 = arith.maximumf %12, %13 : vector<128x128xf32>
      %15 = arith.truncf %14 : vector<128x128xf32> to vector<128x128xbf16>
      %c0_13 = arith.constant 0 : index
      %c0_14 = arith.constant 0 : index
      %16 = vector.load %arg5[%c0_13, %c0_14] : memref<128x128xbf16, #tpu.memory_space<vmem>>, vector<128x128xbf16>
      tpu.vector_store %arg5[%c0_13, %c0_14], %15 {strides = array<i32>} : memref<128x128xbf16, #tpu.memory_space<vmem>>, vector<128x128xbf16>,
    } else {
    }
    return
  }
  func.func @transform_0(%arg0: i32, %arg1: i32, %arg2: i32) -> (i32, i32) {
    %c0_i32 = arith.constant 0 : i32
    return %arg0, %arg2 : i32, i32
  }
  func.func @transform_1(%arg0: i32, %arg1: i32, %arg2: i32) -> (i32, i32) {
    %c0_i32 = arith.constant 0 : i32
    return %arg2, %arg1 : i32, i32
  }
  func.func @transform_2(%arg0: i32, %arg1: i32, %arg2: i32) -> (i32, i32) {
    %c0_i32 = arith.constant 0 : i32
    return %arg0, %arg1 : i32, i32
  }
}

module attributes {stable_mosaic.version = 11 : i64} {
  func.func @kernel(%arg0: i32, %arg1: i32, %arg2: i32, %arg3: memref<128x640xbf16, #tpu.memory_space<vmem>>, %arg4: memref<640x128xbf16, #tpu.memory_space<vmem>>, %arg5: memref<128x128xbf16, #tpu.memory_space<vmem>>, %arg6: memref<128x128xbf16, #tpu.memory_space<vmem>>, %arg7: memref<128x128xf32, #tpu.memory_space<vmem>>) attributes {dimension_semantics = [#tpu.dimension_semantics<parallel>, #tpu.dimension_semantics<parallel>, #tpu.dimension_semantics<arbitrary>], iteration_bounds = array<i64: 1, 1, 1>, scalar_prefetch = 0 : i64, scratch_operands = 1 : i64, tpu.core_type = #tpu.core_type<tc>, window_params = [{transform_indices = @transform_0, window_bounds = array<i64: 128, 640>}, {transform_indices = @transform_1, window_bounds = array<i64: 640, 128>}, {transform_indices = @transform_2, window_bounds = array<i64: 128, 128>}, {transform_indices = @transform_3, window_bounds = array<i64: 128, 128>}]} {
    %c0_i32 = arith.constant 0 : i32
    %0 = arith.cmpi eq, %arg2, %c0_i32 : i32
    %1 = arith.extui %0 : i1 to i32
    %c0_i32_0 = arith.constant 0 : i32
    %2 = arith.cmpi ne, %1, %c0_i32_0 : i32
    scf.if %2 {
      %cst_10 = arith.constant 0.000000e+00 : f32
      %12 = vector.broadcast %cst_10 : f32 to vector<128x128xf32>
      %c0_11 = arith.constant 0 : index
      %c0_12 = arith.constant 0 : index
      %13 = vector.load %arg7[%c0_11, %c0_12] : memref<128x128xf32, #tpu.memory_space<vmem>>, vector<128x128xf32>
      tpu.vector_store %arg7[%c0_11, %c0_12], %12 {strides = array<i32>} : memref<128x128xf32, #tpu.memory_space<vmem>>, vector<128x128xf32>,
    } else {
    }
    %c0 = arith.constant 0 : index
    %c0_1 = arith.constant 0 : index
    %3 = vector.load %arg7[%c0, %c0_1] : memref<128x128xf32, #tpu.memory_space<vmem>>, vector<128x128xf32>
    %c0_2 = arith.constant 0 : index
    %c0_3 = arith.constant 0 : index
    %4 = vector.load %arg3[%c0_2, %c0_3] : memref<128x640xbf16, #tpu.memory_space<vmem>>, vector<128x640xbf16>
    %c0_4 = arith.constant 0 : index
    %c0_5 = arith.constant 0 : index
    %5 = vector.load %arg4[%c0_4, %c0_5] : memref<640x128xbf16, #tpu.memory_space<vmem>>, vector<640x128xbf16>
    %cst = arith.constant dense<0.000000e+00> : vector<128x128xf32>
    %6 = tpu.matmul %4, %5, %cst {dimension_numbers = #tpu.dot_dimension_numbers<[1], [0], [0], [1], [0, 0, 1, 1], [], []>} : vector<128x640xbf16>, vector<640x128xbf16>, vector<128x128xf32> -> vector<128x128xf32>
    %7 = arith.addf %3, %6 : vector<128x128xf32>
    %c0_6 = arith.constant 0 : index
    %c0_7 = arith.constant 0 : index
    %8 = vector.load %arg7[%c0_6, %c0_7] : memref<128x128xf32, #tpu.memory_space<vmem>>, vector<128x128xf32>
    tpu.vector_store %arg7[%c0_6, %c0_7], %7 {strides = array<i32>} : memref<128x128xf32, #tpu.memory_space<vmem>>, vector<128x128xf32>,
    %c0_i32_8 = arith.constant 0 : i32
    %9 = arith.cmpi eq, %arg2, %c0_i32_8 : i32
    %10 = arith.extui %9 : i1 to i32
    %c0_i32_9 = arith.constant 0 : i32
    %11 = arith.cmpi ne, %10, %c0_i32_9 : i32
    scf.if %11 {
      %c0_10 = arith.constant 0 : index
      %c0_11 = arith.constant 0 : index
      %12 = vector.load %arg7[%c0_10, %c0_11] : memref<128x128xf32, #tpu.memory_space<vmem>>, vector<128x128xf32>
      %c0_12 = arith.constant 0 : index
      %c0_13 = arith.constant 0 : index
      %13 = vector.load %arg5[%c0_12, %c0_13] : memref<128x128xbf16, #tpu.memory_space<vmem>>, vector<128x128xbf16>
      %14 = arith.extf %13 : vector<128x128xbf16> to vector<128x128xf32>
      %15 = arith.addf %12, %14 : vector<128x128xf32>
      %cst_14 = arith.constant 0.000000e+00 : f32
      %16 = vector.broadcast %cst_14 : f32 to vector<128x128xf32>
      %17 = arith.maximumf %15, %16 : vector<128x128xf32>
      %18 = arith.truncf %17 : vector<128x128xf32> to vector<128x128xbf16>
      %c0_15 = arith.constant 0 : index
      %c0_16 = arith.constant 0 : index
      %19 = vector.load %arg6[%c0_15, %c0_16] : memref<128x128xbf16, #tpu.memory_space<vmem>>, vector<128x128xbf16>
      tpu.vector_store %arg6[%c0_15, %c0_16], %18 {strides = array<i32>} : memref<128x128xbf16, #tpu.memory_space<vmem>>, vector<128x128xbf16>,
    } else {
    }
    return
  }
  func.func @transform_0(%arg0: i32, %arg1: i32, %arg2: i32) -> (i32, i32) {
    %c0_i32 = arith.constant 0 : i32
    return %arg0, %arg2 : i32, i32
  }
  func.func @transform_1(%arg0: i32, %arg1: i32, %arg2: i32) -> (i32, i32) {
    %c0_i32 = arith.constant 0 : i32
    return %arg2, %arg1 : i32, i32
  }
  func.func @transform_2(%arg0: i32, %arg1: i32, %arg2: i32) -> (i32, i32) {
    %c0_i32 = arith.constant 0 : i32
    return %arg0, %arg1 : i32, i32
  }
  func.func @transform_3(%arg0: i32, %arg1: i32, %arg2: i32) -> (i32, i32) {
    %c0_i32 = arith.constant 0 : i32
    return %arg0, %arg1 : i32, i32
  }
}

module attributes {stable_mosaic.version = 11 : i64} {
  func.func @kernel(%arg0: i32, %arg1: i32, %arg2: i32, %arg3: memref<32x640xbf16, #tpu.memory_space<vmem>>, %arg4: memref<640x128xbf16, #tpu.memory_space<vmem>>, %arg5: memref<32x128xbf16, #tpu.memory_space<vmem>>, %arg6: memref<32x128xf32, #tpu.memory_space<vmem>>) attributes {dimension_semantics = [#tpu.dimension_semantics<parallel>, #tpu.dimension_semantics<parallel>, #tpu.dimension_semantics<arbitrary>], iteration_bounds = array<i64: 1, 1, 1>, scalar_prefetch = 0 : i64, scratch_operands = 1 : i64, tpu.core_type = #tpu.core_type<tc>, window_params = [{transform_indices = @transform_0, window_bounds = array<i64: 32, 640>}, {transform_indices = @transform_1, window_bounds = array<i64: 640, 128>}, {transform_indices = @transform_2, window_bounds = array<i64: 32, 128>}]} {
    %c0_i32 = arith.constant 0 : i32
    %0 = arith.cmpi eq, %arg2, %c0_i32 : i32
    %1 = arith.extui %0 : i1 to i32
    %c0_i32_0 = arith.constant 0 : i32
    %2 = arith.cmpi ne, %1, %c0_i32_0 : i32
    scf.if %2 {
      %cst_10 = arith.constant 0.000000e+00 : f32
      %12 = vector.broadcast %cst_10 : f32 to vector<32x128xf32>
      %c0_11 = arith.constant 0 : index
      %c0_12 = arith.constant 0 : index
      %13 = vector.load %arg6[%c0_11, %c0_12] : memref<32x128xf32, #tpu.memory_space<vmem>>, vector<32x128xf32>
      tpu.vector_store %arg6[%c0_11, %c0_12], %12 {strides = array<i32>} : memref<32x128xf32, #tpu.memory_space<vmem>>, vector<32x128xf32>,
    } else {
    }
    %c0 = arith.constant 0 : index
    %c0_1 = arith.constant 0 : index
    %3 = vector.load %arg6[%c0, %c0_1] : memref<32x128xf32, #tpu.memory_space<vmem>>, vector<32x128xf32>
    %c0_2 = arith.constant 0 : index
    %c0_3 = arith.constant 0 : index
    %4 = vector.load %arg3[%c0_2, %c0_3] : memref<32x640xbf16, #tpu.memory_space<vmem>>, vector<32x640xbf16>
    %c0_4 = arith.constant 0 : index
    %c0_5 = arith.constant 0 : index
    %5 = vector.load %arg4[%c0_4, %c0_5] : memref<640x128xbf16, #tpu.memory_space<vmem>>, vector<640x128xbf16>
    %cst = arith.constant dense<0.000000e+00> : vector<32x128xf32>
    %6 = tpu.matmul %4, %5, %cst {dimension_numbers = #tpu.dot_dimension_numbers<[1], [0], [0], [1], [0, 0, 1, 1], [], []>} : vector<32x640xbf16>, vector<640x128xbf16>, vector<32x128xf32> -> vector<32x128xf32>
    %7 = arith.addf %3, %6 : vector<32x128xf32>
    %c0_6 = arith.constant 0 : index
    %c0_7 = arith.constant 0 : index
    %8 = vector.load %arg6[%c0_6, %c0_7] : memref<32x128xf32, #tpu.memory_space<vmem>>, vector<32x128xf32>
    tpu.vector_store %arg6[%c0_6, %c0_7], %7 {strides = array<i32>} : memref<32x128xf32, #tpu.memory_space<vmem>>, vector<32x128xf32>,
    %c0_i32_8 = arith.constant 0 : i32
    %9 = arith.cmpi eq, %arg2, %c0_i32_8 : i32
    %10 = arith.extui %9 : i1 to i32
    %c0_i32_9 = arith.constant 0 : i32
    %11 = arith.cmpi ne, %10, %c0_i32_9 : i32
    scf.if %11 {
      %c0_10 = arith.constant 0 : index
      %c0_11 = arith.constant 0 : index
      %12 = vector.load %arg6[%c0_10, %c0_11] : memref<32x128xf32, #tpu.memory_space<vmem>>, vector<32x128xf32>
      %cst_12 = arith.constant 0.000000e+00 : f32
      %13 = vector.broadcast %cst_12 : f32 to vector<32x128xf32>
      %14 = arith.maximumf %12, %13 : vector<32x128xf32>
      %15 = arith.truncf %14 : vector<32x128xf32> to vector<32x128xbf16>
      %c0_13 = arith.constant 0 : index
      %c0_14 = arith.constant 0 : index
      %16 = vector.load %arg5[%c0_13, %c0_14] : memref<32x128xbf16, #tpu.memory_space<vmem>>, vector<32x128xbf16>
      tpu.vector_store %arg5[%c0_13, %c0_14], %15 {strides = array<i32>} : memref<32x128xbf16, #tpu.memory_space<vmem>>, vector<32x128xbf16>,
    } else {
    }
    return
  }
  func.func @transform_0(%arg0: i32, %arg1: i32, %arg2: i32) -> (i32, i32) {
    %c0_i32 = arith.constant 0 : i32
    return %arg0, %arg2 : i32, i32
  }
  func.func @transform_1(%arg0: i32, %arg1: i32, %arg2: i32) -> (i32, i32) {
    %c0_i32 = arith.constant 0 : i32
    return %arg2, %arg1 : i32, i32
  }
  func.func @transform_2(%arg0: i32, %arg1: i32, %arg2: i32) -> (i32, i32) {
    %c0_i32 = arith.constant 0 : i32
    return %arg0, %arg1 : i32, i32
  }
}

module attributes {stable_mosaic.version = 11 : i64} {
  func.func @kernel(%arg0: i32, %arg1: i32, %arg2: i32, %arg3: memref<32x128xbf16, #tpu.memory_space<vmem>>, %arg4: memref<128x128xbf16, #tpu.memory_space<vmem>>, %arg5: memref<32x128xbf16, #tpu.memory_space<vmem>>, %arg6: memref<32x128xf32, #tpu.memory_space<vmem>>) attributes {dimension_semantics = [#tpu.dimension_semantics<parallel>, #tpu.dimension_semantics<parallel>, #tpu.dimension_semantics<arbitrary>], iteration_bounds = array<i64: 1, 1, 1>, scalar_prefetch = 0 : i64, scratch_operands = 1 : i64, tpu.core_type = #tpu.core_type<tc>, window_params = [{transform_indices = @transform_0, window_bounds = array<i64: 32, 128>}, {transform_indices = @transform_1, window_bounds = array<i64: 128, 128>}, {transform_indices = @transform_2, window_bounds = array<i64: 32, 128>}]} {
    %c0_i32 = arith.constant 0 : i32
    %0 = arith.cmpi eq, %arg2, %c0_i32 : i32
    %1 = arith.extui %0 : i1 to i32
    %c0_i32_0 = arith.constant 0 : i32
    %2 = arith.cmpi ne, %1, %c0_i32_0 : i32
    scf.if %2 {
      %cst_10 = arith.constant 0.000000e+00 : f32
      %12 = vector.broadcast %cst_10 : f32 to vector<32x128xf32>
      %c0_11 = arith.constant 0 : index
      %c0_12 = arith.constant 0 : index
      %13 = vector.load %arg6[%c0_11, %c0_12] : memref<32x128xf32, #tpu.memory_space<vmem>>, vector<32x128xf32>
      tpu.vector_store %arg6[%c0_11, %c0_12], %12 {strides = array<i32>} : memref<32x128xf32, #tpu.memory_space<vmem>>, vector<32x128xf32>,
    } else {
    }
    %c0 = arith.constant 0 : index
    %c0_1 = arith.constant 0 : index
    %3 = vector.load %arg6[%c0, %c0_1] : memref<32x128xf32, #tpu.memory_space<vmem>>, vector<32x128xf32>
    %c0_2 = arith.constant 0 : index
    %c0_3 = arith.constant 0 : index
    %4 = vector.load %arg3[%c0_2, %c0_3] : memref<32x128xbf16, #tpu.memory_space<vmem>>, vector<32x128xbf16>
    %c0_4 = arith.constant 0 : index
    %c0_5 = arith.constant 0 : index
    %5 = vector.load %arg4[%c0_4, %c0_5] : memref<128x128xbf16, #tpu.memory_space<vmem>>, vector<128x128xbf16>
    %cst = arith.constant dense<0.000000e+00> : vector<32x128xf32>
    %6 = tpu.matmul %4, %5, %cst {dimension_numbers = #tpu.dot_dimension_numbers<[1], [0], [0], [1], [0, 0, 1, 1], [], []>} : vector<32x128xbf16>, vector<128x128xbf16>, vector<32x128xf32> -> vector<32x128xf32>
    %7 = arith.addf %3, %6 : vector<32x128xf32>
    %c0_6 = arith.constant 0 : index
    %c0_7 = arith.constant 0 : index
    %8 = vector.load %arg6[%c0_6, %c0_7] : memref<32x128xf32, #tpu.memory_space<vmem>>, vector<32x128xf32>
    tpu.vector_store %arg6[%c0_6, %c0_7], %7 {strides = array<i32>} : memref<32x128xf32, #tpu.memory_space<vmem>>, vector<32x128xf32>,
    %c0_i32_8 = arith.constant 0 : i32
    %9 = arith.cmpi eq, %arg2, %c0_i32_8 : i32
    %10 = arith.extui %9 : i1 to i32
    %c0_i32_9 = arith.constant 0 : i32
    %11 = arith.cmpi ne, %10, %c0_i32_9 : i32
    scf.if %11 {
      %c0_10 = arith.constant 0 : index
      %c0_11 = arith.constant 0 : index
      %12 = vector.load %arg6[%c0_10, %c0_11] : memref<32x128xf32, #tpu.memory_space<vmem>>, vector<32x128xf32>
      %13 = arith.truncf %12 : vector<32x128xf32> to vector<32x128xbf16>
      %c0_12 = arith.constant 0 : index
      %c0_13 = arith.constant 0 : index
      %14 = vector.load %arg5[%c0_12, %c0_13] : memref<32x128xbf16, #tpu.memory_space<vmem>>, vector<32x128xbf16>
      tpu.vector_store %arg5[%c0_12, %c0_13], %13 {strides = array<i32>} : memref<32x128xbf16, #tpu.memory_space<vmem>>, vector<32x128xbf16>,
    } else {
    }
    return
  }
  func.func @transform_0(%arg0: i32, %arg1: i32, %arg2: i32) -> (i32, i32) {
    %c0_i32 = arith.constant 0 : i32
    return %arg0, %arg2 : i32, i32
  }
  func.func @transform_1(%arg0: i32, %arg1: i32, %arg2: i32) -> (i32, i32) {
    %c0_i32 = arith.constant 0 : i32
    return %arg2, %arg1 : i32, i32
  }
  func.func @transform_2(%arg0: i32, %arg1: i32, %arg2: i32) -> (i32, i32) {
    %c0_i32 = arith.constant 0 : i32
    return %arg0, %arg1 : i32, i32
  }
}

module attributes {stable_mosaic.version = 11 : i64} {
  func.func @kernel(%arg0: i32, %arg1: i32, %arg2: i32, %arg3: memref<32x384xbf16, #tpu.memory_space<vmem>>, %arg4: memref<384x128xbf16, #tpu.memory_space<vmem>>, %arg5: memref<32x128xbf16, #tpu.memory_space<vmem>>, %arg6: memref<32x128xbf16, #tpu.memory_space<vmem>>, %arg7: memref<32x128xf32, #tpu.memory_space<vmem>>) attributes {dimension_semantics = [#tpu.dimension_semantics<parallel>, #tpu.dimension_semantics<parallel>, #tpu.dimension_semantics<arbitrary>], iteration_bounds = array<i64: 1, 1, 3>, scalar_prefetch = 0 : i64, scratch_operands = 1 : i64, tpu.core_type = #tpu.core_type<tc>, window_params = [{transform_indices = @transform_0, window_bounds = array<i64: 32, 384>}, {transform_indices = @transform_1, window_bounds = array<i64: 384, 128>}, {transform_indices = @transform_2, window_bounds = array<i64: 32, 128>}, {transform_indices = @transform_3, window_bounds = array<i64: 32, 128>}]} {
    %c0_i32 = arith.constant 0 : i32
    %0 = arith.cmpi eq, %arg2, %c0_i32 : i32
    %1 = arith.extui %0 : i1 to i32
    %c0_i32_0 = arith.constant 0 : i32
    %2 = arith.cmpi ne, %1, %c0_i32_0 : i32
    scf.if %2 {
      %cst_9 = arith.constant 0.000000e+00 : f32
      %12 = vector.broadcast %cst_9 : f32 to vector<32x128xf32>
      %c0_10 = arith.constant 0 : index
      %c0_11 = arith.constant 0 : index
      %13 = vector.load %arg7[%c0_10, %c0_11] : memref<32x128xf32, #tpu.memory_space<vmem>>, vector<32x128xf32>
      tpu.vector_store %arg7[%c0_10, %c0_11], %12 {strides = array<i32>} : memref<32x128xf32, #tpu.memory_space<vmem>>, vector<32x128xf32>,
    } else {
    }
    %c0 = arith.constant 0 : index
    %c0_1 = arith.constant 0 : index
    %3 = vector.load %arg7[%c0, %c0_1] : memref<32x128xf32, #tpu.memory_space<vmem>>, vector<32x128xf32>
    %c0_2 = arith.constant 0 : index
    %c0_3 = arith.constant 0 : index
    %4 = vector.load %arg3[%c0_2, %c0_3] : memref<32x384xbf16, #tpu.memory_space<vmem>>, vector<32x384xbf16>
    %c0_4 = arith.constant 0 : index
    %c0_5 = arith.constant 0 : index
    %5 = vector.load %arg4[%c0_4, %c0_5] : memref<384x128xbf16, #tpu.memory_space<vmem>>, vector<384x128xbf16>
    %cst = arith.constant dense<0.000000e+00> : vector<32x128xf32>
    %6 = tpu.matmul %4, %5, %cst {dimension_numbers = #tpu.dot_dimension_numbers<[1], [0], [0], [1], [0, 0, 1, 1], [], []>} : vector<32x384xbf16>, vector<384x128xbf16>, vector<32x128xf32> -> vector<32x128xf32>
    %7 = arith.addf %3, %6 : vector<32x128xf32>
    %c0_6 = arith.constant 0 : index
    %c0_7 = arith.constant 0 : index
    %8 = vector.load %arg7[%c0_6, %c0_7] : memref<32x128xf32, #tpu.memory_space<vmem>>, vector<32x128xf32>
    tpu.vector_store %arg7[%c0_6, %c0_7], %7 {strides = array<i32>} : memref<32x128xf32, #tpu.memory_space<vmem>>, vector<32x128xf32>,
    %c2_i32 = arith.constant 2 : i32
    %9 = arith.cmpi eq, %arg2, %c2_i32 : i32
    %10 = arith.extui %9 : i1 to i32
    %c0_i32_8 = arith.constant 0 : i32
    %11 = arith.cmpi ne, %10, %c0_i32_8 : i32
    scf.if %11 {
      %c0_9 = arith.constant 0 : index
      %c0_10 = arith.constant 0 : index
      %12 = vector.load %arg7[%c0_9, %c0_10] : memref<32x128xf32, #tpu.memory_space<vmem>>, vector<32x128xf32>
      %c0_11 = arith.constant 0 : index
      %c0_12 = arith.constant 0 : index
      %13 = vector.load %arg5[%c0_11, %c0_12] : memref<32x128xbf16, #tpu.memory_space<vmem>>, vector<32x128xbf16>
      %14 = arith.extf %13 : vector<32x128xbf16> to vector<32x128xf32>
      %15 = arith.addf %12, %14 : vector<32x128xf32>
      %cst_13 = arith.constant 0.000000e+00 : f32
      %16 = vector.broadcast %cst_13 : f32 to vector<32x128xf32>
      %17 = arith.maximumf %15, %16 : vector<32x128xf32>
      %18 = arith.truncf %17 : vector<32x128xf32> to vector<32x128xbf16>
      %c0_14 = arith.constant 0 : index
      %c0_15 = arith.constant 0 : index
      %19 = vector.load %arg6[%c0_14, %c0_15] : memref<32x128xbf16, #tpu.memory_space<vmem>>, vector<32x128xbf16>
      tpu.vector_store %arg6[%c0_14, %c0_15], %18 {strides = array<i32>} : memref<32x128xbf16, #tpu.memory_space<vmem>>, vector<32x128xbf16>,
    } else {
    }
    return
  }
  func.func @transform_0(%arg0: i32, %arg1: i32, %arg2: i32) -> (i32, i32) {
    %c0_i32 = arith.constant 0 : i32
    return %arg0, %arg2 : i32, i32
  }
  func.func @transform_1(%arg0: i32, %arg1: i32, %arg2: i32) -> (i32, i32) {
    %c0_i32 = arith.constant 0 : i32
    return %arg2, %arg1 : i32, i32
  }
  func.func @transform_2(%arg0: i32, %arg1: i32, %arg2: i32) -> (i32, i32) {
    %c0_i32 = arith.constant 0 : i32
    return %arg0, %arg1 : i32, i32
  }
  func.func @transform_3(%arg0: i32, %arg1: i32, %arg2: i32) -> (i32, i32) {
    %c0_i32 = arith.constant 0 : i32
    return %arg0, %arg1 : i32, i32
  }
}

module attributes {stable_mosaic.version = 11 : i64} {
  func.func @kernel(%arg0: i32, %arg1: i32, %arg2: i32, %arg3: memref<8x384xbf16, #tpu.memory_space<vmem>>, %arg4: memref<384x256xbf16, #tpu.memory_space<vmem>>, %arg5: memref<8x256xbf16, #tpu.memory_space<vmem>>, %arg6: memref<8x256xf32, #tpu.memory_space<vmem>>) attributes {dimension_semantics = [#tpu.dimension_semantics<parallel>, #tpu.dimension_semantics<parallel>, #tpu.dimension_semantics<arbitrary>], iteration_bounds = array<i64: 1, 1, 3>, scalar_prefetch = 0 : i64, scratch_operands = 1 : i64, tpu.core_type = #tpu.core_type<tc>, window_params = [{transform_indices = @transform_0, window_bounds = array<i64: 8, 384>}, {transform_indices = @transform_1, window_bounds = array<i64: 384, 256>}, {transform_indices = @transform_2, window_bounds = array<i64: 8, 256>}]} {
    %c0_i32 = arith.constant 0 : i32
    %0 = arith.cmpi eq, %arg2, %c0_i32 : i32
    %1 = arith.extui %0 : i1 to i32
    %c0_i32_0 = arith.constant 0 : i32
    %2 = arith.cmpi ne, %1, %c0_i32_0 : i32
    scf.if %2 {
      %cst_9 = arith.constant 0.000000e+00 : f32
      %12 = vector.broadcast %cst_9 : f32 to vector<8x256xf32>
      %c0_10 = arith.constant 0 : index
      %c0_11 = arith.constant 0 : index
      %13 = vector.load %arg6[%c0_10, %c0_11] : memref<8x256xf32, #tpu.memory_space<vmem>>, vector<8x256xf32>
      tpu.vector_store %arg6[%c0_10, %c0_11], %12 {strides = array<i32>} : memref<8x256xf32, #tpu.memory_space<vmem>>, vector<8x256xf32>,
    } else {
    }
    %c0 = arith.constant 0 : index
    %c0_1 = arith.constant 0 : index
    %3 = vector.load %arg6[%c0, %c0_1] : memref<8x256xf32, #tpu.memory_space<vmem>>, vector<8x256xf32>
    %c0_2 = arith.constant 0 : index
    %c0_3 = arith.constant 0 : index
    %4 = vector.load %arg3[%c0_2, %c0_3] : memref<8x384xbf16, #tpu.memory_space<vmem>>, vector<8x384xbf16>
    %c0_4 = arith.constant 0 : index
    %c0_5 = arith.constant 0 : index
    %5 = vector.load %arg4[%c0_4, %c0_5] : memref<384x256xbf16, #tpu.memory_space<vmem>>, vector<384x256xbf16>
    %cst = arith.constant dense<0.000000e+00> : vector<8x256xf32>
    %6 = tpu.matmul %4, %5, %cst {dimension_numbers = #tpu.dot_dimension_numbers<[1], [0], [0], [1], [0, 0, 1, 1], [], []>} : vector<8x384xbf16>, vector<384x256xbf16>, vector<8x256xf32> -> vector<8x256xf32>
    %7 = arith.addf %3, %6 : vector<8x256xf32>
    %c0_6 = arith.constant 0 : index
    %c0_7 = arith.constant 0 : index
    %8 = vector.load %arg6[%c0_6, %c0_7] : memref<8x256xf32, #tpu.memory_space<vmem>>, vector<8x256xf32>
    tpu.vector_store %arg6[%c0_6, %c0_7], %7 {strides = array<i32>} : memref<8x256xf32, #tpu.memory_space<vmem>>, vector<8x256xf32>,
    %c2_i32 = arith.constant 2 : i32
    %9 = arith.cmpi eq, %arg2, %c2_i32 : i32
    %10 = arith.extui %9 : i1 to i32
    %c0_i32_8 = arith.constant 0 : i32
    %11 = arith.cmpi ne, %10, %c0_i32_8 : i32
    scf.if %11 {
      %c0_9 = arith.constant 0 : index
      %c0_10 = arith.constant 0 : index
      %12 = vector.load %arg6[%c0_9, %c0_10] : memref<8x256xf32, #tpu.memory_space<vmem>>, vector<8x256xf32>
      %cst_11 = arith.constant 0.000000e+00 : f32
      %13 = vector.broadcast %cst_11 : f32 to vector<8x256xf32>
      %14 = arith.maximumf %12, %13 : vector<8x256xf32>
      %15 = arith.truncf %14 : vector<8x256xf32> to vector<8x256xbf16>
      %c0_12 = arith.constant 0 : index
      %c0_13 = arith.constant 0 : index
      %16 = vector.load %arg5[%c0_12, %c0_13] : memref<8x256xbf16, #tpu.memory_space<vmem>>, vector<8x256xbf16>
      tpu.vector_store %arg5[%c0_12, %c0_13], %15 {strides = array<i32>} : memref<8x256xbf16, #tpu.memory_space<vmem>>, vector<8x256xbf16>,
    } else {
    }
    return
  }
  func.func @transform_0(%arg0: i32, %arg1: i32, %arg2: i32) -> (i32, i32) {
    %c0_i32 = arith.constant 0 : i32
    return %arg0, %arg2 : i32, i32
  }
  func.func @transform_1(%arg0: i32, %arg1: i32, %arg2: i32) -> (i32, i32) {
    %c0_i32 = arith.constant 0 : i32
    return %arg2, %arg1 : i32, i32
  }
  func.func @transform_2(%arg0: i32, %arg1: i32, %arg2: i32) -> (i32, i32) {
    %c0_i32 = arith.constant 0 : i32
    return %arg0, %arg1 : i32, i32
  }
}

module attributes {stable_mosaic.version = 11 : i64} {
  func.func @kernel(%arg0: i32, %arg1: i32, %arg2: i32, %arg3: memref<8x128xbf16, #tpu.memory_space<vmem>>, %arg4: memref<128x256xbf16, #tpu.memory_space<vmem>>, %arg5: memref<8x256xbf16, #tpu.memory_space<vmem>>, %arg6: memref<8x256xf32, #tpu.memory_space<vmem>>) attributes {dimension_semantics = [#tpu.dimension_semantics<parallel>, #tpu.dimension_semantics<parallel>, #tpu.dimension_semantics<arbitrary>], iteration_bounds = array<i64: 1, 1, 1>, scalar_prefetch = 0 : i64, scratch_operands = 1 : i64, tpu.core_type = #tpu.core_type<tc>, window_params = [{transform_indices = @transform_0, window_bounds = array<i64: 8, 128>}, {transform_indices = @transform_1, window_bounds = array<i64: 128, 256>}, {transform_indices = @transform_2, window_bounds = array<i64: 8, 256>}]} {
    %c0_i32 = arith.constant 0 : i32
    %0 = arith.cmpi eq, %arg2, %c0_i32 : i32
    %1 = arith.extui %0 : i1 to i32
    %c0_i32_0 = arith.constant 0 : i32
    %2 = arith.cmpi ne, %1, %c0_i32_0 : i32
    scf.if %2 {
      %cst_10 = arith.constant 0.000000e+00 : f32
      %12 = vector.broadcast %cst_10 : f32 to vector<8x256xf32>
      %c0_11 = arith.constant 0 : index
      %c0_12 = arith.constant 0 : index
      %13 = vector.load %arg6[%c0_11, %c0_12] : memref<8x256xf32, #tpu.memory_space<vmem>>, vector<8x256xf32>
      tpu.vector_store %arg6[%c0_11, %c0_12], %12 {strides = array<i32>} : memref<8x256xf32, #tpu.memory_space<vmem>>, vector<8x256xf32>,
    } else {
    }
    %c0 = arith.constant 0 : index
    %c0_1 = arith.constant 0 : index
    %3 = vector.load %arg6[%c0, %c0_1] : memref<8x256xf32, #tpu.memory_space<vmem>>, vector<8x256xf32>
    %c0_2 = arith.constant 0 : index
    %c0_3 = arith.constant 0 : index
    %4 = vector.load %arg3[%c0_2, %c0_3] : memref<8x128xbf16, #tpu.memory_space<vmem>>, vector<8x128xbf16>
    %c0_4 = arith.constant 0 : index
    %c0_5 = arith.constant 0 : index
    %5 = vector.load %arg4[%c0_4, %c0_5] : memref<128x256xbf16, #tpu.memory_space<vmem>>, vector<128x256xbf16>
    %cst = arith.constant dense<0.000000e+00> : vector<8x256xf32>
    %6 = tpu.matmul %4, %5, %cst {dimension_numbers = #tpu.dot_dimension_numbers<[1], [0], [0], [1], [0, 0, 1, 1], [], []>} : vector<8x128xbf16>, vector<128x256xbf16>, vector<8x256xf32> -> vector<8x256xf32>
    %7 = arith.addf %3, %6 : vector<8x256xf32>
    %c0_6 = arith.constant 0 : index
    %c0_7 = arith.constant 0 : index
    %8 = vector.load %arg6[%c0_6, %c0_7] : memref<8x256xf32, #tpu.memory_space<vmem>>, vector<8x256xf32>
    tpu.vector_store %arg6[%c0_6, %c0_7], %7 {strides = array<i32>} : memref<8x256xf32, #tpu.memory_space<vmem>>, vector<8x256xf32>,
    %c0_i32_8 = arith.constant 0 : i32
    %9 = arith.cmpi eq, %arg2, %c0_i32_8 : i32
    %10 = arith.extui %9 : i1 to i32
    %c0_i32_9 = arith.constant 0 : i32
    %11 = arith.cmpi ne, %10, %c0_i32_9 : i32
    scf.if %11 {
      %c0_10 = arith.constant 0 : index
      %c0_11 = arith.constant 0 : index
      %12 = vector.load %arg6[%c0_10, %c0_11] : memref<8x256xf32, #tpu.memory_space<vmem>>, vector<8x256xf32>
      %13 = arith.truncf %12 : vector<8x256xf32> to vector<8x256xbf16>
      %c0_12 = arith.constant 0 : index
      %c0_13 = arith.constant 0 : index
      %14 = vector.load %arg5[%c0_12, %c0_13] : memref<8x256xbf16, #tpu.memory_space<vmem>>, vector<8x256xbf16>
      tpu.vector_store %arg5[%c0_12, %c0_13], %13 {strides = array<i32>} : memref<8x256xbf16, #tpu.memory_space<vmem>>, vector<8x256xbf16>,
    } else {
    }
    return
  }
  func.func @transform_0(%arg0: i32, %arg1: i32, %arg2: i32) -> (i32, i32) {
    %c0_i32 = arith.constant 0 : i32
    return %arg0, %arg2 : i32, i32
  }
  func.func @transform_1(%arg0: i32, %arg1: i32, %arg2: i32) -> (i32, i32) {
    %c0_i32 = arith.constant 0 : i32
    return %arg2, %arg1 : i32, i32
  }
  func.func @transform_2(%arg0: i32, %arg1: i32, %arg2: i32) -> (i32, i32) {
    %c0_i32 = arith.constant 0 : i32
    return %arg0, %arg1 : i32, i32
  }
}

module attributes {stable_mosaic.version = 11 : i64} {
  func.func @kernel(%arg0: i32, %arg1: i32, %arg2: i32, %arg3: memref<8x768xbf16, #tpu.memory_space<vmem>>, %arg4: memref<768x256xbf16, #tpu.memory_space<vmem>>, %arg5: memref<8x256xbf16, #tpu.memory_space<vmem>>, %arg6: memref<8x256xbf16, #tpu.memory_space<vmem>>, %arg7: memref<8x256xf32, #tpu.memory_space<vmem>>) attributes {dimension_semantics = [#tpu.dimension_semantics<parallel>, #tpu.dimension_semantics<parallel>, #tpu.dimension_semantics<arbitrary>], iteration_bounds = array<i64: 1, 1, 3>, scalar_prefetch = 0 : i64, scratch_operands = 1 : i64, tpu.core_type = #tpu.core_type<tc>, window_params = [{transform_indices = @transform_0, window_bounds = array<i64: 8, 768>}, {transform_indices = @transform_1, window_bounds = array<i64: 768, 256>}, {transform_indices = @transform_2, window_bounds = array<i64: 8, 256>}, {transform_indices = @transform_3, window_bounds = array<i64: 8, 256>}]} {
    %c0_i32 = arith.constant 0 : i32
    %0 = arith.cmpi eq, %arg2, %c0_i32 : i32
    %1 = arith.extui %0 : i1 to i32
    %c0_i32_0 = arith.constant 0 : i32
    %2 = arith.cmpi ne, %1, %c0_i32_0 : i32
    scf.if %2 {
      %cst_9 = arith.constant 0.000000e+00 : f32
      %12 = vector.broadcast %cst_9 : f32 to vector<8x256xf32>
      %c0_10 = arith.constant 0 : index
      %c0_11 = arith.constant 0 : index
      %13 = vector.load %arg7[%c0_10, %c0_11] : memref<8x256xf32, #tpu.memory_space<vmem>>, vector<8x256xf32>
      tpu.vector_store %arg7[%c0_10, %c0_11], %12 {strides = array<i32>} : memref<8x256xf32, #tpu.memory_space<vmem>>, vector<8x256xf32>,
    } else {
    }
    %c0 = arith.constant 0 : index
    %c0_1 = arith.constant 0 : index
    %3 = vector.load %arg7[%c0, %c0_1] : memref<8x256xf32, #tpu.memory_space<vmem>>, vector<8x256xf32>
    %c0_2 = arith.constant 0 : index
    %c0_3 = arith.constant 0 : index
    %4 = vector.load %arg3[%c0_2, %c0_3] : memref<8x768xbf16, #tpu.memory_space<vmem>>, vector<8x768xbf16>
    %c0_4 = arith.constant 0 : index
    %c0_5 = arith.constant 0 : index
    %5 = vector.load %arg4[%c0_4, %c0_5] : memref<768x256xbf16, #tpu.memory_space<vmem>>, vector<768x256xbf16>
    %cst = arith.constant dense<0.000000e+00> : vector<8x256xf32>
    %6 = tpu.matmul %4, %5, %cst {dimension_numbers = #tpu.dot_dimension_numbers<[1], [0], [0], [1], [0, 0, 1, 1], [], []>} : vector<8x768xbf16>, vector<768x256xbf16>, vector<8x256xf32> -> vector<8x256xf32>
    %7 = arith.addf %3, %6 : vector<8x256xf32>
    %c0_6 = arith.constant 0 : index
    %c0_7 = arith.constant 0 : index
    %8 = vector.load %arg7[%c0_6, %c0_7] : memref<8x256xf32, #tpu.memory_space<vmem>>, vector<8x256xf32>
    tpu.vector_store %arg7[%c0_6, %c0_7], %7 {strides = array<i32>} : memref<8x256xf32, #tpu.memory_space<vmem>>, vector<8x256xf32>,
    %c2_i32 = arith.constant 2 : i32
    %9 = arith.cmpi eq, %arg2, %c2_i32 : i32
    %10 = arith.extui %9 : i1 to i32
    %c0_i32_8 = arith.constant 0 : i32
    %11 = arith.cmpi ne, %10, %c0_i32_8 : i32
    scf.if %11 {
      %c0_9 = arith.constant 0 : index
      %c0_10 = arith.constant 0 : index
      %12 = vector.load %arg7[%c0_9, %c0_10] : memref<8x256xf32, #tpu.memory_space<vmem>>, vector<8x256xf32>
      %c0_11 = arith.constant 0 : index
      %c0_12 = arith.constant 0 : index
      %13 = vector.load %arg5[%c0_11, %c0_12] : memref<8x256xbf16, #tpu.memory_space<vmem>>, vector<8x256xbf16>
      %14 = arith.extf %13 : vector<8x256xbf16> to vector<8x256xf32>
      %15 = arith.addf %12, %14 : vector<8x256xf32>
      %cst_13 = arith.constant 0.000000e+00 : f32
      %16 = vector.broadcast %cst_13 : f32 to vector<8x256xf32>
      %17 = arith.maximumf %15, %16 : vector<8x256xf32>
      %18 = arith.truncf %17 : vector<8x256xf32> to vector<8x256xbf16>
      %c0_14 = arith.constant 0 : index
      %c0_15 = arith.constant 0 : index
      %19 = vector.load %arg6[%c0_14, %c0_15] : memref<8x256xbf16, #tpu.memory_space<vmem>>, vector<8x256xbf16>
      tpu.vector_store %arg6[%c0_14, %c0_15], %18 {strides = array<i32>} : memref<8x256xbf16, #tpu.memory_space<vmem>>, vector<8x256xbf16>,
    } else {
    }
    return
  }
  func.func @transform_0(%arg0: i32, %arg1: i32, %arg2: i32) -> (i32, i32) {
    %c0_i32 = arith.constant 0 : i32
    return %arg0, %arg2 : i32, i32
  }
  func.func @transform_1(%arg0: i32, %arg1: i32, %arg2: i32) -> (i32, i32) {
    %c0_i32 = arith.constant 0 : i32
    return %arg2, %arg1 : i32, i32
  }
  func.func @transform_2(%arg0: i32, %arg1: i32, %arg2: i32) -> (i32, i32) {
    %c0_i32 = arith.constant 0 : i32
    return %arg0, %arg1 : i32, i32
  }
  func.func @transform_3(%arg0: i32, %arg1: i32, %arg2: i32) -> (i32, i32) {
    %c0_i32 = arith.constant 0 : i32
    return %arg0, %arg1 : i32, i32
  }
}

module attributes {stable_mosaic.version = 11 : i64} {
  func.func @kernel(%arg0: i32, %arg1: i32, %arg2: i32, %arg3: memref<8x768xbf16, #tpu.memory_space<vmem>>, %arg4: memref<768x256xbf16, #tpu.memory_space<vmem>>, %arg5: memref<8x256xbf16, #tpu.memory_space<vmem>>, %arg6: memref<8x256xf32, #tpu.memory_space<vmem>>) attributes {dimension_semantics = [#tpu.dimension_semantics<parallel>, #tpu.dimension_semantics<parallel>, #tpu.dimension_semantics<arbitrary>], iteration_bounds = array<i64: 1, 2, 3>, scalar_prefetch = 0 : i64, scratch_operands = 1 : i64, tpu.core_type = #tpu.core_type<tc>, window_params = [{transform_indices = @transform_0, window_bounds = array<i64: 8, 768>}, {transform_indices = @transform_1, window_bounds = array<i64: 768, 256>}, {transform_indices = @transform_2, window_bounds = array<i64: 8, 256>}]} {
    %c0_i32 = arith.constant 0 : i32
    %0 = arith.cmpi eq, %arg2, %c0_i32 : i32
    %1 = arith.extui %0 : i1 to i32
    %c0_i32_0 = arith.constant 0 : i32
    %2 = arith.cmpi ne, %1, %c0_i32_0 : i32
    scf.if %2 {
      %cst_9 = arith.constant 0.000000e+00 : f32
      %12 = vector.broadcast %cst_9 : f32 to vector<8x256xf32>
      %c0_10 = arith.constant 0 : index
      %c0_11 = arith.constant 0 : index
      %13 = vector.load %arg6[%c0_10, %c0_11] : memref<8x256xf32, #tpu.memory_space<vmem>>, vector<8x256xf32>
      tpu.vector_store %arg6[%c0_10, %c0_11], %12 {strides = array<i32>} : memref<8x256xf32, #tpu.memory_space<vmem>>, vector<8x256xf32>,
    } else {
    }
    %c0 = arith.constant 0 : index
    %c0_1 = arith.constant 0 : index
    %3 = vector.load %arg6[%c0, %c0_1] : memref<8x256xf32, #tpu.memory_space<vmem>>, vector<8x256xf32>
    %c0_2 = arith.constant 0 : index
    %c0_3 = arith.constant 0 : index
    %4 = vector.load %arg3[%c0_2, %c0_3] : memref<8x768xbf16, #tpu.memory_space<vmem>>, vector<8x768xbf16>
    %c0_4 = arith.constant 0 : index
    %c0_5 = arith.constant 0 : index
    %5 = vector.load %arg4[%c0_4, %c0_5] : memref<768x256xbf16, #tpu.memory_space<vmem>>, vector<768x256xbf16>
    %cst = arith.constant dense<0.000000e+00> : vector<8x256xf32>
    %6 = tpu.matmul %4, %5, %cst {dimension_numbers = #tpu.dot_dimension_numbers<[1], [0], [0], [1], [0, 0, 1, 1], [], []>} : vector<8x768xbf16>, vector<768x256xbf16>, vector<8x256xf32> -> vector<8x256xf32>
    %7 = arith.addf %3, %6 : vector<8x256xf32>
    %c0_6 = arith.constant 0 : index
    %c0_7 = arith.constant 0 : index
    %8 = vector.load %arg6[%c0_6, %c0_7] : memref<8x256xf32, #tpu.memory_space<vmem>>, vector<8x256xf32>
    tpu.vector_store %arg6[%c0_6, %c0_7], %7 {strides = array<i32>} : memref<8x256xf32, #tpu.memory_space<vmem>>, vector<8x256xf32>,
    %c2_i32 = arith.constant 2 : i32
    %9 = arith.cmpi eq, %arg2, %c2_i32 : i32
    %10 = arith.extui %9 : i1 to i32
    %c0_i32_8 = arith.constant 0 : i32
    %11 = arith.cmpi ne, %10, %c0_i32_8 : i32
    scf.if %11 {
      %c0_9 = arith.constant 0 : index
      %c0_10 = arith.constant 0 : index
      %12 = vector.load %arg6[%c0_9, %c0_10] : memref<8x256xf32, #tpu.memory_space<vmem>>, vector<8x256xf32>
      %cst_11 = arith.constant 0.000000e+00 : f32
      %13 = vector.broadcast %cst_11 : f32 to vector<8x256xf32>
      %14 = arith.maximumf %12, %13 : vector<8x256xf32>
      %15 = arith.truncf %14 : vector<8x256xf32> to vector<8x256xbf16>
      %c0_12 = arith.constant 0 : index
      %c0_13 = arith.constant 0 : index
      %16 = vector.load %arg5[%c0_12, %c0_13] : memref<8x256xbf16, #tpu.memory_space<vmem>>, vector<8x256xbf16>
      tpu.vector_store %arg5[%c0_12, %c0_13], %15 {strides = array<i32>} : memref<8x256xbf16, #tpu.memory_space<vmem>>, vector<8x256xbf16>,
    } else {
    }
    return
  }
  func.func @transform_0(%arg0: i32, %arg1: i32, %arg2: i32) -> (i32, i32) {
    %c0_i32 = arith.constant 0 : i32
    return %arg0, %arg2 : i32, i32
  }
  func.func @transform_1(%arg0: i32, %arg1: i32, %arg2: i32) -> (i32, i32) {
    %c0_i32 = arith.constant 0 : i32
    return %arg2, %arg1 : i32, i32
  }
  func.func @transform_2(%arg0: i32, %arg1: i32, %arg2: i32) -> (i32, i32) {
    %c0_i32 = arith.constant 0 : i32
    return %arg0, %arg1 : i32, i32
  }
}

module attributes {stable_mosaic.version = 11 : i64} {
  func.func @kernel(%arg0: i32, %arg1: i32, %arg2: i32, %arg3: memref<8x256xbf16, #tpu.memory_space<vmem>>, %arg4: memref<256x256xbf16, #tpu.memory_space<vmem>>, %arg5: memref<8x256xbf16, #tpu.memory_space<vmem>>, %arg6: memref<8x256xf32, #tpu.memory_space<vmem>>) attributes {dimension_semantics = [#tpu.dimension_semantics<parallel>, #tpu.dimension_semantics<parallel>, #tpu.dimension_semantics<arbitrary>], iteration_bounds = array<i64: 1, 2, 1>, scalar_prefetch = 0 : i64, scratch_operands = 1 : i64, tpu.core_type = #tpu.core_type<tc>, window_params = [{transform_indices = @transform_0, window_bounds = array<i64: 8, 256>}, {transform_indices = @transform_1, window_bounds = array<i64: 256, 256>}, {transform_indices = @transform_2, window_bounds = array<i64: 8, 256>}]} {
    %c0_i32 = arith.constant 0 : i32
    %0 = arith.cmpi eq, %arg2, %c0_i32 : i32
    %1 = arith.extui %0 : i1 to i32
    %c0_i32_0 = arith.constant 0 : i32
    %2 = arith.cmpi ne, %1, %c0_i32_0 : i32
    scf.if %2 {
      %cst_10 = arith.constant 0.000000e+00 : f32
      %12 = vector.broadcast %cst_10 : f32 to vector<8x256xf32>
      %c0_11 = arith.constant 0 : index
      %c0_12 = arith.constant 0 : index
      %13 = vector.load %arg6[%c0_11, %c0_12] : memref<8x256xf32, #tpu.memory_space<vmem>>, vector<8x256xf32>
      tpu.vector_store %arg6[%c0_11, %c0_12], %12 {strides = array<i32>} : memref<8x256xf32, #tpu.memory_space<vmem>>, vector<8x256xf32>,
    } else {
    }
    %c0 = arith.constant 0 : index
    %c0_1 = arith.constant 0 : index
    %3 = vector.load %arg6[%c0, %c0_1] : memref<8x256xf32, #tpu.memory_space<vmem>>, vector<8x256xf32>
    %c0_2 = arith.constant 0 : index
    %c0_3 = arith.constant 0 : index
    %4 = vector.load %arg3[%c0_2, %c0_3] : memref<8x256xbf16, #tpu.memory_space<vmem>>, vector<8x256xbf16>
    %c0_4 = arith.constant 0 : index
    %c0_5 = arith.constant 0 : index
    %5 = vector.load %arg4[%c0_4, %c0_5] : memref<256x256xbf16, #tpu.memory_space<vmem>>, vector<256x256xbf16>
    %cst = arith.constant dense<0.000000e+00> : vector<8x256xf32>
    %6 = tpu.matmul %4, %5, %cst {dimension_numbers = #tpu.dot_dimension_numbers<[1], [0], [0], [1], [0, 0, 1, 1], [], []>} : vector<8x256xbf16>, vector<256x256xbf16>, vector<8x256xf32> -> vector<8x256xf32>
    %7 = arith.addf %3, %6 : vector<8x256xf32>
    %c0_6 = arith.constant 0 : index
    %c0_7 = arith.constant 0 : index
    %8 = vector.load %arg6[%c0_6, %c0_7] : memref<8x256xf32, #tpu.memory_space<vmem>>, vector<8x256xf32>
    tpu.vector_store %arg6[%c0_6, %c0_7], %7 {strides = array<i32>} : memref<8x256xf32, #tpu.memory_space<vmem>>, vector<8x256xf32>,
    %c0_i32_8 = arith.constant 0 : i32
    %9 = arith.cmpi eq, %arg2, %c0_i32_8 : i32
    %10 = arith.extui %9 : i1 to i32
    %c0_i32_9 = arith.constant 0 : i32
    %11 = arith.cmpi ne, %10, %c0_i32_9 : i32
    scf.if %11 {
      %c0_10 = arith.constant 0 : index
      %c0_11 = arith.constant 0 : index
      %12 = vector.load %arg6[%c0_10, %c0_11] : memref<8x256xf32, #tpu.memory_space<vmem>>, vector<8x256xf32>
      %13 = arith.truncf %12 : vector<8x256xf32> to vector<8x256xbf16>
      %c0_12 = arith.constant 0 : index
      %c0_13 = arith.constant 0 : index
      %14 = vector.load %arg5[%c0_12, %c0_13] : memref<8x256xbf16, #tpu.memory_space<vmem>>, vector<8x256xbf16>
      tpu.vector_store %arg5[%c0_12, %c0_13], %13 {strides = array<i32>} : memref<8x256xbf16, #tpu.memory_space<vmem>>, vector<8x256xbf16>,
    } else {
    }
    return
  }
  func.func @transform_0(%arg0: i32, %arg1: i32, %arg2: i32) -> (i32, i32) {
    %c0_i32 = arith.constant 0 : i32
    return %arg0, %arg2 : i32, i32
  }
  func.func @transform_1(%arg0: i32, %arg1: i32, %arg2: i32) -> (i32, i32) {
    %c0_i32 = arith.constant 0 : i32
    return %arg2, %arg1 : i32, i32
  }
  func.func @transform_2(%arg0: i32, %arg1: i32, %arg2: i32) -> (i32, i32) {
    %c0_i32 = arith.constant 0 : i32
    return %arg0, %arg1 : i32, i32
  }
}

module attributes {stable_mosaic.version = 11 : i64} {
  func.func @kernel(%arg0: i32, %arg1: i32, %arg2: i32, %arg3: memref<8x768xbf16, #tpu.memory_space<vmem>>, %arg4: memref<768x256xbf16, #tpu.memory_space<vmem>>, %arg5: memref<8x256xbf16, #tpu.memory_space<vmem>>, %arg6: memref<8x256xbf16, #tpu.memory_space<vmem>>, %arg7: memref<8x256xf32, #tpu.memory_space<vmem>>) attributes {dimension_semantics = [#tpu.dimension_semantics<parallel>, #tpu.dimension_semantics<parallel>, #tpu.dimension_semantics<arbitrary>], iteration_bounds = array<i64: 1, 2, 6>, scalar_prefetch = 0 : i64, scratch_operands = 1 : i64, tpu.core_type = #tpu.core_type<tc>, window_params = [{transform_indices = @transform_0, window_bounds = array<i64: 8, 768>}, {transform_indices = @transform_1, window_bounds = array<i64: 768, 256>}, {transform_indices = @transform_2, window_bounds = array<i64: 8, 256>}, {transform_indices = @transform_3, window_bounds = array<i64: 8, 256>}]} {
    %c0_i32 = arith.constant 0 : i32
    %0 = arith.cmpi eq, %arg2, %c0_i32 : i32
    %1 = arith.extui %0 : i1 to i32
    %c0_i32_0 = arith.constant 0 : i32
    %2 = arith.cmpi ne, %1, %c0_i32_0 : i32
    scf.if %2 {
      %cst_9 = arith.constant 0.000000e+00 : f32
      %12 = vector.broadcast %cst_9 : f32 to vector<8x256xf32>
      %c0_10 = arith.constant 0 : index
      %c0_11 = arith.constant 0 : index
      %13 = vector.load %arg7[%c0_10, %c0_11] : memref<8x256xf32, #tpu.memory_space<vmem>>, vector<8x256xf32>
      tpu.vector_store %arg7[%c0_10, %c0_11], %12 {strides = array<i32>} : memref<8x256xf32, #tpu.memory_space<vmem>>, vector<8x256xf32>,
    } else {
    }
    %c0 = arith.constant 0 : index
    %c0_1 = arith.constant 0 : index
    %3 = vector.load %arg7[%c0, %c0_1] : memref<8x256xf32, #tpu.memory_space<vmem>>, vector<8x256xf32>
    %c0_2 = arith.constant 0 : index
    %c0_3 = arith.constant 0 : index
    %4 = vector.load %arg3[%c0_2, %c0_3] : memref<8x768xbf16, #tpu.memory_space<vmem>>, vector<8x768xbf16>
    %c0_4 = arith.constant 0 : index
    %c0_5 = arith.constant 0 : index
    %5 = vector.load %arg4[%c0_4, %c0_5] : memref<768x256xbf16, #tpu.memory_space<vmem>>, vector<768x256xbf16>
    %cst = arith.constant dense<0.000000e+00> : vector<8x256xf32>
    %6 = tpu.matmul %4, %5, %cst {dimension_numbers = #tpu.dot_dimension_numbers<[1], [0], [0], [1], [0, 0, 1, 1], [], []>} : vector<8x768xbf16>, vector<768x256xbf16>, vector<8x256xf32> -> vector<8x256xf32>
    %7 = arith.addf %3, %6 : vector<8x256xf32>
    %c0_6 = arith.constant 0 : index
    %c0_7 = arith.constant 0 : index
    %8 = vector.load %arg7[%c0_6, %c0_7] : memref<8x256xf32, #tpu.memory_space<vmem>>, vector<8x256xf32>
    tpu.vector_store %arg7[%c0_6, %c0_7], %7 {strides = array<i32>} : memref<8x256xf32, #tpu.memory_space<vmem>>, vector<8x256xf32>,
    %c5_i32 = arith.constant 5 : i32
    %9 = arith.cmpi eq, %arg2, %c5_i32 : i32
    %10 = arith.extui %9 : i1 to i32
    %c0_i32_8 = arith.constant 0 : i32
    %11 = arith.cmpi ne, %10, %c0_i32_8 : i32
    scf.if %11 {
      %c0_9 = arith.constant 0 : index
      %c0_10 = arith.constant 0 : index
      %12 = vector.load %arg7[%c0_9, %c0_10] : memref<8x256xf32, #tpu.memory_space<vmem>>, vector<8x256xf32>
      %c0_11 = arith.constant 0 : index
      %c0_12 = arith.constant 0 : index
      %13 = vector.load %arg5[%c0_11, %c0_12] : memref<8x256xbf16, #tpu.memory_space<vmem>>, vector<8x256xbf16>
      %14 = arith.extf %13 : vector<8x256xbf16> to vector<8x256xf32>
      %15 = arith.addf %12, %14 : vector<8x256xf32>
      %cst_13 = arith.constant 0.000000e+00 : f32
      %16 = vector.broadcast %cst_13 : f32 to vector<8x256xf32>
      %17 = arith.maximumf %15, %16 : vector<8x256xf32>
      %18 = arith.truncf %17 : vector<8x256xf32> to vector<8x256xbf16>
      %c0_14 = arith.constant 0 : index
      %c0_15 = arith.constant 0 : index
      %19 = vector.load %arg6[%c0_14, %c0_15] : memref<8x256xbf16, #tpu.memory_space<vmem>>, vector<8x256xbf16>
      tpu.vector_store %arg6[%c0_14, %c0_15], %18 {strides = array<i32>} : memref<8x256xbf16, #tpu.memory_space<vmem>>, vector<8x256xbf16>,
    } else {
    }
    return
  }
  func.func @transform_0(%arg0: i32, %arg1: i32, %arg2: i32) -> (i32, i32) {
    %c0_i32 = arith.constant 0 : i32
    return %arg0, %arg2 : i32, i32
  }
  func.func @transform_1(%arg0: i32, %arg1: i32, %arg2: i32) -> (i32, i32) {
    %c0_i32 = arith.constant 0 : i32
    return %arg2, %arg1 : i32, i32
  }
  func.func @transform_2(%arg0: i32, %arg1: i32, %arg2: i32) -> (i32, i32) {
    %c0_i32 = arith.constant 0 : i32
    return %arg0, %arg1 : i32, i32
  }
  func.func @transform_3(%arg0: i32, %arg1: i32, %arg2: i32) -> (i32, i32) {
    %c0_i32 = arith.constant 0 : i32
    return %arg0, %arg1 : i32, i32
  }
}

module attributes {stable_mosaic.version = 11 : i64} {
  func.func @kernel(%arg0: i32, %arg1: i32, %arg2: i32, %arg3: memref<8x512xbf16, #tpu.memory_space<vmem>>, %arg4: memref<512x128xbf16, #tpu.memory_space<vmem>>, %arg5: memref<1x128xf32, #tpu.memory_space<vmem>>, %arg6: memref<8x128xf32, #tpu.memory_space<vmem>>, %arg7: memref<8x128xf32, #tpu.memory_space<vmem>>) attributes {dimension_semantics = [#tpu.dimension_semantics<parallel>, #tpu.dimension_semantics<parallel>, #tpu.dimension_semantics<arbitrary>], iteration_bounds = array<i64: 1, 1, 1>, scalar_prefetch = 0 : i64, scratch_operands = 1 : i64, tpu.core_type = #tpu.core_type<tc>, window_params = [{transform_indices = @transform_0, window_bounds = array<i64: 8, 512>}, {transform_indices = @transform_1, window_bounds = array<i64: 512, 128>}, {transform_indices = @transform_2, window_bounds = array<i64: 1, 128>}, {transform_indices = @transform_3, window_bounds = array<i64: 8, 128>}]} {
    %c0_i32 = arith.constant 0 : i32
    %0 = arith.cmpi eq, %arg2, %c0_i32 : i32
    %1 = arith.extui %0 : i1 to i32
    %c0_i32_0 = arith.constant 0 : i32
    %2 = arith.cmpi ne, %1, %c0_i32_0 : i32
    scf.if %2 {
      %cst_10 = arith.constant 0.000000e+00 : f32
      %12 = vector.broadcast %cst_10 : f32 to vector<8x128xf32>
      %c0_11 = arith.constant 0 : index
      %c0_12 = arith.constant 0 : index
      %13 = vector.load %arg7[%c0_11, %c0_12] : memref<8x128xf32, #tpu.memory_space<vmem>>, vector<8x128xf32>
      tpu.vector_store %arg7[%c0_11, %c0_12], %12 {strides = array<i32>} : memref<8x128xf32, #tpu.memory_space<vmem>>, vector<8x128xf32>,
    } else {
    }
    %c0 = arith.constant 0 : index
    %c0_1 = arith.constant 0 : index
    %3 = vector.load %arg7[%c0, %c0_1] : memref<8x128xf32, #tpu.memory_space<vmem>>, vector<8x128xf32>
    %c0_2 = arith.constant 0 : index
    %c0_3 = arith.constant 0 : index
    %4 = vector.load %arg3[%c0_2, %c0_3] : memref<8x512xbf16, #tpu.memory_space<vmem>>, vector<8x512xbf16>
    %c0_4 = arith.constant 0 : index
    %c0_5 = arith.constant 0 : index
    %5 = vector.load %arg4[%c0_4, %c0_5] : memref<512x128xbf16, #tpu.memory_space<vmem>>, vector<512x128xbf16>
    %cst = arith.constant dense<0.000000e+00> : vector<8x128xf32>
    %6 = tpu.matmul %4, %5, %cst {dimension_numbers = #tpu.dot_dimension_numbers<[1], [0], [0], [1], [0, 0, 1, 1], [], []>} : vector<8x512xbf16>, vector<512x128xbf16>, vector<8x128xf32> -> vector<8x128xf32>
    %7 = arith.addf %3, %6 : vector<8x128xf32>
    %c0_6 = arith.constant 0 : index
    %c0_7 = arith.constant 0 : index
    %8 = vector.load %arg7[%c0_6, %c0_7] : memref<8x128xf32, #tpu.memory_space<vmem>>, vector<8x128xf32>
    tpu.vector_store %arg7[%c0_6, %c0_7], %7 {strides = array<i32>} : memref<8x128xf32, #tpu.memory_space<vmem>>, vector<8x128xf32>,
    %c0_i32_8 = arith.constant 0 : i32
    %9 = arith.cmpi eq, %arg2, %c0_i32_8 : i32
    %10 = arith.extui %9 : i1 to i32
    %c0_i32_9 = arith.constant 0 : i32
    %11 = arith.cmpi ne, %10, %c0_i32_9 : i32
    scf.if %11 {
      %c0_10 = arith.constant 0 : index
      %c0_11 = arith.constant 0 : index
      %12 = vector.load %arg7[%c0_10, %c0_11] : memref<8x128xf32, #tpu.memory_space<vmem>>, vector<8x128xf32>
      %c0_12 = arith.constant 0 : index
      %c0_13 = arith.constant 0 : index
      %13 = vector.load %arg5[%c0_12, %c0_13] : memref<1x128xf32, #tpu.memory_space<vmem>>, vector<1x128xf32>
      %14 = vector.broadcast %13 : vector<1x128xf32> to vector<8x128xf32>
      %15 = arith.addf %12, %14 : vector<8x128xf32>
      %c0_14 = arith.constant 0 : index
      %c0_15 = arith.constant 0 : index
      %16 = vector.load %arg6[%c0_14, %c0_15] : memref<8x128xf32, #tpu.memory_space<vmem>>, vector<8x128xf32>
      tpu.vector_store %arg6[%c0_14, %c0_15], %15 {strides = array<i32>} : memref<8x128xf32, #tpu.memory_space<vmem>>, vector<8x128xf32>,
    } else {
    }
    return
  }
  func.func @transform_0(%arg0: i32, %arg1: i32, %arg2: i32) -> (i32, i32) {
    %c0_i32 = arith.constant 0 : i32
    return %arg0, %arg2 : i32, i32
  }
  func.func @transform_1(%arg0: i32, %arg1: i32, %arg2: i32) -> (i32, i32) {
    %c0_i32 = arith.constant 0 : i32
    return %arg2, %arg1 : i32, i32
  }
  func.func @transform_2(%arg0: i32, %arg1: i32, %arg2: i32) -> (i32, i32) {
    %c0_i32 = arith.constant 0 : i32
    %c0_i32_0 = arith.constant 0 : i32
    return %c0_i32, %arg1 : i32, i32
  }
  func.func @transform_3(%arg0: i32, %arg1: i32, %arg2: i32) -> (i32, i32) {
    %c0_i32 = arith.constant 0 : i32
    return %arg0, %arg1 : i32, i32
  }
}

</mosaic_0001>

<bundles_post_ra>
// kernel: resnet_forward.13
= control target key start
LH: loop header
LB: loop body
LE: loop exit
PB: predicated region body
PF: predicated region fallthrough
CT: control target
= control target key end

     0   :  { %v2072_v0 = vmov 0   ;;  %s2456_s1 = inlined_call_operand.vmem [shape: bf16[256,128], index: 1, kind: input, shape index: {}]   ;;  %s2457_s0 = inlined_call_operand.vmem [shape: bf16[512,256], index: 0, kind: input, shape index: {}]   ;;  %s2458_s2 = inlined_call_operand.vmem [shape: bf16[512,128], index: 2, kind: output, shape index: {}]  }
   0x1   :  { %656 = vmatprep.subr.bf16.mxu0 %v2072_v0  ;;  %1927 = vmatprep.subr.bf16.mxu1 %v2072_v0  ;;  %v1960_v1 = vld [vmem:[%s2456_s1 + $0x38] sm:$0xff]   ;;  %v1961_v2 = vld [vmem:[%s2456_s1 + $0x30] sm:$0xff]   ;;  %v1962_v3 = vld [vmem:[%s2456_s1 + $0x28] sm:$0xff]  }
   0x2   :  { %657 = vmatpush1.bf16.msra.mxu0 %v1960_v1  ;;  %1943 = vmatpush1.bf16.msra.mxu1 %v1960_v1  ;;  %v1963_v4 = vld [vmem:[%s2456_s1 + $0x20] sm:$0xff]   ;;  %v1964_v5 = vld [vmem:[%s2456_s1 + $0x18] sm:$0xff]   ;;  %v1965_v7 = vld [vmem:[%s2456_s1 + $0x10] sm:$0xff]  }
   0x3   :  { %658 = vmatprep.subr.bf16.mxu0 %v2072_v0  ;;  %1928 = vmatprep.subr.bf16.mxu1 %v2072_v0  ;;  %v1978_v6 = vld [vmem:[%s2457_s0 + $0x4] ss:$8 sps:$4 sm:$0xff]   ;;  %v1968_v11 = vld [vmem:[%s2456_s1 + $0x78] sm:$0xff]   ;;  %v1969_v12 = vld [vmem:[%s2456_s1 + $0x70] sm:$0xff]  }
   0x4   :  { %v1981_v8 = vld [vmem:[%s2457_s0 + $0x104] ss:$8 sps:$4 sm:$0xff]   ;;  %688 = vmatprep.mubr.bf16.mxu0 %v1978_v6  ;;  %v1972_v15 = vld [vmem:[%s2456_s1 + $0x58] sm:$0xff]   ;;  %v1973_v16 = vld [vmem:[%s2456_s1 + $0x50] sm:$0xff]  }
   0x5   :  { %816 = vmatprep.mubr.bf16.mxu1 %v1981_v8  ;;  %v1966_v9 = vld [vmem:[%s2456_s1 + $0x8] sm:$0xff]   ;;  %v1967_v10 = vld [vmem:[%s2456_s1] sm:$0xff]   ;;  %v1982_v21 = vld [vmem:[%s2457_s0 + $0x14] ss:$8 sps:$4 sm:$0xff]  }
   0x6   :  { %659 = vmatpush1.bf16.msra.mxu0 %v1961_v2  ;;  %1944 = vmatpush1.bf16.msra.mxu1 %v1961_v2  ;;  %v1970_v13 = vld [vmem:[%s2456_s1 + $0x68] sm:$0xff]   ;;  %v1971_v14 = vld [vmem:[%s2456_s1 + $0x60] sm:$0xff]   ;;  %v1984_v22 = vld [vmem:[%s2457_s0 + $0x114] ss:$8 sps:$4 sm:$0xff]  }
   0x7   :  { %660 = vmatprep.subr.bf16.mxu0 %v2072_v0  ;;  %1929 = vmatprep.subr.bf16.mxu1 %v2072_v0  ;;  %v1974_v17 = vld [vmem:[%s2456_s1 + $0x48] sm:$0xff]   ;;  %v1975_v18 = vld [vmem:[%s2456_s1 + $0x40] sm:$0xff]   ;;  %v1986_v23 = vld [vmem:[%s2457_s0 + $0x10] ss:$8 sps:$4 sm:$0xff]  }
   0x8   :  { %v1976_v19 = vld [vmem:[%s2457_s0] ss:$8 sps:$4 sm:$0xff]   ;;  %v1987_v24 = vld [vmem:[%s2457_s0 + $0x110] ss:$8 sps:$4 sm:$0xff]   ;;  %v1988_v25 = vld [vmem:[%s2457_s0 + $0x24] ss:$8 sps:$4 sm:$0xff]  }
   0x9   :  { %v1979_v20 = vld [vmem:[%s2457_s0 + $0x100] ss:$8 sps:$4 sm:$0xff]   ;;  %v1990_v26 = vld [vmem:[%s2457_s0 + $0x124] ss:$8 sps:$4 sm:$0xff]   ;;  %v1994_v29 = vld [vmem:[%s2457_s0 + $0x34] ss:$8 sps:$4 sm:$0xff]  }
   0xa   :  { %661 = vmatpush1.bf16.msra.mxu0 %v1962_v3  ;;  %1945 = vmatpush1.bf16.msra.mxu1 %v1962_v3  ;;  %v1992_v27 = vld [vmem:[%s2457_s0 + $0x20] ss:$8 sps:$4 sm:$0xff]   ;;  %v1996_v30 = vld [vmem:[%s2457_s0 + $0x134] ss:$8 sps:$4 sm:$0xff]   ;;  %v1998_v31 = vld [vmem:[%s2457_s0 + $0x30] ss:$8 sps:$4 sm:$0xff]  }
   0xb   :  { %662 = vmatprep.subr.bf16.mxu0 %v2072_v0  ;;  %1930 = vmatprep.subr.bf16.mxu1 %v2072_v0  ;;  %v1993_v28 = vld [vmem:[%s2457_s0 + $0x120] ss:$8 sps:$4 sm:$0xff]   ;;  %v1999_v32 = vld [vmem:[%s2457_s0 + $0x130] ss:$8 sps:$4 sm:$0xff]   ;;  %v2000_v33 = vld [vmem:[%s2457_s0 + $0x44] ss:$8 sps:$4 sm:$0xff]  }
   0xc   :  { %v2002_v34 = vld [vmem:[%s2457_s0 + $0x144] ss:$8 sps:$4 sm:$0xff]   ;;  %v2004_v35 = vld [vmem:[%s2457_s0 + $0x40] ss:$8 sps:$4 sm:$0xff]   ;;  %v2006_v37 = vld [vmem:[%s2457_s0 + $0x54] ss:$8 sps:$4 sm:$0xff]  }
   0xd   :  { %v2005_v36 = vld [vmem:[%s2457_s0 + $0x140] ss:$8 sps:$4 sm:$0xff]   ;;  %v2008_v38 = vld [vmem:[%s2457_s0 + $0x154] ss:$8 sps:$4 sm:$0xff]   ;;  %v2010_v39 = vld [vmem:[%s2457_s0 + $0x50] ss:$8 sps:$4 sm:$0xff]  }
   0xe   :  { %663 = vmatpush1.bf16.msra.mxu0 %v1963_v4  ;;  %1946 = vmatpush1.bf16.msra.mxu1 %v1963_v4  ;;  %v2011_v40 = vld [vmem:[%s2457_s0 + $0x150] ss:$8 sps:$4 sm:$0xff]   ;;  %v2012_v41 = vld [vmem:[%s2457_s0 + $0x64] ss:$8 sps:$4 sm:$0xff]   ;;  %v2016_v43 = vld [vmem:[%s2457_s0 + $0x60] ss:$8 sps:$4 sm:$0xff]  }
   0xf   :  { %664 = vmatprep.subr.bf16.mxu0 %v2072_v0  ;;  %1931 = vmatprep.subr.bf16.mxu1 %v2072_v0  ;;  %v2014_v42 = vld [vmem:[%s2457_s0 + $0x164] ss:$8 sps:$4 sm:$0xff]   ;;  %v2017_v44 = vld [vmem:[%s2457_s0 + $0x160] ss:$8 sps:$4 sm:$0xff]   ;;  %v2018_v45 = vld [vmem:[%s2457_s0 + $0x74] ss:$8 sps:$4 sm:$0xff]  }
  0x10   :  { %v2020_v46 = vld [vmem:[%s2457_s0 + $0x174] ss:$8 sps:$4 sm:$0xff]   ;;  %v2022_v47 = vld [vmem:[%s2457_s0 + $0x70] ss:$8 sps:$4 sm:$0xff]   ;;  %v2024_v49 = vld [vmem:[%s2457_s0 + $0x84] ss:$8 sps:$4 sm:$0xff]  }
  0x11   :  { %v2023_v48 = vld [vmem:[%s2457_s0 + $0x170] ss:$8 sps:$4 sm:$0xff]   ;;  %v2026_v50 = vld [vmem:[%s2457_s0 + $0x184] ss:$8 sps:$4 sm:$0xff]   ;;  %v2028_v51 = vld [vmem:[%s2457_s0 + $0x80] ss:$8 sps:$4 sm:$0xff]  }
  0x12   :  { %665 = vmatpush1.bf16.msra.mxu0 %v1964_v5  ;;  %1947 = vmatpush1.bf16.msra.mxu1 %v1964_v5  ;;  %v2029_v52 = vld [vmem:[%s2457_s0 + $0x180] ss:$8 sps:$4 sm:$0xff]   ;;  %v2030_v53 = vld [vmem:[%s2457_s0 + $0x94] ss:$8 sps:$4 sm:$0xff]   ;;  %v2034_v55 = vld [vmem:[%s2457_s0 + $0x90] ss:$8 sps:$4 sm:$0xff]  }
  0x13   :  { %666 = vmatprep.subr.bf16.mxu0 %v2072_v0  ;;  %1932 = vmatprep.subr.bf16.mxu1 %v2072_v0  ;;  %v2032_v54 = vld [vmem:[%s2457_s0 + $0x194] ss:$8 sps:$4 sm:$0xff]   ;;  %v2035_v56 = vld [vmem:[%s2457_s0 + $0x190] ss:$8 sps:$4 sm:$0xff]   ;;  %v2036_v57 = vld [vmem:[%s2457_s0 + $0xa4] ss:$8 sps:$4 sm:$0xff]  }
  0x14   :  { %v2038_v58 = vld [vmem:[%s2457_s0 + $0x1a4] ss:$8 sps:$4 sm:$0xff]   ;;  %v2040_v59 = vld [vmem:[%s2457_s0 + $0xa0] ss:$8 sps:$4 sm:$0xff]   ;;  %v2042_v61 = vld [vmem:[%s2457_s0 + $0xb4] ss:$8 sps:$4 sm:$0xff]  }
  0x15   :  { %v2041_v60 = vld [vmem:[%s2457_s0 + $0x1a0] ss:$8 sps:$4 sm:$0xff]   ;;  %v2044_v62 = vld [vmem:[%s2457_s0 + $0x1b4] ss:$8 sps:$4 sm:$0xff]   ;;  %v2046_v63 = vld [vmem:[%s2457_s0 + $0xb0] ss:$8 sps:$4 sm:$0xff]  }
  0x16   :  { %667 = vmatpush1.bf16.msra.mxu0 %v1965_v7  ;;  %1948 = vmatpush1.bf16.msra.mxu1 %v1965_v7  ;;  %v2048_v1 = vld [vmem:[%s2457_s0 + $0xc4] ss:$8 sps:$4 sm:$0xff]   ;;  %v2052_v3 = vld [vmem:[%s2457_s0 + $0xc0] ss:$8 sps:$4 sm:$0xff]   ;;  %v2054_v5 = vld [vmem:[%s2457_s0 + $0xd4] ss:$8 sps:$4 sm:$0xff]  }
  0x17   :  { %668 = vmatprep.subr.bf16.mxu0 %v2072_v0  ;;  %1933 = vmatprep.subr.bf16.mxu1 %v2072_v0  ;;  %v2050_v2 = vld [vmem:[%s2457_s0 + $0x1c4] ss:$8 sps:$4 sm:$0xff]   ;;  %v2053_v4 = vld [vmem:[%s2457_s0 + $0x1c0] ss:$8 sps:$4 sm:$0xff]   ;;  %v2056_v6 = vld [vmem:[%s2457_s0 + $0x1d4] ss:$8 sps:$4 sm:$0xff]  }
  0x18   :  { %v2058_v7 = vld [vmem:[%s2457_s0 + $0xd0] ss:$8 sps:$4 sm:$0xff]  }
  0x19   :  { %v2059_v8 = vld [vmem:[%s2457_s0 + $0x1d0] ss:$8 sps:$4 sm:$0xff]  }
  0x1a   :  { %669 = vmatpush1.bf16.msra.mxu0 %v1966_v9  ;;  %1949 = vmatpush1.bf16.msra.mxu1 %v1966_v9  ;;  %v2060_v9 = vld [vmem:[%s2457_s0 + $0xe4] ss:$8 sps:$4 sm:$0xff]  }
  0x1b   :  { %670 = vmatprep.subr.bf16.mxu0 %v2072_v0  ;;  %1934 = vmatprep.subr.bf16.mxu1 %v2072_v0 }
  0x1e   :  { %671 = vmatpush1.bf16.msra.mxu0 %v1967_v10  ;;  %1950 = vmatpush1.bf16.msra.mxu1 %v1967_v10  ;;  %v2062_v10 = vld [vmem:[%s2457_s0 + $0x1e4] ss:$8 sps:$4 sm:$0xff]  }
  0x1f   :  { %672 = vmatprep.subr.bf16.mxu0 %v2072_v0  ;;  %1935 = vmatprep.subr.bf16.mxu1 %v2072_v0 }
  0x22   :  { %673 = vmatpush2.bf16.msra.mxu0 %v1968_v11  ;;  %1951 = vmatpush2.bf16.msra.mxu1 %v1968_v11  ;;  %v2064_v11 = vld [vmem:[%s2457_s0 + $0xe0] ss:$8 sps:$4 sm:$0xff]  }
  0x23   :  { %674 = vmatprep.subr.bf16.mxu0 %v2072_v0  ;;  %1936 = vmatprep.subr.bf16.mxu1 %v2072_v0 }
  0x26   :  { %675 = vmatpush2.bf16.msra.mxu0 %v1969_v12  ;;  %1952 = vmatpush2.bf16.msra.mxu1 %v1969_v12  ;;  %v2065_v12 = vld [vmem:[%s2457_s0 + $0x1e0] ss:$8 sps:$4 sm:$0xff]  }
  0x27   :  { %676 = vmatprep.subr.bf16.mxu0 %v2072_v0  ;;  %1937 = vmatprep.subr.bf16.mxu1 %v2072_v0 }
  0x2a   :  { %677 = vmatpush2.bf16.msra.mxu0 %v1970_v13  ;;  %1953 = vmatpush2.bf16.msra.mxu1 %v1970_v13  ;;  %v2066_v13 = vld [vmem:[%s2457_s0 + $0xf4] ss:$8 sps:$4 sm:$0xff]  }
  0x2b   :  { %678 = vmatprep.subr.bf16.mxu0 %v2072_v0  ;;  %1938 = vmatprep.subr.bf16.mxu1 %v2072_v0 }
  0x2e   :  { %679 = vmatpush2.bf16.msra.mxu0 %v1971_v14  ;;  %1954 = vmatpush2.bf16.msra.mxu1 %v1971_v14  ;;  %v2068_v14 = vld [vmem:[%s2457_s0 + $0x1f4] ss:$8 sps:$4 sm:$0xff]  }
  0x2f   :  { %680 = vmatprep.subr.bf16.mxu0 %v2072_v0  ;;  %1939 = vmatprep.subr.bf16.mxu1 %v2072_v0 }
  0x32   :  { %681 = vmatpush2.bf16.msra.mxu0 %v1972_v15  ;;  %1955 = vmatpush2.bf16.msra.mxu1 %v1972_v15  ;;  %v2070_v15 = vld [vmem:[%s2457_s0 + $0xf0] ss:$8 sps:$4 sm:$0xff]  }
  0x33   :  { %682 = vmatprep.subr.bf16.mxu0 %v2072_v0  ;;  %1940 = vmatprep.subr.bf16.mxu1 %v2072_v0 }
  0x36   :  { %683 = vmatpush2.bf16.msra.mxu0 %v1973_v16  ;;  %1956 = vmatpush2.bf16.msra.mxu1 %v1973_v16  ;;  %v2071_v16 = vld [vmem:[%s2457_s0 + $0x1f0] ss:$8 sps:$4 sm:$0xff]  }
  0x37   :  { %684 = vmatprep.subr.bf16.mxu0 %v2072_v0  ;;  %1941 = vmatprep.subr.bf16.mxu1 %v2072_v0 }
  0x3a   :  { %685 = vmatpush2.bf16.msra.mxu0 %v1974_v17  ;;  %1957 = vmatpush2.bf16.msra.mxu1 %v1974_v17 }
  0x3b   :  { %686 = vmatprep.subr.bf16.mxu0 %v2072_v0  ;;  %1942 = vmatprep.subr.bf16.mxu1 %v2072_v0  ;;  %v2047_v0 = vld [vmem:[%s2457_s0 + $0x1b0] ss:$8 sps:$4 sm:$0xff]  }
  0x3e   :  { %687 = vmatpush2.bf16.msra.mxu0 %v1975_v18  ;;  %1958 = vmatpush2.bf16.msra.mxu1 %v1975_v18 }
  0x41   :  { %689 = vmatmul.mubr.bf16.vlgmr.msra.gmra.mxu0 %v1976_v19  ;;  %817 = vmatmul.mubr.bf16.vlgmr.msra.gmra.mxu1 %v1979_v20 }
  0x42   :  { %696 = vmatprep.mubr.bf16.mxu0 %v1982_v21  ;;  %824 = vmatprep.mubr.bf16.mxu1 %v1984_v22 }
  0x49   :  { %697 = vmatmul.mubr.bf16.gmra.mxu0 %v1986_v23  ;;  %825 = vmatmul.mubr.bf16.gmra.mxu1 %v1987_v24 }
  0x4a   :  { %704 = vmatprep.mubr.bf16.mxu0 %v1988_v25  ;;  %832 = vmatprep.mubr.bf16.mxu1 %v1990_v26 }
  0x51   :  { %705 = vmatmul.mubr.bf16.gmra.mxu0 %v1992_v27  ;;  %833 = vmatmul.mubr.bf16.gmra.mxu1 %v1993_v28 }
  0x52   :  { %712 = vmatprep.mubr.bf16.mxu0 %v1994_v29  ;;  %840 = vmatprep.mubr.bf16.mxu1 %v1996_v30 }
  0x59   :  { %713 = vmatmul.mubr.bf16.gmra.mxu0 %v1998_v31  ;;  %841 = vmatmul.mubr.bf16.gmra.mxu1 %v1999_v32 }
  0x5a   :  { %720 = vmatprep.mubr.bf16.mxu0 %v2000_v33  ;;  %848 = vmatprep.mubr.bf16.mxu1 %v2002_v34 }
  0x61   :  { %721 = vmatmul.mubr.bf16.gmra.mxu0 %v2004_v35  ;;  %849 = vmatmul.mubr.bf16.gmra.mxu1 %v2005_v36 }
  0x62   :  { %728 = vmatprep.mubr.bf16.mxu0 %v2006_v37  ;;  %856 = vmatprep.mubr.bf16.mxu1 %v2008_v38 }
  0x69   :  { %729 = vmatmul.mubr.bf16.gmra.mxu0 %v2010_v39  ;;  %857 = vmatmul.mubr.bf16.gmra.mxu1 %v2011_v40 }
  0x6a   :  { %736 = vmatprep.mubr.bf16.mxu0 %v2012_v41  ;;  %864 = vmatprep.mubr.bf16.mxu1 %v2014_v42 }
  0x71   :  { %737 = vmatmul.mubr.bf16.gmra.mxu0 %v2016_v43  ;;  %865 = vmatmul.mubr.bf16.gmra.mxu1 %v2017_v44 }
  0x72   :  { %744 = vmatprep.mubr.bf16.mxu0 %v2018_v45  ;;  %872 = vmatprep.mubr.bf16.mxu1 %v2020_v46 }
  0x79   :  { %745 = vmatmul.mubr.bf16.gmra.mxu0 %v2022_v47  ;;  %873 = vmatmul.mubr.bf16.gmra.mxu1 %v2023_v48 }
  0x7a   :  { %752 = vmatprep.mubr.bf16.mxu0 %v2024_v49  ;;  %880 = vmatprep.mubr.bf16.mxu1 %v2026_v50 }
  0x81   :  { %753 = vmatmul.mubr.bf16.gmra.mxu0 %v2028_v51  ;;  %881 = vmatmul.mubr.bf16.gmra.mxu1 %v2029_v52 }
  0x82   :  { %760 = vmatprep.mubr.bf16.mxu0 %v2030_v53  ;;  %888 = vmatprep.mubr.bf16.mxu1 %v2032_v54 }
  0x89   :  { %761 = vmatmul.mubr.bf16.gmra.mxu0 %v2034_v55  ;;  %889 = vmatmul.mubr.bf16.gmra.mxu1 %v2035_v56 }
  0x8a   :  { %768 = vmatprep.mubr.bf16.mxu0 %v2036_v57  ;;  %896 = vmatprep.mubr.bf16.mxu1 %v2038_v58 }
  0x91   :  { %769 = vmatmul.mubr.bf16.gmra.mxu0 %v2040_v59  ;;  %897 = vmatmul.mubr.bf16.gmra.mxu1 %v2041_v60 }
  0x92   :  { %776 = vmatprep.mubr.bf16.mxu0 %v2042_v61  ;;  %904 = vmatprep.mubr.bf16.mxu1 %v2044_v62 }
  0x99   :  { %777 = vmatmul.mubr.bf16.gmra.mxu0 %v2046_v63  ;;  %905 = vmatmul.mubr.bf16.gmra.mxu1 %v2047_v0 }
  0x9a   :  { %784 = vmatprep.mubr.bf16.mxu0 %v2048_v1  ;;  %912 = vmatprep.mubr.bf16.mxu1 %v2050_v2 }
  0xa1   :  { %785 = vmatmul.mubr.bf16.gmra.mxu0 %v2052_v3  ;;  %913 = vmatmul.mubr.bf16.gmra.mxu1 %v2053_v4 }
  0xa2   :  { %792 = vmatprep.mubr.bf16.mxu0 %v2054_v5  ;;  %920 = vmatprep.mubr.bf16.mxu1 %v2056_v6 }
  0xa9   :  { %793 = vmatmul.mubr.bf16.gmra.mxu0 %v2058_v7  ;;  %921 = vmatmul.mubr.bf16.gmra.mxu1 %v2059_v8 }
  0xaa   :  { %800 = vmatprep.mubr.bf16.mxu0 %v2060_v9  ;;  %928 = vmatprep.mubr.bf16.mxu1 %v2062_v10 }
  0xb1   :  { %801 = vmatmul.mubr.bf16.gmra.mxu0 %v2064_v11  ;;  %929 = vmatmul.mubr.bf16.gmra.mxu1 %v2065_v12 }
  0xb2   :  { %808 = vmatprep.mubr.bf16.mxu0 %v2066_v13  ;;  %936 = vmatprep.mubr.bf16.mxu1 %v2068_v14 }
  0xb9   :  { %809 = vmatmul.mubr.bf16.gmra.mxu0 %v2070_v15  ;;  %937 = vmatmul.mubr.bf16.gmra.mxu1 %v2071_v16 }
 0x101   :  { %v690_v17 = vpop.f32.mrf.mxu0  ;;  %v818_v18 = vpop.f32.mrf.mxu1 }
 0x102   :  { %v1140_v23 = vmax.f32 %v690_v17, 0.0  ;;  %v1172_v24 = vmax.f32 %v818_v18, 0.0 }
 0x103   :  { %v692_v19 = vpop.f32.mrf.mxu0  ;;  %v820_v20 = vpop.f32.mrf.mxu1 }
 0x105   :  { %v693_v21 = vpop.f32.mrf.mxu0  ;;  %v821_v22 = vpop.f32.mrf.mxu1 }
 0x106   :  { %v1141_v25 = vmax.f32 %v693_v21, 0.0  ;;  %v1173_v26 = vmax.f32 %v821_v22, 0.0 }
 0x107   :  { %v695_v27 = vpop.f32.mrf.mxu0  ;;  %v823_v28 = vpop.f32.mrf.mxu1 }
 0x108   :  { %v1739_v29 = vpack.c.bf16 %v1141_v25, %v1140_v23  ;;  %v1819_v30 = vpack.c.bf16 %v1173_v26, %v1172_v24 }
 0x109   :  { %v698_v31 = vpop.f32.mrf.mxu0  ;;  %v826_v32 = vpop.f32.mrf.mxu1 }
 0x10a   :  { %1740 = vst [vmem:[%s2458_s2] sm:$0xff] %v1739_v29   ;;  %1911 = vst [vmem:[%s2458_s2 + $0x80] sm:$0xff] %v1819_v30   ;;  %v1142_v37 = vmax.f32 %v698_v31, 0.0  ;;  %v1174_v38 = vmax.f32 %v826_v32, 0.0 }
 0x10b   :  { %v700_v33 = vpop.f32.mrf.mxu0  ;;  %v828_v34 = vpop.f32.mrf.mxu1 }
 0x10d   :  { %v701_v35 = vpop.f32.mrf.mxu0  ;;  %v829_v36 = vpop.f32.mrf.mxu1 }
 0x10e   :  { %v1143_v39 = vmax.f32 %v701_v35, 0.0  ;;  %v1175_v40 = vmax.f32 %v829_v36, 0.0 }
 0x10f   :  { %v703_v41 = vpop.f32.mrf.mxu0  ;;  %v831_v42 = vpop.f32.mrf.mxu1 }
 0x110   :  { %v1744_v43 = vpack.c.bf16 %v1143_v39, %v1142_v37  ;;  %v1824_v44 = vpack.c.bf16 %v1175_v40, %v1174_v38 }
 0x111   :  { %v706_v45 = vpop.f32.mrf.mxu0  ;;  %v834_v46 = vpop.f32.mrf.mxu1 }
 0x112   :  { %1896 = vst [vmem:[%s2458_s2 + $0x8] sm:$0xff] %v1744_v43   ;;  %1912 = vst [vmem:[%s2458_s2 + $0x88] sm:$0xff] %v1824_v44   ;;  %v1144_v51 = vmax.f32 %v706_v45, 0.0  ;;  %v1176_v52 = vmax.f32 %v834_v46, 0.0 }
 0x113   :  { %v708_v47 = vpop.f32.mrf.mxu0  ;;  %v836_v48 = vpop.f32.mrf.mxu1 }
 0x115   :  { %v709_v49 = vpop.f32.mrf.mxu0  ;;  %v837_v50 = vpop.f32.mrf.mxu1 }
 0x116   :  { %v1145_v53 = vmax.f32 %v709_v49, 0.0  ;;  %v1177_v54 = vmax.f32 %v837_v50, 0.0 }
 0x117   :  { %v711_v55 = vpop.f32.mrf.mxu0  ;;  %v839_v56 = vpop.f32.mrf.mxu1 }
 0x118   :  { %v1749_v57 = vpack.c.bf16 %v1145_v53, %v1144_v51  ;;  %v1829_v58 = vpack.c.bf16 %v1177_v54, %v1176_v52 }
 0x119   :  { %v714_v59 = vpop.f32.mrf.mxu0  ;;  %v842_v60 = vpop.f32.mrf.mxu1 }
 0x11a   :  { %1897 = vst [vmem:[%s2458_s2 + $0x10] sm:$0xff] %v1749_v57   ;;  %1913 = vst [vmem:[%s2458_s2 + $0x90] sm:$0xff] %v1829_v58   ;;  %v1146_v1 = vmax.f32 %v714_v59, 0.0  ;;  %v1178_v2 = vmax.f32 %v842_v60, 0.0 }
 0x11b   :  { %v716_v61 = vpop.f32.mrf.mxu0  ;;  %v844_v62 = vpop.f32.mrf.mxu1 }
 0x11d   :  { %v717_v63 = vpop.f32.mrf.mxu0  ;;  %v845_v0 = vpop.f32.mrf.mxu1 }
 0x11e   :  { %v1147_v3 = vmax.f32 %v717_v63, 0.0  ;;  %v1179_v4 = vmax.f32 %v845_v0, 0.0 }
 0x11f   :  { %v719_v5 = vpop.f32.mrf.mxu0  ;;  %v847_v6 = vpop.f32.mrf.mxu1 }
 0x120   :  { %v1754_v7 = vpack.c.bf16 %v1147_v3, %v1146_v1  ;;  %v1834_v8 = vpack.c.bf16 %v1179_v4, %v1178_v2 }
 0x121   :  { %v722_v9 = vpop.f32.mrf.mxu0  ;;  %v850_v10 = vpop.f32.mrf.mxu1 }
 0x122   :  { %1898 = vst [vmem:[%s2458_s2 + $0x18] sm:$0xff] %v1754_v7   ;;  %1914 = vst [vmem:[%s2458_s2 + $0x98] sm:$0xff] %v1834_v8   ;;  %v1148_v15 = vmax.f32 %v722_v9, 0.0  ;;  %v1180_v16 = vmax.f32 %v850_v10, 0.0 }
 0x123   :  { %v724_v11 = vpop.f32.mrf.mxu0  ;;  %v852_v12 = vpop.f32.mrf.mxu1 }
 0x125   :  { %v725_v13 = vpop.f32.mrf.mxu0  ;;  %v853_v14 = vpop.f32.mrf.mxu1 }
 0x126   :  { %v1149_v17 = vmax.f32 %v725_v13, 0.0  ;;  %v1181_v18 = vmax.f32 %v853_v14, 0.0 }
 0x127   :  { %v727_v19 = vpop.f32.mrf.mxu0  ;;  %v855_v20 = vpop.f32.mrf.mxu1 }
 0x128   :  { %v1759_v21 = vpack.c.bf16 %v1149_v17, %v1148_v15  ;;  %v1839_v22 = vpack.c.bf16 %v1181_v18, %v1180_v16 }
 0x129   :  { %v730_v23 = vpop.f32.mrf.mxu0  ;;  %v858_v24 = vpop.f32.mrf.mxu1 }
 0x12a   :  { %1899 = vst [vmem:[%s2458_s2 + $0x20] sm:$0xff] %v1759_v21   ;;  %1915 = vst [vmem:[%s2458_s2 + $0xa0] sm:$0xff] %v1839_v22   ;;  %v1150_v29 = vmax.f32 %v730_v23, 0.0  ;;  %v1182_v30 = vmax.f32 %v858_v24, 0.0 }
 0x12b   :  { %v732_v25 = vpop.f32.mrf.mxu0  ;;  %v860_v26 = vpop.f32.mrf.mxu1 }
 0x12d   :  { %v733_v27 = vpop.f32.mrf.mxu0  ;;  %v861_v28 = vpop.f32.mrf.mxu1 }
 0x12e   :  { %v1151_v31 = vmax.f32 %v733_v27, 0.0  ;;  %v1183_v32 = vmax.f32 %v861_v28, 0.0 }
 0x12f   :  { %v735_v33 = vpop.f32.mrf.mxu0  ;;  %v863_v34 = vpop.f32.mrf.mxu1 }
 0x130   :  { %v1764_v35 = vpack.c.bf16 %v1151_v31, %v1150_v29  ;;  %v1844_v36 = vpack.c.bf16 %v1183_v32, %v1182_v30 }
 0x131   :  { %v738_v37 = vpop.f32.mrf.mxu0  ;;  %v866_v38 = vpop.f32.mrf.mxu1 }
 0x132   :  { %1900 = vst [vmem:[%s2458_s2 + $0x28] sm:$0xff] %v1764_v35   ;;  %1916 = vst [vmem:[%s2458_s2 + $0xa8] sm:$0xff] %v1844_v36   ;;  %v1152_v43 = vmax.f32 %v738_v37, 0.0  ;;  %v1184_v44 = vmax.f32 %v866_v38, 0.0 }
 0x133   :  { %v740_v39 = vpop.f32.mrf.mxu0  ;;  %v868_v40 = vpop.f32.mrf.mxu1 }
 0x135   :  { %v741_v41 = vpop.f32.mrf.mxu0  ;;  %v869_v42 = vpop.f32.mrf.mxu1 }
 0x136   :  { %v1153_v45 = vmax.f32 %v741_v41, 0.0  ;;  %v1185_v46 = vmax.f32 %v869_v42, 0.0 }
 0x137   :  { %v743_v47 = vpop.f32.mrf.mxu0  ;;  %v871_v48 = vpop.f32.mrf.mxu1 }
 0x138   :  { %v1769_v49 = vpack.c.bf16 %v1153_v45, %v1152_v43  ;;  %v1849_v50 = vpack.c.bf16 %v1185_v46, %v1184_v44 }
 0x139   :  { %v746_v51 = vpop.f32.mrf.mxu0  ;;  %v874_v52 = vpop.f32.mrf.mxu1 }
 0x13a   :  { %1901 = vst [vmem:[%s2458_s2 + $0x30] sm:$0xff] %v1769_v49   ;;  %1917 = vst [vmem:[%s2458_s2 + $0xb0] sm:$0xff] %v1849_v50   ;;  %v1154_v57 = vmax.f32 %v746_v51, 0.0  ;;  %v1186_v58 = vmax.f32 %v874_v52, 0.0 }
 0x13b   :  { %v748_v53 = vpop.f32.mrf.mxu0  ;;  %v876_v54 = vpop.f32.mrf.mxu1 }
 0x13d   :  { %v749_v55 = vpop.f32.mrf.mxu0  ;;  %v877_v56 = vpop.f32.mrf.mxu1 }
 0x13e   :  { %v1155_v59 = vmax.f32 %v749_v55, 0.0  ;;  %v1187_v60 = vmax.f32 %v877_v56, 0.0 }
 0x13f   :  { %v751_v61 = vpop.f32.mrf.mxu0  ;;  %v879_v62 = vpop.f32.mrf.mxu1 }
 0x140   :  { %v1774_v63 = vpack.c.bf16 %v1155_v59, %v1154_v57  ;;  %v1854_v0 = vpack.c.bf16 %v1187_v60, %v1186_v58 }
 0x141   :  { %v754_v1 = vpop.f32.mrf.mxu0  ;;  %v882_v2 = vpop.f32.mrf.mxu1 }
 0x142   :  { %1902 = vst [vmem:[%s2458_s2 + $0x38] sm:$0xff] %v1774_v63   ;;  %1918 = vst [vmem:[%s2458_s2 + $0xb8] sm:$0xff] %v1854_v0   ;;  %v1156_v7 = vmax.f32 %v754_v1, 0.0  ;;  %v1188_v8 = vmax.f32 %v882_v2, 0.0 }
 0x143   :  { %v756_v3 = vpop.f32.mrf.mxu0  ;;  %v884_v4 = vpop.f32.mrf.mxu1 }
 0x145   :  { %v757_v5 = vpop.f32.mrf.mxu0  ;;  %v885_v6 = vpop.f32.mrf.mxu1 }
 0x146   :  { %v1157_v9 = vmax.f32 %v757_v5, 0.0  ;;  %v1189_v10 = vmax.f32 %v885_v6, 0.0 }
 0x147   :  { %v759_v11 = vpop.f32.mrf.mxu0  ;;  %v887_v12 = vpop.f32.mrf.mxu1 }
 0x148   :  { %v1779_v13 = vpack.c.bf16 %v1157_v9, %v1156_v7  ;;  %v1859_v14 = vpack.c.bf16 %v1189_v10, %v1188_v8 }
 0x149   :  { %v762_v15 = vpop.f32.mrf.mxu0  ;;  %v890_v16 = vpop.f32.mrf.mxu1 }
 0x14a   :  { %1903 = vst [vmem:[%s2458_s2 + $0x40] sm:$0xff] %v1779_v13   ;;  %1919 = vst [vmem:[%s2458_s2 + $0xc0] sm:$0xff] %v1859_v14   ;;  %v1158_v21 = vmax.f32 %v762_v15, 0.0  ;;  %v1190_v22 = vmax.f32 %v890_v16, 0.0 }
 0x14b   :  { %v764_v17 = vpop.f32.mrf.mxu0  ;;  %v892_v18 = vpop.f32.mrf.mxu1 }
 0x14d   :  { %v765_v19 = vpop.f32.mrf.mxu0  ;;  %v893_v20 = vpop.f32.mrf.mxu1 }
 0x14e   :  { %v1159_v23 = vmax.f32 %v765_v19, 0.0  ;;  %v1191_v24 = vmax.f32 %v893_v20, 0.0 }
 0x14f   :  { %v767_v25 = vpop.f32.mrf.mxu0  ;;  %v895_v26 = vpop.f32.mrf.mxu1 }
 0x150   :  { %v1784_v27 = vpack.c.bf16 %v1159_v23, %v1158_v21  ;;  %v1864_v28 = vpack.c.bf16 %v1191_v24, %v1190_v22 }
 0x151   :  { %v770_v29 = vpop.f32.mrf.mxu0  ;;  %v898_v30 = vpop.f32.mrf.mxu1 }
 0x152   :  { %1904 = vst [vmem:[%s2458_s2 + $0x48] sm:$0xff] %v1784_v27   ;;  %1920 = vst [vmem:[%s2458_s2 + $0xc8] sm:$0xff] %v1864_v28   ;;  %v1160_v35 = vmax.f32 %v770_v29, 0.0  ;;  %v1192_v36 = vmax.f32 %v898_v30, 0.0 }
 0x153   :  { %v772_v31 = vpop.f32.mrf.mxu0  ;;  %v900_v32 = vpop.f32.mrf.mxu1 }
 0x155   :  { %v773_v33 = vpop.f32.mrf.mxu0  ;;  %v901_v34 = vpop.f32.mrf.mxu1 }
 0x156   :  { %v1161_v37 = vmax.f32 %v773_v33, 0.0  ;;  %v1193_v38 = vmax.f32 %v901_v34, 0.0 }
 0x157   :  { %v775_v39 = vpop.f32.mrf.mxu0  ;;  %v903_v40 = vpop.f32.mrf.mxu1 }
 0x158   :  { %v1789_v41 = vpack.c.bf16 %v1161_v37, %v1160_v35  ;;  %v1869_v42 = vpack.c.bf16 %v1193_v38, %v1192_v36 }
 0x159   :  { %v778_v43 = vpop.f32.mrf.mxu0  ;;  %v906_v44 = vpop.f32.mrf.mxu1 }
 0x15a   :  { %1905 = vst [vmem:[%s2458_s2 + $0x50] sm:$0xff] %v1789_v41   ;;  %1921 = vst [vmem:[%s2458_s2 + $0xd0] sm:$0xff] %v1869_v42   ;;  %v1162_v49 = vmax.f32 %v778_v43, 0.0  ;;  %v1194_v50 = vmax.f32 %v906_v44, 0.0 }
 0x15b   :  { %v780_v45 = vpop.f32.mrf.mxu0  ;;  %v908_v46 = vpop.f32.mrf.mxu1 }
 0x15d   :  { %v781_v47 = vpop.f32.mrf.mxu0  ;;  %v909_v48 = vpop.f32.mrf.mxu1 }
 0x15e   :  { %v1163_v51 = vmax.f32 %v781_v47, 0.0  ;;  %v1195_v52 = vmax.f32 %v909_v48, 0.0 }
 0x15f   :  { %v783_v53 = vpop.f32.mrf.mxu0  ;;  %v911_v54 = vpop.f32.mrf.mxu1 }
 0x160   :  { %v1794_v55 = vpack.c.bf16 %v1163_v51, %v1162_v49  ;;  %v1874_v56 = vpack.c.bf16 %v1195_v52, %v1194_v50 }
 0x161   :  { %v786_v57 = vpop.f32.mrf.mxu0  ;;  %v914_v58 = vpop.f32.mrf.mxu1 }
 0x162   :  { %1906 = vst [vmem:[%s2458_s2 + $0x58] sm:$0xff] %v1794_v55   ;;  %1922 = vst [vmem:[%s2458_s2 + $0xd8] sm:$0xff] %v1874_v56   ;;  %v1164_v63 = vmax.f32 %v786_v57, 0.0  ;;  %v1196_v0 = vmax.f32 %v914_v58, 0.0 }
 0x163   :  { %v788_v59 = vpop.f32.mrf.mxu0  ;;  %v916_v60 = vpop.f32.mrf.mxu1 }
 0x165   :  { %v789_v61 = vpop.f32.mrf.mxu0  ;;  %v917_v62 = vpop.f32.mrf.mxu1 }
 0x166   :  { %v1165_v1 = vmax.f32 %v789_v61, 0.0  ;;  %v1197_v2 = vmax.f32 %v917_v62, 0.0 }
 0x167   :  { %v791_v3 = vpop.f32.mrf.mxu0  ;;  %v919_v4 = vpop.f32.mrf.mxu1 }
 0x168   :  { %v1799_v5 = vpack.c.bf16 %v1165_v1, %v1164_v63  ;;  %v1879_v6 = vpack.c.bf16 %v1197_v2, %v1196_v0 }
 0x169   :  { %v794_v7 = vpop.f32.mrf.mxu0  ;;  %v922_v8 = vpop.f32.mrf.mxu1 }
 0x16a   :  { %1907 = vst [vmem:[%s2458_s2 + $0x60] sm:$0xff] %v1799_v5   ;;  %1923 = vst [vmem:[%s2458_s2 + $0xe0] sm:$0xff] %v1879_v6   ;;  %v1166_v13 = vmax.f32 %v794_v7, 0.0  ;;  %v1198_v14 = vmax.f32 %v922_v8, 0.0 }
 0x16b   :  { %v796_v9 = vpop.f32.mrf.mxu0  ;;  %v924_v10 = vpop.f32.mrf.mxu1 }
 0x16d   :  { %v797_v11 = vpop.f32.mrf.mxu0  ;;  %v925_v12 = vpop.f32.mrf.mxu1 }
 0x16e   :  { %v1167_v15 = vmax.f32 %v797_v11, 0.0  ;;  %v1199_v16 = vmax.f32 %v925_v12, 0.0 }
 0x16f   :  { %v799_v17 = vpop.f32.mrf.mxu0  ;;  %v927_v18 = vpop.f32.mrf.mxu1 }
 0x170   :  { %v1804_v19 = vpack.c.bf16 %v1167_v15, %v1166_v13  ;;  %v1884_v20 = vpack.c.bf16 %v1199_v16, %v1198_v14 }
 0x171   :  { %v802_v21 = vpop.f32.mrf.mxu0  ;;  %v930_v22 = vpop.f32.mrf.mxu1 }
 0x172   :  { %1908 = vst [vmem:[%s2458_s2 + $0x68] sm:$0xff] %v1804_v19   ;;  %1924 = vst [vmem:[%s2458_s2 + $0xe8] sm:$0xff] %v1884_v20   ;;  %v1168_v27 = vmax.f32 %v802_v21, 0.0  ;;  %v1200_v28 = vmax.f32 %v930_v22, 0.0 }
 0x173   :  { %v804_v23 = vpop.f32.mrf.mxu0  ;;  %v932_v24 = vpop.f32.mrf.mxu1 }
 0x175   :  { %v805_v25 = vpop.f32.mrf.mxu0  ;;  %v933_v26 = vpop.f32.mrf.mxu1 }
 0x176   :  { %v1169_v29 = vmax.f32 %v805_v25, 0.0  ;;  %v1201_v30 = vmax.f32 %v933_v26, 0.0 }
 0x177   :  { %v807_v31 = vpop.f32.mrf.mxu0  ;;  %v935_v32 = vpop.f32.mrf.mxu1 }
 0x178   :  { %v1809_v33 = vpack.c.bf16 %v1169_v29, %v1168_v27  ;;  %v1889_v34 = vpack.c.bf16 %v1201_v30, %v1200_v28 }
 0x179   :  { %v810_v35 = vpop.f32.mrf.mxu0  ;;  %v938_v36 = vpop.f32.mrf.mxu1 }
 0x17a   :  { %1909 = vst [vmem:[%s2458_s2 + $0x70] sm:$0xff] %v1809_v33   ;;  %1925 = vst [vmem:[%s2458_s2 + $0xf0] sm:$0xff] %v1889_v34   ;;  %v1170_v41 = vmax.f32 %v810_v35, 0.0  ;;  %v1202_v42 = vmax.f32 %v938_v36, 0.0 }
 0x17b   :  { %v812_v37 = vpop.f32.mrf.mxu0  ;;  %v940_v38 = vpop.f32.mrf.mxu1 }
 0x17d   :  { %v813_v39 = vpop.f32.mrf.mxu0  ;;  %v941_v40 = vpop.f32.mrf.mxu1 }
 0x17e   :  { %v1171_v43 = vmax.f32 %v813_v39, 0.0  ;;  %v1203_v44 = vmax.f32 %v941_v40, 0.0 }
 0x17f   :  { %v815_v45 = vpop.f32.mrf.mxu0  ;;  %v943_v46 = vpop.f32.mrf.mxu1 }
 0x180   :  { %v1814_v47 = vpack.c.bf16 %v1171_v43, %v1170_v41  ;;  %v1894_v48 = vpack.c.bf16 %v1203_v44, %v1202_v42 }
 0x182   :  { %1910 = vst [vmem:[%s2458_s2 + $0x78] sm:$0xff] %v1814_v47   ;;  %1926 = vst [vmem:[%s2458_s2 + $0xf8] sm:$0xff] %v1894_v48  }

// kernel: resnet_forward.14
= control target key start
LH: loop header
LB: loop body
LE: loop exit
PB: predicated region body
PF: predicated region fallthrough
CT: control target
= control target key end

     0   :  { %s1831_s1 = inlined_call_operand.vmem [shape: bf16[640,128], index: 1, kind: input, shape index: {}]   ;;  %s1832_s0 = inlined_call_operand.vmem [shape: bf16[128,640], index: 0, kind: input, shape index: {}]   ;;  %s1833_s2 = inlined_call_operand.vmem [shape: bf16[128,128], index: 2, kind: output, shape index: {}]  }
   0x1   :  { %v1417_v0 = vld [vmem:[%s1831_s1 + $0x78] sm:$0xff]   ;;  %v1421_v4 = vld [vmem:[%s1831_s1 + $0x70] sm:$0xff]   ;;  %v1425_v8 = vld [vmem:[%s1831_s1 + $0x68] sm:$0xff]  }
   0x2   :  { %v1418_v1 = vld [vmem:[%s1831_s1 + $0xf8] sm:$0xff]   ;;  %1225 = vmatprep.subr.bf16.mxu0 %v1417_v0  ;;  %v1422_v5 = vld [vmem:[%s1831_s1 + $0xf0] sm:$0xff]   ;;  %v1426_v9 = vld [vmem:[%s1831_s1 + $0xe8] sm:$0xff]  }
   0x3   :  { %v1419_v2 = vld [vmem:[%s1831_s1 + $0x38] sm:$0xff]   ;;  %1289 = vmatprep.subr.bf16.mxu1 %v1418_v1  ;;  %v1423_v6 = vld [vmem:[%s1831_s1 + $0x30] sm:$0xff]   ;;  %v1427_v10 = vld [vmem:[%s1831_s1 + $0x28] sm:$0xff]  }
   0x4   :  { %v1420_v3 = vld [vmem:[%s1831_s1 + $0xb8] sm:$0xff]   ;;  %1226 = vmatpush3.bf16.msra.mxu0 %v1419_v2  ;;  %v1424_v7 = vld [vmem:[%s1831_s1 + $0xb0] sm:$0xff]   ;;  %v1428_v11 = vld [vmem:[%s1831_s1 + $0xa8] sm:$0xff]  }
   0x5   :  { %1290 = vmatpush3.bf16.msra.mxu1 %v1420_v3  ;;  %1227 = vmatprep.subr.bf16.mxu0 %v1421_v4  ;;  %v1429_v12 = vld [vmem:[%s1831_s1 + $0x60] sm:$0xff]   ;;  %v1433_v16 = vld [vmem:[%s1831_s1 + $0x58] sm:$0xff]   ;;  %v1437_v20 = vld [vmem:[%s1831_s1 + $0x50] sm:$0xff]  }
   0x6   :  { %1291 = vmatprep.subr.bf16.mxu1 %v1422_v5  ;;  %v1430_v13 = vld [vmem:[%s1831_s1 + $0xe0] sm:$0xff]   ;;  %v1434_v17 = vld [vmem:[%s1831_s1 + $0xd8] sm:$0xff]   ;;  %v1438_v21 = vld [vmem:[%s1831_s1 + $0xd0] sm:$0xff]  }
   0x7   :  { %v1431_v14 = vld [vmem:[%s1831_s1 + $0x20] sm:$0xff]   ;;  %v1435_v18 = vld [vmem:[%s1831_s1 + $0x18] sm:$0xff]   ;;  %v1439_v22 = vld [vmem:[%s1831_s1 + $0x10] sm:$0xff]  }
   0x8   :  { %1228 = vmatpush3.bf16.msra.mxu0 %v1423_v6  ;;  %v1432_v15 = vld [vmem:[%s1831_s1 + $0xa0] sm:$0xff]   ;;  %v1436_v19 = vld [vmem:[%s1831_s1 + $0x98] sm:$0xff]   ;;  %v1440_v23 = vld [vmem:[%s1831_s1 + $0x90] sm:$0xff]  }
   0x9   :  { %1292 = vmatpush3.bf16.msra.mxu1 %v1424_v7  ;;  %1229 = vmatprep.subr.bf16.mxu0 %v1425_v8  ;;  %v1441_v24 = vld [vmem:[%s1831_s1 + $0x48] sm:$0xff]   ;;  %v1445_v28 = vld [vmem:[%s1831_s1 + $0x40] sm:$0xff]   ;;  %v1455_v36 = vld [vmem:[%s1831_s1 + $0x138] sm:$0xff]  }
   0xa   :  { %1293 = vmatprep.subr.bf16.mxu1 %v1426_v9  ;;  %v1442_v25 = vld [vmem:[%s1831_s1 + $0xc8] sm:$0xff]   ;;  %v1446_v29 = vld [vmem:[%s1831_s1 + $0xc0] sm:$0xff]   ;;  %v1462_v39 = vld [vmem:[%s1831_s1 + $0x130] sm:$0xff]  }
   0xb   :  { %v1443_v26 = vld [vmem:[%s1831_s1 + $0x8] sm:$0xff]   ;;  %v1447_v30 = vld [vmem:[%s1831_s1] sm:$0xff]   ;;  %v1465_v43 = vld [vmem:[%s1832_s0 + $0x5c] ss:$20 sps:$4 sm:$0xff]  }
   0xc   :  { %1230 = vmatpush3.bf16.msra.mxu0 %v1427_v10  ;;  %v1444_v27 = vld [vmem:[%s1831_s1 + $0x88] sm:$0xff]   ;;  %v1448_v31 = vld [vmem:[%s1831_s1 + $0x80] sm:$0xff]   ;;  %v1470_v48 = vld [vmem:[%s1832_s0 + $0x7c] ss:$20 sps:$4 sm:$0xff]  }
   0xd   :  { %1294 = vmatpush3.bf16.msra.mxu1 %v1428_v11  ;;  %1231 = vmatprep.subr.bf16.mxu0 %v1429_v12  ;;  %v1449_v32 = vld [vmem:[%s1832_s0] ss:$20 sps:$4 sm:$0xff]   ;;  %v1451_v33 = vld [vmem:[%s1832_s0 + $0x4] ss:$20 sps:$4 sm:$0xff]   ;;  %v1452_v34 = vld [vmem:[%s1832_s0 + $0x8] ss:$20 sps:$4 sm:$0xff]  }
   0xe   :  { %1295 = vmatprep.subr.bf16.mxu1 %v1430_v13  ;;  %v1454_v35 = vld [vmem:[%s1832_s0 + $0xc] ss:$20 sps:$4 sm:$0xff]   ;;  %656 = vmatprep.mubr.bf16.mxu0 %v1451_v33  ;;  %v1458_v38 = vld [vmem:[%s1832_s0 + $0x34] ss:$20 sps:$4 sm:$0xff]   ;;  %v1461_v41 = vld [vmem:[%s1832_s0 + $0x30] ss:$20 sps:$4 sm:$0xff]  }
   0xf   :  { %753 = vmatprep.mubr.bf16.mxu1 %v1454_v35  ;;  %v1456_v37 = vld [vmem:[%s1832_s0 + $0x2c] ss:$20 sps:$4 sm:$0xff]   ;;  %v1460_v40 = vld [vmem:[%s1832_s0 + $0x28] ss:$20 sps:$4 sm:$0xff]   ;;  %v1467_v46 = vld [vmem:[%s1832_s0 + $0x50] ss:$20 sps:$4 sm:$0xff]  }
  0x10   :  { %1232 = vmatpush3.bf16.msra.mxu0 %v1431_v14  ;;  %v1463_v42 = vld [vmem:[%s1832_s0 + $0x54] ss:$20 sps:$4 sm:$0xff]   ;;  %v1476_v45 = vld [vmem:[%s1831_s1 + $0x120] sm:$0xff]   ;;  %v1468_v47 = vld [vmem:[%s1832_s0 + $0x58] ss:$20 sps:$4 sm:$0xff]  }
  0x11   :  { %1296 = vmatpush3.bf16.msra.mxu1 %v1432_v15  ;;  %1233 = vmatprep.subr.bf16.mxu0 %v1433_v16  ;;  %v1469_v44 = vld [vmem:[%s1831_s1 + $0x128] sm:$0xff]   ;;  %v1472_v49 = vld [vmem:[%s1832_s0 + $0x84] ss:$20 sps:$4 sm:$0xff]   ;;  %v1490_v51 = vld [vmem:[%s1831_s1 + $0x110] sm:$0xff]  }
  0x12   :  { %1297 = vmatprep.subr.bf16.mxu1 %v1434_v17  ;;  %v1483_v50 = vld [vmem:[%s1831_s1 + $0x118] sm:$0xff]   ;;  %v1475_v53 = vld [vmem:[%s1832_s0 + $0x80] ss:$20 sps:$4 sm:$0xff]   ;;  %v1497_v55 = vld [vmem:[%s1831_s1 + $0x108] sm:$0xff]  }
  0x13   :  { %v1474_v52 = vld [vmem:[%s1832_s0 + $0x78] ss:$20 sps:$4 sm:$0xff]   ;;  %v1504_v57 = vld [vmem:[%s1831_s1 + $0x100] sm:$0xff]   ;;  %v1482_v59 = vld [vmem:[%s1832_s0 + $0xa8] ss:$20 sps:$4 sm:$0xff]  }
  0x14   :  { %1234 = vmatpush3.bf16.msra.mxu0 %v1435_v18  ;;  %v1477_v54 = vld [vmem:[%s1832_s0 + $0xa4] ss:$20 sps:$4 sm:$0xff]   ;;  %v1479_v56 = vld [vmem:[%s1832_s0 + $0xac] ss:$20 sps:$4 sm:$0xff]   ;;  %v1486_v61 = vld [vmem:[%s1832_s0 + $0xd4] ss:$20 sps:$4 sm:$0xff]  }
  0x15   :  { %1298 = vmatpush3.bf16.msra.mxu1 %v1436_v19  ;;  %1235 = vmatprep.subr.bf16.mxu0 %v1437_v20  ;;  %v1481_v58 = vld [vmem:[%s1832_s0 + $0xa0] ss:$20 sps:$4 sm:$0xff]   ;;  %v1488_v62 = vld [vmem:[%s1832_s0 + $0xc8] ss:$20 sps:$4 sm:$0xff]   ;;  %v1489_v63 = vld [vmem:[%s1832_s0 + $0xd0] ss:$20 sps:$4 sm:$0xff]  }
  0x16   :  { %1299 = vmatprep.subr.bf16.mxu1 %v1438_v21  ;;  %v1484_v60 = vld [vmem:[%s1832_s0 + $0xcc] ss:$20 sps:$4 sm:$0xff]   ;;  %v1491_v0 = vld [vmem:[%s1832_s0 + $0xf4] ss:$20 sps:$4 sm:$0xff]   ;;  %v1493_v1 = vld [vmem:[%s1832_s0 + $0xfc] ss:$20 sps:$4 sm:$0xff]  }
  0x17   :  { %v1495_v2 = vld [vmem:[%s1832_s0 + $0xf0] ss:$20 sps:$4 sm:$0xff]   ;;  %v1496_v3 = vld [vmem:[%s1832_s0 + $0xf8] ss:$20 sps:$4 sm:$0xff]   ;;  %v1503_v7 = vld [vmem:[%s1832_s0 + $0x120] ss:$20 sps:$4 sm:$0xff]  }
  0x18   :  { %1236 = vmatpush3.bf16.msra.mxu0 %v1439_v22  ;;  %v1498_v4 = vld [vmem:[%s1832_s0 + $0x11c] ss:$20 sps:$4 sm:$0xff]   ;;  %v1500_v5 = vld [vmem:[%s1832_s0 + $0x124] ss:$20 sps:$4 sm:$0xff]   ;;  %v1509_v12 = vld [vmem:[%s1832_s0 + $0x60] ss:$20 sps:$4 sm:$0xff]  }
  0x19   :  { %1300 = vmatpush3.bf16.msra.mxu1 %v1440_v23  ;;  %1237 = vmatprep.subr.bf16.mxu0 %v1441_v24  ;;  %v1502_v6 = vld [vmem:[%s1832_s0 + $0x118] ss:$20 sps:$4 sm:$0xff]   ;;  %v1505_v8 = vld [vmem:[%s1832_s0 + $0x10] ss:$20 sps:$4 sm:$0xff]   ;;  %v1510_v13 = vld [vmem:[%s1832_s0 + $0x100] ss:$20 sps:$4 sm:$0xff]  }
  0x1a   :  { %1301 = vmatprep.subr.bf16.mxu1 %v1442_v25  ;;  %v1506_v9 = vld [vmem:[%s1832_s0 + $0xb0] ss:$20 sps:$4 sm:$0xff]   ;;  %v1507_v10 = vld [vmem:[%s1832_s0 + $0x38] ss:$20 sps:$4 sm:$0xff]   ;;  %v1511_v14 = vld [vmem:[%s1832_s0 + $0x88] ss:$20 sps:$4 sm:$0xff]  }
  0x1b   :  { %v1508_v11 = vld [vmem:[%s1832_s0 + $0xd8] ss:$20 sps:$4 sm:$0xff]   ;;  %v1512_v15 = vld [vmem:[%s1832_s0 + $0x128] ss:$20 sps:$4 sm:$0xff]  }
  0x1c   :  { %1238 = vmatpush3.bf16.msra.mxu0 %v1443_v26 }
  0x1d   :  { %1302 = vmatpush3.bf16.msra.mxu1 %v1444_v27  ;;  %1239 = vmatprep.subr.bf16.mxu0 %v1445_v28 }
  0x1e   :  { %1303 = vmatprep.subr.bf16.mxu1 %v1446_v29 }
  0x20   :  { %1240 = vmatpush3.bf16.msra.mxu0 %v1447_v30 }
  0x21   :  { %1304 = vmatpush3.bf16.msra.mxu1 %v1448_v31  ;;  %1369 = vmatprep.subr.bf16.mxu0 %v1455_v36 }
  0x22   :  { %1401 = vmatprep.subr.bf16.mxu1 %v1455_v36 }
  0x23   :  { %657 = vmatmul.mubr.bf16.vlgmr.msra.gmra.mxu0 %v1449_v32 }
  0x24   :  { %754 = vmatmul.mubr.bf16.vlgmr.msra.gmra.mxu1 %v1452_v34  ;;  %1370 = vmatpush3.bf16.msra.mxu0 %v1455_v36 }
  0x25   :  { %1409 = vmatpush3.bf16.msra.mxu1 %v1455_v36  ;;  %664 = vmatprep.mubr.bf16.mxu0 %v1456_v37 }
  0x26   :  { %761 = vmatprep.mubr.bf16.mxu1 %v1458_v38  ;;  %1371 = vmatprep.subr.bf16.mxu0 %v1462_v39 }
  0x27   :  { %1402 = vmatprep.subr.bf16.mxu1 %v1462_v39 }
  0x28   :  { %1372 = vmatpush3.bf16.msra.mxu0 %v1462_v39 }
  0x29   :  { %1410 = vmatpush3.bf16.msra.mxu1 %v1462_v39  ;;  %1373 = vmatprep.subr.bf16.mxu0 %v1469_v44 }
  0x2a   :  { %1403 = vmatprep.subr.bf16.mxu1 %v1469_v44 }
  0x2b   :  { %665 = vmatmul.mubr.bf16.gmra.mxu0 %v1460_v40 }
  0x2c   :  { %762 = vmatmul.mubr.bf16.gmra.mxu1 %v1461_v41  ;;  %672 = vmatprep.mubr.bf16.mxu0 %v1463_v42 }
  0x2d   :  { %769 = vmatprep.mubr.bf16.mxu1 %v1465_v43  ;;  %1374 = vmatpush3.bf16.msra.mxu0 %v1469_v44 }
  0x2e   :  { %1411 = vmatpush3.bf16.msra.mxu1 %v1469_v44  ;;  %1375 = vmatprep.subr.bf16.mxu0 %v1476_v45 }
  0x2f   :  { %1404 = vmatprep.subr.bf16.mxu1 %v1476_v45 }
  0x31   :  { %1376 = vmatpush3.bf16.msra.mxu0 %v1476_v45 }
  0x32   :  { %1412 = vmatpush3.bf16.msra.mxu1 %v1476_v45  ;;  %1377 = vmatprep.subr.bf16.mxu0 %v1483_v50 }
  0x33   :  { %673 = vmatmul.mubr.bf16.gmra.mxu0 %v1467_v46  ;;  %1405 = vmatprep.subr.bf16.mxu1 %v1483_v50 }
  0x34   :  { %770 = vmatmul.mubr.bf16.gmra.mxu1 %v1468_v47  ;;  %680 = vmatprep.mubr.bf16.mxu0 %v1470_v48 }
  0x35   :  { %777 = vmatprep.mubr.bf16.mxu1 %v1472_v49  ;;  %1378 = vmatpush3.bf16.msra.mxu0 %v1483_v50 }
  0x36   :  { %1413 = vmatpush3.bf16.msra.mxu1 %v1483_v50  ;;  %1379 = vmatprep.subr.bf16.mxu0 %v1490_v51 }
  0x37   :  { %1406 = vmatprep.subr.bf16.mxu1 %v1490_v51 }
  0x39   :  { %1380 = vmatpush3.bf16.msra.mxu0 %v1490_v51 }
  0x3a   :  { %1414 = vmatpush3.bf16.msra.mxu1 %v1490_v51  ;;  %1381 = vmatprep.subr.bf16.mxu0 %v1497_v55 }
  0x3b   :  { %681 = vmatmul.mubr.bf16.gmra.mxu0 %v1474_v52  ;;  %1407 = vmatprep.subr.bf16.mxu1 %v1497_v55 }
  0x3c   :  { %778 = vmatmul.mubr.bf16.gmra.mxu1 %v1475_v53  ;;  %688 = vmatprep.mubr.bf16.mxu0 %v1477_v54 }
  0x3d   :  { %785 = vmatprep.mubr.bf16.mxu1 %v1479_v56  ;;  %1382 = vmatpush3.bf16.msra.mxu0 %v1497_v55 }
  0x3e   :  { %1415 = vmatpush3.bf16.msra.mxu1 %v1497_v55  ;;  %1383 = vmatprep.subr.bf16.mxu0 %v1504_v57 }
  0x3f   :  { %1408 = vmatprep.subr.bf16.mxu1 %v1504_v57 }
  0x41   :  { %1384 = vmatpush3.bf16.msra.mxu0 %v1504_v57 }
  0x42   :  { %1416 = vmatpush3.bf16.msra.mxu1 %v1504_v57 }
  0x43   :  { %689 = vmatmul.mubr.bf16.gmra.mxu0 %v1481_v58 }
  0x44   :  { %786 = vmatmul.mubr.bf16.gmra.mxu1 %v1482_v59  ;;  %696 = vmatprep.mubr.bf16.mxu0 %v1484_v60 }
  0x45   :  { %793 = vmatprep.mubr.bf16.mxu1 %v1486_v61 }
  0x4b   :  { %697 = vmatmul.mubr.bf16.gmra.mxu0 %v1488_v62 }
  0x4c   :  { %794 = vmatmul.mubr.bf16.gmra.mxu1 %v1489_v63  ;;  %704 = vmatprep.mubr.bf16.mxu0 %v1491_v0 }
  0x4d   :  { %801 = vmatprep.mubr.bf16.mxu1 %v1493_v1 }
  0x53   :  { %705 = vmatmul.mubr.bf16.gmra.mxu0 %v1495_v2 }
  0x54   :  { %802 = vmatmul.mubr.bf16.gmra.mxu1 %v1496_v3  ;;  %712 = vmatprep.mubr.bf16.mxu0 %v1498_v4 }
  0x55   :  { %809 = vmatprep.mubr.bf16.mxu1 %v1500_v5 }
  0x5b   :  { %713 = vmatmul.mubr.bf16.gmra.mxu0 %v1502_v6 }
  0x5c   :  { %810 = vmatmul.mubr.bf16.gmra.mxu1 %v1503_v7  ;;  %1385 = vmatprep.mubr.bf16.mxu0 %v1505_v8 }
  0x5d   :  { %1393 = vmatprep.mubr.bf16.mxu1 %v1506_v9 }
  0x63   :  { %1386 = vmatmul.mubr.bf16.vlgmr.msra.gmra.mxu0 %v1507_v10 }
  0x64   :  { %1394 = vmatmul.mubr.bf16.vlgmr.msra.gmra.mxu1 %v1508_v11  ;;  %1389 = vmatprep.mubr.bf16.mxu0 %v1509_v12 }
  0x65   :  { %1397 = vmatprep.mubr.bf16.mxu1 %v1510_v13 }
  0x6b   :  { %1390 = vmatmul.mubr.bf16.gmra.mxu0 %v1511_v14 }
  0x6c   :  { %1398 = vmatmul.mubr.bf16.gmra.mxu1 %v1512_v15 }
  0xe3   :  { %v1241_v16 = vpop.f32.mrf.mxu0 }
  0xe4   :  { %v1305_v17 = vpop.f32.mrf.mxu1 }
  0xe5   :  { %v1242_v18 = vpop.f32.mrf.mxu0 }
  0xe6   :  { %v1243_v19 = vadd.f32 %v1242_v18, %v1241_v16  ;;  %v1306_v20 = vpop.f32.mrf.mxu1 }
  0xe7   :  { %v1307_v21 = vadd.f32 %v1306_v20, %v1305_v17  ;;  %v1244_v22 = vpop.f32.mrf.mxu0 }
  0xe8   :  { %v1308_v23 = vpop.f32.mrf.mxu1 }
  0xe9   :  { %v1245_v24 = vpop.f32.mrf.mxu0  ;;  %v1768_v25 = vadd.f32 %v1307_v21, %v1243_v19 }
  0xea   :  { %v1309_v26 = vpop.f32.mrf.mxu1  ;;  %v1246_v14 = vadd.f32 %v1245_v24, %v1244_v22 }
  0xeb   :  { %1834 = vst [vmem:[#allocation3_spill] sm:$0xff] %v1768_v25  ;;  %v1247_v27 = vpop.f32.mrf.mxu0  ;;  %v1310_v15 = vadd.f32 %v1309_v26, %v1308_v23 }
  0xec   :  { %v1311_v28 = vpop.f32.mrf.mxu1 }
  0xed   :  { %v1248_v29 = vpop.f32.mrf.mxu0 }
  0xee   :  { %v1312_v30 = vpop.f32.mrf.mxu1  ;;  %v1249_v18 = vadd.f32 %v1248_v29, %v1247_v27 }
  0xef   :  { %v1250_v31 = vpop.f32.mrf.mxu0  ;;  %v1313_v19 = vadd.f32 %v1312_v30, %v1311_v28 }
  0xf0   :  { %v1314_v32 = vpop.f32.mrf.mxu1 }
  0xf1   :  { %v1251_v33 = vpop.f32.mrf.mxu0 }
  0xf2   :  { %v1315_v34 = vpop.f32.mrf.mxu1  ;;  %v1252_v20 = vadd.f32 %v1251_v33, %v1250_v31  ;;  %v764_v31 = vadd.f32 %v1313_v19, %v1249_v18 }
  0xf3   :  { %v1770_v35 = vpop.f32.mrf.mxu0  ;;  %v1316_v21 = vadd.f32 %v1315_v34, %v1314_v32 }
  0xf4   :  { %v1772_v36 = vpop.f32.mrf.mxu1 }
  0xf5   :  { %1835 = vst [vmem:[#allocation4_spill] sm:$0xff] %v1772_v36  ;;  %v1774_v37 = vpop.f32.mrf.mxu0  ;;  %v767_v33 = vadd.f32 %v1316_v21, %v1252_v20 }
  0xf6   :  { %1836 = vst [vmem:[#allocation5_spill] sm:$0xff] %v1774_v37  ;;  %v1776_v38 = vpop.f32.mrf.mxu1 }
  0xf7   :  { %1837 = vst [vmem:[#allocation6_spill] sm:$0xff] %v1776_v38  ;;  %v1778_v39 = vpop.f32.mrf.mxu0  ;;  %v759_v38 = vadd.f32 %v1310_v15, %v1246_v14  ;;  %v1855_v15 = vld [vmem:[#allocation3_spill] sm:$0xff] }
  0xf8   :  { %1838 = vst [vmem:[#allocation7_spill] sm:$0xff] %v1778_v39  ;;  %v1780_v40 = vpop.f32.mrf.mxu1 }
  0xf9   :  { %1839 = vst [vmem:[#allocation8_spill] sm:$0xff] %v1780_v40  ;;  %v1782_v41 = vpop.f32.mrf.mxu0 }
  0xfa   :  { %1840 = vst [vmem:[#allocation9_spill] sm:$0xff] %v1782_v41  ;;  %v1784_v42 = vpop.f32.mrf.mxu1 }
  0xfb   :  { %1841 = vst [vmem:[#allocation10_spill] sm:$0xff] %v1784_v42  ;;  %v1259_v43 = vpop.f32.mrf.mxu0 }
  0xfc   :  { %v1323_v44 = vpop.f32.mrf.mxu1  ;;  %v1847_v28 = vld [vmem:[#allocation4_spill] sm:$0xff] }
  0xfd   :  { %v1260_v45 = vpop.f32.mrf.mxu0  ;;  %v1846_v26 = vld [vmem:[#allocation5_spill] sm:$0xff] }
  0xfe   :  { %v1324_v46 = vpop.f32.mrf.mxu1  ;;  %v1255_v27 = vadd.f32 %v1846_v26, %v1770_v35  ;;  %v1848_v29 = vld [vmem:[#allocation6_spill] sm:$0xff] }
  0xff   :  { %v1786_v47 = vpop.f32.mrf.mxu0  ;;  %v1319_v30 = vadd.f32 %v1848_v29, %v1847_v28  ;;  %v1849_v34 = vld [vmem:[#allocation7_spill] sm:$0xff] }
 0x100   :  { %1842 = vst [vmem:[#allocation11_spill] sm:$0xff] %v1786_v47  ;;  %v1788_v48 = vpop.f32.mrf.mxu1  ;;  %v1325_v47 = vadd.f32 %v1324_v46, %v1323_v44 }
 0x101   :  { %1843 = vst [vmem:[#allocation12_spill] sm:$0xff] %v1788_v48  ;;  %v1263_v49 = vpop.f32.mrf.mxu0  ;;  %v1261_v48 = vadd.f32 %v1260_v45, %v1259_v43  ;;  %v1850_v43 = vld [vmem:[#allocation9_spill] sm:$0xff]  ;;  %v1851_v45 = vld [vmem:[#allocation8_spill] sm:$0xff] }
 0x102   :  { %v1327_v50 = vpop.f32.mrf.mxu1  ;;  %v1258_v44 = vadd.f32 %v1850_v43, %v1849_v34  ;;  %v1852_v46 = vld [vmem:[#allocation10_spill] sm:$0xff] }
 0x103   :  { %v1265_v51 = vpop.f32.mrf.mxu0 }
 0x104   :  { %v1329_v52 = vpop.f32.mrf.mxu1 }
 0x105   :  { %v1266_v53 = vpop.f32.mrf.mxu0 }
 0x106   :  { %v1330_v54 = vpop.f32.mrf.mxu1  ;;  %v1267_v41 = vadd.f32 %v1266_v53, %v1265_v51  ;;  %v1322_v51 = vadd.f32 %v1852_v46, %v1851_v45 }
 0x107   :  { %v1268_v55 = vpop.f32.mrf.mxu0  ;;  %v1331_v39 = vadd.f32 %v1330_v54, %v1329_v52  ;;  %v780_v54 = vadd.f32 %v1325_v47, %v1261_v48 }
 0x108   :  { %v1332_v56 = vpop.f32.mrf.mxu1 }
 0x109   :  { %v1269_v57 = vpop.f32.mrf.mxu0 }
 0x10a   :  { %v1333_v58 = vpop.f32.mrf.mxu1  ;;  %v1270_v36 = vadd.f32 %v1269_v57, %v1268_v55  ;;  %v1853_v55 = vld [vmem:[#allocation11_spill] sm:$0xff]  ;;  %v1854_v57 = vld [vmem:[#allocation12_spill] sm:$0xff] }
 0x10b   :  { %v1271_v59 = vpop.f32.mrf.mxu0  ;;  %v1334_v37 = vadd.f32 %v1333_v58, %v1332_v56  ;;  %v1264_v56 = vadd.f32 %v1263_v49, %v1853_v55  ;;  %v1328_v58 = vadd.f32 %v1327_v50, %v1854_v57 }
 0x10c   :  { %v1335_v60 = vpop.f32.mrf.mxu1 }
 0x10d   :  { %v1272_v61 = vpop.f32.mrf.mxu0  ;;  %v783_v29 = vadd.f32 %v1328_v58, %v1264_v56 }
 0x10e   :  { %v1336_v62 = vpop.f32.mrf.mxu1  ;;  %v1273_v42 = vadd.f32 %v1272_v61, %v1271_v59  ;;  %v788_v59 = vadd.f32 %v1331_v39, %v1267_v41 }
 0x10f   :  { %v1274_v63 = vpop.f32.mrf.mxu0  ;;  %v1337_v40 = vadd.f32 %v1336_v62, %v1335_v60 }
 0x110   :  { %v1338_v0 = vpop.f32.mrf.mxu1 }
 0x111   :  { %v1275_v1 = vpop.f32.mrf.mxu0  ;;  %v796_v52 = vadd.f32 %v1337_v40, %v1273_v42 }
 0x112   :  { %v1339_v2 = vpop.f32.mrf.mxu1  ;;  %v1276_v22 = vadd.f32 %v1275_v1, %v1274_v63  ;;  %v791_v1 = vadd.f32 %v1334_v37, %v1270_v36 }
 0x113   :  { %v1277_v3 = vpop.f32.mrf.mxu0  ;;  %v1340_v23 = vadd.f32 %v1339_v2, %v1338_v0 }
 0x114   :  { %v1341_v4 = vpop.f32.mrf.mxu1 }
 0x115   :  { %v1278_v5 = vpop.f32.mrf.mxu0  ;;  %v799_v0 = vadd.f32 %v1340_v23, %v1276_v22 }
 0x116   :  { %v1342_v6 = vpop.f32.mrf.mxu1  ;;  %v1279_v61 = vadd.f32 %v1278_v5, %v1277_v3 }
 0x117   :  { %v1280_v7 = vpop.f32.mrf.mxu0  ;;  %v1343_v2 = vadd.f32 %v1342_v6, %v1341_v4 }
 0x118   :  { %v1790_v8 = vpop.f32.mrf.mxu1 }
 0x119   :  { %1844 = vst [vmem:[#allocation13_spill] sm:$0xff] %v1790_v8  ;;  %v1281_v9 = vpop.f32.mrf.mxu0 }
 0x11a   :  { %v1792_v10 = vpop.f32.mrf.mxu1  ;;  %v1282_v14 = vadd.f32 %v1281_v9, %v1280_v7 }
 0x11b   :  { %1845 = vst [vmem:[#allocation14_spill] sm:$0xff] %v1792_v10  ;;  %v1283_v11 = vpop.f32.mrf.mxu0 }
 0x11c   :  { %v1347_v12 = vpop.f32.mrf.mxu1 }
 0x11d   :  { %v1284_v13 = vpop.f32.mrf.mxu0 }
 0x11e   :  { %v1348_v16 = vpop.f32.mrf.mxu1  ;;  %v1285_v42 = vadd.f32 %v1284_v13, %v1283_v11 }
 0x11f   :  { %v1286_v17 = vpop.f32.mrf.mxu0  ;;  %v1349_v47 = vadd.f32 %v1348_v16, %v1347_v12 }
 0x120   :  { %v1350_v25 = vpop.f32.mrf.mxu1  ;;  %v1856_v4 = vld [vmem:[#allocation13_spill] sm:$0xff] }
 0x121   :  { %v1287_v8 = vpop.f32.mrf.mxu0 }
 0x122   :  { %v1351_v10 = vpop.f32.mrf.mxu1  ;;  %v1288_v50 = vadd.f32 %v1287_v8, %v1286_v17  ;;  %v1857_v6 = vld [vmem:[#allocation14_spill] sm:$0xff]  ;;  %v812_v8 = vadd.f32 %v1349_v47, %v1285_v42 }
 0x123   :  { %v1387_v24 = vpop.f32.mrf.mxu0  ;;  %v1352_v5 = vadd.f32 %v1351_v10, %v1350_v25  ;;  %v1346_v7 = vadd.f32 %v1857_v6, %v1856_v4  ;;  %v772_v10 = vadd.f32 %v1319_v30, %v1255_v27 }
 0x124   :  { %v1395_v32 = vpop.f32.mrf.mxu1  ;;  %v861_v35 = vadd.f32 %v1387_v24, %v764_v31 }
 0x125   :  { %v852_v53 = vpop.f32.mrf.mxu0  ;;  %v893_v62 = vadd.f32 %v1395_v32, %v796_v52  ;;  %v815_v43 = vadd.f32 %v1352_v5, %v1288_v50  ;;  %v807_v55 = vadd.f32 %v1346_v7, %v1282_v14 }
 0x126   :  { %v884_v60 = vpop.f32.mrf.mxu1  ;;  %v853_v18 = vadd.f32 %v852_v53, %v1855_v15  ;;  %v968_v21 = vmax.f32 %v861_v35, 0.0  ;;  %v775_v53 = vadd.f32 %v1322_v51, %v1258_v44 }
 0x127   :  { %v1388_v63 = vpop.f32.mrf.mxu0  ;;  %v885_v48 = vadd.f32 %v884_v60, %v788_v59  ;;  %v976_v24 = vmax.f32 %v893_v62, 0.0 }
 0x128   :  { %v864_v19 = vadd.f32 %v1388_v63, %v767_v33  ;;  %v1396_v40 = vpop.f32.mrf.mxu1  ;;  %v966_v9 = vmax.f32 %v853_v18, 0.0  ;;  %v804_v33 = vadd.f32 %v1343_v2, %v1279_v61 }
 0x129   :  { %v896_v49 = vadd.f32 %v1396_v40, %v799_v0  ;;  %v855_v20 = vpop.f32.mrf.mxu0  ;;  %v974_v13 = vmax.f32 %v885_v48, 0.0 }
 0x12a   :  { %v969_v39 = vmax.f32 %v864_v19, 0.0  ;;  %v856_v41 = vadd.f32 %v855_v20, %v759_v38  ;;  %v887_v3 = vpop.f32.mrf.mxu1 }
 0x12b   :  { %v977_v22 = vmax.f32 %v896_v49, 0.0  ;;  %v888_v36 = vadd.f32 %v887_v3, %v791_v1  ;;  %v1391_v37 = vpop.f32.mrf.mxu0 }
 0x12c   :  { %v1186_v23 = vpack.c.bf16 %v969_v39, %v968_v21  ;;  %v967_v11 = vmax.f32 %v856_v41, 0.0  ;;  %v1399_v12 = vpop.f32.mrf.mxu1  ;;  %v877_v38 = vadd.f32 %v1391_v37, %v780_v54 }
 0x12d   :  { %v1206_v16 = vpack.c.bf16 %v977_v22, %v976_v24  ;;  %v975_v26 = vmax.f32 %v888_v36, 0.0  ;;  %v868_v17 = vpop.f32.mrf.mxu0  ;;  %v909_v32 = vadd.f32 %v1399_v12, %v812_v8 }
 0x12e   :  { %1218 = vst [vmem:[%s1833_s2 + $0x8] sm:$0xff] %v1186_v23   ;;  %v1181_v25 = vpack.c.bf16 %v967_v11, %v966_v9  ;;  %v900_v28 = vpop.f32.mrf.mxu1  ;;  %v869_v45 = vadd.f32 %v868_v17, %v772_v10  ;;  %v972_v56 = vmax.f32 %v877_v38, 0.0 }
 0x12f   :  { %1222 = vst [vmem:[%s1833_s2 + $0x28] sm:$0xff] %v1206_v16   ;;  %v1201_v31 = vpack.c.bf16 %v975_v26, %v974_v13  ;;  %v1392_v34 = vpop.f32.mrf.mxu0  ;;  %v901_v27 = vadd.f32 %v900_v28, %v804_v33  ;;  %v980_v59 = vmax.f32 %v909_v32, 0.0 }
 0x130   :  { %1182 = vst [vmem:[%s1833_s2] sm:$0xff] %v1181_v25   ;;  %v880_v46 = vadd.f32 %v1392_v34, %v783_v29  ;;  %v1400_v52 = vpop.f32.mrf.mxu1  ;;  %v970_v62 = vmax.f32 %v869_v45, 0.0 }
 0x131   :  { %1221 = vst [vmem:[%s1833_s2 + $0x20] sm:$0xff] %v1201_v31   ;;  %v912_v30 = vadd.f32 %v1400_v52, %v815_v43  ;;  %v871_v54 = vpop.f32.mrf.mxu0  ;;  %v978_v1 = vmax.f32 %v901_v27, 0.0 }
 0x132   :  { %v973_v57 = vmax.f32 %v880_v46, 0.0  ;;  %v872_v58 = vadd.f32 %v871_v54, %v775_v53  ;;  %v903_v35 = vpop.f32.mrf.mxu1 }
 0x133   :  { %v981_v60 = vmax.f32 %v912_v30, 0.0  ;;  %v904_v61 = vadd.f32 %v903_v35, %v807_v55 }
 0x134   :  { %v1196_v63 = vpack.c.bf16 %v973_v57, %v972_v56  ;;  %v971_v0 = vmax.f32 %v872_v58, 0.0 }
 0x135   :  { %v1216_v44 = vpack.c.bf16 %v981_v60, %v980_v59  ;;  %v979_v51 = vmax.f32 %v904_v61, 0.0 }
 0x136   :  { %1220 = vst [vmem:[%s1833_s2 + $0x18] sm:$0xff] %v1196_v63   ;;  %v1191_v2 = vpack.c.bf16 %v971_v0, %v970_v62 }
 0x137   :  { %1224 = vst [vmem:[%s1833_s2 + $0x38] sm:$0xff] %v1216_v44   ;;  %v1211_v14 = vpack.c.bf16 %v979_v51, %v978_v1 }
 0x138   :  { %1219 = vst [vmem:[%s1833_s2 + $0x10] sm:$0xff] %v1191_v2  }
 0x139   :  { %1223 = vst [vmem:[%s1833_s2 + $0x30] sm:$0xff] %v1211_v14  }

// kernel: resnet_forward.15
= control target key start
LH: loop header
LB: loop body
LE: loop exit
PB: predicated region body
PF: predicated region fallthrough
CT: control target
= control target key end

     0   :  { %s2125_s1 = inlined_call_operand.vmem [shape: bf16[640,128], index: 1, kind: input, shape index: {}]   ;;  %s2126_s0 = inlined_call_operand.vmem [shape: bf16[128,640], index: 0, kind: input, shape index: {}]   ;;  %s2127_s2 = inlined_call_operand.vmem [shape: bf16[128,128], index: 2, kind: input, shape index: {}]   ;;  %s2128_s3 = inlined_call_operand.vmem [shape: bf16[128,128], index: 3, kind: output, shape index: {}]  }
   0x1   :  { %v1507_v0 = vld [vmem:[%s2125_s1 + $0x78] sm:$0xff]   ;;  %v1511_v4 = vld [vmem:[%s2125_s1 + $0x70] sm:$0xff]   ;;  %v1515_v8 = vld [vmem:[%s2125_s1 + $0x68] sm:$0xff]  }
   0x2   :  { %v1508_v1 = vld [vmem:[%s2125_s1 + $0xf8] sm:$0xff]   ;;  %1315 = vmatprep.subr.bf16.mxu0 %v1507_v0  ;;  %v1512_v5 = vld [vmem:[%s2125_s1 + $0xf0] sm:$0xff]   ;;  %v1516_v9 = vld [vmem:[%s2125_s1 + $0xe8] sm:$0xff]  }
   0x3   :  { %v1509_v2 = vld [vmem:[%s2125_s1 + $0x38] sm:$0xff]   ;;  %1379 = vmatprep.subr.bf16.mxu1 %v1508_v1  ;;  %v1513_v6 = vld [vmem:[%s2125_s1 + $0x30] sm:$0xff]   ;;  %v1517_v10 = vld [vmem:[%s2125_s1 + $0x28] sm:$0xff]  }
   0x4   :  { %v1510_v3 = vld [vmem:[%s2125_s1 + $0xb8] sm:$0xff]   ;;  %1316 = vmatpush3.bf16.msra.mxu0 %v1509_v2  ;;  %v1514_v7 = vld [vmem:[%s2125_s1 + $0xb0] sm:$0xff]   ;;  %v1518_v11 = vld [vmem:[%s2125_s1 + $0xa8] sm:$0xff]  }
   0x5   :  { %1380 = vmatpush3.bf16.msra.mxu1 %v1510_v3  ;;  %1317 = vmatprep.subr.bf16.mxu0 %v1511_v4  ;;  %v1519_v12 = vld [vmem:[%s2125_s1 + $0x60] sm:$0xff]   ;;  %v1523_v16 = vld [vmem:[%s2125_s1 + $0x58] sm:$0xff]   ;;  %v1527_v20 = vld [vmem:[%s2125_s1 + $0x50] sm:$0xff]  }
   0x6   :  { %1381 = vmatprep.subr.bf16.mxu1 %v1512_v5  ;;  %v1520_v13 = vld [vmem:[%s2125_s1 + $0xe0] sm:$0xff]   ;;  %v1524_v17 = vld [vmem:[%s2125_s1 + $0xd8] sm:$0xff]   ;;  %v1528_v21 = vld [vmem:[%s2125_s1 + $0xd0] sm:$0xff]  }
   0x7   :  { %v1521_v14 = vld [vmem:[%s2125_s1 + $0x20] sm:$0xff]   ;;  %v1525_v18 = vld [vmem:[%s2125_s1 + $0x18] sm:$0xff]   ;;  %v1529_v22 = vld [vmem:[%s2125_s1 + $0x10] sm:$0xff]  }
   0x8   :  { %1318 = vmatpush3.bf16.msra.mxu0 %v1513_v6  ;;  %v1522_v15 = vld [vmem:[%s2125_s1 + $0xa0] sm:$0xff]   ;;  %v1526_v19 = vld [vmem:[%s2125_s1 + $0x98] sm:$0xff]   ;;  %v1530_v23 = vld [vmem:[%s2125_s1 + $0x90] sm:$0xff]  }
   0x9   :  { %1382 = vmatpush3.bf16.msra.mxu1 %v1514_v7  ;;  %1319 = vmatprep.subr.bf16.mxu0 %v1515_v8  ;;  %v1531_v24 = vld [vmem:[%s2125_s1 + $0x48] sm:$0xff]   ;;  %v1535_v28 = vld [vmem:[%s2125_s1 + $0x40] sm:$0xff]   ;;  %v1545_v36 = vld [vmem:[%s2125_s1 + $0x138] sm:$0xff]  }
   0xa   :  { %1383 = vmatprep.subr.bf16.mxu1 %v1516_v9  ;;  %v1532_v25 = vld [vmem:[%s2125_s1 + $0xc8] sm:$0xff]   ;;  %v1536_v29 = vld [vmem:[%s2125_s1 + $0xc0] sm:$0xff]   ;;  %v1552_v39 = vld [vmem:[%s2125_s1 + $0x130] sm:$0xff]  }
   0xb   :  { %v1533_v26 = vld [vmem:[%s2125_s1 + $0x8] sm:$0xff]   ;;  %v1537_v30 = vld [vmem:[%s2125_s1] sm:$0xff]   ;;  %v1555_v43 = vld [vmem:[%s2126_s0 + $0x5c] ss:$20 sps:$4 sm:$0xff]  }
   0xc   :  { %1320 = vmatpush3.bf16.msra.mxu0 %v1517_v10  ;;  %v1534_v27 = vld [vmem:[%s2125_s1 + $0x88] sm:$0xff]   ;;  %v1538_v31 = vld [vmem:[%s2125_s1 + $0x80] sm:$0xff]   ;;  %v1560_v48 = vld [vmem:[%s2126_s0 + $0x7c] ss:$20 sps:$4 sm:$0xff]  }
   0xd   :  { %1384 = vmatpush3.bf16.msra.mxu1 %v1518_v11  ;;  %1321 = vmatprep.subr.bf16.mxu0 %v1519_v12  ;;  %v1539_v32 = vld [vmem:[%s2126_s0] ss:$20 sps:$4 sm:$0xff]   ;;  %v1541_v33 = vld [vmem:[%s2126_s0 + $0x4] ss:$20 sps:$4 sm:$0xff]   ;;  %v1542_v34 = vld [vmem:[%s2126_s0 + $0x8] ss:$20 sps:$4 sm:$0xff]  }
   0xe   :  { %1385 = vmatprep.subr.bf16.mxu1 %v1520_v13  ;;  %v1544_v35 = vld [vmem:[%s2126_s0 + $0xc] ss:$20 sps:$4 sm:$0xff]   ;;  %659 = vmatprep.mubr.bf16.mxu0 %v1541_v33  ;;  %v1548_v38 = vld [vmem:[%s2126_s0 + $0x34] ss:$20 sps:$4 sm:$0xff]   ;;  %v1551_v41 = vld [vmem:[%s2126_s0 + $0x30] ss:$20 sps:$4 sm:$0xff]  }
   0xf   :  { %756 = vmatprep.mubr.bf16.mxu1 %v1544_v35  ;;  %v1546_v37 = vld [vmem:[%s2126_s0 + $0x2c] ss:$20 sps:$4 sm:$0xff]   ;;  %v1550_v40 = vld [vmem:[%s2126_s0 + $0x28] ss:$20 sps:$4 sm:$0xff]   ;;  %v1557_v46 = vld [vmem:[%s2126_s0 + $0x50] ss:$20 sps:$4 sm:$0xff]  }
  0x10   :  { %1322 = vmatpush3.bf16.msra.mxu0 %v1521_v14  ;;  %v1553_v42 = vld [vmem:[%s2126_s0 + $0x54] ss:$20 sps:$4 sm:$0xff]   ;;  %v1566_v45 = vld [vmem:[%s2125_s1 + $0x120] sm:$0xff]   ;;  %v1558_v47 = vld [vmem:[%s2126_s0 + $0x58] ss:$20 sps:$4 sm:$0xff]  }
  0x11   :  { %1386 = vmatpush3.bf16.msra.mxu1 %v1522_v15  ;;  %1323 = vmatprep.subr.bf16.mxu0 %v1523_v16  ;;  %v1559_v44 = vld [vmem:[%s2125_s1 + $0x128] sm:$0xff]   ;;  %v1562_v49 = vld [vmem:[%s2126_s0 + $0x84] ss:$20 sps:$4 sm:$0xff]   ;;  %v1580_v51 = vld [vmem:[%s2125_s1 + $0x110] sm:$0xff]  }
  0x12   :  { %1387 = vmatprep.subr.bf16.mxu1 %v1524_v17  ;;  %v1573_v50 = vld [vmem:[%s2125_s1 + $0x118] sm:$0xff]   ;;  %v1565_v53 = vld [vmem:[%s2126_s0 + $0x80] ss:$20 sps:$4 sm:$0xff]   ;;  %v1587_v55 = vld [vmem:[%s2125_s1 + $0x108] sm:$0xff]  }
  0x13   :  { %v1564_v52 = vld [vmem:[%s2126_s0 + $0x78] ss:$20 sps:$4 sm:$0xff]   ;;  %v1594_v57 = vld [vmem:[%s2125_s1 + $0x100] sm:$0xff]   ;;  %v1572_v59 = vld [vmem:[%s2126_s0 + $0xa8] ss:$20 sps:$4 sm:$0xff]  }
  0x14   :  { %1324 = vmatpush3.bf16.msra.mxu0 %v1525_v18  ;;  %v1567_v54 = vld [vmem:[%s2126_s0 + $0xa4] ss:$20 sps:$4 sm:$0xff]   ;;  %v1569_v56 = vld [vmem:[%s2126_s0 + $0xac] ss:$20 sps:$4 sm:$0xff]   ;;  %v1576_v61 = vld [vmem:[%s2126_s0 + $0xd4] ss:$20 sps:$4 sm:$0xff]  }
  0x15   :  { %1388 = vmatpush3.bf16.msra.mxu1 %v1526_v19  ;;  %1325 = vmatprep.subr.bf16.mxu0 %v1527_v20  ;;  %v1571_v58 = vld [vmem:[%s2126_s0 + $0xa0] ss:$20 sps:$4 sm:$0xff]   ;;  %v1578_v62 = vld [vmem:[%s2126_s0 + $0xc8] ss:$20 sps:$4 sm:$0xff]   ;;  %v1579_v63 = vld [vmem:[%s2126_s0 + $0xd0] ss:$20 sps:$4 sm:$0xff]  }
  0x16   :  { %1389 = vmatprep.subr.bf16.mxu1 %v1528_v21  ;;  %v1574_v60 = vld [vmem:[%s2126_s0 + $0xcc] ss:$20 sps:$4 sm:$0xff]   ;;  %v1581_v0 = vld [vmem:[%s2126_s0 + $0xf4] ss:$20 sps:$4 sm:$0xff]   ;;  %v1583_v1 = vld [vmem:[%s2126_s0 + $0xfc] ss:$20 sps:$4 sm:$0xff]  }
  0x17   :  { %v1585_v2 = vld [vmem:[%s2126_s0 + $0xf0] ss:$20 sps:$4 sm:$0xff]   ;;  %v1586_v3 = vld [vmem:[%s2126_s0 + $0xf8] ss:$20 sps:$4 sm:$0xff]   ;;  %v1593_v7 = vld [vmem:[%s2126_s0 + $0x120] ss:$20 sps:$4 sm:$0xff]  }
  0x18   :  { %1326 = vmatpush3.bf16.msra.mxu0 %v1529_v22  ;;  %v1588_v4 = vld [vmem:[%s2126_s0 + $0x11c] ss:$20 sps:$4 sm:$0xff]   ;;  %v1590_v5 = vld [vmem:[%s2126_s0 + $0x124] ss:$20 sps:$4 sm:$0xff]   ;;  %v1599_v12 = vld [vmem:[%s2126_s0 + $0x60] ss:$20 sps:$4 sm:$0xff]  }
  0x19   :  { %1390 = vmatpush3.bf16.msra.mxu1 %v1530_v23  ;;  %1327 = vmatprep.subr.bf16.mxu0 %v1531_v24  ;;  %v1592_v6 = vld [vmem:[%s2126_s0 + $0x118] ss:$20 sps:$4 sm:$0xff]   ;;  %v1595_v8 = vld [vmem:[%s2126_s0 + $0x10] ss:$20 sps:$4 sm:$0xff]   ;;  %v1600_v13 = vld [vmem:[%s2126_s0 + $0x100] ss:$20 sps:$4 sm:$0xff]  }
  0x1a   :  { %1391 = vmatprep.subr.bf16.mxu1 %v1532_v25  ;;  %v1596_v9 = vld [vmem:[%s2126_s0 + $0xb0] ss:$20 sps:$4 sm:$0xff]   ;;  %v1597_v10 = vld [vmem:[%s2126_s0 + $0x38] ss:$20 sps:$4 sm:$0xff]   ;;  %v1601_v14 = vld [vmem:[%s2126_s0 + $0x88] ss:$20 sps:$4 sm:$0xff]  }
  0x1b   :  { %v1598_v11 = vld [vmem:[%s2126_s0 + $0xd8] ss:$20 sps:$4 sm:$0xff]   ;;  %v1602_v15 = vld [vmem:[%s2126_s0 + $0x128] ss:$20 sps:$4 sm:$0xff]  }
  0x1c   :  { %1328 = vmatpush3.bf16.msra.mxu0 %v1533_v26 }
  0x1d   :  { %1392 = vmatpush3.bf16.msra.mxu1 %v1534_v27  ;;  %1329 = vmatprep.subr.bf16.mxu0 %v1535_v28 }
  0x1e   :  { %1393 = vmatprep.subr.bf16.mxu1 %v1536_v29 }
  0x20   :  { %1330 = vmatpush3.bf16.msra.mxu0 %v1537_v30 }
  0x21   :  { %1394 = vmatpush3.bf16.msra.mxu1 %v1538_v31  ;;  %1459 = vmatprep.subr.bf16.mxu0 %v1545_v36 }
  0x22   :  { %1491 = vmatprep.subr.bf16.mxu1 %v1545_v36 }
  0x23   :  { %660 = vmatmul.mubr.bf16.vlgmr.msra.gmra.mxu0 %v1539_v32 }
  0x24   :  { %757 = vmatmul.mubr.bf16.vlgmr.msra.gmra.mxu1 %v1542_v34  ;;  %1460 = vmatpush3.bf16.msra.mxu0 %v1545_v36 }
  0x25   :  { %1499 = vmatpush3.bf16.msra.mxu1 %v1545_v36  ;;  %667 = vmatprep.mubr.bf16.mxu0 %v1546_v37 }
  0x26   :  { %764 = vmatprep.mubr.bf16.mxu1 %v1548_v38  ;;  %1461 = vmatprep.subr.bf16.mxu0 %v1552_v39 }
  0x27   :  { %1492 = vmatprep.subr.bf16.mxu1 %v1552_v39 }
  0x28   :  { %1462 = vmatpush3.bf16.msra.mxu0 %v1552_v39 }
  0x29   :  { %1500 = vmatpush3.bf16.msra.mxu1 %v1552_v39  ;;  %1463 = vmatprep.subr.bf16.mxu0 %v1559_v44 }
  0x2a   :  { %1493 = vmatprep.subr.bf16.mxu1 %v1559_v44 }
  0x2b   :  { %668 = vmatmul.mubr.bf16.gmra.mxu0 %v1550_v40 }
  0x2c   :  { %765 = vmatmul.mubr.bf16.gmra.mxu1 %v1551_v41  ;;  %675 = vmatprep.mubr.bf16.mxu0 %v1553_v42 }
  0x2d   :  { %772 = vmatprep.mubr.bf16.mxu1 %v1555_v43  ;;  %1464 = vmatpush3.bf16.msra.mxu0 %v1559_v44 }
  0x2e   :  { %1501 = vmatpush3.bf16.msra.mxu1 %v1559_v44  ;;  %1465 = vmatprep.subr.bf16.mxu0 %v1566_v45 }
  0x2f   :  { %1494 = vmatprep.subr.bf16.mxu1 %v1566_v45 }
  0x31   :  { %1466 = vmatpush3.bf16.msra.mxu0 %v1566_v45 }
  0x32   :  { %1502 = vmatpush3.bf16.msra.mxu1 %v1566_v45  ;;  %1467 = vmatprep.subr.bf16.mxu0 %v1573_v50 }
  0x33   :  { %676 = vmatmul.mubr.bf16.gmra.mxu0 %v1557_v46  ;;  %1495 = vmatprep.subr.bf16.mxu1 %v1573_v50 }
  0x34   :  { %773 = vmatmul.mubr.bf16.gmra.mxu1 %v1558_v47  ;;  %683 = vmatprep.mubr.bf16.mxu0 %v1560_v48 }
  0x35   :  { %780 = vmatprep.mubr.bf16.mxu1 %v1562_v49  ;;  %1468 = vmatpush3.bf16.msra.mxu0 %v1573_v50 }
  0x36   :  { %1503 = vmatpush3.bf16.msra.mxu1 %v1573_v50  ;;  %1469 = vmatprep.subr.bf16.mxu0 %v1580_v51 }
  0x37   :  { %1496 = vmatprep.subr.bf16.mxu1 %v1580_v51 }
  0x39   :  { %1470 = vmatpush3.bf16.msra.mxu0 %v1580_v51 }
  0x3a   :  { %1504 = vmatpush3.bf16.msra.mxu1 %v1580_v51  ;;  %1471 = vmatprep.subr.bf16.mxu0 %v1587_v55 }
  0x3b   :  { %684 = vmatmul.mubr.bf16.gmra.mxu0 %v1564_v52  ;;  %1497 = vmatprep.subr.bf16.mxu1 %v1587_v55 }
  0x3c   :  { %781 = vmatmul.mubr.bf16.gmra.mxu1 %v1565_v53  ;;  %691 = vmatprep.mubr.bf16.mxu0 %v1567_v54 }
  0x3d   :  { %788 = vmatprep.mubr.bf16.mxu1 %v1569_v56  ;;  %1472 = vmatpush3.bf16.msra.mxu0 %v1587_v55 }
  0x3e   :  { %1505 = vmatpush3.bf16.msra.mxu1 %v1587_v55  ;;  %1473 = vmatprep.subr.bf16.mxu0 %v1594_v57 }
  0x3f   :  { %1498 = vmatprep.subr.bf16.mxu1 %v1594_v57 }
  0x41   :  { %1474 = vmatpush3.bf16.msra.mxu0 %v1594_v57 }
  0x42   :  { %1506 = vmatpush3.bf16.msra.mxu1 %v1594_v57 }
  0x43   :  { %692 = vmatmul.mubr.bf16.gmra.mxu0 %v1571_v58 }
  0x44   :  { %789 = vmatmul.mubr.bf16.gmra.mxu1 %v1572_v59  ;;  %699 = vmatprep.mubr.bf16.mxu0 %v1574_v60 }
  0x45   :  { %796 = vmatprep.mubr.bf16.mxu1 %v1576_v61 }
  0x4b   :  { %700 = vmatmul.mubr.bf16.gmra.mxu0 %v1578_v62 }
  0x4c   :  { %797 = vmatmul.mubr.bf16.gmra.mxu1 %v1579_v63  ;;  %707 = vmatprep.mubr.bf16.mxu0 %v1581_v0 }
  0x4d   :  { %804 = vmatprep.mubr.bf16.mxu1 %v1583_v1 }
  0x53   :  { %708 = vmatmul.mubr.bf16.gmra.mxu0 %v1585_v2 }
  0x54   :  { %805 = vmatmul.mubr.bf16.gmra.mxu1 %v1586_v3  ;;  %715 = vmatprep.mubr.bf16.mxu0 %v1588_v4 }
  0x55   :  { %812 = vmatprep.mubr.bf16.mxu1 %v1590_v5 }
  0x5b   :  { %716 = vmatmul.mubr.bf16.gmra.mxu0 %v1592_v6 }
  0x5c   :  { %813 = vmatmul.mubr.bf16.gmra.mxu1 %v1593_v7  ;;  %1475 = vmatprep.mubr.bf16.mxu0 %v1595_v8  ;;  %v1956_v7 = vld [vmem:[%s2127_s2 + $0x8] sm:$0xff]  }
  0x5d   :  { %1483 = vmatprep.mubr.bf16.mxu1 %v1596_v9  ;;  %2137 = vst [vmem:[#allocation3_spill] sm:$0xff] %v1956_v7  ;;  %v1963_v9 = vld [vmem:[%s2127_s2 + $0x28] sm:$0xff]  }
  0x5e   :  { %2139 = vst [vmem:[#allocation5_spill] sm:$0xff] %v1963_v9 }
  0x63   :  { %1476 = vmatmul.mubr.bf16.vlgmr.msra.gmra.mxu0 %v1597_v10  ;;  %v1968_v10 = vld [vmem:[%s2127_s2] sm:$0xff]  }
  0x64   :  { %1484 = vmatmul.mubr.bf16.vlgmr.msra.gmra.mxu1 %v1598_v11  ;;  %1479 = vmatprep.mubr.bf16.mxu0 %v1599_v12  ;;  %2140 = vst [vmem:[#allocation6_spill] sm:$0xff] %v1968_v10  ;;  %v1973_v11 = vld [vmem:[%s2127_s2 + $0x20] sm:$0xff]  }
  0x65   :  { %1487 = vmatprep.mubr.bf16.mxu1 %v1600_v13  ;;  %2141 = vst [vmem:[#allocation7_spill] sm:$0xff] %v1973_v11 }
  0x6b   :  { %1480 = vmatmul.mubr.bf16.gmra.mxu0 %v1601_v14 }
  0x6c   :  { %1488 = vmatmul.mubr.bf16.gmra.mxu1 %v1602_v15 }
  0xe3   :  { %v1331_v16 = vpop.f32.mrf.mxu0 }
  0xe4   :  { %v1395_v17 = vpop.f32.mrf.mxu1 }
  0xe5   :  { %v1332_v18 = vpop.f32.mrf.mxu0 }
  0xe6   :  { %v1333_v19 = vadd.f32 %v1332_v18, %v1331_v16  ;;  %v1396_v20 = vpop.f32.mrf.mxu1  ;;  %v1999_v16 = vld [vmem:[%s2127_s2 + $0x10] sm:$0xff]  }
  0xe7   :  { %v1397_v21 = vadd.f32 %v1396_v20, %v1395_v17  ;;  %v1863_v22 = vpop.f32.mrf.mxu0  ;;  %v1989_v20 = vld [vmem:[%s2127_s2 + $0x18] sm:$0xff]   ;;  %v1240_v10 = vunpack.c.h.bf16 %v1999_v16 }
  0xe8   :  { %v1865_v23 = vpop.f32.mrf.mxu1 }
  0xe9   :  { %v1867_v24 = vpop.f32.mrf.mxu0  ;;  %v1869_v25 = vadd.f32 %v1397_v21, %v1333_v19  ;;  %v1994_v21 = vld [vmem:[%s2127_s2 + $0x38] sm:$0xff]  }
  0xea   :  { %v1871_v26 = vpop.f32.mrf.mxu1  ;;  %v1336_v18 = vadd.f32 %v1867_v24, %v1863_v22  ;;  %v1260_v14 = vunpack.c.h.bf16 %v1994_v21 }
  0xeb   :  { %v1873_v27 = vpop.f32.mrf.mxu0  ;;  %v1400_v19 = vadd.f32 %v1871_v26, %v1865_v23 }
  0xec   :  { %v1875_v28 = vpop.f32.mrf.mxu1 }
  0xed   :  { %v1877_v29 = vpop.f32.mrf.mxu0  ;;  %v762_v7 = vadd.f32 %v1400_v19, %v1336_v18 }
  0xee   :  { %v1879_v30 = vpop.f32.mrf.mxu1 }
  0xef   :  { %v1881_v31 = vpop.f32.mrf.mxu0 }
  0xf0   :  { %v1883_v32 = vpop.f32.mrf.mxu1 }
  0xf1   :  { %v1885_v33 = vpop.f32.mrf.mxu0 }
  0xf2   :  { %v1887_v34 = vpop.f32.mrf.mxu1  ;;  %v1342_v22 = vadd.f32 %v1885_v33, %v1881_v31  ;;  %v1244_v31 = vunpack.c.h.bf16 %v1989_v20 }
  0xf3   :  { %v1889_v35 = vpop.f32.mrf.mxu0  ;;  %v1406_v23 = vadd.f32 %v1887_v34, %v1883_v32 }
  0xf4   :  { %v1891_v36 = vpop.f32.mrf.mxu1 }
  0xf5   :  { %v1893_v37 = vpop.f32.mrf.mxu0  ;;  %v770_v11 = vadd.f32 %v1406_v23, %v1342_v22 }
  0xf6   :  { %v1895_v38 = vpop.f32.mrf.mxu1 }
  0xf7   :  { %v1897_v39 = vpop.f32.mrf.mxu0 }
  0xf8   :  { %v1899_v40 = vpop.f32.mrf.mxu1 }
  0xf9   :  { %v1901_v41 = vpop.f32.mrf.mxu0 }
  0xfa   :  { %v1903_v42 = vpop.f32.mrf.mxu1 }
  0xfb   :  { %v1905_v43 = vpop.f32.mrf.mxu0 }
  0xfc   :  { %v1907_v44 = vpop.f32.mrf.mxu1 }
  0xfd   :  { %v1909_v45 = vpop.f32.mrf.mxu0 }
  0xfe   :  { %v1911_v46 = vpop.f32.mrf.mxu1 }
  0xff   :  { %v1913_v47 = vpop.f32.mrf.mxu0 }
 0x100   :  { %v1915_v48 = vpop.f32.mrf.mxu1 }
 0x101   :  { %v1917_v49 = vpop.f32.mrf.mxu0 }
 0x102   :  { %v1919_v50 = vpop.f32.mrf.mxu1 }
 0x103   :  { %v1921_v51 = vpop.f32.mrf.mxu0 }
 0x104   :  { %v1923_v52 = vpop.f32.mrf.mxu1 }
 0x105   :  { %v1925_v53 = vpop.f32.mrf.mxu0 }
 0x106   :  { %v1927_v54 = vpop.f32.mrf.mxu1 }
 0x107   :  { %v1929_v55 = vpop.f32.mrf.mxu0 }
 0x108   :  { %v1931_v56 = vpop.f32.mrf.mxu1 }
 0x109   :  { %v1933_v57 = vpop.f32.mrf.mxu0 }
 0x10a   :  { %v1935_v58 = vpop.f32.mrf.mxu1 }
 0x10b   :  { %v1361_v59 = vpop.f32.mrf.mxu0 }
 0x10c   :  { %v1425_v60 = vpop.f32.mrf.mxu1 }
 0x10d   :  { %v1362_v61 = vpop.f32.mrf.mxu0 }
 0x10e   :  { %v1426_v62 = vpop.f32.mrf.mxu1  ;;  %v1363_v32 = vadd.f32 %v1362_v61, %v1361_v59  ;;  %v1421_v59 = vadd.f32 %v1927_v54, %v1923_v52  ;;  %v2043_v61 = vadd.f32 %v1901_v41, %v1897_v39  ;;  %v1424_v41 = vadd.f32 %v1935_v58, %v1931_v56 }
 0x10f   :  { %v1937_v63 = vpop.f32.mrf.mxu0  ;;  %v1427_v33 = vadd.f32 %v1426_v62, %v1425_v60  ;;  %v1354_v62 = vadd.f32 %v1917_v49, %v1913_v47 }
 0x110   :  { %v1939_v0 = vpop.f32.mrf.mxu1 }
 0x111   :  { %v1941_v1 = vpop.f32.mrf.mxu0  ;;  %v799_v39 = vadd.f32 %v1427_v33, %v1363_v32 }
 0x112   :  { %v1943_v2 = vpop.f32.mrf.mxu1 }
 0x113   :  { %v1945_v3 = vpop.f32.mrf.mxu0 }
 0x114   :  { %v1947_v4 = vpop.f32.mrf.mxu1 }
 0x115   :  { %v1949_v5 = vpop.f32.mrf.mxu0 }
 0x116   :  { %v1951_v6 = vpop.f32.mrf.mxu1  ;;  %v1369_v47 = vadd.f32 %v1949_v5, %v1945_v3 }
 0x117   :  { %v1958_v8 = vpop.f32.mrf.mxu0 }
 0x118   :  { %2138 = vst [vmem:[#allocation4_spill] sm:$0xff] %v1958_v8  ;;  %v1975_v12 = vpop.f32.mrf.mxu1  ;;  %v1403_v8 = vadd.f32 %v1879_v30, %v1875_v28  ;;  %v1409_v28 = vadd.f32 %v1895_v38, %v1891_v36  ;;  %v1351_v36 = vadd.f32 %v1909_v45, %v1905_v43  ;;  %v1357_v38 = vadd.f32 %v1925_v53, %v1921_v51 }
 0x119   :  { %2142 = vst [vmem:[#allocation8_spill] sm:$0xff] %v1975_v12  ;;  %v1977_v13 = vpop.f32.mrf.mxu0  ;;  %v2010_v12 = vld [vmem:[%s2127_s2 + $0x30] sm:$0xff]   ;;  %v1418_v43 = vadd.f32 %v1919_v50, %v1915_v48  ;;  %v1430_v51 = vadd.f32 %v1943_v2, %v1939_v0  ;;  %v1433_v48 = vadd.f32 %v1951_v6, %v1947_v4  ;;  %v1412_v53 = vadd.f32 %v1903_v42, %v1899_v40  ;;  %v2145_v6 = vld [vmem:[#allocation3_spill] sm:$0xff] }
 0x11a   :  { %2143 = vst [vmem:[#allocation9_spill] sm:$0xff] %v1977_v13  ;;  %v1980_v15 = vpop.f32.mrf.mxu1  ;;  %v1339_v13 = vadd.f32 %v1877_v29, %v1873_v27  ;;  %v1345_v27 = vadd.f32 %v1893_v37, %v1889_v35  ;;  %v1255_v30 = vunpack.c.l.bf16 %v2010_v12  ;;  %v1256_v35 = vunpack.c.h.bf16 %v2010_v12 }
 0x11b   :  { %2144 = vst [vmem:[#allocation10_spill] sm:$0xff] %v1980_v15  ;;  %v1373_v17 = vpop.f32.mrf.mxu0  ;;  %v1415_v37 = vadd.f32 %v1911_v46, %v1907_v44  ;;  %v1360_v44 = vadd.f32 %v1933_v57, %v1929_v55  ;;  %v1366_v46 = vadd.f32 %v1941_v1, %v1937_v63  ;;  %v791_v57 = vadd.f32 %v1421_v59, %v1357_v38 }
 0x11c   :  { %v1437_v24 = vpop.f32.mrf.mxu1  ;;  %v767_v9 = vadd.f32 %v1403_v8, %v1339_v13  ;;  %v775_v8 = vadd.f32 %v1409_v28, %v1345_v27  ;;  %v786_v58 = vadd.f32 %v1418_v43, %v1354_v62  ;;  %v807_v23 = vadd.f32 %v1433_v48, %v1369_v47 }
 0x11d   :  { %v1374_v26 = vpop.f32.mrf.mxu0  ;;  %v783_v63 = vadd.f32 %v1415_v37, %v1351_v36  ;;  %v802_v4 = vadd.f32 %v1430_v51, %v1366_v46  ;;  %v794_v42 = vadd.f32 %v1424_v41, %v1360_v44  ;;  %v2153_v36 = vld [vmem:[#allocation6_spill] sm:$0xff]  ;;  %v2155_v59 = vunpack.c.h.bf16 %v2145_v6 }
 0x11e   :  { %v1438_v29 = vpop.f32.mrf.mxu1  ;;  %v1375_v0 = vadd.f32 %v1374_v26, %v1373_v17  ;;  %v2154_v37 = vunpack.c.l.bf16 %v2153_v36 }
 0x11f   :  { %v1376_v34 = vpop.f32.mrf.mxu0  ;;  %v1439_v1 = vadd.f32 %v1438_v29, %v1437_v24  ;;  %v2147_v27 = vld [vmem:[#allocation4_spill] sm:$0xff]  ;;  %v2151_v29 = vld [vmem:[#allocation5_spill] sm:$0xff] }
 0x120   :  { %v1440_v15 = vpop.f32.mrf.mxu1  ;;  %v2149_v24 = vld [vmem:[#allocation8_spill] sm:$0xff]  ;;  %v2152_v32 = vunpack.c.l.bf16 %v2151_v29  ;;  %v2158_v51 = vunpack.c.h.bf16 %v2151_v29  ;;  %v778_v29 = vadd.f32 %v1412_v53, %v2043_v61 }
 0x121   :  { %v1377_v60 = vpop.f32.mrf.mxu0  ;;  %v2148_v28 = vld [vmem:[#allocation9_spill] sm:$0xff]  ;;  %v815_v43 = vadd.f32 %v1439_v1, %v1375_v0 }
 0x122   :  { %v1441_v45 = vpop.f32.mrf.mxu1  ;;  %v1378_v13 = vadd.f32 %v1377_v60, %v1376_v34  ;;  %v1372_v17 = vadd.f32 %v2148_v28, %v2147_v27  ;;  %v2150_v26 = vld [vmem:[#allocation10_spill] sm:$0xff]  ;;  %v2161_v27 = vunpack.c.l.bf16 %v1989_v20 }
 0x123   :  { %v1477_v52 = vpop.f32.mrf.mxu0  ;;  %v1442_v3 = vadd.f32 %v1441_v45, %v1440_v15  ;;  %v2156_v45 = vld [vmem:[#allocation7_spill] sm:$0xff] }
 0x124   :  { %v864_v49 = vadd.f32 %v1477_v52, %v767_v9  ;;  %v1485_v50 = vpop.f32.mrf.mxu1  ;;  %v2146_v9 = vunpack.c.l.bf16 %v2145_v6  ;;  %v2157_v44 = vunpack.c.l.bf16 %v2156_v45  ;;  %v2160_v0 = vunpack.c.h.bf16 %v2156_v45 }
 0x125   :  { %v896_v54 = vadd.f32 %v1485_v50, %v799_v39  ;;  %v855_v55 = vpop.f32.mrf.mxu0  ;;  %v818_v47 = vadd.f32 %v1442_v3, %v1378_v13  ;;  %v2159_v50 = vunpack.c.h.bf16 %v2153_v36 }
 0x126   :  { %v856_v2 = vadd.f32 %v855_v55, %v1869_v25  ;;  %v887_v56 = vpop.f32.mrf.mxu1  ;;  %v1003_v19 = vadd.f32 %v2146_v9, %v864_v49  ;;  %v1436_v25 = vadd.f32 %v2150_v26, %v2149_v24 }
 0x127   :  { %v888_v5 = vadd.f32 %v887_v56, %v791_v57  ;;  %v1478_v18 = vpop.f32.mrf.mxu0  ;;  %v1011_v33 = vadd.f32 %v2152_v32, %v896_v54 }
 0x128   :  { %v867_v22 = vadd.f32 %v1478_v18, %v770_v11  ;;  %v1486_v40 = vpop.f32.mrf.mxu1  ;;  %v1001_v38 = vadd.f32 %v2154_v37, %v856_v2  ;;  %v1019_v48 = vmax.f32 %v1003_v19, 0.0 }
 0x129   :  { %v899_v15 = vadd.f32 %v1486_v40, %v802_v4  ;;  %v858_v34 = vpop.f32.mrf.mxu0  ;;  %v1009_v46 = vadd.f32 %v2157_v44, %v888_v5  ;;  %v1027_v2 = vmax.f32 %v1011_v33, 0.0 }
 0x12a   :  { %v1004_v11 = vadd.f32 %v2155_v59, %v867_v22  ;;  %v859_v60 = vadd.f32 %v858_v34, %v762_v7  ;;  %v890_v62 = vpop.f32.mrf.mxu1  ;;  %v1017_v18 = vmax.f32 %v1001_v38, 0.0  ;;  %v810_v34 = vadd.f32 %v1436_v25, %v1372_v17 }
 0x12b   :  { %v1012_v52 = vadd.f32 %v2158_v51, %v899_v15  ;;  %v891_v39 = vadd.f32 %v890_v62, %v794_v42  ;;  %v1481_v41 = vpop.f32.mrf.mxu0  ;;  %v1025_v13 = vmax.f32 %v1009_v46, 0.0 }
 0x12c   :  { %v1020_v49 = vmax.f32 %v1004_v11, 0.0  ;;  %v1002_v54 = vadd.f32 %v2159_v50, %v859_v60  ;;  %v880_v55 = vadd.f32 %v1481_v41, %v783_v63  ;;  %v1489_v57 = vpop.f32.mrf.mxu1 }
 0x12d   :  { %v1028_v7 = vmax.f32 %v1012_v52, 0.0  ;;  %v1010_v1 = vadd.f32 %v2160_v0, %v891_v39  ;;  %v912_v56 = vadd.f32 %v1489_v57, %v815_v43  ;;  %v871_v5 = vpop.f32.mrf.mxu0 }
 0x12e   :  { %v1269_v4 = vpack.c.bf16 %v1020_v49, %v1019_v48  ;;  %v1018_v6 = vmax.f32 %v1002_v54, 0.0  ;;  %v872_v9 = vadd.f32 %v871_v5, %v775_v8  ;;  %v903_v22 = vpop.f32.mrf.mxu1  ;;  %v1007_v28 = vadd.f32 %v2161_v27, %v880_v55 }
 0x12f   :  { %v1289_v3 = vpack.c.bf16 %v1028_v7, %v1027_v2  ;;  %v1026_v19 = vmax.f32 %v1010_v1, 0.0  ;;  %v904_v40 = vadd.f32 %v903_v22, %v807_v23  ;;  %v1482_v42 = vpop.f32.mrf.mxu0  ;;  %v2162_v23 = vunpack.c.l.bf16 %v1994_v21 }
 0x130   :  { %1308 = vst [vmem:[%s2128_s3 + $0x8] sm:$0xff] %v1269_v4   ;;  %v1264_v63 = vpack.c.bf16 %v1018_v6, %v1017_v18  ;;  %v883_v24 = vadd.f32 %v1482_v42, %v786_v58  ;;  %v1490_v26 = vpop.f32.mrf.mxu1  ;;  %v2163_v58 = vunpack.c.l.bf16 %v1999_v16  ;;  %v1023_v59 = vmax.f32 %v1007_v28, 0.0 }
 0x131   :  { %1312 = vst [vmem:[%s2128_s3 + $0x28] sm:$0xff] %v1289_v3   ;;  %v1284_v8 = vpack.c.bf16 %v1026_v19, %v1025_v13  ;;  %v1015_v32 = vadd.f32 %v2162_v23, %v912_v56  ;;  %v915_v33 = vadd.f32 %v1490_v26, %v818_v47  ;;  %v874_v15 = vpop.f32.mrf.mxu0  ;;  %v1013_v38 = vadd.f32 %v1255_v30, %v904_v40 }
 0x132   :  { %1265 = vst [vmem:[%s2128_s3] sm:$0xff] %v1264_v63   ;;  %v1005_v36 = vadd.f32 %v2163_v58, %v872_v9  ;;  %v1008_v61 = vadd.f32 %v1244_v31, %v883_v24  ;;  %v875_v53 = vadd.f32 %v874_v15, %v778_v29  ;;  %v906_v37 = vpop.f32.mrf.mxu1 }
 0x133   :  { %1311 = vst [vmem:[%s2128_s3 + $0x20] sm:$0xff] %v1284_v8   ;;  %v1016_v17 = vadd.f32 %v1260_v14, %v915_v33  ;;  %v907_v25 = vadd.f32 %v906_v37, %v810_v34  ;;  %v1031_v20 = vmax.f32 %v1015_v32, 0.0  ;;  %v1029_v46 = vmax.f32 %v1013_v38, 0.0 }
 0x134   :  { %v1024_v11 = vmax.f32 %v1008_v61, 0.0  ;;  %v1006_v60 = vadd.f32 %v1240_v10, %v875_v53  ;;  %v1021_v43 = vmax.f32 %v1005_v36, 0.0 }
 0x135   :  { %v1032_v31 = vmax.f32 %v1016_v17, 0.0  ;;  %v1014_v62 = vadd.f32 %v1256_v35, %v907_v25 }
 0x136   :  { %v1279_v45 = vpack.c.bf16 %v1024_v11, %v1023_v59  ;;  %v1022_v44 = vmax.f32 %v1006_v60, 0.0 }
 0x137   :  { %v1299_v51 = vpack.c.bf16 %v1032_v31, %v1031_v20  ;;  %v1030_v30 = vmax.f32 %v1014_v62, 0.0 }
 0x138   :  { %1310 = vst [vmem:[%s2128_s3 + $0x18] sm:$0xff] %v1279_v45   ;;  %v1274_v14 = vpack.c.bf16 %v1022_v44, %v1021_v43 }
 0x139   :  { %1314 = vst [vmem:[%s2128_s3 + $0x38] sm:$0xff] %v1299_v51   ;;  %v1294_v10 = vpack.c.bf16 %v1030_v30, %v1029_v46 }
 0x13a   :  { %1309 = vst [vmem:[%s2128_s3 + $0x10] sm:$0xff] %v1274_v14  }
 0x13b   :  { %1313 = vst [vmem:[%s2128_s3 + $0x30] sm:$0xff] %v1294_v10  }

// kernel: resnet_forward.17
= control target key start
LH: loop header
LB: loop body
LE: loop exit
PB: predicated region body
PF: predicated region fallthrough
CT: control target
= control target key end

     0   :  { %s978_s1 = inlined_call_operand.vmem [shape: bf16[640,128], index: 1, kind: input, shape index: {}]   ;;  %s979_s0 = inlined_call_operand.vmem [shape: bf16[32,640], index: 0, kind: input, shape index: {}]   ;;  %s980_s2 = inlined_call_operand.vmem [shape: bf16[32,128], index: 2, kind: output, shape index: {}]  }
   0x1   :  { %v753_v0 = vld [vmem:[%s978_s1 + $0x78] sm:$0xff]   ;;  %v757_v4 = vld [vmem:[%s978_s1 + $0x70] sm:$0xff]   ;;  %v761_v8 = vld [vmem:[%s978_s1 + $0x68] sm:$0xff]  }
   0x2   :  { %v754_v1 = vld [vmem:[%s978_s1 + $0xf8] sm:$0xff]   ;;  %667 = vmatprep.subr.bf16.mxu0 %v753_v0  ;;  %v758_v5 = vld [vmem:[%s978_s1 + $0xf0] sm:$0xff]   ;;  %v762_v9 = vld [vmem:[%s978_s1 + $0xe8] sm:$0xff]  }
   0x3   :  { %v755_v2 = vld [vmem:[%s978_s1 + $0x38] sm:$0xff]   ;;  %695 = vmatprep.subr.bf16.mxu1 %v754_v1  ;;  %v759_v6 = vld [vmem:[%s978_s1 + $0x30] sm:$0xff]   ;;  %v763_v10 = vld [vmem:[%s978_s1 + $0x28] sm:$0xff]  }
   0x4   :  { %v756_v3 = vld [vmem:[%s978_s1 + $0xb8] sm:$0xff]   ;;  %668 = vmatpush3.bf16.msra.mxu0 %v755_v2  ;;  %v760_v7 = vld [vmem:[%s978_s1 + $0xb0] sm:$0xff]   ;;  %v764_v11 = vld [vmem:[%s978_s1 + $0xa8] sm:$0xff]  }
   0x5   :  { %696 = vmatpush3.bf16.msra.mxu1 %v756_v3  ;;  %669 = vmatprep.subr.bf16.mxu0 %v757_v4  ;;  %v765_v12 = vld [vmem:[%s978_s1 + $0x60] sm:$0xff]   ;;  %v769_v16 = vld [vmem:[%s978_s1 + $0x58] sm:$0xff]   ;;  %v773_v20 = vld [vmem:[%s978_s1 + $0x50] sm:$0xff]  }
   0x6   :  { %697 = vmatprep.subr.bf16.mxu1 %v758_v5  ;;  %v766_v13 = vld [vmem:[%s978_s1 + $0xe0] sm:$0xff]   ;;  %v770_v17 = vld [vmem:[%s978_s1 + $0xd8] sm:$0xff]   ;;  %v774_v21 = vld [vmem:[%s978_s1 + $0xd0] sm:$0xff]  }
   0x7   :  { %v767_v14 = vld [vmem:[%s978_s1 + $0x20] sm:$0xff]   ;;  %v771_v18 = vld [vmem:[%s978_s1 + $0x18] sm:$0xff]   ;;  %v775_v22 = vld [vmem:[%s978_s1 + $0x10] sm:$0xff]  }
   0x8   :  { %670 = vmatpush3.bf16.msra.mxu0 %v759_v6  ;;  %v768_v15 = vld [vmem:[%s978_s1 + $0xa0] sm:$0xff]   ;;  %v772_v19 = vld [vmem:[%s978_s1 + $0x98] sm:$0xff]   ;;  %v776_v23 = vld [vmem:[%s978_s1 + $0x90] sm:$0xff]  }
   0x9   :  { %698 = vmatpush3.bf16.msra.mxu1 %v760_v7  ;;  %671 = vmatprep.subr.bf16.mxu0 %v761_v8  ;;  %v777_v24 = vld [vmem:[%s978_s1 + $0x48] sm:$0xff]   ;;  %v781_v28 = vld [vmem:[%s978_s1 + $0x40] sm:$0xff]   ;;  %v791_v36 = vld [vmem:[%s978_s1 + $0x138] sm:$0xff]  }
   0xa   :  { %699 = vmatprep.subr.bf16.mxu1 %v762_v9  ;;  %v778_v25 = vld [vmem:[%s978_s1 + $0xc8] sm:$0xff]   ;;  %v782_v29 = vld [vmem:[%s978_s1 + $0xc0] sm:$0xff]   ;;  %v792_v37 = vld [vmem:[%s978_s1 + $0x130] sm:$0xff]  }
   0xb   :  { %v779_v26 = vld [vmem:[%s978_s1 + $0x8] sm:$0xff]   ;;  %v783_v30 = vld [vmem:[%s978_s1] sm:$0xff]   ;;  %v795_v45 = vld [vmem:[%s978_s1 + $0x118] sm:$0xff]  }
   0xc   :  { %672 = vmatpush3.bf16.msra.mxu0 %v763_v10  ;;  %v780_v27 = vld [vmem:[%s978_s1 + $0x88] sm:$0xff]   ;;  %v784_v31 = vld [vmem:[%s978_s1 + $0x80] sm:$0xff]   ;;  %v802_v46 = vld [vmem:[%s978_s1 + $0x110] sm:$0xff]  }
   0xd   :  { %700 = vmatpush3.bf16.msra.mxu1 %v764_v11  ;;  %673 = vmatprep.subr.bf16.mxu0 %v765_v12  ;;  %v785_v32 = vld [vmem:[%s979_s0] ss:$20 sps:$4 sm:$0xff]   ;;  %v787_v33 = vld [vmem:[%s979_s0 + $0x4] ss:$20 sps:$4 sm:$0xff]   ;;  %v788_v34 = vld [vmem:[%s979_s0 + $0x8] ss:$20 sps:$4 sm:$0xff]  }
   0xe   :  { %701 = vmatprep.subr.bf16.mxu1 %v766_v13  ;;  %v790_v35 = vld [vmem:[%s979_s0 + $0xc] ss:$20 sps:$4 sm:$0xff]   ;;  %440 = vmatprep.mubr.bf16.mxu0 %v787_v33  ;;  %v798_v40 = vld [vmem:[%s979_s0 + $0x34] ss:$20 sps:$4 sm:$0xff]   ;;  %v801_v42 = vld [vmem:[%s979_s0 + $0x30] ss:$20 sps:$4 sm:$0xff]  }
   0xf   :  { %489 = vmatprep.mubr.bf16.mxu1 %v790_v35  ;;  %v793_v38 = vld [vmem:[%s978_s1 + $0x128] sm:$0xff]   ;;  %v794_v43 = vld [vmem:[%s978_s1 + $0x120] sm:$0xff]  }
  0x10   :  { %674 = vmatpush3.bf16.msra.mxu0 %v767_v14  ;;  %v796_v39 = vld [vmem:[%s979_s0 + $0x2c] ss:$20 sps:$4 sm:$0xff]   ;;  %v800_v41 = vld [vmem:[%s979_s0 + $0x28] ss:$20 sps:$4 sm:$0xff]   ;;  %v805_v44 = vld [vmem:[%s979_s0 + $0x10] ss:$20 sps:$4 sm:$0xff]  }
  0x11   :  { %702 = vmatpush3.bf16.msra.mxu1 %v768_v15  ;;  %675 = vmatprep.subr.bf16.mxu0 %v769_v16  ;;  %v803_v47 = vld [vmem:[%s978_s1 + $0x108] sm:$0xff]   ;;  %v804_v48 = vld [vmem:[%s978_s1 + $0x100] sm:$0xff]  }
  0x12   :  { %703 = vmatprep.subr.bf16.mxu1 %v770_v17  ;;  %v806_v49 = vld [vmem:[%s979_s0 + $0x38] ss:$20 sps:$4 sm:$0xff]  }
  0x14   :  { %676 = vmatpush3.bf16.msra.mxu0 %v771_v18 }
  0x15   :  { %704 = vmatpush3.bf16.msra.mxu1 %v772_v19  ;;  %677 = vmatprep.subr.bf16.mxu0 %v773_v20 }
  0x16   :  { %705 = vmatprep.subr.bf16.mxu1 %v774_v21 }
  0x18   :  { %678 = vmatpush3.bf16.msra.mxu0 %v775_v22 }
  0x19   :  { %706 = vmatpush3.bf16.msra.mxu1 %v776_v23  ;;  %679 = vmatprep.subr.bf16.mxu0 %v777_v24 }
  0x1a   :  { %707 = vmatprep.subr.bf16.mxu1 %v778_v25 }
  0x1c   :  { %680 = vmatpush3.bf16.msra.mxu0 %v779_v26 }
  0x1d   :  { %708 = vmatpush3.bf16.msra.mxu1 %v780_v27  ;;  %681 = vmatprep.subr.bf16.mxu0 %v781_v28 }
  0x1e   :  { %709 = vmatprep.subr.bf16.mxu1 %v782_v29 }
  0x20   :  { %682 = vmatpush3.bf16.msra.mxu0 %v783_v30 }
  0x21   :  { %710 = vmatpush3.bf16.msra.mxu1 %v784_v31  ;;  %733 = vmatprep.subr.bf16.mxu0 %v791_v36 }
  0x23   :  { %441 = vmatmul.mubr.bf16.vlgmr.msra.gmra.mxu0 %v785_v32 }
  0x24   :  { %490 = vmatmul.mubr.bf16.vlgmr.msra.gmra.mxu1 %v788_v34  ;;  %734 = vmatpush3.bf16.msra.mxu0 %v791_v36 }
  0x25   :  { %735 = vmatprep.subr.bf16.mxu0 %v792_v37  ;;  %448 = vmatprep.mubr.bf16.mxu0 %v796_v39 }
  0x26   :  { %497 = vmatprep.mubr.bf16.mxu1 %v798_v40 }
  0x28   :  { %736 = vmatpush3.bf16.msra.mxu0 %v792_v37 }
  0x29   :  { %737 = vmatprep.subr.bf16.mxu0 %v793_v38 }
  0x2b   :  { %449 = vmatmul.mubr.bf16.gmra.mxu0 %v800_v41 }
  0x2c   :  { %498 = vmatmul.mubr.bf16.gmra.mxu1 %v801_v42  ;;  %738 = vmatpush3.bf16.msra.mxu0 %v793_v38 }
  0x2d   :  { %739 = vmatprep.subr.bf16.mxu0 %v794_v43  ;;  %749 = vmatprep.mubr.bf16.mxu0 %v805_v44 }
  0x30   :  { %740 = vmatpush3.bf16.msra.mxu0 %v794_v43 }
  0x31   :  { %741 = vmatprep.subr.bf16.mxu0 %v795_v45 }
  0x34   :  { %742 = vmatpush3.bf16.msra.mxu0 %v795_v45 }
  0x35   :  { %743 = vmatprep.subr.bf16.mxu0 %v802_v46 }
  0x38   :  { %744 = vmatpush3.bf16.msra.mxu0 %v802_v46 }
  0x39   :  { %745 = vmatprep.subr.bf16.mxu0 %v803_v47 }
  0x3c   :  { %746 = vmatpush3.bf16.msra.mxu0 %v803_v47 }
  0x3d   :  { %747 = vmatprep.subr.bf16.mxu0 %v804_v48 }
  0x40   :  { %748 = vmatpush3.bf16.msra.mxu0 %v804_v48 }
  0x43   :  { %750 = vmatmul.mubr.bf16.vlgmr.msra.gmra.mxu0 %v806_v49 }
  0xe3   :  { %v683_v50 = vpop.f32.mrf.mxu0 }
  0xe4   :  { %v711_v51 = vpop.f32.mrf.mxu1 }
  0xe5   :  { %v684_v52 = vpop.f32.mrf.mxu0 }
  0xe6   :  { %v712_v53 = vpop.f32.mrf.mxu1  ;;  %v685_v4 = vadd.f32 %v684_v52, %v683_v50 }
  0xe7   :  { %v686_v54 = vpop.f32.mrf.mxu0  ;;  %v713_v5 = vadd.f32 %v712_v53, %v711_v51 }
  0xe8   :  { %v714_v55 = vpop.f32.mrf.mxu1 }
  0xe9   :  { %v687_v56 = vpop.f32.mrf.mxu0  ;;  %v492_v14 = vadd.f32 %v713_v5, %v685_v4 }
  0xea   :  { %v715_v57 = vpop.f32.mrf.mxu1  ;;  %v688_v9 = vadd.f32 %v687_v56, %v686_v54 }
  0xeb   :  { %v689_v58 = vpop.f32.mrf.mxu0  ;;  %v716_v10 = vadd.f32 %v715_v57, %v714_v55 }
  0xec   :  { %v717_v59 = vpop.f32.mrf.mxu1 }
  0xed   :  { %v690_v60 = vpop.f32.mrf.mxu0  ;;  %v495_v19 = vadd.f32 %v716_v10, %v688_v9 }
  0xee   :  { %v718_v61 = vpop.f32.mrf.mxu1  ;;  %v691_v2 = vadd.f32 %v690_v60, %v689_v58 }
  0xef   :  { %v692_v62 = vpop.f32.mrf.mxu0  ;;  %v719_v3 = vadd.f32 %v718_v61, %v717_v59 }
  0xf0   :  { %v720_v63 = vpop.f32.mrf.mxu1 }
  0xf1   :  { %v693_v0 = vpop.f32.mrf.mxu0  ;;  %v500_v11 = vadd.f32 %v719_v3, %v691_v2 }
  0xf2   :  { %v721_v1 = vpop.f32.mrf.mxu1  ;;  %v694_v6 = vadd.f32 %v693_v0, %v692_v62 }
  0xf3   :  { %v722_v7 = vadd.f32 %v721_v1, %v720_v63 }
  0xf5   :  { %v503_v15 = vadd.f32 %v722_v7, %v694_v6 }
 0x103   :  { %v751_v8 = vpop.f32.mrf.mxu0 }
 0x104   :  { %v549_v13 = vadd.f32 %v751_v8, %v500_v11 }
 0x105   :  { %v540_v12 = vpop.f32.mrf.mxu0 }
 0x106   :  { %v541_v17 = vadd.f32 %v540_v12, %v492_v14  ;;  %v572_v21 = vmax.f32 %v549_v13, 0.0 }
 0x107   :  { %v752_v16 = vpop.f32.mrf.mxu0 }
 0x108   :  { %v552_v18 = vadd.f32 %v752_v16, %v503_v15  ;;  %v570_v24 = vmax.f32 %v541_v17, 0.0 }
 0x109   :  { %v543_v20 = vpop.f32.mrf.mxu0 }
 0x10a   :  { %v573_v22 = vmax.f32 %v552_v18, 0.0  ;;  %v544_v23 = vadd.f32 %v543_v20, %v495_v19 }
 0x10c   :  { %v664_v25 = vpack.c.bf16 %v573_v22, %v572_v21  ;;  %v571_v26 = vmax.f32 %v544_v23, 0.0 }
 0x10e   :  { %666 = vst [vmem:[%s980_s2 + $0x8] sm:$0xff] %v664_v25   ;;  %v659_v27 = vpack.c.bf16 %v571_v26, %v570_v24 }
 0x110   :  { %660 = vst [vmem:[%s980_s2] sm:$0xff] %v659_v27  }

// kernel: resnet_forward.16
= control target key start
LH: loop header
LB: loop body
LE: loop exit
PB: predicated region body
PF: predicated region fallthrough
CT: control target
= control target key end

     0   :  { %s312_s1 = inlined_call_operand.vmem [shape: bf16[128,128], index: 1, kind: input, shape index: {}]   ;;  %s313_s0 = inlined_call_operand.vmem [shape: bf16[32,128], index: 0, kind: input, shape index: {}]   ;;  %s314_s2 = inlined_call_operand.vmem [shape: bf16[32,128], index: 2, kind: output, shape index: {}]  }
   0x1   :  { %v251_v0 = vld [vmem:[%s312_s1 + $0x38] sm:$0xff]   ;;  %v252_v1 = vld [vmem:[%s312_s1 + $0x30] sm:$0xff]   ;;  %v253_v2 = vld [vmem:[%s312_s1 + $0x28] sm:$0xff]  }
   0x2   :  { %231 = vmatprep.subr.bf16.mxu0 %v251_v0  ;;  %v254_v3 = vld [vmem:[%s312_s1 + $0x20] sm:$0xff]   ;;  %v255_v5 = vld [vmem:[%s312_s1 + $0x18] sm:$0xff]   ;;  %v256_v6 = vld [vmem:[%s312_s1 + $0x10] sm:$0xff]  }
   0x3   :  { %232 = vmatpush3.bf16.msra.mxu0 %v251_v0  ;;  %v259_v4 = vld [vmem:[%s313_s0] sm:$0xff]   ;;  %v257_v7 = vld [vmem:[%s312_s1 + $0x8] sm:$0xff]  }
   0x4   :  { %233 = vmatprep.subr.bf16.mxu0 %v252_v1  ;;  %247 = vmatprep.mubr.bf16.mxu0 %v259_v4  ;;  %v258_v8 = vld [vmem:[%s312_s1] sm:$0xff]   ;;  %v260_v9 = vld [vmem:[%s313_s0 + $0x8] sm:$0xff]  }
   0x7   :  { %234 = vmatpush3.bf16.msra.mxu0 %v252_v1 }
   0x8   :  { %235 = vmatprep.subr.bf16.mxu0 %v253_v2 }
   0xb   :  { %236 = vmatpush3.bf16.msra.mxu0 %v253_v2 }
   0xc   :  { %237 = vmatprep.subr.bf16.mxu0 %v254_v3 }
   0xf   :  { %238 = vmatpush3.bf16.msra.mxu0 %v254_v3 }
  0x10   :  { %239 = vmatprep.subr.bf16.mxu0 %v255_v5 }
  0x13   :  { %240 = vmatpush3.bf16.msra.mxu0 %v255_v5 }
  0x14   :  { %241 = vmatprep.subr.bf16.mxu0 %v256_v6 }
  0x17   :  { %242 = vmatpush3.bf16.msra.mxu0 %v256_v6 }
  0x18   :  { %243 = vmatprep.subr.bf16.mxu0 %v257_v7 }
  0x1b   :  { %244 = vmatpush3.bf16.msra.mxu0 %v257_v7 }
  0x1c   :  { %245 = vmatprep.subr.bf16.mxu0 %v258_v8 }
  0x1f   :  { %246 = vmatpush3.bf16.msra.mxu0 %v258_v8 }
  0x22   :  { %248 = vmatmul.mubr.bf16.vlgmr.msra.gmra.mxu0 %v260_v9 }
  0xe2   :  { %v249_v10 = vpop.f32.mrf.mxu0 }
  0xe4   :  { %v138_v11 = vpop.f32.mrf.mxu0 }
  0xe6   :  { %v250_v12 = vpop.f32.mrf.mxu0 }
  0xe7   :  { %v218_v13 = vpack.c.bf16 %v250_v12, %v249_v10 }
  0xe8   :  { %v141_v14 = vpop.f32.mrf.mxu0 }
  0xe9   :  { %220 = vst [vmem:[%s314_s2 + $0x8] sm:$0xff] %v218_v13   ;;  %v213_v15 = vpack.c.bf16 %v141_v14, %v138_v11 }
  0xeb   :  { %214 = vst [vmem:[%s314_s2] sm:$0xff] %v213_v15  }

// kernel: resnet_forward.18
= control target key start
LH: loop header
LB: loop body
LE: loop exit
PB: predicated region body
PF: predicated region fallthrough
CT: control target
= control target key end

     0   :  { %s1106_s12 = smov 0   ;;  %s1108_s13 = smov 0   ;;  %s1219_s0 = inlined_call_operand.vmem [shape: bf16[32,1152], index: 0, kind: input, shape index: {}]   ;;  %s1220_s1 = inlined_call_operand.vmem [shape: bf16[1152,128], index: 1, kind: input, shape index: {}]   ;;  %s1221_s2 = inlined_call_operand.vmem [shape: bf16[32,128], index: 2, kind: input, shape index: {}]   ;;  %s1222_s3 = inlined_call_operand.vmem [shape: bf16[32,128], index: 3, kind: output, shape index: {}]  }
   0x1   :  { %s1110_s14 = smov 0   ;;  %s1112_s15 = smov 0  }
   0x2   :  { %s1114_s16 = smov 0  }
   0x3 LB: > { %s25_s17 = sadd.s32 1, %s1079_s15  ;;  %p48_p1 = scmp.ne.s32.totalorder %s1071_s13, %s1067_s12  ;;  %s1083_s16 = sphi %s1114_s16, %s13_s16   ;;  %s1079_s15 = sphi %s1112_s15, %s1226_s15   ;;  %s1075_s14 = sphi %s1110_s14, %s1225_s14   ;;  %s1071_s13 = sphi %s1108_s13, %s1224_s13   ;;  %s1067_s12 = sphi %s1106_s12, %s1223_s12  }
   0x4   : > { %p26_p0 = scmp.ge.s32.totalorder %s25_s17, 3  ;;  %p49_p2 = scmp.eq.s32.totalorder %s1083_s16, 0 }
   0x5   : > { %s41_s19 = sadd.s32 1, %s1071_s13  ;;  %p835_p5 = scmp.ge.s32.totalorder %s1083_s16, 3 }
   0x6   : > { %s1228_s17 = smov (%p26_p0, %s25_s17), 0  ;;  %p50_p3 = por %p49_p2, %p48_p1 }
   0x7   : > { %s37_s18 = ssub.s32 %s1079_s15, %s1228_s17  ;;  %170 = sbr.rel (%p835_p5) target bundleno = 21 (0x15), region = 20 }
   0x8   : > { %p39_p4 = scmp.eq.s32.totalorder %s37_s18, 0 }
   0xa   : > { %s1141_s20 = scalar_select %p39_p4, %s1071_s13, %s41_s19  }
   0xc   : > { %173 = sbr.rel (!%p50_p3) target bundleno = 21 (0x15), region = 24  ;;  %s175_s21 = sand.u32 (%p50_p3), 1, %s1071_s13  }
   0xd   : > { %s887_s22 = smul.u32 (%p50_p3), 12, %s1079_s15 }
   0xe   : > { %s970_s23 = smul.u32 (%p50_p3), 48, %s175_s21 }
   0xf   : > { %s183_s26 = scalar_lea.vmem (%p50_p3), %s1219_s0, %s887_s22 }
  0x10   : > { %v198_v0 = vld [vmem:[%s183_s26] sm:$0xff] (%p50_p3)  ;;  %v202_v2 = vld [vmem:[%s183_s26 + $0x48] sm:$0xff] (%p50_p3)  ;;  %s177_s27 = scalar_lea.vmem (%p50_p3), [#allocation3], %s970_s23  ;;  %v841_v6 = vld [vmem:[%s183_s26 + $0x50] sm:$0xf] (%p50_p3) }
  0x11   : > { %v200_v1 = vld [vmem:[%s183_s26 + $0x24] sm:$0xff]  ;;  %199 = vst [vmem:[%s177_s27] sm:$0xff] %v198_v0  ;;  %203 = vst [vmem:[%s177_s27 + $0x18] sm:$0xff] %v202_v2  ;;  %v204_v3 = vld [vmem:[%s183_s26 + $0x6c] sm:$0xff] }
  0x12   : > { %201 = vst [vmem:[%s177_s27 + $0xc] sm:$0xff] %v200_v1  ;;  %v837_v4 = vld [vmem:[%s183_s26 + $0x8] sm:$0xf]  ;;  %v839_v5 = vld [vmem:[%s183_s26 + $0x2c] sm:$0xf]  ;;  %205 = vst [vmem:[%s177_s27 + $0x24] sm:$0xff] %v204_v3 }
  0x13   : > { %838 = vst [vmem:[%s177_s27 + $0x8] sm:$0xf] %v837_v4  ;;  %840 = vst [vmem:[%s177_s27 + $0x14] sm:$0xf] %v839_v5  ;;  %v843_v7 = vld [vmem:[%s183_s26 + $0x74] sm:$0xf] }
  0x14   : > { %842 = vst [vmem:[%s177_s27 + $0x20] sm:$0xf] %v841_v6  ;;  %844 = vst [vmem:[%s177_s27 + $0x2c] sm:$0xf] %v843_v7 }
  0x15 PF: > { %p845_p6 = scmp.ge.s32.totalorder %s1083_s16, 1  ;;  %p238_p7 = scmp.lt.s32.totalorder %s1083_s16, 4 }
  0x17   : > { %p239_p8 = pnand %p845_p6, %p238_p7 }
  0x18   : > { %s245_s28 = sand.u32 (!%p239_p8), 1, %s1067_s12   ;;  %s289_s29 = smul.u32 (!%p239_p8), 48, %s1075_s14 }
  0x19   : > { %242 = sbr.rel (%p239_p8) target bundleno = 299 (0x12b), region = 54  ;;  %p847_p10 = scmp.ne.s32.totalorder (!%p239_p8), %s1075_s14, 0 }
  0x1a   : > { %s971_s30 = smul.u32 (!%p239_p8), 48, %s245_s28  ;;  %p290_p9 = scmp.lt.s32.totalorder (!%p239_p8), %s289_s29, 143 }
  0x1c   : > { %s1158_s8 = scalar_lea.vmem (!%p239_p8), [#allocation3], %s971_s30 }
  0x1e   : > { %s1230_s29 = smov (!%p290_p9, %s289_s29), 143  ;;  %320 = sbr.rel (%p847_p10) target bundleno = 38 (0x26), region = 62 }
  0x1f   : > { %s846_s4 = sshll.u32 %s1230_s29, 2 }
  0x20   : > { %s1156_s7 = scalar_lea.vmem %s1220_s1, %s846_s4 }
  0x23   : > { %v1085_v8 = vmov 0.0  }
  0x24   : > { %321 = vst [vmem:[#allocation2 + $0x10] sm:$0xff] %v1085_v8  ;;  %322 = vst [vmem:[#allocation2] sm:$0xff] %v1085_v8 }
  0x25   : > { %323 = vst [vmem:[#allocation2 + $0x18] sm:$0xff] %v1085_v8  ;;  %324 = vst [vmem:[#allocation2 + $0x8] sm:$0xff] %v1085_v8 }
  0x26 PF: > { %v1013_v9 = vld [vmem:[%s1156_s7 + $0x78] sm:$0xff]   ;;  %v1016_v12 = vld [vmem:[%s1156_s7 + $0x70] sm:$0xff]   ;;  %v1019_v15 = vld [vmem:[%s1156_s7 + $0x68] sm:$0xff]   ;;  %p878_p11 = scmp.ne.s32.totalorder %s1075_s14, 2 }
  0x27   : > { %v1014_v10 = vld [vmem:[%s1156_s7 + $0x38] sm:$0xff]   ;;  %912 = vmatprep.subr.bf16.mxu0 %v1013_v9  ;;  %v1017_v13 = vld [vmem:[%s1156_s7 + $0x30] sm:$0xff]   ;;  %v1020_v16 = vld [vmem:[%s1156_s7 + $0x28] sm:$0xff]  }
  0x28   : > { %v1015_v11 = vld [vmem:[%s1156_s7 + $0xb8] sm:$0xff]   ;;  %913 = vmatpush3.bf16.msra.mxu0 %v1014_v10  ;;  %v1018_v14 = vld [vmem:[%s1156_s7 + $0xb0] sm:$0xff]   ;;  %v1021_v17 = vld [vmem:[%s1156_s7 + $0xa8] sm:$0xff]  }
  0x29   : > { %950 = vmatprep.subr.bf16.mxu1 %v1015_v11  ;;  %914 = vmatprep.subr.bf16.mxu0 %v1016_v12  ;;  %v1022_v18 = vld [vmem:[%s1156_s7 + $0x60] sm:$0xff]   ;;  %v1025_v21 = vld [vmem:[%s1156_s7 + $0x58] sm:$0xff]   ;;  %v1028_v24 = vld [vmem:[%s1156_s7 + $0x50] sm:$0xff]  }
  0x2a   : > { %951 = vmatpush3.bf16.msra.mxu1 %v1015_v11  ;;  %v1023_v19 = vld [vmem:[%s1156_s7 + $0x20] sm:$0xff]   ;;  %v1027_v22 = vld [vmem:[%s1156_s7 + $0x98] sm:$0xff]   ;;  %v1030_v25 = vld [vmem:[%s1156_s7 + $0x90] sm:$0xff]  }
  0x2b   : > { %952 = vmatprep.subr.bf16.mxu1 %v1018_v14  ;;  %v1024_v20 = vld [vmem:[%s1156_s7 + $0xa0] sm:$0xff]   ;;  %v1026_v23 = vld [vmem:[%s1156_s7 + $0x18] sm:$0xff]   ;;  %v1029_v26 = vld [vmem:[%s1156_s7 + $0x10] sm:$0xff]  }
  0x2c   : > { %915 = vmatpush3.bf16.msra.mxu0 %v1017_v13  ;;  %v1031_v27 = vld [vmem:[%s1156_s7 + $0x48] sm:$0xff]   ;;  %v1034_v30 = vld [vmem:[%s1156_s7 + $0x40] sm:$0xff]   ;;  %v325_v44 = vld [vmem:[#allocation2 + $0x10] sm:$0xff] }
  0x2d   : > { %916 = vmatprep.subr.bf16.mxu0 %v1019_v15  ;;  %v1032_v28 = vld [vmem:[%s1156_s7 + $0x8] sm:$0xff]   ;;  %v1036_v31 = vld [vmem:[%s1156_s7 + $0x80] sm:$0xff]   ;;  %v327_v58 = vld [vmem:[#allocation2 + $0x18] sm:$0xff] }
  0x2e   : > { %953 = vmatpush3.bf16.msra.mxu1 %v1018_v14  ;;  %v1033_v29 = vld [vmem:[%s1156_s7 + $0x88] sm:$0xff]   ;;  %v1039_v32 = vld [vmem:[%s1158_s8 + $0x4] ss:$12 sps:$4 sm:$0xff]  }
  0x2f   : > { %954 = vmatprep.subr.bf16.mxu1 %v1021_v17  ;;  %v1040_v33 = vld [vmem:[%s1158_s8 + $0x8] ss:$12 sps:$4 sm:$0xff]   ;;  %593 = vmatprep.mubr.bf16.mxu0 %v1039_v32  ;;  %v1037_v35 = vld [vmem:[%s1158_s8] ss:$12 sps:$4 sm:$0xff]   ;;  %v1044_v38 = vld [vmem:[%s1158_s8 + $0x18] ss:$12 sps:$4 sm:$0xff]  }
  0x30   : > { %917 = vmatpush3.bf16.msra.mxu0 %v1020_v16  ;;  %v1035_v34 = vld [vmem:[%s1156_s7] sm:$0xff]   ;;  %966 = vmatprep.mubr.bf16.mxu1 %v1040_v33  ;;  %v1042_v36 = vld [vmem:[%s1158_s8 + $0x1c] ss:$12 sps:$4 sm:$0xff]  }
  0x31   : > { %918 = vmatprep.subr.bf16.mxu0 %v1022_v18  ;;  %v1041_v37 = vld [vmem:[%s1158_s8 + $0x20] ss:$12 sps:$4 sm:$0xff]  }
  0x32   : > { %955 = vmatpush3.bf16.msra.mxu1 %v1021_v17  ;;  %v326_v52 = vld [vmem:[#allocation2] sm:$0xff]  ;;  %v328_v0 = vld [vmem:[#allocation2 + $0x8] sm:$0xff] }
  0x33   : > { %956 = vmatprep.subr.bf16.mxu1 %v1024_v20 }
  0x34   : > { %919 = vmatpush3.bf16.msra.mxu0 %v1023_v19 }
  0x35   : > { %920 = vmatprep.subr.bf16.mxu0 %v1025_v21 }
  0x36   : > { %957 = vmatpush3.bf16.msra.mxu1 %v1024_v20 }
  0x37   : > { %958 = vmatprep.subr.bf16.mxu1 %v1027_v22 }
  0x38   : > { %921 = vmatpush3.bf16.msra.mxu0 %v1026_v23 }
  0x39   : > { %922 = vmatprep.subr.bf16.mxu0 %v1028_v24 }
  0x3a   : > { %959 = vmatpush3.bf16.msra.mxu1 %v1027_v22 }
  0x3b   : > { %960 = vmatprep.subr.bf16.mxu1 %v1030_v25 }
  0x3c   : > { %923 = vmatpush3.bf16.msra.mxu0 %v1029_v26 }
  0x3d   : > { %924 = vmatprep.subr.bf16.mxu0 %v1031_v27 }
  0x3e   : > { %961 = vmatpush3.bf16.msra.mxu1 %v1030_v25 }
  0x3f   : > { %962 = vmatprep.subr.bf16.mxu1 %v1033_v29 }
  0x40   : > { %925 = vmatpush3.bf16.msra.mxu0 %v1032_v28 }
  0x41   : > { %926 = vmatprep.subr.bf16.mxu0 %v1034_v30 }
  0x42   : > { %963 = vmatpush3.bf16.msra.mxu1 %v1033_v29 }
  0x43   : > { %964 = vmatprep.subr.bf16.mxu1 %v1036_v31 }
  0x44   : > { %927 = vmatpush3.bf16.msra.mxu0 %v1035_v34 }
  0x46   : > { %965 = vmatpush3.bf16.msra.mxu1 %v1036_v31 }
  0x47   : > { %594 = vmatmul.mubr.bf16.vlgmr.msra.gmra.mxu0 %v1037_v35 }
  0x48   : > { %601 = vmatprep.mubr.bf16.mxu0 %v1042_v36 }
  0x49   : > { %967 = vmatmul.mubr.bf16.vlgmr.msra.gmra.mxu1 %v1041_v37 }
  0x4f   : > { %602 = vmatmul.mubr.bf16.gmra.mxu0 %v1044_v38 }
 0x107   : > { %v928_v39 = vpop.f32.mrf.mxu0 }
 0x109   : > { %v929_v40 = vpop.f32.mrf.mxu0  ;;  %v968_v41 = vpop.f32.mrf.mxu1 }
 0x10a   : > { %v930_v42 = vadd.f32 %v929_v40, %v928_v39 }
 0x10b   : > { %v931_v43 = vpop.f32.mrf.mxu0  ;;  %v644_v45 = vpop.f32.mrf.mxu1 }
 0x10c   : > { %v645_v46 = vadd.f32 %v930_v42, %v644_v45 }
 0x10d   : > { %v932_v47 = vpop.f32.mrf.mxu0  ;;  %v969_v48 = vpop.f32.mrf.mxu1 }
 0x10e   : > { %v659_v49 = vadd.f32 %v645_v46, %v325_v44  ;;  %v933_v50 = vadd.f32 %v932_v47, %v931_v43 }
 0x10f   : > { %v934_v51 = vpop.f32.mrf.mxu0  ;;  %v647_v53 = vpop.f32.mrf.mxu1 }
 0x110   : > { %663 = vst [vmem:[#allocation2 + $0x10] sm:$0xff] %v659_v49  ;;  %v648_v54 = vadd.f32 %v933_v50, %v647_v53 }
 0x111   : > { %v935_v55 = vpop.f32.mrf.mxu0 }
 0x112   : > { %v660_v56 = vadd.f32 %v648_v54, %v326_v52  ;;  %v936_v57 = vadd.f32 %v935_v55, %v934_v51 }
 0x113   : > { %v937_v59 = vpop.f32.mrf.mxu0 }
 0x114   : > { %664 = vst [vmem:[#allocation2] sm:$0xff] %v660_v56  ;;  %v653_v60 = vadd.f32 %v968_v41, %v936_v57 }
 0x115   : > { %v938_v61 = vpop.f32.mrf.mxu0 }
 0x116   : > { %v661_v62 = vadd.f32 %v653_v60, %v327_v58  ;;  %v939_v63 = vadd.f32 %v938_v61, %v937_v59 }
 0x118   : > { %665 = vst [vmem:[#allocation2 + $0x18] sm:$0xff] %v661_v62  ;;  %v656_v1 = vadd.f32 %v969_v48, %v939_v63  ;;  %670 = sbr.rel (%p878_p11) target bundleno = 299 (0x12b), region = 66 }
 0x11a   : > { %v662_v2 = vadd.f32 %v656_v1, %v328_v0 }
 0x11c   : > { %666 = vst [vmem:[#allocation2 + $0x8] sm:$0xff] %v662_v2 }
 0x11d   : > { %v671_v3 = vld [vmem:[#allocation2 + $0x10] sm:$0xff]  ;;  %v672_v4 = vld [vmem:[#allocation2] sm:$0xff]  ;;  %v910_v10 = vld [vmem:[%s1221_s2 + $0x8] sm:$0xff]  }
 0x11e   : > { %v893_v5 = vld [vmem:[%s1221_s2] sm:$0xff]   ;;  %v898_v11 = vunpack.c.l.bf16 %v910_v10  ;;  %v899_v12 = vunpack.c.h.bf16 %v910_v10 }
 0x11f   : > { %v894_v6 = vunpack.c.l.bf16 %v893_v5  ;;  %v895_v7 = vunpack.c.h.bf16 %v893_v5  ;;  %v673_v8 = vld [vmem:[#allocation2 + $0x18] sm:$0xff] }
 0x120   : > { %v685_v15 = vadd.f32 %v898_v11, %v673_v8 }
 0x121   : > { %v683_v13 = vadd.f32 %v894_v6, %v671_v3  ;;  %v684_v14 = vadd.f32 %v895_v7, %v672_v4 }
 0x122   : > { %v689_v19 = vmax.f32 %v685_v15, 0.0 }
 0x123   : > { %v674_v9 = vld [vmem:[#allocation2 + $0x8] sm:$0xff]  ;;  %v687_v17 = vmax.f32 %v683_v13, 0.0  ;;  %v688_v18 = vmax.f32 %v684_v14, 0.0 }
 0x124   : > { %v686_v16 = vadd.f32 %v899_v12, %v674_v9 }
 0x125   : > { %v903_v21 = vpack.c.bf16 %v688_v18, %v687_v17 }
 0x126   : > { %v690_v20 = vmax.f32 %v686_v16, 0.0 }
 0x127   : > { %904 = vst [vmem:[%s1222_s3] sm:$0xff] %v903_v21  }
 0x128   : > { %v908_v22 = vpack.c.bf16 %v690_v20, %v689_v19 }
 0x12a   : > { %911 = vst [vmem:[%s1222_s3 + $0x8] sm:$0xff] %v908_v22  }
 0x12b PF: > { %s13_s16 = sadd.s32 1, %s1083_s16   ;;  %s1223_s12 = smov %s1071_s13 }
 0x12c   : > { %p10_p12 = scmp.ge.s32.totalorder %s13_s16, 5   ;;  %s1224_s13 = smov %s1141_s20 }
 0x12d   : > { %s1225_s14 = smov %s1079_s15  ;;  %s1226_s15 = smov %s1228_s17 }
 0x12e   :  { %12 = sbr.rel (!%p10_p12) target bundleno = 3 (0x3), region = 113 }

// kernel: resnet_forward.20
= control target key start
LH: loop header
LB: loop body
LE: loop exit
PB: predicated region body
PF: predicated region fallthrough
CT: control target
= control target key end

     0   :  { %s958_s9 = smov 0   ;;  %s960_s10 = smov 0   ;;  %s1054_s0 = inlined_call_operand.vmem [shape: bf16[8,1152], index: 0, kind: input, shape index: {}]   ;;  %s1055_s1 = inlined_call_operand.vmem [shape: bf16[1152,256], index: 1, kind: input, shape index: {}]   ;;  %s1056_s2 = inlined_call_operand.vmem [shape: bf16[8,256], index: 2, kind: output, shape index: {}]  }
   0x1   :  { %s962_s11 = smov 0  }
   0x2 LB: > { %s24_s12 = sadd.s32 1, %s935_s10  ;;  %p752_p0 = scmp.ge.s32.totalorder %s939_s11, 1  ;;  %s939_s11 = sphi %s962_s11, %s12_s11   ;;  %s935_s10 = sphi %s960_s10, %s1058_s10   ;;  %s931_s9 = sphi %s958_s9, %s1057_s9  }
   0x3   : > { %p25_p1 = scmp.ge.s32.totalorder %s24_s12, 3  ;;  %p159_p2 = scmp.lt.s32.totalorder %s939_s11, 4 }
   0x5   : > { %s1060_s12 = smov (%p25_p1, %s24_s12), 0  ;;  %p160_p3 = pnand %p752_p0, %p159_p2 }
   0x6   : > { %s199_s13 = smul.u32 (!%p160_p3), 3, %s931_s9  ;;  %p756_p6 = scmp.ne.s32.totalorder (!%p160_p3), %s931_s9, 0 }
   0x7   : > { %163 = sbr.rel (%p160_p3) target bundleno = 299 (0x12b), region = 28 }
   0x8   : > { %s209_s14 = smul.u32 (!%p160_p3), 48, %s931_s9  ;;  %p202_p4 = scmp.lt.s32.totalorder (!%p160_p3), %s199_s13, 8 }
   0xa   : > { %p211_p5 = scmp.lt.s32.totalorder (!%p160_p3), %s209_s14, 143 }
   0xc   : > { %s1062_s13 = smov (!%p202_p4, %s199_s13), 8  ;;  %s1064_s14 = smov (!%p211_p5, %s209_s14), 143 }
   0xd   : > { %s753_s15 = sshll.u32 %s1062_s13, 2  ;;  %s814_s19 = sshll.u32 %s1064_s14, 3 }
   0xe   : > { %s983_s18 = scalar_lea.vmem %s1054_s0, %s753_s15  ;;  %s988_s22 = scalar_lea.vmem %s1055_s1, %s814_s19 }
   0xf   : > { %235 = sbr.rel (%p756_p6) target bundleno = 22 (0x16), region = 32 }
  0x14   : > { %v941_v0 = vmov 0.0  }
  0x15   : > { %236 = vst [vmem:[#allocation2] sm:$0xff] %v941_v0  ;;  %237 = vst [vmem:[#allocation2 + $0x8] sm:$0xff] %v941_v0 }
  0x16 PF: > { %v842_v1 = vld [vmem:[%s988_s22 + $0x74] ss:$8 sps:$4 sm:$0xff]   ;;  %v844_v2 = vld [vmem:[%s988_s22 + $0x70] ss:$8 sps:$4 sm:$0xff]   ;;  %v942_v3 = vmov 0   ;;  %v240_v34 = vld [vmem:[%s983_s18] sm:$0xff] }
  0x17   : > { %614 = vmatprep.mubr.bf16.mxu1 %v942_v3  ;;  %541 = vmatprep.subr.bf16.mxu0 %v842_v1  ;;  %v845_v4 = vld [vmem:[%s988_s22 + $0x64] ss:$8 sps:$4 sm:$0xff]   ;;  %v847_v5 = vld [vmem:[%s988_s22 + $0x60] ss:$8 sps:$4 sm:$0xff]   ;;  %v848_v6 = vld [vmem:[%s988_s22 + $0x54] ss:$8 sps:$4 sm:$0xff]   ;;  %v758_v36 = vcombine.high %v240_v34, %v240_v34  ;;  %v757_v53 = vcombine.low %v240_v34, %v240_v34 }
  0x18   : > { %542 = vmatpush1.bf16.msra.mxu0 %v844_v2  ;;  %v850_v7 = vld [vmem:[%s988_s22 + $0x50] ss:$8 sps:$4 sm:$0xff]   ;;  %v851_v8 = vld [vmem:[%s988_s22 + $0x44] ss:$8 sps:$4 sm:$0xff]   ;;  %v863_v9 = vld [vmem:[%s988_s22 + $0x174] ss:$8 sps:$4 sm:$0xff]  }
  0x19   : > { %543 = vmatprep.subr.bf16.mxu0 %v845_v4  ;;  %v865_v10 = vld [vmem:[%s988_s22 + $0x170] ss:$8 sps:$4 sm:$0xff]   ;;  %v853_v11 = vld [vmem:[%s988_s22 + $0x40] ss:$8 sps:$4 sm:$0xff]   ;;  %v854_v12 = vld [vmem:[%s988_s22 + $0x34] ss:$8 sps:$4 sm:$0xff]   ;;  %582 = vmatprep.subr.bf16.mxu1 %v863_v9 }
  0x1a   : > { %v869_v13 = vld [vmem:[%s988_s22 + $0x164] ss:$8 sps:$4 sm:$0xff]   ;;  %583 = vmatpush1.bf16.msra.mxu1 %v865_v10  ;;  %v871_v14 = vld [vmem:[%s988_s22 + $0x160] ss:$8 sps:$4 sm:$0xff]   ;;  %v856_v15 = vld [vmem:[%s988_s22 + $0x30] ss:$8 sps:$4 sm:$0xff]   ;;  %573 = vmatprep.mubr.bf16.mxu0 %v758_v36 }
  0x1b   : > { %584 = vmatprep.subr.bf16.mxu1 %v869_v13  ;;  %v875_v16 = vld [vmem:[%s988_s22 + $0x154] ss:$8 sps:$4 sm:$0xff]   ;;  %v857_v17 = vld [vmem:[%s988_s22 + $0x24] ss:$8 sps:$4 sm:$0xff]   ;;  %v877_v18 = vld [vmem:[%s988_s22 + $0x150] ss:$8 sps:$4 sm:$0xff]  }
  0x1c   : > { %544 = vmatpush1.bf16.msra.mxu0 %v847_v5  ;;  %v881_v19 = vld [vmem:[%s988_s22 + $0x144] ss:$8 sps:$4 sm:$0xff]   ;;  %v859_v20 = vld [vmem:[%s988_s22 + $0x20] ss:$8 sps:$4 sm:$0xff]   ;;  %v860_v21 = vld [vmem:[%s988_s22 + $0x14] ss:$8 sps:$4 sm:$0xff]  }
  0x1d   : > { %545 = vmatprep.subr.bf16.mxu0 %v848_v6  ;;  %v883_v22 = vld [vmem:[%s988_s22 + $0x140] ss:$8 sps:$4 sm:$0xff]   ;;  %v887_v23 = vld [vmem:[%s988_s22 + $0x134] ss:$8 sps:$4 sm:$0xff]   ;;  %v862_v24 = vld [vmem:[%s988_s22 + $0x10] ss:$8 sps:$4 sm:$0xff]  }
  0x1e   : > { %585 = vmatpush1.bf16.msra.mxu1 %v871_v14  ;;  %v866_v25 = vld [vmem:[%s988_s22 + $0x4] ss:$8 sps:$4 sm:$0xff]   ;;  %v889_v26 = vld [vmem:[%s988_s22 + $0x130] ss:$8 sps:$4 sm:$0xff]   ;;  %v868_v28 = vld [vmem:[%s988_s22] ss:$8 sps:$4 sm:$0xff]  }
  0x1f   : > { %586 = vmatprep.subr.bf16.mxu1 %v875_v16  ;;  %v893_v27 = vld [vmem:[%s988_s22 + $0x124] ss:$8 sps:$4 sm:$0xff]   ;;  %v872_v29 = vld [vmem:[%s988_s22 + $0xf4] ss:$8 sps:$4 sm:$0xff]   ;;  %v895_v30 = vld [vmem:[%s988_s22 + $0x120] ss:$8 sps:$4 sm:$0xff]  }
  0x20   : > { %546 = vmatpush1.bf16.msra.mxu0 %v850_v7  ;;  %v899_v31 = vld [vmem:[%s988_s22 + $0x114] ss:$8 sps:$4 sm:$0xff]   ;;  %v874_v32 = vld [vmem:[%s988_s22 + $0xf0] ss:$8 sps:$4 sm:$0xff]   ;;  %v878_v33 = vld [vmem:[%s988_s22 + $0xe4] ss:$8 sps:$4 sm:$0xff]  }
  0x21   : > { %547 = vmatprep.subr.bf16.mxu0 %v851_v8  ;;  %v901_v35 = vld [vmem:[%s988_s22 + $0x110] ss:$8 sps:$4 sm:$0xff]   ;;  %v905_v37 = vld [vmem:[%s988_s22 + $0x104] ss:$8 sps:$4 sm:$0xff]   ;;  %v880_v38 = vld [vmem:[%s988_s22 + $0xe0] ss:$8 sps:$4 sm:$0xff]  }
  0x22   : > { %587 = vmatpush1.bf16.msra.mxu1 %v877_v18  ;;  %v884_v39 = vld [vmem:[%s988_s22 + $0xd4] ss:$8 sps:$4 sm:$0xff]   ;;  %v907_v40 = vld [vmem:[%s988_s22 + $0x100] ss:$8 sps:$4 sm:$0xff]   ;;  %v886_v41 = vld [vmem:[%s988_s22 + $0xd0] ss:$8 sps:$4 sm:$0xff]  }
  0x23   : > { %588 = vmatprep.subr.bf16.mxu1 %v881_v19  ;;  %v890_v42 = vld [vmem:[%s988_s22 + $0xc4] ss:$8 sps:$4 sm:$0xff]   ;;  %v911_v43 = vld [vmem:[%s983_s18 + $0x8] ss:$0 sps:$4 sm:$0xff]   ;;  %v896_v45 = vld [vmem:[%s988_s22 + $0xb4] ss:$8 sps:$4 sm:$0xff]  }
  0x24   : > { %548 = vmatpush1.bf16.msra.mxu0 %v853_v11  ;;  %v892_v44 = vld [vmem:[%s988_s22 + $0xc0] ss:$8 sps:$4 sm:$0xff]   ;;  %v898_v46 = vld [vmem:[%s988_s22 + $0xb0] ss:$8 sps:$4 sm:$0xff]   ;;  %v902_v47 = vld [vmem:[%s988_s22 + $0xa4] ss:$8 sps:$4 sm:$0xff]  }
  0x25   : > { %549 = vmatprep.subr.bf16.mxu0 %v854_v12  ;;  %v904_v48 = vld [vmem:[%s988_s22 + $0xa0] ss:$8 sps:$4 sm:$0xff]   ;;  %v908_v49 = vld [vmem:[%s988_s22 + $0x94] ss:$8 sps:$4 sm:$0xff]   ;;  %v910_v50 = vld [vmem:[%s988_s22 + $0x90] ss:$8 sps:$4 sm:$0xff]  }
  0x26   : > { %589 = vmatpush1.bf16.msra.mxu1 %v883_v22  ;;  %v912_v51 = vld [vmem:[%s988_s22 + $0x84] ss:$8 sps:$4 sm:$0xff]   ;;  %v914_v52 = vld [vmem:[%s988_s22 + $0x80] ss:$8 sps:$4 sm:$0xff]   ;;  %p808_p7 = scmp.ne.s32.totalorder %s931_s9, 2 }
  0x27   : > { %590 = vmatprep.subr.bf16.mxu1 %v887_v23  ;;  %v238_v58 = vld [vmem:[#allocation2] sm:$0xff]  ;;  %v239_v61 = vld [vmem:[#allocation2 + $0x8] sm:$0xff] }
  0x28   : > { %550 = vmatpush1.bf16.msra.mxu0 %v856_v15 }
  0x29   : > { %551 = vmatprep.subr.bf16.mxu0 %v857_v17 }
  0x2a   : > { %591 = vmatpush1.bf16.msra.mxu1 %v889_v26 }
  0x2b   : > { %592 = vmatprep.subr.bf16.mxu1 %v893_v27 }
  0x2c   : > { %552 = vmatpush1.bf16.msra.mxu0 %v859_v20 }
  0x2d   : > { %553 = vmatprep.subr.bf16.mxu0 %v860_v21 }
  0x2e   : > { %593 = vmatpush1.bf16.msra.mxu1 %v895_v30 }
  0x2f   : > { %594 = vmatprep.subr.bf16.mxu1 %v899_v31 }
  0x30   : > { %554 = vmatpush1.bf16.msra.mxu0 %v862_v24 }
  0x31   : > { %555 = vmatprep.subr.bf16.mxu0 %v866_v25 }
  0x32   : > { %595 = vmatpush1.bf16.msra.mxu1 %v901_v35 }
  0x33   : > { %596 = vmatprep.subr.bf16.mxu1 %v905_v37 }
  0x34   : > { %556 = vmatpush1.bf16.msra.mxu0 %v868_v28 }
  0x35   : > { %557 = vmatprep.subr.bf16.mxu0 %v872_v29 }
  0x36   : > { %597 = vmatpush1.bf16.msra.mxu1 %v907_v40 }
  0x38   : > { %558 = vmatpush2.bf16.msra.mxu0 %v874_v32 }
  0x39   : > { %559 = vmatprep.subr.bf16.mxu0 %v878_v33  ;;  %615 = vmatmul.mubr.bf16.vlgmr.msra.gmra.mxu1 %v911_v43 }
  0x3c   : > { %560 = vmatpush2.bf16.msra.mxu0 %v880_v38 }
  0x3d   : > { %561 = vmatprep.subr.bf16.mxu0 %v884_v39 }
  0x40   : > { %562 = vmatpush2.bf16.msra.mxu0 %v886_v41 }
  0x41   : > { %563 = vmatprep.subr.bf16.mxu0 %v890_v42 }
  0x44   : > { %564 = vmatpush2.bf16.msra.mxu0 %v892_v44 }
  0x45   : > { %565 = vmatprep.subr.bf16.mxu0 %v896_v45 }
  0x48   : > { %566 = vmatpush2.bf16.msra.mxu0 %v898_v46 }
  0x49   : > { %567 = vmatprep.subr.bf16.mxu0 %v902_v47 }
  0x4c   : > { %568 = vmatpush2.bf16.msra.mxu0 %v904_v48 }
  0x4d   : > { %569 = vmatprep.subr.bf16.mxu0 %v908_v49 }
  0x50   : > { %570 = vmatpush2.bf16.msra.mxu0 %v910_v50 }
  0x51   : > { %571 = vmatprep.subr.bf16.mxu0 %v912_v51 }
  0x54   : > { %572 = vmatpush2.bf16.msra.mxu0 %v914_v52 }
  0x57   : > { %574 = vmatmul.mubr.bf16.vlgmr.msra.gmra.mxu0 %v757_v53 }
  0xf9   : > { %v616_v54 = vpop.f32.mrf.mxu1 }
  0xfb   : > { %v618_v55 = vpop.f32.mrf.mxu1 }
  0xfd   : > { %v620_v56 = vpop.f32.mrf.mxu1 }
  0xff   : > { %v621_v57 = vpop.f32.mrf.mxu1 }
 0x117   : > { %v575_v59 = vpop.f32.mrf.mxu0 }
 0x118   : > { %v617_v60 = vadd.f32 %v616_v54, %v575_v59 }
 0x119   : > { %v577_v62 = vpop.f32.mrf.mxu0 }
 0x11a   : > { %v623_v63 = vadd.f32 %v617_v60, %v238_v58  ;;  %v619_v0 = vadd.f32 %v618_v55, %v577_v62  ;;  %630 = sbr.rel (%p808_p7) target bundleno = 299 (0x12b), region = 36 }
 0x11b   : > { %v579_v1 = vpop.f32.mrf.mxu0 }
 0x11c   : > { %625 = vst [vmem:[#allocation2] sm:$0xff] %v623_v63  ;;  %v624_v2 = vadd.f32 %v619_v0, %v239_v61 }
 0x11d   : > { %v580_v3 = vpop.f32.mrf.mxu0 }
 0x11e   : > { %626 = vst [vmem:[#allocation2 + $0x8] sm:$0xff] %v624_v2 }
 0x123   : > { %v631_v4 = vld [vmem:[#allocation2] sm:$0xff] }
 0x124   : > { %v633_v6 = vmax.f32 %v631_v4, 0.0 }
 0x125   : > { %v632_v5 = vld [vmem:[#allocation2 + $0x8] sm:$0xff] }
 0x126   : > { %v634_v7 = vmax.f32 %v632_v5, 0.0 }
 0x128   : > { %v815_v8 = vpack.c.bf16 %v634_v7, %v633_v6 }
 0x12a   : > { %643 = vst [vmem:[%s1056_s2] sm:$0xff] %v815_v8 }
 0x12b PF: > { %s12_s11 = sadd.s32 1, %s939_s11   ;;  %s1057_s9 = smov %s935_s10 }
 0x12c   : > { %p9_p8 = scmp.ge.s32.totalorder %s12_s11, 5   ;;  %s1058_s10 = smov %s1060_s12 }
 0x12e   :  { %11 = sbr.rel (!%p9_p8) target bundleno = 2 (0x2), region = 69 }

// kernel: resnet_forward.19
= control target key start
LH: loop header
LB: loop body
LE: loop exit
PB: predicated region body
PF: predicated region fallthrough
CT: control target
= control target key end

     0   :  { %v223_v1 = vmov 0   ;;  %s293_s1 = inlined_call_operand.vmem [shape: bf16[128,256], index: 1, kind: input, shape index: {}]   ;;  %s294_s0 = inlined_call_operand.vmem [shape: bf16[8,128], index: 0, kind: input, shape index: {}]   ;;  %s295_s2 = inlined_call_operand.vmem [shape: bf16[8,256], index: 2, kind: output, shape index: {}]  }
   0x1   :  { %v199_v0 = vld [vmem:[%s293_s1 + $0x74] ss:$8 sps:$4 sm:$0xff]   ;;  %149 = vmatprep.mubr.bf16.mxu0 %v223_v1  ;;  %v201_v2 = vld [vmem:[%s293_s1 + $0x70] ss:$8 sps:$4 sm:$0xff]   ;;  %v202_v3 = vld [vmem:[%s293_s1 + $0x64] ss:$8 sps:$4 sm:$0xff]  }
   0x2   :  { %117 = vmatprep.subr.bf16.mxu0 %v199_v0  ;;  %v204_v4 = vld [vmem:[%s293_s1 + $0x60] ss:$8 sps:$4 sm:$0xff]   ;;  %v205_v5 = vld [vmem:[%s293_s1 + $0x54] ss:$8 sps:$4 sm:$0xff]   ;;  %v207_v6 = vld [vmem:[%s293_s1 + $0x50] ss:$8 sps:$4 sm:$0xff]  }
   0x3   :  { %118 = vmatpush1.bf16.msra.mxu0 %v201_v2  ;;  %v208_v7 = vld [vmem:[%s293_s1 + $0x44] ss:$8 sps:$4 sm:$0xff]   ;;  %v210_v8 = vld [vmem:[%s293_s1 + $0x40] ss:$8 sps:$4 sm:$0xff]   ;;  %v211_v9 = vld [vmem:[%s293_s1 + $0x34] ss:$8 sps:$4 sm:$0xff]  }
   0x4   :  { %119 = vmatprep.subr.bf16.mxu0 %v202_v3  ;;  %v213_v10 = vld [vmem:[%s293_s1 + $0x30] ss:$8 sps:$4 sm:$0xff]   ;;  %v214_v11 = vld [vmem:[%s293_s1 + $0x24] ss:$8 sps:$4 sm:$0xff]   ;;  %v216_v12 = vld [vmem:[%s293_s1 + $0x20] ss:$8 sps:$4 sm:$0xff]  }
   0x5   :  { %v217_v13 = vld [vmem:[%s293_s1 + $0x14] ss:$8 sps:$4 sm:$0xff]   ;;  %v219_v14 = vld [vmem:[%s293_s1 + $0x10] ss:$8 sps:$4 sm:$0xff]   ;;  %v220_v15 = vld [vmem:[%s293_s1 + $0x4] ss:$8 sps:$4 sm:$0xff]  }
   0x6   :  { %v222_v16 = vld [vmem:[%s293_s1] ss:$8 sps:$4 sm:$0xff]  }
   0x7   :  { %120 = vmatpush1.bf16.msra.mxu0 %v204_v4  ;;  %v20_v17 = vld [vmem:[%s294_s0] sm:$0xf] }
   0x8   :  { %121 = vmatprep.subr.bf16.mxu0 %v205_v5 }
   0xb   :  { %122 = vmatpush1.bf16.msra.mxu0 %v207_v6 }
   0xc   :  { %123 = vmatprep.subr.bf16.mxu0 %v208_v7 }
   0xf   :  { %124 = vmatpush1.bf16.msra.mxu0 %v210_v8 }
  0x10   :  { %125 = vmatprep.subr.bf16.mxu0 %v211_v9 }
  0x13   :  { %126 = vmatpush1.bf16.msra.mxu0 %v213_v10 }
  0x14   :  { %127 = vmatprep.subr.bf16.mxu0 %v214_v11 }
  0x17   :  { %128 = vmatpush1.bf16.msra.mxu0 %v216_v12 }
  0x18   :  { %129 = vmatprep.subr.bf16.mxu0 %v217_v13 }
  0x1b   :  { %130 = vmatpush1.bf16.msra.mxu0 %v219_v14 }
  0x1c   :  { %131 = vmatprep.subr.bf16.mxu0 %v220_v15 }
  0x1f   :  { %132 = vmatpush1.bf16.msra.mxu0 %v222_v16 }
  0x22   :  { %150 = vmatmul.mubr.bf16.vlgmr.msra.gmra.mxu0 %v20_v17 }
  0xe2   :  { %v151_v18 = vpop.f32.mrf.mxu0 }
  0xe4   :  { %v153_v19 = vpop.f32.mrf.mxu0 }
  0xe5   :  { %v197_v20 = vpack.c.bf16 %v153_v19, %v151_v18 }
  0xe6   :  { %v155_v21 = vpop.f32.mrf.mxu0 }
  0xe7   :  { %175 = vst [vmem:[%s295_s2] sm:$0xff] %v197_v20 }
  0xe8   :  { %v156_v22 = vpop.f32.mrf.mxu0 }

// kernel: resnet_forward.21
= control target key start
LH: loop header
LB: loop body
LE: loop exit
PB: predicated region body
PF: predicated region fallthrough
CT: control target
= control target key end

     0   :  { %s1516_s12 = smov 0   ;;  %s1518_s13 = smov 0   ;;  %s1670_s0 = inlined_call_operand.vmem [shape: bf16[8,2304], index: 0, kind: input, shape index: {}]   ;;  %s1671_s1 = inlined_call_operand.vmem [shape: bf16[2304,256], index: 1, kind: input, shape index: {}]   ;;  %s1672_s2 = inlined_call_operand.vmem [shape: bf16[8,256], index: 2, kind: input, shape index: {}]   ;;  %s1673_s3 = inlined_call_operand.vmem [shape: bf16[8,256], index: 3, kind: output, shape index: {}]  }
   0x1   :  { %s1520_s14 = smov 0  }
   0x2 LB: > { %s25_s15 = sadd.s32 1, %s1489_s13  ;;  %p1181_p0 = scmp.ge.s32.totalorder %s1493_s14, 1  ;;  %s1493_s14 = sphi %s1520_s14, %s13_s14   ;;  %s1489_s13 = sphi %s1518_s13, %s1675_s13   ;;  %s1485_s12 = sphi %s1516_s12, %s1674_s12  }
   0x3   : > { %p26_p1 = scmp.ge.s32.totalorder %s25_s15, 3  ;;  %p201_p2 = scmp.lt.s32.totalorder %s1493_s14, 4 }
   0x5   : > { %s1677_s15 = smov (%p26_p1, %s25_s15), 0  ;;  %p202_p3 = pnand %p1181_p0, %p201_p2 }
   0x6   : > { %s252_s16 = smul.u32 (!%p202_p3), 6, %s1485_s12  ;;  %p1185_p6 = scmp.ne.s32.totalorder (!%p202_p3), %s1485_s12, 0 }
   0x7   : > { %205 = sbr.rel (%p202_p3) target bundleno = 365 (0x16d), region = 32 }
   0x8   : > { %s262_s17 = smul.u32 (!%p202_p3), 96, %s1485_s12  ;;  %p255_p4 = scmp.lt.s32.totalorder (!%p202_p3), %s252_s16, 17 }
   0xa   : > { %p264_p5 = scmp.lt.s32.totalorder (!%p202_p3), %s262_s17, 287 }
   0xc   : > { %s1679_s16 = smov (!%p255_p4, %s252_s16), 17  ;;  %s1681_s17 = smov (!%p264_p5, %s262_s17), 287 }
   0xd   : > { %s1182_s18 = sshll.u32 %s1679_s16, 2  ;;  %s1294_s22 = sshll.u32 %s1681_s17, 3 }
   0xe   : > { %s1541_s21 = scalar_lea.vmem %s1670_s0, %s1182_s18  ;;  %s1546_s25 = scalar_lea.vmem %s1671_s1, %s1294_s22 }
   0xf   : > { %297 = sbr.rel (%p1185_p6) target bundleno = 22 (0x16), region = 36 }
  0x14   : > { %v1495_v0 = vmov 0.0  }
  0x15   : > { %298 = vst [vmem:[#allocation2] sm:$0xff] %v1495_v0  ;;  %299 = vst [vmem:[#allocation2 + $0x8] sm:$0xff] %v1495_v0 }
  0x16 PF: > { %v1321_v1 = vld [vmem:[%s1546_s25 + $0x74] ss:$8 sps:$4 sm:$0xff]   ;;  %v1325_v3 = vld [vmem:[%s1546_s25 + $0x70] ss:$8 sps:$4 sm:$0xff]   ;;  %v1327_v5 = vld [vmem:[%s1546_s25 + $0x64] ss:$8 sps:$4 sm:$0xff]  }
  0x17   : > { %v1323_v2 = vld [vmem:[%s1546_s25 + $0x174] ss:$8 sps:$4 sm:$0xff]   ;;  %902 = vmatprep.subr.bf16.mxu0 %v1321_v1  ;;  %v1326_v4 = vld [vmem:[%s1546_s25 + $0x170] ss:$8 sps:$4 sm:$0xff]   ;;  %v1329_v6 = vld [vmem:[%s1546_s25 + $0x164] ss:$8 sps:$4 sm:$0xff]  }
  0x18   : > { %943 = vmatprep.subr.bf16.mxu1 %v1323_v2  ;;  %903 = vmatpush1.bf16.msra.mxu0 %v1325_v3  ;;  %v1331_v7 = vld [vmem:[%s1546_s25 + $0x60] ss:$8 sps:$4 sm:$0xff]   ;;  %v1333_v9 = vld [vmem:[%s1546_s25 + $0x54] ss:$8 sps:$4 sm:$0xff]   ;;  %v1337_v11 = vld [vmem:[%s1546_s25 + $0x50] ss:$8 sps:$4 sm:$0xff]  }
  0x19   : > { %944 = vmatpush1.bf16.msra.mxu1 %v1326_v4  ;;  %904 = vmatprep.subr.bf16.mxu0 %v1327_v5  ;;  %v1332_v8 = vld [vmem:[%s1546_s25 + $0x160] ss:$8 sps:$4 sm:$0xff]   ;;  %v1335_v10 = vld [vmem:[%s1546_s25 + $0x154] ss:$8 sps:$4 sm:$0xff]   ;;  %v1338_v12 = vld [vmem:[%s1546_s25 + $0x150] ss:$8 sps:$4 sm:$0xff]  }
  0x1a   : > { %945 = vmatprep.subr.bf16.mxu1 %v1329_v6  ;;  %v1339_v13 = vld [vmem:[%s1546_s25 + $0x44] ss:$8 sps:$4 sm:$0xff]   ;;  %v1343_v15 = vld [vmem:[%s1546_s25 + $0x40] ss:$8 sps:$4 sm:$0xff]   ;;  %v1345_v17 = vld [vmem:[%s1546_s25 + $0x34] ss:$8 sps:$4 sm:$0xff]  }
  0x1b   : > { %v1341_v14 = vld [vmem:[%s1546_s25 + $0x144] ss:$8 sps:$4 sm:$0xff]   ;;  %v1344_v16 = vld [vmem:[%s1546_s25 + $0x140] ss:$8 sps:$4 sm:$0xff]   ;;  %v1347_v18 = vld [vmem:[%s1546_s25 + $0x134] ss:$8 sps:$4 sm:$0xff]  }
  0x1c   : > { %905 = vmatpush1.bf16.msra.mxu0 %v1331_v7  ;;  %v1349_v19 = vld [vmem:[%s1546_s25 + $0x30] ss:$8 sps:$4 sm:$0xff]   ;;  %v1351_v21 = vld [vmem:[%s1546_s25 + $0x24] ss:$8 sps:$4 sm:$0xff]   ;;  %v1355_v23 = vld [vmem:[%s1546_s25 + $0x20] ss:$8 sps:$4 sm:$0xff]  }
  0x1d   : > { %946 = vmatpush1.bf16.msra.mxu1 %v1332_v8  ;;  %906 = vmatprep.subr.bf16.mxu0 %v1333_v9  ;;  %v1350_v20 = vld [vmem:[%s1546_s25 + $0x130] ss:$8 sps:$4 sm:$0xff]   ;;  %v1353_v22 = vld [vmem:[%s1546_s25 + $0x124] ss:$8 sps:$4 sm:$0xff]   ;;  %v1356_v24 = vld [vmem:[%s1546_s25 + $0x120] ss:$8 sps:$4 sm:$0xff]  }
  0x1e   : > { %947 = vmatprep.subr.bf16.mxu1 %v1335_v10  ;;  %v1357_v25 = vld [vmem:[%s1546_s25 + $0x14] ss:$8 sps:$4 sm:$0xff]   ;;  %v1361_v27 = vld [vmem:[%s1546_s25 + $0x10] ss:$8 sps:$4 sm:$0xff]   ;;  %v1363_v29 = vld [vmem:[%s1546_s25 + $0x4] ss:$8 sps:$4 sm:$0xff]  }
  0x1f   : > { %v1359_v26 = vld [vmem:[%s1546_s25 + $0x114] ss:$8 sps:$4 sm:$0xff]   ;;  %v1362_v28 = vld [vmem:[%s1546_s25 + $0x110] ss:$8 sps:$4 sm:$0xff]   ;;  %v1365_v30 = vld [vmem:[%s1546_s25 + $0x104] ss:$8 sps:$4 sm:$0xff]  }
  0x20   : > { %907 = vmatpush1.bf16.msra.mxu0 %v1337_v11  ;;  %v1367_v31 = vld [vmem:[%s1546_s25] ss:$8 sps:$4 sm:$0xff]   ;;  %v1369_v33 = vld [vmem:[%s1546_s25 + $0xf4] ss:$8 sps:$4 sm:$0xff]   ;;  %v1373_v35 = vld [vmem:[%s1546_s25 + $0xf0] ss:$8 sps:$4 sm:$0xff]  }
  0x21   : > { %948 = vmatpush1.bf16.msra.mxu1 %v1338_v12  ;;  %908 = vmatprep.subr.bf16.mxu0 %v1339_v13  ;;  %v1368_v32 = vld [vmem:[%s1546_s25 + $0x100] ss:$8 sps:$4 sm:$0xff]   ;;  %v1371_v34 = vld [vmem:[%s1546_s25 + $0x1f4] ss:$8 sps:$4 sm:$0xff]   ;;  %v1374_v36 = vld [vmem:[%s1546_s25 + $0x1f0] ss:$8 sps:$4 sm:$0xff]  }
  0x22   : > { %949 = vmatprep.subr.bf16.mxu1 %v1341_v14  ;;  %v1375_v37 = vld [vmem:[%s1546_s25 + $0xe4] ss:$8 sps:$4 sm:$0xff]   ;;  %v1379_v39 = vld [vmem:[%s1546_s25 + $0xe0] ss:$8 sps:$4 sm:$0xff]   ;;  %v1381_v41 = vld [vmem:[%s1546_s25 + $0xd4] ss:$8 sps:$4 sm:$0xff]  }
  0x23   : > { %v1377_v38 = vld [vmem:[%s1546_s25 + $0x1e4] ss:$8 sps:$4 sm:$0xff]   ;;  %v1380_v40 = vld [vmem:[%s1546_s25 + $0x1e0] ss:$8 sps:$4 sm:$0xff]   ;;  %v1383_v42 = vld [vmem:[%s1546_s25 + $0x1d4] ss:$8 sps:$4 sm:$0xff]  }
  0x24   : > { %909 = vmatpush1.bf16.msra.mxu0 %v1343_v15  ;;  %v1385_v43 = vld [vmem:[%s1546_s25 + $0xd0] ss:$8 sps:$4 sm:$0xff]   ;;  %v1387_v45 = vld [vmem:[%s1546_s25 + $0xc4] ss:$8 sps:$4 sm:$0xff]   ;;  %v1391_v50 = vld [vmem:[%s1546_s25 + $0xc0] ss:$8 sps:$4 sm:$0xff]  }
  0x25   : > { %950 = vmatpush1.bf16.msra.mxu1 %v1344_v16  ;;  %910 = vmatprep.subr.bf16.mxu0 %v1345_v17  ;;  %v1386_v44 = vld [vmem:[%s1546_s25 + $0x1d0] ss:$8 sps:$4 sm:$0xff]   ;;  %v1389_v46 = vld [vmem:[%s1546_s25 + $0x1c4] ss:$8 sps:$4 sm:$0xff]   ;;  %v1392_v51 = vld [vmem:[%s1546_s25 + $0x1c0] ss:$8 sps:$4 sm:$0xff]  }
  0x26   : > { %951 = vmatprep.subr.bf16.mxu1 %v1347_v18  ;;  %v302_v47 = vld [vmem:[%s1541_s21] sm:$0xff]  ;;  %v303_v49 = vld [vmem:[%s1541_s21 + $0x8] sm:$0xff]  ;;  %v1393_v53 = vld [vmem:[%s1546_s25 + $0xb4] ss:$8 sps:$4 sm:$0xff]   ;;  %p1288_p7 = scmp.ne.s32.totalorder %s1485_s12, 2 }
  0x27   : > { %v1187_v48 = vcombine.high %v302_v47, %v302_v47  ;;  %v1189_v52 = vcombine.high %v303_v49, %v303_v49  ;;  %v1395_v54 = vld [vmem:[%s1546_s25 + $0x1b4] ss:$8 sps:$4 sm:$0xff]   ;;  %v1397_v55 = vld [vmem:[%s1546_s25 + $0xb0] ss:$8 sps:$4 sm:$0xff]   ;;  %v1399_v57 = vld [vmem:[%s1546_s25 + $0xa4] ss:$8 sps:$4 sm:$0xff]   ;;  %v1186_v6 = vcombine.low %v302_v47, %v302_v47  ;;  %v1188_v7 = vcombine.low %v303_v49, %v303_v49 }
  0x28   : > { %911 = vmatpush1.bf16.msra.mxu0 %v1349_v19  ;;  %v1398_v56 = vld [vmem:[%s1546_s25 + $0x1b0] ss:$8 sps:$4 sm:$0xff]   ;;  %v1401_v58 = vld [vmem:[%s1546_s25 + $0x1a4] ss:$8 sps:$4 sm:$0xff]   ;;  %v1403_v59 = vld [vmem:[%s1546_s25 + $0xa0] ss:$8 sps:$4 sm:$0xff]  }
  0x29   : > { %952 = vmatpush1.bf16.msra.mxu1 %v1350_v20  ;;  %912 = vmatprep.subr.bf16.mxu0 %v1351_v21  ;;  %v1404_v60 = vld [vmem:[%s1546_s25 + $0x1a0] ss:$8 sps:$4 sm:$0xff]   ;;  %v1405_v61 = vld [vmem:[%s1546_s25 + $0x94] ss:$8 sps:$4 sm:$0xff]   ;;  %v1409_v63 = vld [vmem:[%s1546_s25 + $0x90] ss:$8 sps:$4 sm:$0xff]  }
  0x2a   : > { %953 = vmatprep.subr.bf16.mxu1 %v1353_v22  ;;  %934 = vmatprep.mubr.bf16.mxu0 %v1187_v48  ;;  %v1407_v62 = vld [vmem:[%s1546_s25 + $0x194] ss:$8 sps:$4 sm:$0xff]   ;;  %v1410_v0 = vld [vmem:[%s1546_s25 + $0x190] ss:$8 sps:$4 sm:$0xff]   ;;  %v1411_v1 = vld [vmem:[%s1546_s25 + $0x84] ss:$8 sps:$4 sm:$0xff]  }
  0x2b   : > { %975 = vmatprep.mubr.bf16.mxu1 %v1189_v52  ;;  %v1413_v2 = vld [vmem:[%s1546_s25 + $0x184] ss:$8 sps:$4 sm:$0xff]   ;;  %v1415_v3 = vld [vmem:[%s1546_s25 + $0x80] ss:$8 sps:$4 sm:$0xff]   ;;  %v1423_v5 = vld [vmem:[%s1546_s25 + $0x274] ss:$8 sps:$4 sm:$0xff]  }
  0x2c   : > { %913 = vmatpush1.bf16.msra.mxu0 %v1355_v23  ;;  %v1416_v4 = vld [vmem:[%s1546_s25 + $0x180] ss:$8 sps:$4 sm:$0xff]   ;;  %v1421_v8 = vld [vmem:[%s1546_s25 + $0x270] ss:$8 sps:$4 sm:$0xff]   ;;  %v1426_v10 = vld [vmem:[%s1546_s25 + $0x264] ss:$8 sps:$4 sm:$0xff]  }
  0x2d   : > { %954 = vmatpush1.bf16.msra.mxu1 %v1356_v24  ;;  %914 = vmatprep.subr.bf16.mxu0 %v1357_v25  ;;  %v1618_v9 = vld [vmem:[%s1541_s21 + $0x10] sm:$0xff]  ;;  %v1424_v12 = vld [vmem:[%s1546_s25 + $0x260] ss:$8 sps:$4 sm:$0xff]   ;;  %v1432_v15 = vld [vmem:[%s1546_s25 + $0x244] ss:$8 sps:$4 sm:$0xff]  }
  0x2e   : > { %955 = vmatprep.subr.bf16.mxu1 %v1359_v26  ;;  %v1191_v11 = vcombine.high %v1618_v9, %v1618_v9  ;;  %v1429_v13 = vld [vmem:[%s1546_s25 + $0x254] ss:$8 sps:$4 sm:$0xff]   ;;  %v1427_v14 = vld [vmem:[%s1546_s25 + $0x250] ss:$8 sps:$4 sm:$0xff]   ;;  %v1430_v16 = vld [vmem:[%s1546_s25 + $0x240] ss:$8 sps:$4 sm:$0xff]  }
  0x2f   : > { %v1435_v17 = vld [vmem:[%s1546_s25 + $0x234] ss:$8 sps:$4 sm:$0xff]   ;;  %v1433_v18 = vld [vmem:[%s1546_s25 + $0x230] ss:$8 sps:$4 sm:$0xff]   ;;  %v1438_v19 = vld [vmem:[%s1546_s25 + $0x224] ss:$8 sps:$4 sm:$0xff]  }
  0x30   : > { %915 = vmatpush1.bf16.msra.mxu0 %v1361_v27  ;;  %v1436_v20 = vld [vmem:[%s1546_s25 + $0x220] ss:$8 sps:$4 sm:$0xff]   ;;  %v1441_v21 = vld [vmem:[%s1546_s25 + $0x214] ss:$8 sps:$4 sm:$0xff]   ;;  %v1439_v22 = vld [vmem:[%s1546_s25 + $0x210] ss:$8 sps:$4 sm:$0xff]  }
  0x31   : > { %956 = vmatpush1.bf16.msra.mxu1 %v1362_v28  ;;  %916 = vmatprep.subr.bf16.mxu0 %v1363_v29  ;;  %v1444_v23 = vld [vmem:[%s1546_s25 + $0x204] ss:$8 sps:$4 sm:$0xff]   ;;  %v1442_v24 = vld [vmem:[%s1546_s25 + $0x200] ss:$8 sps:$4 sm:$0xff]   ;;  %v1447_v25 = vld [vmem:[%s1546_s25 + $0x2f4] ss:$8 sps:$4 sm:$0xff]  }
  0x32   : > { %957 = vmatprep.subr.bf16.mxu1 %v1365_v30  ;;  %v1445_v26 = vld [vmem:[%s1546_s25 + $0x2f0] ss:$8 sps:$4 sm:$0xff]   ;;  %v1450_v27 = vld [vmem:[%s1546_s25 + $0x2e4] ss:$8 sps:$4 sm:$0xff]   ;;  %v1448_v28 = vld [vmem:[%s1546_s25 + $0x2e0] ss:$8 sps:$4 sm:$0xff]  }
  0x33   : > { %v1453_v29 = vld [vmem:[%s1546_s25 + $0x2d4] ss:$8 sps:$4 sm:$0xff]   ;;  %v1451_v30 = vld [vmem:[%s1546_s25 + $0x2d0] ss:$8 sps:$4 sm:$0xff]  }
  0x34   : > { %917 = vmatpush1.bf16.msra.mxu0 %v1367_v31  ;;  %v1456_v31 = vld [vmem:[%s1546_s25 + $0x2c4] ss:$8 sps:$4 sm:$0xff]  }
  0x35   : > { %958 = vmatpush1.bf16.msra.mxu1 %v1368_v32  ;;  %918 = vmatprep.subr.bf16.mxu0 %v1369_v33  ;;  %v1454_v32 = vld [vmem:[%s1546_s25 + $0x2c0] ss:$8 sps:$4 sm:$0xff]   ;;  %v1459_v33 = vld [vmem:[%s1546_s25 + $0x2b4] ss:$8 sps:$4 sm:$0xff]  }
  0x36   : > { %959 = vmatprep.subr.bf16.mxu1 %v1371_v34  ;;  %v1457_v34 = vld [vmem:[%s1546_s25 + $0x2b0] ss:$8 sps:$4 sm:$0xff]  }
  0x38   : > { %919 = vmatpush2.bf16.msra.mxu0 %v1373_v35  ;;  %v1462_v35 = vld [vmem:[%s1546_s25 + $0x2a4] ss:$8 sps:$4 sm:$0xff]  }
  0x39   : > { %960 = vmatpush2.bf16.msra.mxu1 %v1374_v36  ;;  %920 = vmatprep.subr.bf16.mxu0 %v1375_v37  ;;  %v1460_v36 = vld [vmem:[%s1546_s25 + $0x2a0] ss:$8 sps:$4 sm:$0xff]   ;;  %v1465_v37 = vld [vmem:[%s1546_s25 + $0x294] ss:$8 sps:$4 sm:$0xff]  }
  0x3a   : > { %961 = vmatprep.subr.bf16.mxu1 %v1377_v38  ;;  %v1463_v38 = vld [vmem:[%s1546_s25 + $0x290] ss:$8 sps:$4 sm:$0xff]  }
  0x3c   : > { %921 = vmatpush2.bf16.msra.mxu0 %v1379_v39  ;;  %v1468_v39 = vld [vmem:[%s1546_s25 + $0x284] ss:$8 sps:$4 sm:$0xff]  }
  0x3d   : > { %962 = vmatpush2.bf16.msra.mxu1 %v1380_v40  ;;  %922 = vmatprep.subr.bf16.mxu0 %v1381_v41  ;;  %v1466_v40 = vld [vmem:[%s1546_s25 + $0x280] ss:$8 sps:$4 sm:$0xff]   ;;  %v1190_v41 = vcombine.low %v1618_v9, %v1618_v9 }
  0x3e   : > { %963 = vmatprep.subr.bf16.mxu1 %v1383_v42 }
  0x40   : > { %923 = vmatpush2.bf16.msra.mxu0 %v1385_v43 }
  0x41   : > { %964 = vmatpush2.bf16.msra.mxu1 %v1386_v44  ;;  %924 = vmatprep.subr.bf16.mxu0 %v1387_v45 }
  0x42   : > { %965 = vmatprep.subr.bf16.mxu1 %v1389_v46 }
  0x44   : > { %925 = vmatpush2.bf16.msra.mxu0 %v1391_v50 }
  0x45   : > { %966 = vmatpush2.bf16.msra.mxu1 %v1392_v51  ;;  %926 = vmatprep.subr.bf16.mxu0 %v1393_v53  ;;  %v300_v51 = vld [vmem:[#allocation2] sm:$0xff] }
  0x46   : > { %967 = vmatprep.subr.bf16.mxu1 %v1395_v54 }
  0x48   : > { %927 = vmatpush2.bf16.msra.mxu0 %v1397_v55  ;;  %v301_v55 = vld [vmem:[#allocation2 + $0x8] sm:$0xff] }
  0x49   : > { %968 = vmatpush2.bf16.msra.mxu1 %v1398_v56  ;;  %928 = vmatprep.subr.bf16.mxu0 %v1399_v57 }
  0x4a   : > { %969 = vmatprep.subr.bf16.mxu1 %v1401_v58 }
  0x4c   : > { %929 = vmatpush2.bf16.msra.mxu0 %v1403_v59 }
  0x4d   : > { %970 = vmatpush2.bf16.msra.mxu1 %v1404_v60  ;;  %930 = vmatprep.subr.bf16.mxu0 %v1405_v61 }
  0x4e   : > { %971 = vmatprep.subr.bf16.mxu1 %v1407_v62 }
  0x50   : > { %931 = vmatpush2.bf16.msra.mxu0 %v1409_v63 }
  0x51   : > { %972 = vmatpush2.bf16.msra.mxu1 %v1410_v0  ;;  %932 = vmatprep.subr.bf16.mxu0 %v1411_v1 }
  0x52   : > { %973 = vmatprep.subr.bf16.mxu1 %v1413_v2 }
  0x54   : > { %933 = vmatpush2.bf16.msra.mxu0 %v1415_v3 }
  0x55   : > { %974 = vmatpush2.bf16.msra.mxu1 %v1416_v4  ;;  %984 = vmatprep.subr.bf16.mxu0 %v1423_v5 }
  0x57   : > { %935 = vmatmul.mubr.bf16.vlgmr.msra.gmra.mxu0 %v1186_v6 }
  0x58   : > { %976 = vmatmul.mubr.bf16.vlgmr.msra.gmra.mxu1 %v1188_v7  ;;  %985 = vmatpush1.bf16.msra.mxu0 %v1421_v8 }
  0x59   : > { %1016 = vmatprep.mubr.bf16.mxu0 %v1191_v11  ;;  %986 = vmatprep.subr.bf16.mxu0 %v1426_v10 }
  0x5c   : > { %987 = vmatpush1.bf16.msra.mxu0 %v1424_v12 }
  0x5d   : > { %988 = vmatprep.subr.bf16.mxu0 %v1429_v13 }
  0x60   : > { %989 = vmatpush1.bf16.msra.mxu0 %v1427_v14 }
  0x61   : > { %990 = vmatprep.subr.bf16.mxu0 %v1432_v15 }
  0x64   : > { %991 = vmatpush1.bf16.msra.mxu0 %v1430_v16 }
  0x65   : > { %992 = vmatprep.subr.bf16.mxu0 %v1435_v17 }
  0x68   : > { %993 = vmatpush1.bf16.msra.mxu0 %v1433_v18 }
  0x69   : > { %994 = vmatprep.subr.bf16.mxu0 %v1438_v19 }
  0x6c   : > { %995 = vmatpush1.bf16.msra.mxu0 %v1436_v20 }
  0x6d   : > { %996 = vmatprep.subr.bf16.mxu0 %v1441_v21 }
  0x70   : > { %997 = vmatpush1.bf16.msra.mxu0 %v1439_v22 }
  0x71   : > { %998 = vmatprep.subr.bf16.mxu0 %v1444_v23 }
  0x74   : > { %999 = vmatpush1.bf16.msra.mxu0 %v1442_v24 }
  0x75   : > { %1000 = vmatprep.subr.bf16.mxu0 %v1447_v25 }
  0x78   : > { %1001 = vmatpush2.bf16.msra.mxu0 %v1445_v26 }
  0x79   : > { %1002 = vmatprep.subr.bf16.mxu0 %v1450_v27 }
  0x7c   : > { %1003 = vmatpush2.bf16.msra.mxu0 %v1448_v28 }
  0x7d   : > { %1004 = vmatprep.subr.bf16.mxu0 %v1453_v29 }
  0x80   : > { %1005 = vmatpush2.bf16.msra.mxu0 %v1451_v30 }
  0x81   : > { %1006 = vmatprep.subr.bf16.mxu0 %v1456_v31 }
  0x84   : > { %1007 = vmatpush2.bf16.msra.mxu0 %v1454_v32 }
  0x85   : > { %1008 = vmatprep.subr.bf16.mxu0 %v1459_v33 }
  0x88   : > { %1009 = vmatpush2.bf16.msra.mxu0 %v1457_v34 }
  0x89   : > { %1010 = vmatprep.subr.bf16.mxu0 %v1462_v35 }
  0x8c   : > { %1011 = vmatpush2.bf16.msra.mxu0 %v1460_v36 }
  0x8d   : > { %1012 = vmatprep.subr.bf16.mxu0 %v1465_v37 }
  0x90   : > { %1013 = vmatpush2.bf16.msra.mxu0 %v1463_v38 }
  0x91   : > { %1014 = vmatprep.subr.bf16.mxu0 %v1468_v39 }
  0x94   : > { %1015 = vmatpush2.bf16.msra.mxu0 %v1466_v40 }
  0x97   : > { %1017 = vmatmul.mubr.bf16.vlgmr.msra.gmra.mxu0 %v1190_v41 }
 0x117   : > { %v936_v42 = vpop.f32.mrf.mxu0 }
 0x118   : > { %v977_v43 = vpop.f32.mrf.mxu1 }
 0x119   : > { %v938_v44 = vpop.f32.mrf.mxu0  ;;  %v978_v50 = vadd.f32 %v977_v43, %v936_v42 }
 0x11a   : > { %v979_v45 = vpop.f32.mrf.mxu1 }
 0x11b   : > { %v940_v46 = vpop.f32.mrf.mxu0  ;;  %v980_v53 = vadd.f32 %v979_v45, %v938_v44 }
 0x11c   : > { %v981_v47 = vpop.f32.mrf.mxu1 }
 0x11d   : > { %v941_v48 = vpop.f32.mrf.mxu0 }
 0x11e   : > { %v982_v49 = vpop.f32.mrf.mxu1 }
 0x157   : > { %v1018_v52 = vpop.f32.mrf.mxu0 }
 0x158   : > { %v1019_v54 = vadd.f32 %v1018_v52, %v978_v50 }
 0x159   : > { %v1020_v56 = vpop.f32.mrf.mxu0 }
 0x15a   : > { %v1025_v57 = vadd.f32 %v1019_v54, %v300_v51  ;;  %v1021_v58 = vadd.f32 %v1020_v56, %v980_v53  ;;  %1032 = sbr.rel (%p1288_p7) target bundleno = 365 (0x16d), region = 40 }
 0x15b   : > { %v1022_v59 = vpop.f32.mrf.mxu0 }
 0x15c   : > { %1027 = vst [vmem:[#allocation2] sm:$0xff] %v1025_v57  ;;  %v1026_v60 = vadd.f32 %v1021_v58, %v301_v55 }
 0x15d   : > { %v1023_v61 = vpop.f32.mrf.mxu0 }
 0x15e   : > { %1028 = vst [vmem:[#allocation2 + $0x8] sm:$0xff] %v1026_v60 }
 0x15f   : > { %v1035_v0 = vld [vmem:[%s1672_s2] sm:$0xff] }
 0x160   : > { %v1036_v1 = vunpack.c.l.bf16 %v1035_v0  ;;  %v1037_v2 = vunpack.c.h.bf16 %v1035_v0 }
 0x163   : > { %v1033_v62 = vld [vmem:[#allocation2] sm:$0xff] }
 0x164   : > { %v1038_v3 = vadd.f32 %v1036_v1, %v1033_v62 }
 0x165   : > { %v1034_v63 = vld [vmem:[#allocation2 + $0x8] sm:$0xff] }
 0x166   : > { %v1039_v4 = vadd.f32 %v1037_v2, %v1034_v63  ;;  %v1040_v5 = vmax.f32 %v1038_v3, 0.0 }
 0x168   : > { %v1041_v6 = vmax.f32 %v1039_v4, 0.0 }
 0x16a   : > { %v1295_v7 = vpack.c.bf16 %v1041_v6, %v1040_v5 }
 0x16c   : > { %1050 = vst [vmem:[%s1673_s3] sm:$0xff] %v1295_v7 }
 0x16d PF: > { %s13_s14 = sadd.s32 1, %s1493_s14   ;;  %s1674_s12 = smov %s1489_s13 }
 0x16e   : > { %p10_p8 = scmp.ge.s32.totalorder %s13_s14, 5   ;;  %s1675_s13 = smov %s1677_s15 }
 0x170   :  { %12 = sbr.rel (!%p10_p8) target bundleno = 2 (0x2), region = 76 }

// kernel: resnet_forward.23
= control target key start
LH: loop header
LB: loop body
LE: loop exit
PB: predicated region body
PF: predicated region fallthrough
CT: control target
= control target key end

     0   :  { %s1900_s9 = smov 0   ;;  %s1902_s10 = smov 0   ;;  %s2302_s0 = inlined_call_operand.vmem [shape: bf16[8,2304], index: 0, kind: input, shape index: {}]   ;;  %s2303_s1 = inlined_call_operand.vmem [shape: bf16[2304,512], index: 1, kind: input, shape index: {}]   ;;  %s2304_s2 = inlined_call_operand.vmem [shape: bf16[8,512], index: 2, kind: output, shape index: {}]  }
   0x1   :  { %s1904_s11 = smov 0   ;;  %s1906_s12 = smov 0  }
   0x2   :  { %s1908_s13 = smov 0   ;;  %s1910_s14 = smov 0  }
   0x3   :  { %s1912_s15 = smov 0  }
   0x4 LB: > { %s24_s16 = sadd.s32 1, %s1874_s13  ;;  %s27_s17 = sadd.s32 1, %s1878_s14  ;;  %s1882_s15 = sphi %s1912_s15, %s12_s15   ;;  %s1878_s14 = sphi %s1910_s14, %s2310_s14   ;;  %s1874_s13 = sphi %s1908_s13, %s2309_s13   ;;  %s1870_s12 = sphi %s1906_s12, %s2308_s12   ;;  %s1866_s11 = sphi %s1904_s11, %s2307_s11   ;;  %s1862_s10 = sphi %s1902_s10, %s2306_s10   ;;  %s1858_s9 = sphi %s1900_s9, %s2305_s9  }
   0x5   : > { %p25_p0 = scmp.ge.s32.totalorder %s24_s16, 3  ;;  %p75_p1 = scmp.ne.s32.totalorder %s1862_s10, %s1858_s9 }
   0x6   : > { %p76_p2 = scmp.eq.s32.totalorder %s1882_s15, 0  ;;  %s68_s21 = sadd.s32 1, %s1862_s10 }
   0x7   : > { %s2312_s16 = smov (%p25_p0, %s24_s16), 0  ;;  %s2314_s17 = smov (!%p25_p0, %s27_s17), %s1878_s14 }
   0x8   : > { %p77_p3 = por %p76_p2, %p75_p1  ;;  %p29_p4 = scmp.ge.s32.totalorder %s2314_s17, 2 }
   0x9   : > { %s63_s18 = ssub.s32 %s1874_s13, %s2312_s16  ;;  %p1502_p6 = scmp.ge.s32.totalorder %s1882_s15, 6 }
   0xa   : > { %s2316_s17 = smov (%p29_p4, %s2314_s17), 0 }
   0xb   : > { %s64_s19 = ssub.s32 %s1878_s14, %s2316_s17  ;;  %129 = sbr.rel (%p1502_p6) target bundleno = 72 (0x48), region = 16 }
   0xc   : > { %s65_s20 = sor.u32 %s64_s19, %s63_s18 }
   0xd   : > { %p66_p5 = scmp.eq.s32.totalorder %s65_s20, 0 }
   0xf   : > { %s1951_s22 = scalar_select %p66_p5, %s1862_s10, %s68_s21  }
  0x10   : > { %145 = sbr.rel (!%p77_p3) target bundleno = 72 (0x48), region = 24  ;;  %s147_s23 = sand.u32 (%p77_p3), 1, %s1862_s10  }
  0x11   : > { %s1619_s24 = smul.u32 (%p77_p3), 768, %s147_s23  ;;  %s1503_s25 = sshll.u32 (%p77_p3), %s1878_s14, 1 }
  0x12   : > { %s1617_s26 = smul.u32 (%p77_p3), 384, %s1874_s13 }
  0x13   : > { %s1965_s4 = scalar_lea.vmem (%p77_p3), [#allocation3], %s1619_s24 }
  0x14   : > { %s153_s27 = sadd.s32 (%p77_p3), %s1617_s26, %s1503_s25 }
  0x15   : > { %s1505_s28 = sshll.u32 %s153_s27, 2 }
  0x16   : > { %s1960_s3 = scalar_lea.vmem %s2303_s1, %s1505_s28 }
  0x17   : > { %v374_v0 = vld [vmem:[%s1960_s3] sm:$0xff]  ;;  %v376_v1 = vld [vmem:[%s1960_s3 + $0x10] sm:$0xff] }
  0x18   : > { %v378_v2 = vld [vmem:[%s1960_s3 + $0x20] sm:$0xff]  ;;  %375 = vst [vmem:[%s1965_s4] sm:$0xff] %v374_v0  ;;  %377 = vst [vmem:[%s1965_s4 + $0x8] sm:$0xff] %v376_v1  ;;  %v380_v3 = vld [vmem:[%s1960_s3 + $0x30] sm:$0xff] }
  0x19   : > { %379 = vst [vmem:[%s1965_s4 + $0x10] sm:$0xff] %v378_v2  ;;  %v382_v4 = vld [vmem:[%s1960_s3 + $0x40] sm:$0xff]  ;;  %v384_v5 = vld [vmem:[%s1960_s3 + $0x50] sm:$0xff]  ;;  %381 = vst [vmem:[%s1965_s4 + $0x18] sm:$0xff] %v380_v3 }
  0x1a   : > { %383 = vst [vmem:[%s1965_s4 + $0x20] sm:$0xff] %v382_v4  ;;  %385 = vst [vmem:[%s1965_s4 + $0x28] sm:$0xff] %v384_v5  ;;  %v386_v6 = vld [vmem:[%s1960_s3 + $0x60] sm:$0xff]  ;;  %v388_v7 = vld [vmem:[%s1960_s3 + $0x70] sm:$0xff] }
  0x1b   : > { %v390_v8 = vld [vmem:[%s1960_s3 + $0x80] sm:$0xff]  ;;  %387 = vst [vmem:[%s1965_s4 + $0x30] sm:$0xff] %v386_v6  ;;  %389 = vst [vmem:[%s1965_s4 + $0x38] sm:$0xff] %v388_v7  ;;  %v392_v9 = vld [vmem:[%s1960_s3 + $0x90] sm:$0xff] }
  0x1c   : > { %391 = vst [vmem:[%s1965_s4 + $0x40] sm:$0xff] %v390_v8  ;;  %v394_v10 = vld [vmem:[%s1960_s3 + $0xa0] sm:$0xff]  ;;  %v396_v11 = vld [vmem:[%s1960_s3 + $0xb0] sm:$0xff]  ;;  %393 = vst [vmem:[%s1965_s4 + $0x48] sm:$0xff] %v392_v9 }
  0x1d   : > { %395 = vst [vmem:[%s1965_s4 + $0x50] sm:$0xff] %v394_v10  ;;  %397 = vst [vmem:[%s1965_s4 + $0x58] sm:$0xff] %v396_v11  ;;  %v398_v12 = vld [vmem:[%s1960_s3 + $0xc0] sm:$0xff]  ;;  %v400_v13 = vld [vmem:[%s1960_s3 + $0xd0] sm:$0xff] }
  0x1e   : > { %v402_v14 = vld [vmem:[%s1960_s3 + $0xe0] sm:$0xff]  ;;  %399 = vst [vmem:[%s1965_s4 + $0x60] sm:$0xff] %v398_v12  ;;  %401 = vst [vmem:[%s1965_s4 + $0x68] sm:$0xff] %v400_v13  ;;  %v404_v15 = vld [vmem:[%s1960_s3 + $0xf0] sm:$0xff] }
  0x1f   : > { %403 = vst [vmem:[%s1965_s4 + $0x70] sm:$0xff] %v402_v14  ;;  %v406_v16 = vld [vmem:[%s1960_s3 + $0x100] sm:$0xff]  ;;  %v408_v17 = vld [vmem:[%s1960_s3 + $0x110] sm:$0xff]  ;;  %405 = vst [vmem:[%s1965_s4 + $0x78] sm:$0xff] %v404_v15 }
  0x20   : > { %407 = vst [vmem:[%s1965_s4 + $0x80] sm:$0xff] %v406_v16  ;;  %409 = vst [vmem:[%s1965_s4 + $0x88] sm:$0xff] %v408_v17  ;;  %v410_v18 = vld [vmem:[%s1960_s3 + $0x120] sm:$0xff]  ;;  %v412_v19 = vld [vmem:[%s1960_s3 + $0x130] sm:$0xff] }
  0x21   : > { %v414_v20 = vld [vmem:[%s1960_s3 + $0x140] sm:$0xff]  ;;  %411 = vst [vmem:[%s1965_s4 + $0x90] sm:$0xff] %v410_v18  ;;  %413 = vst [vmem:[%s1965_s4 + $0x98] sm:$0xff] %v412_v19  ;;  %v416_v21 = vld [vmem:[%s1960_s3 + $0x150] sm:$0xff] }
  0x22   : > { %415 = vst [vmem:[%s1965_s4 + $0xa0] sm:$0xff] %v414_v20  ;;  %v418_v22 = vld [vmem:[%s1960_s3 + $0x160] sm:$0xff]  ;;  %v420_v23 = vld [vmem:[%s1960_s3 + $0x170] sm:$0xff]  ;;  %417 = vst [vmem:[%s1965_s4 + $0xa8] sm:$0xff] %v416_v21 }
  0x23   : > { %419 = vst [vmem:[%s1965_s4 + $0xb0] sm:$0xff] %v418_v22  ;;  %421 = vst [vmem:[%s1965_s4 + $0xb8] sm:$0xff] %v420_v23  ;;  %v422_v24 = vld [vmem:[%s1960_s3 + $0x180] sm:$0xff]  ;;  %v424_v25 = vld [vmem:[%s1960_s3 + $0x190] sm:$0xff] }
  0x24   : > { %v426_v26 = vld [vmem:[%s1960_s3 + $0x1a0] sm:$0xff]  ;;  %423 = vst [vmem:[%s1965_s4 + $0xc0] sm:$0xff] %v422_v24  ;;  %425 = vst [vmem:[%s1965_s4 + $0xc8] sm:$0xff] %v424_v25  ;;  %v428_v27 = vld [vmem:[%s1960_s3 + $0x1b0] sm:$0xff] }
  0x25   : > { %427 = vst [vmem:[%s1965_s4 + $0xd0] sm:$0xff] %v426_v26  ;;  %v430_v28 = vld [vmem:[%s1960_s3 + $0x1c0] sm:$0xff]  ;;  %v432_v29 = vld [vmem:[%s1960_s3 + $0x1d0] sm:$0xff]  ;;  %429 = vst [vmem:[%s1965_s4 + $0xd8] sm:$0xff] %v428_v27 }
  0x26   : > { %431 = vst [vmem:[%s1965_s4 + $0xe0] sm:$0xff] %v430_v28  ;;  %433 = vst [vmem:[%s1965_s4 + $0xe8] sm:$0xff] %v432_v29  ;;  %v434_v30 = vld [vmem:[%s1960_s3 + $0x1e0] sm:$0xff]  ;;  %v436_v31 = vld [vmem:[%s1960_s3 + $0x1f0] sm:$0xff] }
  0x27   : > { %v438_v32 = vld [vmem:[%s1960_s3 + $0x200] sm:$0xff]  ;;  %435 = vst [vmem:[%s1965_s4 + $0xf0] sm:$0xff] %v434_v30  ;;  %437 = vst [vmem:[%s1965_s4 + $0xf8] sm:$0xff] %v436_v31  ;;  %v440_v33 = vld [vmem:[%s1960_s3 + $0x210] sm:$0xff] }
  0x28   : > { %439 = vst [vmem:[%s1965_s4 + $0x100] sm:$0xff] %v438_v32  ;;  %v442_v34 = vld [vmem:[%s1960_s3 + $0x220] sm:$0xff]  ;;  %v444_v35 = vld [vmem:[%s1960_s3 + $0x230] sm:$0xff]  ;;  %441 = vst [vmem:[%s1965_s4 + $0x108] sm:$0xff] %v440_v33 }
  0x29   : > { %443 = vst [vmem:[%s1965_s4 + $0x110] sm:$0xff] %v442_v34  ;;  %445 = vst [vmem:[%s1965_s4 + $0x118] sm:$0xff] %v444_v35  ;;  %v446_v36 = vld [vmem:[%s1960_s3 + $0x240] sm:$0xff]  ;;  %v448_v37 = vld [vmem:[%s1960_s3 + $0x250] sm:$0xff] }
  0x2a   : > { %v450_v38 = vld [vmem:[%s1960_s3 + $0x260] sm:$0xff]  ;;  %447 = vst [vmem:[%s1965_s4 + $0x120] sm:$0xff] %v446_v36  ;;  %449 = vst [vmem:[%s1965_s4 + $0x128] sm:$0xff] %v448_v37  ;;  %v452_v39 = vld [vmem:[%s1960_s3 + $0x270] sm:$0xff] }
  0x2b   : > { %451 = vst [vmem:[%s1965_s4 + $0x130] sm:$0xff] %v450_v38  ;;  %v454_v40 = vld [vmem:[%s1960_s3 + $0x280] sm:$0xff]  ;;  %v456_v41 = vld [vmem:[%s1960_s3 + $0x290] sm:$0xff]  ;;  %453 = vst [vmem:[%s1965_s4 + $0x138] sm:$0xff] %v452_v39 }
  0x2c   : > { %455 = vst [vmem:[%s1965_s4 + $0x140] sm:$0xff] %v454_v40  ;;  %457 = vst [vmem:[%s1965_s4 + $0x148] sm:$0xff] %v456_v41  ;;  %v458_v42 = vld [vmem:[%s1960_s3 + $0x2a0] sm:$0xff]  ;;  %v460_v43 = vld [vmem:[%s1960_s3 + $0x2b0] sm:$0xff] }
  0x2d   : > { %v462_v44 = vld [vmem:[%s1960_s3 + $0x2c0] sm:$0xff]  ;;  %459 = vst [vmem:[%s1965_s4 + $0x150] sm:$0xff] %v458_v42  ;;  %461 = vst [vmem:[%s1965_s4 + $0x158] sm:$0xff] %v460_v43  ;;  %v464_v45 = vld [vmem:[%s1960_s3 + $0x2d0] sm:$0xff] }
  0x2e   : > { %463 = vst [vmem:[%s1965_s4 + $0x160] sm:$0xff] %v462_v44  ;;  %v466_v46 = vld [vmem:[%s1960_s3 + $0x2e0] sm:$0xff]  ;;  %v468_v47 = vld [vmem:[%s1960_s3 + $0x2f0] sm:$0xff]  ;;  %465 = vst [vmem:[%s1965_s4 + $0x168] sm:$0xff] %v464_v45 }
  0x2f   : > { %467 = vst [vmem:[%s1965_s4 + $0x170] sm:$0xff] %v466_v46  ;;  %469 = vst [vmem:[%s1965_s4 + $0x178] sm:$0xff] %v468_v47  ;;  %v470_v48 = vld [vmem:[%s1960_s3 + $0x300] sm:$0xff]  ;;  %v472_v49 = vld [vmem:[%s1960_s3 + $0x310] sm:$0xff] }
  0x30   : > { %v474_v50 = vld [vmem:[%s1960_s3 + $0x320] sm:$0xff]  ;;  %471 = vst [vmem:[%s1965_s4 + $0x180] sm:$0xff] %v470_v48  ;;  %473 = vst [vmem:[%s1965_s4 + $0x188] sm:$0xff] %v472_v49  ;;  %v476_v51 = vld [vmem:[%s1960_s3 + $0x330] sm:$0xff] }
  0x31   : > { %475 = vst [vmem:[%s1965_s4 + $0x190] sm:$0xff] %v474_v50  ;;  %v478_v52 = vld [vmem:[%s1960_s3 + $0x340] sm:$0xff]  ;;  %v480_v53 = vld [vmem:[%s1960_s3 + $0x350] sm:$0xff]  ;;  %477 = vst [vmem:[%s1965_s4 + $0x198] sm:$0xff] %v476_v51 }
  0x32   : > { %479 = vst [vmem:[%s1965_s4 + $0x1a0] sm:$0xff] %v478_v52  ;;  %481 = vst [vmem:[%s1965_s4 + $0x1a8] sm:$0xff] %v480_v53  ;;  %v482_v54 = vld [vmem:[%s1960_s3 + $0x360] sm:$0xff]  ;;  %v484_v55 = vld [vmem:[%s1960_s3 + $0x370] sm:$0xff] }
  0x33   : > { %v486_v56 = vld [vmem:[%s1960_s3 + $0x380] sm:$0xff]  ;;  %483 = vst [vmem:[%s1965_s4 + $0x1b0] sm:$0xff] %v482_v54  ;;  %485 = vst [vmem:[%s1965_s4 + $0x1b8] sm:$0xff] %v484_v55  ;;  %v488_v57 = vld [vmem:[%s1960_s3 + $0x390] sm:$0xff] }
  0x34   : > { %487 = vst [vmem:[%s1965_s4 + $0x1c0] sm:$0xff] %v486_v56  ;;  %v490_v58 = vld [vmem:[%s1960_s3 + $0x3a0] sm:$0xff]  ;;  %v492_v59 = vld [vmem:[%s1960_s3 + $0x3b0] sm:$0xff]  ;;  %489 = vst [vmem:[%s1965_s4 + $0x1c8] sm:$0xff] %v488_v57 }
  0x35   : > { %491 = vst [vmem:[%s1965_s4 + $0x1d0] sm:$0xff] %v490_v58  ;;  %493 = vst [vmem:[%s1965_s4 + $0x1d8] sm:$0xff] %v492_v59  ;;  %v494_v60 = vld [vmem:[%s1960_s3 + $0x3c0] sm:$0xff]  ;;  %v496_v61 = vld [vmem:[%s1960_s3 + $0x3d0] sm:$0xff] }
  0x36   : > { %v498_v62 = vld [vmem:[%s1960_s3 + $0x3e0] sm:$0xff]  ;;  %495 = vst [vmem:[%s1965_s4 + $0x1e0] sm:$0xff] %v494_v60  ;;  %497 = vst [vmem:[%s1965_s4 + $0x1e8] sm:$0xff] %v496_v61  ;;  %v500_v63 = vld [vmem:[%s1960_s3 + $0x3f0] sm:$0xff] }
  0x37   : > { %499 = vst [vmem:[%s1965_s4 + $0x1f0] sm:$0xff] %v498_v62  ;;  %v502_v0 = vld [vmem:[%s1960_s3 + $0x400] sm:$0xff]  ;;  %v504_v1 = vld [vmem:[%s1960_s3 + $0x410] sm:$0xff]  ;;  %501 = vst [vmem:[%s1965_s4 + $0x1f8] sm:$0xff] %v500_v63 }
  0x38   : > { %503 = vst [vmem:[%s1965_s4 + $0x200] sm:$0xff] %v502_v0  ;;  %505 = vst [vmem:[%s1965_s4 + $0x208] sm:$0xff] %v504_v1  ;;  %v506_v2 = vld [vmem:[%s1960_s3 + $0x420] sm:$0xff]  ;;  %v508_v3 = vld [vmem:[%s1960_s3 + $0x430] sm:$0xff] }
  0x39   : > { %v510_v4 = vld [vmem:[%s1960_s3 + $0x440] sm:$0xff]  ;;  %507 = vst [vmem:[%s1965_s4 + $0x210] sm:$0xff] %v506_v2  ;;  %509 = vst [vmem:[%s1965_s4 + $0x218] sm:$0xff] %v508_v3  ;;  %v512_v5 = vld [vmem:[%s1960_s3 + $0x450] sm:$0xff] }
  0x3a   : > { %511 = vst [vmem:[%s1965_s4 + $0x220] sm:$0xff] %v510_v4  ;;  %v514_v6 = vld [vmem:[%s1960_s3 + $0x460] sm:$0xff]  ;;  %v516_v7 = vld [vmem:[%s1960_s3 + $0x470] sm:$0xff]  ;;  %513 = vst [vmem:[%s1965_s4 + $0x228] sm:$0xff] %v512_v5 }
  0x3b   : > { %515 = vst [vmem:[%s1965_s4 + $0x230] sm:$0xff] %v514_v6  ;;  %517 = vst [vmem:[%s1965_s4 + $0x238] sm:$0xff] %v516_v7  ;;  %v518_v8 = vld [vmem:[%s1960_s3 + $0x480] sm:$0xff]  ;;  %v520_v9 = vld [vmem:[%s1960_s3 + $0x490] sm:$0xff] }
  0x3c   : > { %v522_v10 = vld [vmem:[%s1960_s3 + $0x4a0] sm:$0xff]  ;;  %519 = vst [vmem:[%s1965_s4 + $0x240] sm:$0xff] %v518_v8  ;;  %521 = vst [vmem:[%s1965_s4 + $0x248] sm:$0xff] %v520_v9  ;;  %v524_v11 = vld [vmem:[%s1960_s3 + $0x4b0] sm:$0xff] }
  0x3d   : > { %523 = vst [vmem:[%s1965_s4 + $0x250] sm:$0xff] %v522_v10  ;;  %v526_v12 = vld [vmem:[%s1960_s3 + $0x4c0] sm:$0xff]  ;;  %v528_v13 = vld [vmem:[%s1960_s3 + $0x4d0] sm:$0xff]  ;;  %525 = vst [vmem:[%s1965_s4 + $0x258] sm:$0xff] %v524_v11 }
  0x3e   : > { %527 = vst [vmem:[%s1965_s4 + $0x260] sm:$0xff] %v526_v12  ;;  %529 = vst [vmem:[%s1965_s4 + $0x268] sm:$0xff] %v528_v13  ;;  %v530_v14 = vld [vmem:[%s1960_s3 + $0x4e0] sm:$0xff]  ;;  %v532_v15 = vld [vmem:[%s1960_s3 + $0x4f0] sm:$0xff] }
  0x3f   : > { %v534_v16 = vld [vmem:[%s1960_s3 + $0x500] sm:$0xff]  ;;  %531 = vst [vmem:[%s1965_s4 + $0x270] sm:$0xff] %v530_v14  ;;  %533 = vst [vmem:[%s1965_s4 + $0x278] sm:$0xff] %v532_v15  ;;  %v536_v17 = vld [vmem:[%s1960_s3 + $0x510] sm:$0xff] }
  0x40   : > { %535 = vst [vmem:[%s1965_s4 + $0x280] sm:$0xff] %v534_v16  ;;  %v538_v18 = vld [vmem:[%s1960_s3 + $0x520] sm:$0xff]  ;;  %v540_v19 = vld [vmem:[%s1960_s3 + $0x530] sm:$0xff]  ;;  %537 = vst [vmem:[%s1965_s4 + $0x288] sm:$0xff] %v536_v17 }
  0x41   : > { %539 = vst [vmem:[%s1965_s4 + $0x290] sm:$0xff] %v538_v18  ;;  %541 = vst [vmem:[%s1965_s4 + $0x298] sm:$0xff] %v540_v19  ;;  %v542_v20 = vld [vmem:[%s1960_s3 + $0x540] sm:$0xff]  ;;  %v544_v21 = vld [vmem:[%s1960_s3 + $0x550] sm:$0xff] }
  0x42   : > { %v546_v22 = vld [vmem:[%s1960_s3 + $0x560] sm:$0xff]  ;;  %543 = vst [vmem:[%s1965_s4 + $0x2a0] sm:$0xff] %v542_v20  ;;  %545 = vst [vmem:[%s1965_s4 + $0x2a8] sm:$0xff] %v544_v21  ;;  %v548_v23 = vld [vmem:[%s1960_s3 + $0x570] sm:$0xff] }
  0x43   : > { %547 = vst [vmem:[%s1965_s4 + $0x2b0] sm:$0xff] %v546_v22  ;;  %v550_v24 = vld [vmem:[%s1960_s3 + $0x580] sm:$0xff]  ;;  %v552_v25 = vld [vmem:[%s1960_s3 + $0x590] sm:$0xff]  ;;  %549 = vst [vmem:[%s1965_s4 + $0x2b8] sm:$0xff] %v548_v23 }
  0x44   : > { %551 = vst [vmem:[%s1965_s4 + $0x2c0] sm:$0xff] %v550_v24  ;;  %553 = vst [vmem:[%s1965_s4 + $0x2c8] sm:$0xff] %v552_v25  ;;  %v554_v26 = vld [vmem:[%s1960_s3 + $0x5a0] sm:$0xff]  ;;  %v556_v27 = vld [vmem:[%s1960_s3 + $0x5b0] sm:$0xff] }
  0x45   : > { %v558_v28 = vld [vmem:[%s1960_s3 + $0x5c0] sm:$0xff]  ;;  %555 = vst [vmem:[%s1965_s4 + $0x2d0] sm:$0xff] %v554_v26  ;;  %557 = vst [vmem:[%s1965_s4 + $0x2d8] sm:$0xff] %v556_v27  ;;  %v560_v29 = vld [vmem:[%s1960_s3 + $0x5d0] sm:$0xff] }
  0x46   : > { %559 = vst [vmem:[%s1965_s4 + $0x2e0] sm:$0xff] %v558_v28  ;;  %v562_v30 = vld [vmem:[%s1960_s3 + $0x5e0] sm:$0xff]  ;;  %v564_v31 = vld [vmem:[%s1960_s3 + $0x5f0] sm:$0xff]  ;;  %561 = vst [vmem:[%s1965_s4 + $0x2e8] sm:$0xff] %v560_v29 }
  0x47   : > { %563 = vst [vmem:[%s1965_s4 + $0x2f0] sm:$0xff] %v562_v30  ;;  %565 = vst [vmem:[%s1965_s4 + $0x2f8] sm:$0xff] %v564_v31 }
  0x48 PF: > { %p1506_p7 = scmp.ge.s32.totalorder %s1882_s15, 1  ;;  %p570_p8 = scmp.lt.s32.totalorder %s1882_s15, 7 }
  0x4a   : > { %p571_p9 = pnand %p1506_p7, %p570_p8 }
  0x4b   : > { %s577_s5 = sand.u32 (!%p571_p9), 1, %s1858_s9   ;;  %s611_s6 = smul.u32 (!%p571_p9), 6, %s1866_s11 }
  0x4c   : > { %574 = sbr.rel (%p571_p9) target bundleno = 432 (0x1b0), region = 62  ;;  %s1508_s8 = sshll.u32 (!%p571_p9), %s1870_s12, 1 }
  0x4d   : > { %s1620_s7 = smul.u32 (!%p571_p9), 768, %s577_s5  ;;  %p614_p10 = scmp.lt.s32.totalorder (!%p571_p9), %s611_s6, 17 }
  0x4e   : > { %p626_p11 = scmp.lt.s32.totalorder (!%p571_p9), %s1508_s8, 3  ;;  %p1510_p12 = scmp.ne.s32.totalorder (!%p571_p9), %s1866_s11, 0 }
  0x4f   : > { %s2171_s9 = scalar_lea.vmem (!%p571_p9), [#allocation3], %s1620_s7 }
  0x51   : > { %s2318_s6 = smov (!%p614_p10, %s611_s6), 17  ;;  %s2320_s8 = smov (!%p626_p11, %s1508_s8), 3 }
  0x52   : > { %s1507_s18 = sshll.u32 %s2318_s6, 2  ;;  %s1509_s23 = sshll.u32 %s2320_s8, 2 }
  0x53   : > { %s2164_s21 = scalar_lea.vmem %s2302_s0, %s1507_s18  ;;  %s2169_s26 = scalar_lea.vmem %s2304_s2, %s1509_s23 }
  0x54   : > { %636 = sbr.rel (%p1510_p12) target bundleno = 91 (0x5b), region = 70 }
  0x59   : > { %v1884_v32 = vmov 0.0  }
  0x5a   : > { %637 = vst [vmem:[#allocation2] sm:$0xff] %v1884_v32  ;;  %638 = vst [vmem:[#allocation2 + $0x8] sm:$0xff] %v1884_v32 }
  0x5b PF: > { %v1678_v33 = vld [vmem:[%s2171_s9 + $0x74] ss:$8 sps:$4 sm:$0xff]   ;;  %v1682_v35 = vld [vmem:[%s2171_s9 + $0x70] ss:$8 sps:$4 sm:$0xff]   ;;  %v1684_v37 = vld [vmem:[%s2171_s9 + $0x64] ss:$8 sps:$4 sm:$0xff]  }
  0x5c   : > { %v1680_v34 = vld [vmem:[%s2171_s9 + $0x174] ss:$8 sps:$4 sm:$0xff]   ;;  %1241 = vmatprep.subr.bf16.mxu0 %v1678_v33  ;;  %v1683_v36 = vld [vmem:[%s2171_s9 + $0x170] ss:$8 sps:$4 sm:$0xff]   ;;  %v1686_v38 = vld [vmem:[%s2171_s9 + $0x164] ss:$8 sps:$4 sm:$0xff]  }
  0x5d   : > { %1282 = vmatprep.subr.bf16.mxu1 %v1680_v34  ;;  %1242 = vmatpush1.bf16.msra.mxu0 %v1682_v35  ;;  %v1688_v39 = vld [vmem:[%s2171_s9 + $0x60] ss:$8 sps:$4 sm:$0xff]   ;;  %v1690_v41 = vld [vmem:[%s2171_s9 + $0x54] ss:$8 sps:$4 sm:$0xff]   ;;  %v1694_v43 = vld [vmem:[%s2171_s9 + $0x50] ss:$8 sps:$4 sm:$0xff]  }
  0x5e   : > { %1283 = vmatpush1.bf16.msra.mxu1 %v1683_v36  ;;  %1243 = vmatprep.subr.bf16.mxu0 %v1684_v37  ;;  %v1689_v40 = vld [vmem:[%s2171_s9 + $0x160] ss:$8 sps:$4 sm:$0xff]   ;;  %v1692_v42 = vld [vmem:[%s2171_s9 + $0x154] ss:$8 sps:$4 sm:$0xff]   ;;  %v1695_v44 = vld [vmem:[%s2171_s9 + $0x150] ss:$8 sps:$4 sm:$0xff]  }
  0x5f   : > { %1284 = vmatprep.subr.bf16.mxu1 %v1686_v38  ;;  %v1696_v45 = vld [vmem:[%s2171_s9 + $0x44] ss:$8 sps:$4 sm:$0xff]   ;;  %v1700_v47 = vld [vmem:[%s2171_s9 + $0x40] ss:$8 sps:$4 sm:$0xff]   ;;  %v1702_v49 = vld [vmem:[%s2171_s9 + $0x34] ss:$8 sps:$4 sm:$0xff]  }
  0x60   : > { %v1698_v46 = vld [vmem:[%s2171_s9 + $0x144] ss:$8 sps:$4 sm:$0xff]   ;;  %v1701_v48 = vld [vmem:[%s2171_s9 + $0x140] ss:$8 sps:$4 sm:$0xff]   ;;  %v1704_v50 = vld [vmem:[%s2171_s9 + $0x134] ss:$8 sps:$4 sm:$0xff]  }
  0x61   : > { %1244 = vmatpush1.bf16.msra.mxu0 %v1688_v39  ;;  %v1706_v51 = vld [vmem:[%s2171_s9 + $0x30] ss:$8 sps:$4 sm:$0xff]   ;;  %v1708_v53 = vld [vmem:[%s2171_s9 + $0x24] ss:$8 sps:$4 sm:$0xff]   ;;  %v1712_v55 = vld [vmem:[%s2171_s9 + $0x20] ss:$8 sps:$4 sm:$0xff]  }
  0x62   : > { %1285 = vmatpush1.bf16.msra.mxu1 %v1689_v40  ;;  %1245 = vmatprep.subr.bf16.mxu0 %v1690_v41  ;;  %v1707_v52 = vld [vmem:[%s2171_s9 + $0x130] ss:$8 sps:$4 sm:$0xff]   ;;  %v1710_v54 = vld [vmem:[%s2171_s9 + $0x124] ss:$8 sps:$4 sm:$0xff]   ;;  %v1713_v56 = vld [vmem:[%s2171_s9 + $0x120] ss:$8 sps:$4 sm:$0xff]  }
  0x63   : > { %1286 = vmatprep.subr.bf16.mxu1 %v1692_v42  ;;  %v1714_v57 = vld [vmem:[%s2171_s9 + $0x14] ss:$8 sps:$4 sm:$0xff]   ;;  %v1718_v59 = vld [vmem:[%s2171_s9 + $0x10] ss:$8 sps:$4 sm:$0xff]   ;;  %v1720_v61 = vld [vmem:[%s2171_s9 + $0x4] ss:$8 sps:$4 sm:$0xff]  }
  0x64   : > { %v1716_v58 = vld [vmem:[%s2171_s9 + $0x114] ss:$8 sps:$4 sm:$0xff]   ;;  %v1719_v60 = vld [vmem:[%s2171_s9 + $0x110] ss:$8 sps:$4 sm:$0xff]   ;;  %v1722_v62 = vld [vmem:[%s2171_s9 + $0x104] ss:$8 sps:$4 sm:$0xff]  }
  0x65   : > { %1246 = vmatpush1.bf16.msra.mxu0 %v1694_v43  ;;  %v1724_v63 = vld [vmem:[%s2171_s9] ss:$8 sps:$4 sm:$0xff]   ;;  %v1726_v1 = vld [vmem:[%s2171_s9 + $0xf4] ss:$8 sps:$4 sm:$0xff]   ;;  %v1730_v3 = vld [vmem:[%s2171_s9 + $0xf0] ss:$8 sps:$4 sm:$0xff]  }
  0x66   : > { %1287 = vmatpush1.bf16.msra.mxu1 %v1695_v44  ;;  %1247 = vmatprep.subr.bf16.mxu0 %v1696_v45  ;;  %v1725_v0 = vld [vmem:[%s2171_s9 + $0x100] ss:$8 sps:$4 sm:$0xff]   ;;  %v1728_v2 = vld [vmem:[%s2171_s9 + $0x1f4] ss:$8 sps:$4 sm:$0xff]   ;;  %v1731_v4 = vld [vmem:[%s2171_s9 + $0x1f0] ss:$8 sps:$4 sm:$0xff]  }
  0x67   : > { %1288 = vmatprep.subr.bf16.mxu1 %v1698_v46  ;;  %v1732_v5 = vld [vmem:[%s2171_s9 + $0xe4] ss:$8 sps:$4 sm:$0xff]   ;;  %v1736_v7 = vld [vmem:[%s2171_s9 + $0xe0] ss:$8 sps:$4 sm:$0xff]   ;;  %v1738_v9 = vld [vmem:[%s2171_s9 + $0xd4] ss:$8 sps:$4 sm:$0xff]  }
  0x68   : > { %v1734_v6 = vld [vmem:[%s2171_s9 + $0x1e4] ss:$8 sps:$4 sm:$0xff]   ;;  %v1737_v8 = vld [vmem:[%s2171_s9 + $0x1e0] ss:$8 sps:$4 sm:$0xff]   ;;  %v1740_v10 = vld [vmem:[%s2171_s9 + $0x1d4] ss:$8 sps:$4 sm:$0xff]  }
  0x69   : > { %1248 = vmatpush1.bf16.msra.mxu0 %v1700_v47  ;;  %v1742_v11 = vld [vmem:[%s2171_s9 + $0xd0] ss:$8 sps:$4 sm:$0xff]   ;;  %v1744_v13 = vld [vmem:[%s2171_s9 + $0xc4] ss:$8 sps:$4 sm:$0xff]   ;;  %v1748_v18 = vld [vmem:[%s2171_s9 + $0xc0] ss:$8 sps:$4 sm:$0xff]  }
  0x6a   : > { %1289 = vmatpush1.bf16.msra.mxu1 %v1701_v48  ;;  %1249 = vmatprep.subr.bf16.mxu0 %v1702_v49  ;;  %v1743_v12 = vld [vmem:[%s2171_s9 + $0x1d0] ss:$8 sps:$4 sm:$0xff]   ;;  %v1746_v14 = vld [vmem:[%s2171_s9 + $0x1c4] ss:$8 sps:$4 sm:$0xff]   ;;  %v1749_v19 = vld [vmem:[%s2171_s9 + $0x1c0] ss:$8 sps:$4 sm:$0xff]  }
  0x6b   : > { %1290 = vmatprep.subr.bf16.mxu1 %v1704_v50  ;;  %v641_v15 = vld [vmem:[%s2164_s21] sm:$0xff]  ;;  %v642_v17 = vld [vmem:[%s2164_s21 + $0x8] sm:$0xff]  ;;  %v1756_v25 = vld [vmem:[%s2171_s9 + $0xa4] ss:$8 sps:$4 sm:$0xff]   ;;  %p1613_p13 = scmp.ne.s32.totalorder %s1866_s11, 2 }
  0x6c   : > { %v1512_v16 = vcombine.high %v641_v15, %v641_v15  ;;  %v1514_v20 = vcombine.high %v642_v17, %v642_v17  ;;  %v1750_v21 = vld [vmem:[%s2171_s9 + $0xb4] ss:$8 sps:$4 sm:$0xff]   ;;  %v1754_v23 = vld [vmem:[%s2171_s9 + $0xb0] ss:$8 sps:$4 sm:$0xff]   ;;  %v1758_v26 = vld [vmem:[%s2171_s9 + $0x1a4] ss:$8 sps:$4 sm:$0xff]   ;;  %v1511_v38 = vcombine.low %v641_v15, %v641_v15  ;;  %v1513_v39 = vcombine.low %v642_v17, %v642_v17 }
  0x6d   : > { %1250 = vmatpush1.bf16.msra.mxu0 %v1706_v51  ;;  %v1752_v22 = vld [vmem:[%s2171_s9 + $0x1b4] ss:$8 sps:$4 sm:$0xff]   ;;  %v1755_v24 = vld [vmem:[%s2171_s9 + $0x1b0] ss:$8 sps:$4 sm:$0xff]   ;;  %v1760_v27 = vld [vmem:[%s2171_s9 + $0xa0] ss:$8 sps:$4 sm:$0xff]  }
  0x6e   : > { %1291 = vmatpush1.bf16.msra.mxu1 %v1707_v52  ;;  %1251 = vmatprep.subr.bf16.mxu0 %v1708_v53  ;;  %v1761_v28 = vld [vmem:[%s2171_s9 + $0x1a0] ss:$8 sps:$4 sm:$0xff]   ;;  %v1762_v29 = vld [vmem:[%s2171_s9 + $0x94] ss:$8 sps:$4 sm:$0xff]   ;;  %v1766_v31 = vld [vmem:[%s2171_s9 + $0x90] ss:$8 sps:$4 sm:$0xff]  }
  0x6f   : > { %1292 = vmatprep.subr.bf16.mxu1 %v1710_v54  ;;  %1273 = vmatprep.mubr.bf16.mxu0 %v1512_v16  ;;  %v1764_v30 = vld [vmem:[%s2171_s9 + $0x194] ss:$8 sps:$4 sm:$0xff]   ;;  %v1767_v32 = vld [vmem:[%s2171_s9 + $0x190] ss:$8 sps:$4 sm:$0xff]   ;;  %v1768_v33 = vld [vmem:[%s2171_s9 + $0x84] ss:$8 sps:$4 sm:$0xff]  }
  0x70   : > { %1314 = vmatprep.mubr.bf16.mxu1 %v1514_v20  ;;  %v1770_v34 = vld [vmem:[%s2171_s9 + $0x184] ss:$8 sps:$4 sm:$0xff]   ;;  %v1772_v35 = vld [vmem:[%s2171_s9 + $0x80] ss:$8 sps:$4 sm:$0xff]   ;;  %v1780_v37 = vld [vmem:[%s2171_s9 + $0x274] ss:$8 sps:$4 sm:$0xff]  }
  0x71   : > { %1252 = vmatpush1.bf16.msra.mxu0 %v1712_v55  ;;  %v1773_v36 = vld [vmem:[%s2171_s9 + $0x180] ss:$8 sps:$4 sm:$0xff]   ;;  %v1778_v40 = vld [vmem:[%s2171_s9 + $0x270] ss:$8 sps:$4 sm:$0xff]   ;;  %v1783_v42 = vld [vmem:[%s2171_s9 + $0x264] ss:$8 sps:$4 sm:$0xff]  }
  0x72   : > { %1293 = vmatpush1.bf16.msra.mxu1 %v1713_v56  ;;  %1253 = vmatprep.subr.bf16.mxu0 %v1714_v57  ;;  %v2243_v41 = vld [vmem:[%s2164_s21 + $0x10] sm:$0xff]  ;;  %v1786_v45 = vld [vmem:[%s2171_s9 + $0x254] ss:$8 sps:$4 sm:$0xff]   ;;  %v1784_v46 = vld [vmem:[%s2171_s9 + $0x250] ss:$8 sps:$4 sm:$0xff]  }
  0x73   : > { %1294 = vmatprep.subr.bf16.mxu1 %v1716_v58  ;;  %v1516_v43 = vcombine.high %v2243_v41, %v2243_v41  ;;  %v1781_v44 = vld [vmem:[%s2171_s9 + $0x260] ss:$8 sps:$4 sm:$0xff]   ;;  %v1789_v47 = vld [vmem:[%s2171_s9 + $0x244] ss:$8 sps:$4 sm:$0xff]   ;;  %v1792_v49 = vld [vmem:[%s2171_s9 + $0x234] ss:$8 sps:$4 sm:$0xff]  }
  0x74   : > { %v1787_v48 = vld [vmem:[%s2171_s9 + $0x240] ss:$8 sps:$4 sm:$0xff]   ;;  %v1790_v50 = vld [vmem:[%s2171_s9 + $0x230] ss:$8 sps:$4 sm:$0xff]   ;;  %v1795_v51 = vld [vmem:[%s2171_s9 + $0x224] ss:$8 sps:$4 sm:$0xff]  }
  0x75   : > { %1254 = vmatpush1.bf16.msra.mxu0 %v1718_v59  ;;  %v1793_v52 = vld [vmem:[%s2171_s9 + $0x220] ss:$8 sps:$4 sm:$0xff]   ;;  %v1798_v53 = vld [vmem:[%s2171_s9 + $0x214] ss:$8 sps:$4 sm:$0xff]   ;;  %v1796_v54 = vld [vmem:[%s2171_s9 + $0x210] ss:$8 sps:$4 sm:$0xff]  }
  0x76   : > { %1295 = vmatpush1.bf16.msra.mxu1 %v1719_v60  ;;  %1255 = vmatprep.subr.bf16.mxu0 %v1720_v61  ;;  %v1801_v55 = vld [vmem:[%s2171_s9 + $0x204] ss:$8 sps:$4 sm:$0xff]   ;;  %v1799_v56 = vld [vmem:[%s2171_s9 + $0x200] ss:$8 sps:$4 sm:$0xff]   ;;  %v1804_v57 = vld [vmem:[%s2171_s9 + $0x2f4] ss:$8 sps:$4 sm:$0xff]  }
  0x77   : > { %1296 = vmatprep.subr.bf16.mxu1 %v1722_v62  ;;  %v1802_v58 = vld [vmem:[%s2171_s9 + $0x2f0] ss:$8 sps:$4 sm:$0xff]   ;;  %v1807_v59 = vld [vmem:[%s2171_s9 + $0x2e4] ss:$8 sps:$4 sm:$0xff]   ;;  %v1805_v60 = vld [vmem:[%s2171_s9 + $0x2e0] ss:$8 sps:$4 sm:$0xff]  }
  0x78   : > { %v1810_v61 = vld [vmem:[%s2171_s9 + $0x2d4] ss:$8 sps:$4 sm:$0xff]   ;;  %v1808_v62 = vld [vmem:[%s2171_s9 + $0x2d0] ss:$8 sps:$4 sm:$0xff]  }
  0x79   : > { %1256 = vmatpush1.bf16.msra.mxu0 %v1724_v63  ;;  %v1813_v63 = vld [vmem:[%s2171_s9 + $0x2c4] ss:$8 sps:$4 sm:$0xff]  }
  0x7a   : > { %1297 = vmatpush1.bf16.msra.mxu1 %v1725_v0  ;;  %1257 = vmatprep.subr.bf16.mxu0 %v1726_v1  ;;  %v1811_v0 = vld [vmem:[%s2171_s9 + $0x2c0] ss:$8 sps:$4 sm:$0xff]   ;;  %v1816_v1 = vld [vmem:[%s2171_s9 + $0x2b4] ss:$8 sps:$4 sm:$0xff]  }
  0x7b   : > { %1298 = vmatprep.subr.bf16.mxu1 %v1728_v2  ;;  %v1814_v2 = vld [vmem:[%s2171_s9 + $0x2b0] ss:$8 sps:$4 sm:$0xff]  }
  0x7d   : > { %1258 = vmatpush2.bf16.msra.mxu0 %v1730_v3  ;;  %v1819_v3 = vld [vmem:[%s2171_s9 + $0x2a4] ss:$8 sps:$4 sm:$0xff]  }
  0x7e   : > { %1299 = vmatpush2.bf16.msra.mxu1 %v1731_v4  ;;  %1259 = vmatprep.subr.bf16.mxu0 %v1732_v5  ;;  %v1817_v4 = vld [vmem:[%s2171_s9 + $0x2a0] ss:$8 sps:$4 sm:$0xff]   ;;  %v1822_v5 = vld [vmem:[%s2171_s9 + $0x294] ss:$8 sps:$4 sm:$0xff]  }
  0x7f   : > { %1300 = vmatprep.subr.bf16.mxu1 %v1734_v6  ;;  %v1820_v6 = vld [vmem:[%s2171_s9 + $0x290] ss:$8 sps:$4 sm:$0xff]  }
  0x81   : > { %1260 = vmatpush2.bf16.msra.mxu0 %v1736_v7  ;;  %v1825_v7 = vld [vmem:[%s2171_s9 + $0x284] ss:$8 sps:$4 sm:$0xff]  }
  0x82   : > { %1301 = vmatpush2.bf16.msra.mxu1 %v1737_v8  ;;  %1261 = vmatprep.subr.bf16.mxu0 %v1738_v9  ;;  %v1823_v8 = vld [vmem:[%s2171_s9 + $0x280] ss:$8 sps:$4 sm:$0xff]   ;;  %v1515_v9 = vcombine.low %v2243_v41, %v2243_v41 }
  0x83   : > { %1302 = vmatprep.subr.bf16.mxu1 %v1740_v10 }
  0x85   : > { %1262 = vmatpush2.bf16.msra.mxu0 %v1742_v11 }
  0x86   : > { %1303 = vmatpush2.bf16.msra.mxu1 %v1743_v12  ;;  %1263 = vmatprep.subr.bf16.mxu0 %v1744_v13 }
  0x87   : > { %1304 = vmatprep.subr.bf16.mxu1 %v1746_v14 }
  0x89   : > { %1264 = vmatpush2.bf16.msra.mxu0 %v1748_v18 }
  0x8a   : > { %1305 = vmatpush2.bf16.msra.mxu1 %v1749_v19  ;;  %1265 = vmatprep.subr.bf16.mxu0 %v1750_v21  ;;  %v639_v19 = vld [vmem:[#allocation2] sm:$0xff] }
  0x8b   : > { %1306 = vmatprep.subr.bf16.mxu1 %v1752_v22 }
  0x8d   : > { %1266 = vmatpush2.bf16.msra.mxu0 %v1754_v23  ;;  %v640_v23 = vld [vmem:[#allocation2 + $0x8] sm:$0xff] }
  0x8e   : > { %1307 = vmatpush2.bf16.msra.mxu1 %v1755_v24  ;;  %1267 = vmatprep.subr.bf16.mxu0 %v1756_v25 }
  0x8f   : > { %1308 = vmatprep.subr.bf16.mxu1 %v1758_v26 }
  0x91   : > { %1268 = vmatpush2.bf16.msra.mxu0 %v1760_v27 }
  0x92   : > { %1309 = vmatpush2.bf16.msra.mxu1 %v1761_v28  ;;  %1269 = vmatprep.subr.bf16.mxu0 %v1762_v29 }
  0x93   : > { %1310 = vmatprep.subr.bf16.mxu1 %v1764_v30 }
  0x95   : > { %1270 = vmatpush2.bf16.msra.mxu0 %v1766_v31 }
  0x96   : > { %1311 = vmatpush2.bf16.msra.mxu1 %v1767_v32  ;;  %1271 = vmatprep.subr.bf16.mxu0 %v1768_v33 }
  0x97   : > { %1312 = vmatprep.subr.bf16.mxu1 %v1770_v34 }
  0x99   : > { %1272 = vmatpush2.bf16.msra.mxu0 %v1772_v35 }
  0x9a   : > { %1313 = vmatpush2.bf16.msra.mxu1 %v1773_v36  ;;  %1323 = vmatprep.subr.bf16.mxu0 %v1780_v37 }
  0x9c   : > { %1274 = vmatmul.mubr.bf16.vlgmr.msra.gmra.mxu0 %v1511_v38 }
  0x9d   : > { %1315 = vmatmul.mubr.bf16.vlgmr.msra.gmra.mxu1 %v1513_v39  ;;  %1324 = vmatpush1.bf16.msra.mxu0 %v1778_v40 }
  0x9e   : > { %1355 = vmatprep.mubr.bf16.mxu0 %v1516_v43  ;;  %1325 = vmatprep.subr.bf16.mxu0 %v1783_v42 }
  0xa1   : > { %1326 = vmatpush1.bf16.msra.mxu0 %v1781_v44 }
  0xa2   : > { %1327 = vmatprep.subr.bf16.mxu0 %v1786_v45 }
  0xa5   : > { %1328 = vmatpush1.bf16.msra.mxu0 %v1784_v46 }
  0xa6   : > { %1329 = vmatprep.subr.bf16.mxu0 %v1789_v47 }
  0xa9   : > { %1330 = vmatpush1.bf16.msra.mxu0 %v1787_v48 }
  0xaa   : > { %1331 = vmatprep.subr.bf16.mxu0 %v1792_v49 }
  0xad   : > { %1332 = vmatpush1.bf16.msra.mxu0 %v1790_v50 }
  0xae   : > { %1333 = vmatprep.subr.bf16.mxu0 %v1795_v51 }
  0xb1   : > { %1334 = vmatpush1.bf16.msra.mxu0 %v1793_v52 }
  0xb2   : > { %1335 = vmatprep.subr.bf16.mxu0 %v1798_v53 }
  0xb5   : > { %1336 = vmatpush1.bf16.msra.mxu0 %v1796_v54 }
  0xb6   : > { %1337 = vmatprep.subr.bf16.mxu0 %v1801_v55 }
  0xb9   : > { %1338 = vmatpush1.bf16.msra.mxu0 %v1799_v56 }
  0xba   : > { %1339 = vmatprep.subr.bf16.mxu0 %v1804_v57 }
  0xbd   : > { %1340 = vmatpush2.bf16.msra.mxu0 %v1802_v58 }
  0xbe   : > { %1341 = vmatprep.subr.bf16.mxu0 %v1807_v59 }
  0xc1   : > { %1342 = vmatpush2.bf16.msra.mxu0 %v1805_v60 }
  0xc2   : > { %1343 = vmatprep.subr.bf16.mxu0 %v1810_v61 }
  0xc5   : > { %1344 = vmatpush2.bf16.msra.mxu0 %v1808_v62 }
  0xc6   : > { %1345 = vmatprep.subr.bf16.mxu0 %v1813_v63 }
  0xc9   : > { %1346 = vmatpush2.bf16.msra.mxu0 %v1811_v0 }
  0xca   : > { %1347 = vmatprep.subr.bf16.mxu0 %v1816_v1 }
  0xcd   : > { %1348 = vmatpush2.bf16.msra.mxu0 %v1814_v2 }
  0xce   : > { %1349 = vmatprep.subr.bf16.mxu0 %v1819_v3 }
  0xd1   : > { %1350 = vmatpush2.bf16.msra.mxu0 %v1817_v4 }
  0xd2   : > { %1351 = vmatprep.subr.bf16.mxu0 %v1822_v5 }
  0xd5   : > { %1352 = vmatpush2.bf16.msra.mxu0 %v1820_v6 }
  0xd6   : > { %1353 = vmatprep.subr.bf16.mxu0 %v1825_v7 }
  0xd9   : > { %1354 = vmatpush2.bf16.msra.mxu0 %v1823_v8 }
  0xdc   : > { %1356 = vmatmul.mubr.bf16.vlgmr.msra.gmra.mxu0 %v1515_v9 }
 0x15c   : > { %v1275_v10 = vpop.f32.mrf.mxu0 }
 0x15d   : > { %v1316_v11 = vpop.f32.mrf.mxu1 }
 0x15e   : > { %v1277_v12 = vpop.f32.mrf.mxu0  ;;  %v1317_v18 = vadd.f32 %v1316_v11, %v1275_v10 }
 0x15f   : > { %v1318_v13 = vpop.f32.mrf.mxu1 }
 0x160   : > { %v1279_v14 = vpop.f32.mrf.mxu0  ;;  %v1319_v21 = vadd.f32 %v1318_v13, %v1277_v12 }
 0x161   : > { %v1320_v15 = vpop.f32.mrf.mxu1 }
 0x162   : > { %v1280_v16 = vpop.f32.mrf.mxu0 }
 0x163   : > { %v1321_v17 = vpop.f32.mrf.mxu1 }
 0x19c   : > { %v1357_v20 = vpop.f32.mrf.mxu0 }
 0x19d   : > { %v1358_v22 = vadd.f32 %v1357_v20, %v1317_v18 }
 0x19e   : > { %v1359_v24 = vpop.f32.mrf.mxu0 }
 0x19f   : > { %v1364_v25 = vadd.f32 %v1358_v22, %v639_v19  ;;  %v1360_v26 = vadd.f32 %v1359_v24, %v1319_v21  ;;  %1371 = sbr.rel (%p1613_p13) target bundleno = 432 (0x1b0), region = 74 }
 0x1a0   : > { %v1361_v27 = vpop.f32.mrf.mxu0 }
 0x1a1   : > { %1366 = vst [vmem:[#allocation2] sm:$0xff] %v1364_v25  ;;  %v1365_v28 = vadd.f32 %v1360_v26, %v640_v23 }
 0x1a2   : > { %v1362_v29 = vpop.f32.mrf.mxu0 }
 0x1a3   : > { %1367 = vst [vmem:[#allocation2 + $0x8] sm:$0xff] %v1365_v28 }
 0x1a8   : > { %v1372_v30 = vld [vmem:[#allocation2] sm:$0xff] }
 0x1a9   : > { %v1374_v32 = vmax.f32 %v1372_v30, 0.0 }
 0x1aa   : > { %v1373_v31 = vld [vmem:[#allocation2 + $0x8] sm:$0xff] }
 0x1ab   : > { %v1375_v33 = vmax.f32 %v1373_v31, 0.0 }
 0x1ad   : > { %v1618_v34 = vpack.c.bf16 %v1375_v33, %v1374_v32 }
 0x1af   : > { %1384 = vst [vmem:[%s2169_s26] sm:$0xff] %v1618_v34 }
 0x1b0 PF: > { %s12_s15 = sadd.s32 1, %s1882_s15   ;;  %s2305_s9 = smov %s1862_s10 }
 0x1b1   : > { %p9_p0 = scmp.ge.s32.totalorder %s12_s15, 8   ;;  %s2306_s10 = smov %s1951_s22 }
 0x1b2   : > { %s2307_s11 = smov %s1874_s13  ;;  %s2308_s12 = smov %s1878_s14 }
 0x1b3   : > { %s2309_s13 = smov %s2312_s16  ;;  %s2310_s14 = smov %s2316_s17 }
 0x1b4   :  { %11 = sbr.rel (!%p9_p0) target bundleno = 4 (0x4), region = 112 }

// kernel: resnet_forward.22
= control target key start
LH: loop header
LB: loop body
LE: loop exit
PB: predicated region body
PF: predicated region fallthrough
CT: control target
= control target key end

     0   :  { %s954_s9 = smov 0   ;;  %s956_s10 = smov 0   ;;  %s1130_s0 = inlined_call_operand.vmem [shape: bf16[8,256], index: 0, kind: input, shape index: {}]   ;;  %s1131_s1 = inlined_call_operand.vmem [shape: bf16[256,512], index: 1, kind: input, shape index: {}]   ;;  %s1132_s2 = inlined_call_operand.vmem [shape: bf16[8,512], index: 2, kind: output, shape index: {}]  }
   0x1   :  { %s958_s11 = smov 0   ;;  %s960_s12 = smov 0  }
   0x2   :  { %s962_s13 = smov 0  }
   0x3 LB: > { %s27_s14 = sadd.s32 1, %s933_s12  ;;  %p75_p1 = scmp.ne.s32.totalorder %s925_s10, %s921_s9  ;;  %s937_s13 = sphi %s962_s13, %s12_s13   ;;  %s933_s12 = sphi %s960_s12, %s1136_s12   ;;  %s929_s11 = sphi %s958_s11, %s1135_s11   ;;  %s925_s10 = sphi %s956_s10, %s1134_s10   ;;  %s921_s9 = sphi %s954_s9, %s1133_s9  }
   0x4   : > { %p29_p0 = scmp.ge.s32.totalorder %s27_s14, 2  ;;  %p76_p2 = scmp.eq.s32.totalorder %s937_s13, 0 }
   0x5   : > { %s68_s16 = sadd.s32 1, %s925_s10  ;;  %p762_p5 = scmp.ge.s32.totalorder %s937_s13, 2 }
   0x6   : > { %s1138_s14 = smov (%p29_p0, %s27_s14), 0  ;;  %p77_p3 = por %p76_p2, %p75_p1 }
   0x7   : > { %s64_s15 = ssub.s32 %s933_s12, %s1138_s14  ;;  %142 = sbr.rel (%p762_p5) target bundleno = 32 (0x20), region = 20 }
   0x8   : > { %p66_p4 = scmp.eq.s32.totalorder %s64_s15, 0 }
   0xa   : > { %s989_s17 = scalar_select %p66_p4, %s925_s10, %s68_s16  }
   0xc   : > { %145 = sbr.rel (!%p77_p3) target bundleno = 32 (0x20), region = 24  ;;  %s147_s18 = sand.u32 (%p77_p3), 1, %s925_s10  }
   0xd   : > { %s807_s19 = sshll.u32 (%p77_p3), %s933_s12, 3  ;;  %s763_s20 = sshll.u32 (%p77_p3), %s147_s18, 8 }
   0xe   : > { %s997_s23 = scalar_lea.vmem (%p77_p3), %s1131_s1, %s807_s19  ;;  %s1002_s24 = scalar_lea.vmem (%p77_p3), [#allocation3], %s763_s20 }
   0xf   : > { %v246_v0 = vld [vmem:[%s997_s23] sm:$0xff] (%p77_p3)  ;;  %v248_v1 = vld [vmem:[%s997_s23 + $0x10] sm:$0xff] (%p77_p3) }
  0x10   : > { %v250_v2 = vld [vmem:[%s997_s23 + $0x20] sm:$0xff] (%p77_p3)  ;;  %247 = vst [vmem:[%s1002_s24] sm:$0xff] (%p77_p3), %v246_v0  ;;  %249 = vst [vmem:[%s1002_s24 + $0x8] sm:$0xff] (%p77_p3), %v248_v1  ;;  %v252_v3 = vld [vmem:[%s997_s23 + $0x30] sm:$0xff] (%p77_p3) }
  0x11   : > { %251 = vst [vmem:[%s1002_s24 + $0x10] sm:$0xff] %v250_v2  ;;  %v254_v4 = vld [vmem:[%s997_s23 + $0x40] sm:$0xff]  ;;  %v256_v5 = vld [vmem:[%s997_s23 + $0x50] sm:$0xff]  ;;  %253 = vst [vmem:[%s1002_s24 + $0x18] sm:$0xff] %v252_v3 }
  0x12   : > { %255 = vst [vmem:[%s1002_s24 + $0x20] sm:$0xff] %v254_v4  ;;  %257 = vst [vmem:[%s1002_s24 + $0x28] sm:$0xff] %v256_v5  ;;  %v258_v6 = vld [vmem:[%s997_s23 + $0x60] sm:$0xff]  ;;  %v260_v7 = vld [vmem:[%s997_s23 + $0x70] sm:$0xff] }
  0x13   : > { %v262_v8 = vld [vmem:[%s997_s23 + $0x80] sm:$0xff]  ;;  %259 = vst [vmem:[%s1002_s24 + $0x30] sm:$0xff] %v258_v6  ;;  %261 = vst [vmem:[%s1002_s24 + $0x38] sm:$0xff] %v260_v7  ;;  %v264_v9 = vld [vmem:[%s997_s23 + $0x90] sm:$0xff] }
  0x14   : > { %263 = vst [vmem:[%s1002_s24 + $0x40] sm:$0xff] %v262_v8  ;;  %v266_v10 = vld [vmem:[%s997_s23 + $0xa0] sm:$0xff]  ;;  %v268_v11 = vld [vmem:[%s997_s23 + $0xb0] sm:$0xff]  ;;  %265 = vst [vmem:[%s1002_s24 + $0x48] sm:$0xff] %v264_v9 }
  0x15   : > { %267 = vst [vmem:[%s1002_s24 + $0x50] sm:$0xff] %v266_v10  ;;  %269 = vst [vmem:[%s1002_s24 + $0x58] sm:$0xff] %v268_v11  ;;  %v270_v12 = vld [vmem:[%s997_s23 + $0xc0] sm:$0xff]  ;;  %v272_v13 = vld [vmem:[%s997_s23 + $0xd0] sm:$0xff] }
  0x16   : > { %v274_v14 = vld [vmem:[%s997_s23 + $0xe0] sm:$0xff]  ;;  %271 = vst [vmem:[%s1002_s24 + $0x60] sm:$0xff] %v270_v12  ;;  %273 = vst [vmem:[%s1002_s24 + $0x68] sm:$0xff] %v272_v13  ;;  %v276_v15 = vld [vmem:[%s997_s23 + $0xf0] sm:$0xff] }
  0x17   : > { %275 = vst [vmem:[%s1002_s24 + $0x70] sm:$0xff] %v274_v14  ;;  %v278_v16 = vld [vmem:[%s997_s23 + $0x100] sm:$0xff]  ;;  %v280_v17 = vld [vmem:[%s997_s23 + $0x110] sm:$0xff]  ;;  %277 = vst [vmem:[%s1002_s24 + $0x78] sm:$0xff] %v276_v15 }
  0x18   : > { %279 = vst [vmem:[%s1002_s24 + $0x80] sm:$0xff] %v278_v16  ;;  %281 = vst [vmem:[%s1002_s24 + $0x88] sm:$0xff] %v280_v17  ;;  %v282_v18 = vld [vmem:[%s997_s23 + $0x120] sm:$0xff]  ;;  %v284_v19 = vld [vmem:[%s997_s23 + $0x130] sm:$0xff] }
  0x19   : > { %v286_v20 = vld [vmem:[%s997_s23 + $0x140] sm:$0xff]  ;;  %283 = vst [vmem:[%s1002_s24 + $0x90] sm:$0xff] %v282_v18  ;;  %285 = vst [vmem:[%s1002_s24 + $0x98] sm:$0xff] %v284_v19  ;;  %v288_v21 = vld [vmem:[%s997_s23 + $0x150] sm:$0xff] }
  0x1a   : > { %287 = vst [vmem:[%s1002_s24 + $0xa0] sm:$0xff] %v286_v20  ;;  %v290_v22 = vld [vmem:[%s997_s23 + $0x160] sm:$0xff]  ;;  %v292_v23 = vld [vmem:[%s997_s23 + $0x170] sm:$0xff]  ;;  %289 = vst [vmem:[%s1002_s24 + $0xa8] sm:$0xff] %v288_v21 }
  0x1b   : > { %291 = vst [vmem:[%s1002_s24 + $0xb0] sm:$0xff] %v290_v22  ;;  %293 = vst [vmem:[%s1002_s24 + $0xb8] sm:$0xff] %v292_v23  ;;  %v294_v24 = vld [vmem:[%s997_s23 + $0x180] sm:$0xff]  ;;  %v296_v25 = vld [vmem:[%s997_s23 + $0x190] sm:$0xff] }
  0x1c   : > { %v298_v26 = vld [vmem:[%s997_s23 + $0x1a0] sm:$0xff]  ;;  %295 = vst [vmem:[%s1002_s24 + $0xc0] sm:$0xff] %v294_v24  ;;  %297 = vst [vmem:[%s1002_s24 + $0xc8] sm:$0xff] %v296_v25  ;;  %v300_v27 = vld [vmem:[%s997_s23 + $0x1b0] sm:$0xff] }
  0x1d   : > { %299 = vst [vmem:[%s1002_s24 + $0xd0] sm:$0xff] %v298_v26  ;;  %v302_v28 = vld [vmem:[%s997_s23 + $0x1c0] sm:$0xff]  ;;  %v304_v29 = vld [vmem:[%s997_s23 + $0x1d0] sm:$0xff]  ;;  %301 = vst [vmem:[%s1002_s24 + $0xd8] sm:$0xff] %v300_v27 }
  0x1e   : > { %303 = vst [vmem:[%s1002_s24 + $0xe0] sm:$0xff] %v302_v28  ;;  %305 = vst [vmem:[%s1002_s24 + $0xe8] sm:$0xff] %v304_v29  ;;  %v306_v30 = vld [vmem:[%s997_s23 + $0x1e0] sm:$0xff]  ;;  %v308_v31 = vld [vmem:[%s997_s23 + $0x1f0] sm:$0xff] }
  0x1f   : > { %307 = vst [vmem:[%s1002_s24 + $0xf0] sm:$0xff] %v306_v30  ;;  %309 = vst [vmem:[%s1002_s24 + $0xf8] sm:$0xff] %v308_v31 }
  0x20 PF: > { %p766_p6 = scmp.ge.s32.totalorder %s937_s13, 1  ;;  %p314_p7 = scmp.lt.s32.totalorder %s937_s13, 3 }
  0x22   : > { %p315_p8 = pnand %p766_p6, %p314_p7 }
  0x23   : > { %s321_s25 = sand.u32 (!%p315_p8), 1, %s921_s9   ;;  %s768_s30 = sshll.u32 (!%p315_p8), %s929_s11, 1 }
  0x24   : > { %318 = sbr.rel (%p315_p8) target bundleno = 305 (0x131), region = 62  ;;  %s767_s28 = sshll.u32 (!%p315_p8), %s321_s25, 8 }
  0x25   : > { %s1075_s29 = scalar_lea.vmem (!%p315_p8), [#allocation3], %s767_s28  ;;  %p370_p9 = scmp.lt.s32.totalorder (!%p315_p8), %s768_s30, 3 }
  0x29   : > { %v1071_v32 = vld [vmem:[%s1130_s0] sm:$0xff]  ;;  %v849_v34 = vld [vmem:[%s1075_s29 + $0x74] ss:$8 sps:$4 sm:$0xff]   ;;  %v851_v35 = vld [vmem:[%s1075_s29 + $0x70] ss:$8 sps:$4 sm:$0xff]   ;;  %s1140_s30 = smov (!%p370_p9, %s768_s30), 3 }
  0x2a   : > { %v771_v33 = vcombine.high %v1071_v32, %v1071_v32  ;;  %585 = vmatprep.subr.bf16.mxu0 %v849_v34  ;;  %v852_v36 = vld [vmem:[%s1075_s29 + $0x64] ss:$8 sps:$4 sm:$0xff]   ;;  %v854_v37 = vld [vmem:[%s1075_s29 + $0x60] ss:$8 sps:$4 sm:$0xff]   ;;  %v855_v38 = vld [vmem:[%s1075_s29 + $0x54] ss:$8 sps:$4 sm:$0xff]   ;;  %v770_v2 = vcombine.low %v1071_v32, %v1071_v32 }
  0x2b   : > { %586 = vmatpush1.bf16.msra.mxu0 %v851_v35  ;;  %v857_v39 = vld [vmem:[%s1075_s29 + $0x50] ss:$8 sps:$4 sm:$0xff]   ;;  %v858_v40 = vld [vmem:[%s1075_s29 + $0x44] ss:$8 sps:$4 sm:$0xff]   ;;  %v860_v41 = vld [vmem:[%s1075_s29 + $0x40] ss:$8 sps:$4 sm:$0xff]  }
  0x2c   : > { %617 = vmatprep.mubr.bf16.mxu0 %v771_v33  ;;  %587 = vmatprep.subr.bf16.mxu0 %v852_v36  ;;  %v861_v42 = vld [vmem:[%s1075_s29 + $0x34] ss:$8 sps:$4 sm:$0xff]   ;;  %v863_v43 = vld [vmem:[%s1075_s29 + $0x30] ss:$8 sps:$4 sm:$0xff]   ;;  %v864_v44 = vld [vmem:[%s1075_s29 + $0x24] ss:$8 sps:$4 sm:$0xff]  }
  0x2d   : > { %v866_v45 = vld [vmem:[%s1075_s29 + $0x20] ss:$8 sps:$4 sm:$0xff]   ;;  %v867_v46 = vld [vmem:[%s1075_s29 + $0x14] ss:$8 sps:$4 sm:$0xff]   ;;  %v869_v47 = vld [vmem:[%s1075_s29 + $0x10] ss:$8 sps:$4 sm:$0xff]  }
  0x2e   : > { %v870_v48 = vld [vmem:[%s1075_s29 + $0x4] ss:$8 sps:$4 sm:$0xff]   ;;  %v872_v49 = vld [vmem:[%s1075_s29] ss:$8 sps:$4 sm:$0xff]   ;;  %v873_v50 = vld [vmem:[%s1075_s29 + $0xf4] ss:$8 sps:$4 sm:$0xff]  }
  0x2f   : > { %588 = vmatpush1.bf16.msra.mxu0 %v854_v37  ;;  %v875_v51 = vld [vmem:[%s1075_s29 + $0xf0] ss:$8 sps:$4 sm:$0xff]   ;;  %v876_v52 = vld [vmem:[%s1075_s29 + $0xe4] ss:$8 sps:$4 sm:$0xff]   ;;  %v878_v53 = vld [vmem:[%s1075_s29 + $0xe0] ss:$8 sps:$4 sm:$0xff]  }
  0x30   : > { %589 = vmatprep.subr.bf16.mxu0 %v855_v38  ;;  %v879_v54 = vld [vmem:[%s1075_s29 + $0xd4] ss:$8 sps:$4 sm:$0xff]   ;;  %v881_v55 = vld [vmem:[%s1075_s29 + $0xd0] ss:$8 sps:$4 sm:$0xff]   ;;  %v882_v56 = vld [vmem:[%s1075_s29 + $0xc4] ss:$8 sps:$4 sm:$0xff]  }
  0x31   : > { %v884_v57 = vld [vmem:[%s1075_s29 + $0xc0] ss:$8 sps:$4 sm:$0xff]   ;;  %v885_v58 = vld [vmem:[%s1075_s29 + $0xb4] ss:$8 sps:$4 sm:$0xff]   ;;  %v887_v59 = vld [vmem:[%s1075_s29 + $0xb0] ss:$8 sps:$4 sm:$0xff]  }
  0x32   : > { %v888_v60 = vld [vmem:[%s1075_s29 + $0xa4] ss:$8 sps:$4 sm:$0xff]   ;;  %v890_v61 = vld [vmem:[%s1075_s29 + $0xa0] ss:$8 sps:$4 sm:$0xff]   ;;  %v891_v62 = vld [vmem:[%s1075_s29 + $0x94] ss:$8 sps:$4 sm:$0xff]  }
  0x33   : > { %590 = vmatpush1.bf16.msra.mxu0 %v857_v39  ;;  %v893_v63 = vld [vmem:[%s1075_s29 + $0x90] ss:$8 sps:$4 sm:$0xff]   ;;  %v894_v0 = vld [vmem:[%s1075_s29 + $0x84] ss:$8 sps:$4 sm:$0xff]   ;;  %v896_v1 = vld [vmem:[%s1075_s29 + $0x80] ss:$8 sps:$4 sm:$0xff]  }
  0x34   : > { %591 = vmatprep.subr.bf16.mxu0 %v858_v40  ;;  %s769_s3 = sshll.u32 %s1140_s30, 2 }
  0x35   : > { %s375_s6 = scalar_lea.vmem %s1132_s2, %s769_s3 }
  0x37   : > { %592 = vmatpush1.bf16.msra.mxu0 %v860_v41 }
  0x38   : > { %593 = vmatprep.subr.bf16.mxu0 %v861_v42 }
  0x3b   : > { %594 = vmatpush1.bf16.msra.mxu0 %v863_v43 }
  0x3c   : > { %595 = vmatprep.subr.bf16.mxu0 %v864_v44 }
  0x3f   : > { %596 = vmatpush1.bf16.msra.mxu0 %v866_v45 }
  0x40   : > { %597 = vmatprep.subr.bf16.mxu0 %v867_v46 }
  0x43   : > { %598 = vmatpush1.bf16.msra.mxu0 %v869_v47 }
  0x44   : > { %599 = vmatprep.subr.bf16.mxu0 %v870_v48 }
  0x47   : > { %600 = vmatpush1.bf16.msra.mxu0 %v872_v49 }
  0x48   : > { %601 = vmatprep.subr.bf16.mxu0 %v873_v50 }
  0x4b   : > { %602 = vmatpush2.bf16.msra.mxu0 %v875_v51 }
  0x4c   : > { %603 = vmatprep.subr.bf16.mxu0 %v876_v52 }
  0x4f   : > { %604 = vmatpush2.bf16.msra.mxu0 %v878_v53 }
  0x50   : > { %605 = vmatprep.subr.bf16.mxu0 %v879_v54 }
  0x53   : > { %606 = vmatpush2.bf16.msra.mxu0 %v881_v55 }
  0x54   : > { %607 = vmatprep.subr.bf16.mxu0 %v882_v56 }
  0x57   : > { %608 = vmatpush2.bf16.msra.mxu0 %v884_v57 }
  0x58   : > { %609 = vmatprep.subr.bf16.mxu0 %v885_v58 }
  0x5b   : > { %610 = vmatpush2.bf16.msra.mxu0 %v887_v59 }
  0x5c   : > { %611 = vmatprep.subr.bf16.mxu0 %v888_v60 }
  0x5f   : > { %612 = vmatpush2.bf16.msra.mxu0 %v890_v61 }
  0x60   : > { %613 = vmatprep.subr.bf16.mxu0 %v891_v62 }
  0x63   : > { %614 = vmatpush2.bf16.msra.mxu0 %v893_v63 }
  0x64   : > { %615 = vmatprep.subr.bf16.mxu0 %v894_v0 }
  0x67   : > { %616 = vmatpush2.bf16.msra.mxu0 %v896_v1 }
  0x6a   : > { %618 = vmatmul.mubr.bf16.vlgmr.msra.gmra.mxu0 %v770_v2 }
 0x12a   : > { %v619_v3 = vpop.f32.mrf.mxu0 }
 0x12c   : > { %v621_v4 = vpop.f32.mrf.mxu0 }
 0x12d   : > { %v808_v5 = vpack.c.bf16 %v621_v4, %v619_v3 }
 0x12e   : > { %v623_v6 = vpop.f32.mrf.mxu0 }
 0x12f   : > { %643 = vst [vmem:[%s375_s6] sm:$0xff] %v808_v5 }
 0x130   : > { %v624_v7 = vpop.f32.mrf.mxu0 }
 0x131 PF: > { %s12_s13 = sadd.s32 1, %s937_s13   ;;  %s1133_s9 = smov %s925_s10 }
 0x132   : > { %p9_p10 = scmp.ge.s32.totalorder %s12_s13, 4   ;;  %s1134_s10 = smov %s989_s17 }
 0x133   : > { %s1135_s11 = smov %s933_s12  ;;  %s1136_s12 = smov %s1138_s14 }
 0x134   :  { %11 = sbr.rel (!%p9_p10) target bundleno = 3 (0x3), region = 112 }

// kernel: resnet_forward.24
= control target key start
LH: loop header
LB: loop body
LE: loop exit
PB: predicated region body
PF: predicated region fallthrough
CT: control target
= control target key end

     0   :  { %s1993_s12 = smov 0   ;;  %s1995_s13 = smov 0   ;;  %s2401_s0 = inlined_call_operand.vmem [shape: bf16[8,4608], index: 0, kind: input, shape index: {}]   ;;  %s2402_s1 = inlined_call_operand.vmem [shape: bf16[4608,512], index: 1, kind: input, shape index: {}]   ;;  %s2403_s2 = inlined_call_operand.vmem [shape: bf16[8,512], index: 2, kind: input, shape index: {}]   ;;  %s2404_s3 = inlined_call_operand.vmem [shape: bf16[8,512], index: 3, kind: output, shape index: {}]  }
   0x1   :  { %s1997_s14 = smov 0   ;;  %s1999_s15 = smov 0  }
   0x2   :  { %s2001_s16 = smov 0   ;;  %s2003_s17 = smov 0  }
   0x3   :  { %s2005_s18 = smov 0  }
   0x4 LB: > { %s25_s19 = sadd.s32 1, %s1962_s16  ;;  %s28_s20 = sadd.s32 1, %s1966_s17  ;;  %s1970_s18 = sphi %s2005_s18, %s13_s18   ;;  %s1966_s17 = sphi %s2003_s17, %s2410_s17   ;;  %s1962_s16 = sphi %s2001_s16, %s2409_s16   ;;  %s1958_s15 = sphi %s1999_s15, %s2408_s15   ;;  %s1954_s14 = sphi %s1997_s14, %s2407_s14   ;;  %s1950_s13 = sphi %s1995_s13, %s2406_s13   ;;  %s1946_s12 = sphi %s1993_s12, %s2405_s12  }
   0x5   : > { %p26_p0 = scmp.ge.s32.totalorder %s25_s19, 6  ;;  %p76_p1 = scmp.ne.s32.totalorder %s1950_s13, %s1946_s12 }
   0x6   : > { %p77_p2 = scmp.eq.s32.totalorder %s1970_s18, 0  ;;  %s69_s24 = sadd.s32 1, %s1950_s13 }
   0x7   : > { %s2412_s19 = smov (%p26_p0, %s25_s19), 0  ;;  %s2414_s20 = smov (!%p26_p0, %s28_s20), %s1966_s17 }
   0x8   : > { %p78_p3 = por %p77_p2, %p76_p1  ;;  %p30_p4 = scmp.ge.s32.totalorder %s2414_s20, 2 }
   0x9   : > { %s64_s21 = ssub.s32 %s1962_s16, %s2412_s19  ;;  %p1588_p6 = scmp.ge.s32.totalorder %s1970_s18, 12 }
   0xa   : > { %s2416_s20 = smov (%p30_p4, %s2414_s20), 0 }
   0xb   : > { %s65_s22 = ssub.s32 %s1966_s17, %s2416_s20  ;;  %158 = sbr.rel (%p1588_p6) target bundleno = 72 (0x48), region = 16 }
   0xc   : > { %s66_s23 = sor.u32 %s65_s22, %s64_s21 }
   0xd   : > { %p67_p5 = scmp.eq.s32.totalorder %s66_s23, 0 }
   0xf   : > { %s2044_s25 = scalar_select %p67_p5, %s1950_s13, %s69_s24  }
  0x10   : > { %174 = sbr.rel (!%p78_p3) target bundleno = 72 (0x48), region = 24  ;;  %s176_s26 = sand.u32 (%p78_p3), 1, %s1950_s13  }
  0x11   : > { %s1707_s27 = smul.u32 (%p78_p3), 768, %s176_s26  ;;  %s1589_s28 = sshll.u32 (%p78_p3), %s1966_s17, 1 }
  0x12   : > { %s1705_s29 = smul.u32 (%p78_p3), 384, %s1962_s16 }
  0x13   : > { %s2058_s8 = scalar_lea.vmem (%p78_p3), [#allocation3], %s1707_s27 }
  0x14   : > { %s182_s30 = sadd.s32 (%p78_p3), %s1705_s29, %s1589_s28 }
  0x15   : > { %s1591_s4 = sshll.u32 %s182_s30, 2 }
  0x16   : > { %s2053_s7 = scalar_lea.vmem %s2402_s1, %s1591_s4 }
  0x17   : > { %v403_v0 = vld [vmem:[%s2053_s7] sm:$0xff]  ;;  %v405_v1 = vld [vmem:[%s2053_s7 + $0x10] sm:$0xff] }
  0x18   : > { %v407_v2 = vld [vmem:[%s2053_s7 + $0x20] sm:$0xff]  ;;  %404 = vst [vmem:[%s2058_s8] sm:$0xff] %v403_v0  ;;  %406 = vst [vmem:[%s2058_s8 + $0x8] sm:$0xff] %v405_v1  ;;  %v409_v3 = vld [vmem:[%s2053_s7 + $0x30] sm:$0xff] }
  0x19   : > { %408 = vst [vmem:[%s2058_s8 + $0x10] sm:$0xff] %v407_v2  ;;  %v411_v4 = vld [vmem:[%s2053_s7 + $0x40] sm:$0xff]  ;;  %v413_v5 = vld [vmem:[%s2053_s7 + $0x50] sm:$0xff]  ;;  %410 = vst [vmem:[%s2058_s8 + $0x18] sm:$0xff] %v409_v3 }
  0x1a   : > { %412 = vst [vmem:[%s2058_s8 + $0x20] sm:$0xff] %v411_v4  ;;  %414 = vst [vmem:[%s2058_s8 + $0x28] sm:$0xff] %v413_v5  ;;  %v415_v6 = vld [vmem:[%s2053_s7 + $0x60] sm:$0xff]  ;;  %v417_v7 = vld [vmem:[%s2053_s7 + $0x70] sm:$0xff] }
  0x1b   : > { %v419_v8 = vld [vmem:[%s2053_s7 + $0x80] sm:$0xff]  ;;  %416 = vst [vmem:[%s2058_s8 + $0x30] sm:$0xff] %v415_v6  ;;  %418 = vst [vmem:[%s2058_s8 + $0x38] sm:$0xff] %v417_v7  ;;  %v421_v9 = vld [vmem:[%s2053_s7 + $0x90] sm:$0xff] }
  0x1c   : > { %420 = vst [vmem:[%s2058_s8 + $0x40] sm:$0xff] %v419_v8  ;;  %v423_v10 = vld [vmem:[%s2053_s7 + $0xa0] sm:$0xff]  ;;  %v425_v11 = vld [vmem:[%s2053_s7 + $0xb0] sm:$0xff]  ;;  %422 = vst [vmem:[%s2058_s8 + $0x48] sm:$0xff] %v421_v9 }
  0x1d   : > { %424 = vst [vmem:[%s2058_s8 + $0x50] sm:$0xff] %v423_v10  ;;  %426 = vst [vmem:[%s2058_s8 + $0x58] sm:$0xff] %v425_v11  ;;  %v427_v12 = vld [vmem:[%s2053_s7 + $0xc0] sm:$0xff]  ;;  %v429_v13 = vld [vmem:[%s2053_s7 + $0xd0] sm:$0xff] }
  0x1e   : > { %v431_v14 = vld [vmem:[%s2053_s7 + $0xe0] sm:$0xff]  ;;  %428 = vst [vmem:[%s2058_s8 + $0x60] sm:$0xff] %v427_v12  ;;  %430 = vst [vmem:[%s2058_s8 + $0x68] sm:$0xff] %v429_v13  ;;  %v433_v15 = vld [vmem:[%s2053_s7 + $0xf0] sm:$0xff] }
  0x1f   : > { %432 = vst [vmem:[%s2058_s8 + $0x70] sm:$0xff] %v431_v14  ;;  %v435_v16 = vld [vmem:[%s2053_s7 + $0x100] sm:$0xff]  ;;  %v437_v17 = vld [vmem:[%s2053_s7 + $0x110] sm:$0xff]  ;;  %434 = vst [vmem:[%s2058_s8 + $0x78] sm:$0xff] %v433_v15 }
  0x20   : > { %436 = vst [vmem:[%s2058_s8 + $0x80] sm:$0xff] %v435_v16  ;;  %438 = vst [vmem:[%s2058_s8 + $0x88] sm:$0xff] %v437_v17  ;;  %v439_v18 = vld [vmem:[%s2053_s7 + $0x120] sm:$0xff]  ;;  %v441_v19 = vld [vmem:[%s2053_s7 + $0x130] sm:$0xff] }
  0x21   : > { %v443_v20 = vld [vmem:[%s2053_s7 + $0x140] sm:$0xff]  ;;  %440 = vst [vmem:[%s2058_s8 + $0x90] sm:$0xff] %v439_v18  ;;  %442 = vst [vmem:[%s2058_s8 + $0x98] sm:$0xff] %v441_v19  ;;  %v445_v21 = vld [vmem:[%s2053_s7 + $0x150] sm:$0xff] }
  0x22   : > { %444 = vst [vmem:[%s2058_s8 + $0xa0] sm:$0xff] %v443_v20  ;;  %v447_v22 = vld [vmem:[%s2053_s7 + $0x160] sm:$0xff]  ;;  %v449_v23 = vld [vmem:[%s2053_s7 + $0x170] sm:$0xff]  ;;  %446 = vst [vmem:[%s2058_s8 + $0xa8] sm:$0xff] %v445_v21 }
  0x23   : > { %448 = vst [vmem:[%s2058_s8 + $0xb0] sm:$0xff] %v447_v22  ;;  %450 = vst [vmem:[%s2058_s8 + $0xb8] sm:$0xff] %v449_v23  ;;  %v451_v24 = vld [vmem:[%s2053_s7 + $0x180] sm:$0xff]  ;;  %v453_v25 = vld [vmem:[%s2053_s7 + $0x190] sm:$0xff] }
  0x24   : > { %v455_v26 = vld [vmem:[%s2053_s7 + $0x1a0] sm:$0xff]  ;;  %452 = vst [vmem:[%s2058_s8 + $0xc0] sm:$0xff] %v451_v24  ;;  %454 = vst [vmem:[%s2058_s8 + $0xc8] sm:$0xff] %v453_v25  ;;  %v457_v27 = vld [vmem:[%s2053_s7 + $0x1b0] sm:$0xff] }
  0x25   : > { %456 = vst [vmem:[%s2058_s8 + $0xd0] sm:$0xff] %v455_v26  ;;  %v459_v28 = vld [vmem:[%s2053_s7 + $0x1c0] sm:$0xff]  ;;  %v461_v29 = vld [vmem:[%s2053_s7 + $0x1d0] sm:$0xff]  ;;  %458 = vst [vmem:[%s2058_s8 + $0xd8] sm:$0xff] %v457_v27 }
  0x26   : > { %460 = vst [vmem:[%s2058_s8 + $0xe0] sm:$0xff] %v459_v28  ;;  %462 = vst [vmem:[%s2058_s8 + $0xe8] sm:$0xff] %v461_v29  ;;  %v463_v30 = vld [vmem:[%s2053_s7 + $0x1e0] sm:$0xff]  ;;  %v465_v31 = vld [vmem:[%s2053_s7 + $0x1f0] sm:$0xff] }
  0x27   : > { %v467_v32 = vld [vmem:[%s2053_s7 + $0x200] sm:$0xff]  ;;  %464 = vst [vmem:[%s2058_s8 + $0xf0] sm:$0xff] %v463_v30  ;;  %466 = vst [vmem:[%s2058_s8 + $0xf8] sm:$0xff] %v465_v31  ;;  %v469_v33 = vld [vmem:[%s2053_s7 + $0x210] sm:$0xff] }
  0x28   : > { %468 = vst [vmem:[%s2058_s8 + $0x100] sm:$0xff] %v467_v32  ;;  %v471_v34 = vld [vmem:[%s2053_s7 + $0x220] sm:$0xff]  ;;  %v473_v35 = vld [vmem:[%s2053_s7 + $0x230] sm:$0xff]  ;;  %470 = vst [vmem:[%s2058_s8 + $0x108] sm:$0xff] %v469_v33 }
  0x29   : > { %472 = vst [vmem:[%s2058_s8 + $0x110] sm:$0xff] %v471_v34  ;;  %474 = vst [vmem:[%s2058_s8 + $0x118] sm:$0xff] %v473_v35  ;;  %v475_v36 = vld [vmem:[%s2053_s7 + $0x240] sm:$0xff]  ;;  %v477_v37 = vld [vmem:[%s2053_s7 + $0x250] sm:$0xff] }
  0x2a   : > { %v479_v38 = vld [vmem:[%s2053_s7 + $0x260] sm:$0xff]  ;;  %476 = vst [vmem:[%s2058_s8 + $0x120] sm:$0xff] %v475_v36  ;;  %478 = vst [vmem:[%s2058_s8 + $0x128] sm:$0xff] %v477_v37  ;;  %v481_v39 = vld [vmem:[%s2053_s7 + $0x270] sm:$0xff] }
  0x2b   : > { %480 = vst [vmem:[%s2058_s8 + $0x130] sm:$0xff] %v479_v38  ;;  %v483_v40 = vld [vmem:[%s2053_s7 + $0x280] sm:$0xff]  ;;  %v485_v41 = vld [vmem:[%s2053_s7 + $0x290] sm:$0xff]  ;;  %482 = vst [vmem:[%s2058_s8 + $0x138] sm:$0xff] %v481_v39 }
  0x2c   : > { %484 = vst [vmem:[%s2058_s8 + $0x140] sm:$0xff] %v483_v40  ;;  %486 = vst [vmem:[%s2058_s8 + $0x148] sm:$0xff] %v485_v41  ;;  %v487_v42 = vld [vmem:[%s2053_s7 + $0x2a0] sm:$0xff]  ;;  %v489_v43 = vld [vmem:[%s2053_s7 + $0x2b0] sm:$0xff] }
  0x2d   : > { %v491_v44 = vld [vmem:[%s2053_s7 + $0x2c0] sm:$0xff]  ;;  %488 = vst [vmem:[%s2058_s8 + $0x150] sm:$0xff] %v487_v42  ;;  %490 = vst [vmem:[%s2058_s8 + $0x158] sm:$0xff] %v489_v43  ;;  %v493_v45 = vld [vmem:[%s2053_s7 + $0x2d0] sm:$0xff] }
  0x2e   : > { %492 = vst [vmem:[%s2058_s8 + $0x160] sm:$0xff] %v491_v44  ;;  %v495_v46 = vld [vmem:[%s2053_s7 + $0x2e0] sm:$0xff]  ;;  %v497_v47 = vld [vmem:[%s2053_s7 + $0x2f0] sm:$0xff]  ;;  %494 = vst [vmem:[%s2058_s8 + $0x168] sm:$0xff] %v493_v45 }
  0x2f   : > { %496 = vst [vmem:[%s2058_s8 + $0x170] sm:$0xff] %v495_v46  ;;  %498 = vst [vmem:[%s2058_s8 + $0x178] sm:$0xff] %v497_v47  ;;  %v499_v48 = vld [vmem:[%s2053_s7 + $0x300] sm:$0xff]  ;;  %v501_v49 = vld [vmem:[%s2053_s7 + $0x310] sm:$0xff] }
  0x30   : > { %v503_v50 = vld [vmem:[%s2053_s7 + $0x320] sm:$0xff]  ;;  %500 = vst [vmem:[%s2058_s8 + $0x180] sm:$0xff] %v499_v48  ;;  %502 = vst [vmem:[%s2058_s8 + $0x188] sm:$0xff] %v501_v49  ;;  %v505_v51 = vld [vmem:[%s2053_s7 + $0x330] sm:$0xff] }
  0x31   : > { %504 = vst [vmem:[%s2058_s8 + $0x190] sm:$0xff] %v503_v50  ;;  %v507_v52 = vld [vmem:[%s2053_s7 + $0x340] sm:$0xff]  ;;  %v509_v53 = vld [vmem:[%s2053_s7 + $0x350] sm:$0xff]  ;;  %506 = vst [vmem:[%s2058_s8 + $0x198] sm:$0xff] %v505_v51 }
  0x32   : > { %508 = vst [vmem:[%s2058_s8 + $0x1a0] sm:$0xff] %v507_v52  ;;  %510 = vst [vmem:[%s2058_s8 + $0x1a8] sm:$0xff] %v509_v53  ;;  %v511_v54 = vld [vmem:[%s2053_s7 + $0x360] sm:$0xff]  ;;  %v513_v55 = vld [vmem:[%s2053_s7 + $0x370] sm:$0xff] }
  0x33   : > { %v515_v56 = vld [vmem:[%s2053_s7 + $0x380] sm:$0xff]  ;;  %512 = vst [vmem:[%s2058_s8 + $0x1b0] sm:$0xff] %v511_v54  ;;  %514 = vst [vmem:[%s2058_s8 + $0x1b8] sm:$0xff] %v513_v55  ;;  %v517_v57 = vld [vmem:[%s2053_s7 + $0x390] sm:$0xff] }
  0x34   : > { %516 = vst [vmem:[%s2058_s8 + $0x1c0] sm:$0xff] %v515_v56  ;;  %v519_v58 = vld [vmem:[%s2053_s7 + $0x3a0] sm:$0xff]  ;;  %v521_v59 = vld [vmem:[%s2053_s7 + $0x3b0] sm:$0xff]  ;;  %518 = vst [vmem:[%s2058_s8 + $0x1c8] sm:$0xff] %v517_v57 }
  0x35   : > { %520 = vst [vmem:[%s2058_s8 + $0x1d0] sm:$0xff] %v519_v58  ;;  %522 = vst [vmem:[%s2058_s8 + $0x1d8] sm:$0xff] %v521_v59  ;;  %v523_v60 = vld [vmem:[%s2053_s7 + $0x3c0] sm:$0xff]  ;;  %v525_v61 = vld [vmem:[%s2053_s7 + $0x3d0] sm:$0xff] }
  0x36   : > { %v527_v62 = vld [vmem:[%s2053_s7 + $0x3e0] sm:$0xff]  ;;  %524 = vst [vmem:[%s2058_s8 + $0x1e0] sm:$0xff] %v523_v60  ;;  %526 = vst [vmem:[%s2058_s8 + $0x1e8] sm:$0xff] %v525_v61  ;;  %v529_v63 = vld [vmem:[%s2053_s7 + $0x3f0] sm:$0xff] }
  0x37   : > { %528 = vst [vmem:[%s2058_s8 + $0x1f0] sm:$0xff] %v527_v62  ;;  %v531_v0 = vld [vmem:[%s2053_s7 + $0x400] sm:$0xff]  ;;  %v533_v1 = vld [vmem:[%s2053_s7 + $0x410] sm:$0xff]  ;;  %530 = vst [vmem:[%s2058_s8 + $0x1f8] sm:$0xff] %v529_v63 }
  0x38   : > { %532 = vst [vmem:[%s2058_s8 + $0x200] sm:$0xff] %v531_v0  ;;  %534 = vst [vmem:[%s2058_s8 + $0x208] sm:$0xff] %v533_v1  ;;  %v535_v2 = vld [vmem:[%s2053_s7 + $0x420] sm:$0xff]  ;;  %v537_v3 = vld [vmem:[%s2053_s7 + $0x430] sm:$0xff] }
  0x39   : > { %v539_v4 = vld [vmem:[%s2053_s7 + $0x440] sm:$0xff]  ;;  %536 = vst [vmem:[%s2058_s8 + $0x210] sm:$0xff] %v535_v2  ;;  %538 = vst [vmem:[%s2058_s8 + $0x218] sm:$0xff] %v537_v3  ;;  %v541_v5 = vld [vmem:[%s2053_s7 + $0x450] sm:$0xff] }
  0x3a   : > { %540 = vst [vmem:[%s2058_s8 + $0x220] sm:$0xff] %v539_v4  ;;  %v543_v6 = vld [vmem:[%s2053_s7 + $0x460] sm:$0xff]  ;;  %v545_v7 = vld [vmem:[%s2053_s7 + $0x470] sm:$0xff]  ;;  %542 = vst [vmem:[%s2058_s8 + $0x228] sm:$0xff] %v541_v5 }
  0x3b   : > { %544 = vst [vmem:[%s2058_s8 + $0x230] sm:$0xff] %v543_v6  ;;  %546 = vst [vmem:[%s2058_s8 + $0x238] sm:$0xff] %v545_v7  ;;  %v547_v8 = vld [vmem:[%s2053_s7 + $0x480] sm:$0xff]  ;;  %v549_v9 = vld [vmem:[%s2053_s7 + $0x490] sm:$0xff] }
  0x3c   : > { %v551_v10 = vld [vmem:[%s2053_s7 + $0x4a0] sm:$0xff]  ;;  %548 = vst [vmem:[%s2058_s8 + $0x240] sm:$0xff] %v547_v8  ;;  %550 = vst [vmem:[%s2058_s8 + $0x248] sm:$0xff] %v549_v9  ;;  %v553_v11 = vld [vmem:[%s2053_s7 + $0x4b0] sm:$0xff] }
  0x3d   : > { %552 = vst [vmem:[%s2058_s8 + $0x250] sm:$0xff] %v551_v10  ;;  %v555_v12 = vld [vmem:[%s2053_s7 + $0x4c0] sm:$0xff]  ;;  %v557_v13 = vld [vmem:[%s2053_s7 + $0x4d0] sm:$0xff]  ;;  %554 = vst [vmem:[%s2058_s8 + $0x258] sm:$0xff] %v553_v11 }
  0x3e   : > { %556 = vst [vmem:[%s2058_s8 + $0x260] sm:$0xff] %v555_v12  ;;  %558 = vst [vmem:[%s2058_s8 + $0x268] sm:$0xff] %v557_v13  ;;  %v559_v14 = vld [vmem:[%s2053_s7 + $0x4e0] sm:$0xff]  ;;  %v561_v15 = vld [vmem:[%s2053_s7 + $0x4f0] sm:$0xff] }
  0x3f   : > { %v563_v16 = vld [vmem:[%s2053_s7 + $0x500] sm:$0xff]  ;;  %560 = vst [vmem:[%s2058_s8 + $0x270] sm:$0xff] %v559_v14  ;;  %562 = vst [vmem:[%s2058_s8 + $0x278] sm:$0xff] %v561_v15  ;;  %v565_v17 = vld [vmem:[%s2053_s7 + $0x510] sm:$0xff] }
  0x40   : > { %564 = vst [vmem:[%s2058_s8 + $0x280] sm:$0xff] %v563_v16  ;;  %v567_v18 = vld [vmem:[%s2053_s7 + $0x520] sm:$0xff]  ;;  %v569_v19 = vld [vmem:[%s2053_s7 + $0x530] sm:$0xff]  ;;  %566 = vst [vmem:[%s2058_s8 + $0x288] sm:$0xff] %v565_v17 }
  0x41   : > { %568 = vst [vmem:[%s2058_s8 + $0x290] sm:$0xff] %v567_v18  ;;  %570 = vst [vmem:[%s2058_s8 + $0x298] sm:$0xff] %v569_v19  ;;  %v571_v20 = vld [vmem:[%s2053_s7 + $0x540] sm:$0xff]  ;;  %v573_v21 = vld [vmem:[%s2053_s7 + $0x550] sm:$0xff] }
  0x42   : > { %v575_v22 = vld [vmem:[%s2053_s7 + $0x560] sm:$0xff]  ;;  %572 = vst [vmem:[%s2058_s8 + $0x2a0] sm:$0xff] %v571_v20  ;;  %574 = vst [vmem:[%s2058_s8 + $0x2a8] sm:$0xff] %v573_v21  ;;  %v577_v23 = vld [vmem:[%s2053_s7 + $0x570] sm:$0xff] }
  0x43   : > { %576 = vst [vmem:[%s2058_s8 + $0x2b0] sm:$0xff] %v575_v22  ;;  %v579_v24 = vld [vmem:[%s2053_s7 + $0x580] sm:$0xff]  ;;  %v581_v25 = vld [vmem:[%s2053_s7 + $0x590] sm:$0xff]  ;;  %578 = vst [vmem:[%s2058_s8 + $0x2b8] sm:$0xff] %v577_v23 }
  0x44   : > { %580 = vst [vmem:[%s2058_s8 + $0x2c0] sm:$0xff] %v579_v24  ;;  %582 = vst [vmem:[%s2058_s8 + $0x2c8] sm:$0xff] %v581_v25  ;;  %v583_v26 = vld [vmem:[%s2053_s7 + $0x5a0] sm:$0xff]  ;;  %v585_v27 = vld [vmem:[%s2053_s7 + $0x5b0] sm:$0xff] }
  0x45   : > { %v587_v28 = vld [vmem:[%s2053_s7 + $0x5c0] sm:$0xff]  ;;  %584 = vst [vmem:[%s2058_s8 + $0x2d0] sm:$0xff] %v583_v26  ;;  %586 = vst [vmem:[%s2058_s8 + $0x2d8] sm:$0xff] %v585_v27  ;;  %v589_v29 = vld [vmem:[%s2053_s7 + $0x5d0] sm:$0xff] }
  0x46   : > { %588 = vst [vmem:[%s2058_s8 + $0x2e0] sm:$0xff] %v587_v28  ;;  %v591_v30 = vld [vmem:[%s2053_s7 + $0x5e0] sm:$0xff]  ;;  %v593_v31 = vld [vmem:[%s2053_s7 + $0x5f0] sm:$0xff]  ;;  %590 = vst [vmem:[%s2058_s8 + $0x2e8] sm:$0xff] %v589_v29 }
  0x47   : > { %592 = vst [vmem:[%s2058_s8 + $0x2f0] sm:$0xff] %v591_v30  ;;  %594 = vst [vmem:[%s2058_s8 + $0x2f8] sm:$0xff] %v593_v31 }
  0x48 PF: > { %p1592_p7 = scmp.ge.s32.totalorder %s1970_s18, 1  ;;  %p612_p8 = scmp.lt.s32.totalorder %s1970_s18, 13 }
  0x4a   : > { %p613_p9 = pnand %p1592_p7, %p612_p8 }
  0x4b   : > { %s619_s9 = sand.u32 (!%p613_p9), 1, %s1946_s12   ;;  %s664_s10 = smul.u32 (!%p613_p9), 6, %s1954_s14 }
  0x4c   : > { %616 = sbr.rel (%p613_p9) target bundleno = 434 (0x1b2), region = 66  ;;  %s1594_s21 = sshll.u32 (!%p613_p9), %s1958_s15, 1 }
  0x4d   : > { %s1708_s11 = smul.u32 (!%p613_p9), 768, %s619_s9  ;;  %p667_p10 = scmp.lt.s32.totalorder (!%p613_p9), %s664_s10, 35 }
  0x4e   : > { %p679_p11 = scmp.lt.s32.totalorder (!%p613_p9), %s1594_s21, 3  ;;  %p1598_p12 = scmp.ne.s32.totalorder (!%p613_p9), %s1954_s14, 0 }
  0x4f   : > { %s2269_s5 = scalar_lea.vmem (!%p613_p9), [#allocation3], %s1708_s11 }
  0x51   : > { %s2418_s10 = smov (!%p667_p10, %s664_s10), 35  ;;  %s2420_s21 = smov (!%p679_p11, %s1594_s21), 3 }
  0x52   : > { %s1593_s22 = sshll.u32 %s2418_s10, 2  ;;  %s1595_s27 = sshll.u32 %s2420_s21, 2 }
  0x53   : > { %s2257_s26 = scalar_lea.vmem %s2401_s0, %s1593_s22  ;;  %s2262_s30 = scalar_lea.vmem %s2403_s2, %s1595_s27 }
  0x54   : > { %s2267_s15 = scalar_lea.vmem %s2404_s3, %s1595_s27  ;;  %699 = sbr.rel (%p1598_p12) target bundleno = 91 (0x5b), region = 74 }
  0x59   : > { %v1972_v32 = vmov 0.0  }
  0x5a   : > { %700 = vst [vmem:[#allocation2] sm:$0xff] %v1972_v32  ;;  %701 = vst [vmem:[#allocation2 + $0x8] sm:$0xff] %v1972_v32 }
  0x5b PF: > { %v1766_v33 = vld [vmem:[%s2269_s5 + $0x74] ss:$8 sps:$4 sm:$0xff]   ;;  %v1770_v35 = vld [vmem:[%s2269_s5 + $0x70] ss:$8 sps:$4 sm:$0xff]   ;;  %v1772_v37 = vld [vmem:[%s2269_s5 + $0x64] ss:$8 sps:$4 sm:$0xff]  }
  0x5c   : > { %v1768_v34 = vld [vmem:[%s2269_s5 + $0x174] ss:$8 sps:$4 sm:$0xff]   ;;  %1304 = vmatprep.subr.bf16.mxu0 %v1766_v33  ;;  %v1771_v36 = vld [vmem:[%s2269_s5 + $0x170] ss:$8 sps:$4 sm:$0xff]   ;;  %v1774_v38 = vld [vmem:[%s2269_s5 + $0x164] ss:$8 sps:$4 sm:$0xff]  }
  0x5d   : > { %1345 = vmatprep.subr.bf16.mxu1 %v1768_v34  ;;  %1305 = vmatpush1.bf16.msra.mxu0 %v1770_v35  ;;  %v1776_v39 = vld [vmem:[%s2269_s5 + $0x60] ss:$8 sps:$4 sm:$0xff]   ;;  %v1778_v41 = vld [vmem:[%s2269_s5 + $0x54] ss:$8 sps:$4 sm:$0xff]   ;;  %v1782_v43 = vld [vmem:[%s2269_s5 + $0x50] ss:$8 sps:$4 sm:$0xff]  }
  0x5e   : > { %1346 = vmatpush1.bf16.msra.mxu1 %v1771_v36  ;;  %1306 = vmatprep.subr.bf16.mxu0 %v1772_v37  ;;  %v1777_v40 = vld [vmem:[%s2269_s5 + $0x160] ss:$8 sps:$4 sm:$0xff]   ;;  %v1780_v42 = vld [vmem:[%s2269_s5 + $0x154] ss:$8 sps:$4 sm:$0xff]   ;;  %v1783_v44 = vld [vmem:[%s2269_s5 + $0x150] ss:$8 sps:$4 sm:$0xff]  }
  0x5f   : > { %1347 = vmatprep.subr.bf16.mxu1 %v1774_v38  ;;  %v1784_v45 = vld [vmem:[%s2269_s5 + $0x44] ss:$8 sps:$4 sm:$0xff]   ;;  %v1788_v47 = vld [vmem:[%s2269_s5 + $0x40] ss:$8 sps:$4 sm:$0xff]   ;;  %v1790_v49 = vld [vmem:[%s2269_s5 + $0x34] ss:$8 sps:$4 sm:$0xff]  }
  0x60   : > { %v1786_v46 = vld [vmem:[%s2269_s5 + $0x144] ss:$8 sps:$4 sm:$0xff]   ;;  %v1789_v48 = vld [vmem:[%s2269_s5 + $0x140] ss:$8 sps:$4 sm:$0xff]   ;;  %v1792_v50 = vld [vmem:[%s2269_s5 + $0x134] ss:$8 sps:$4 sm:$0xff]  }
  0x61   : > { %1307 = vmatpush1.bf16.msra.mxu0 %v1776_v39  ;;  %v1794_v51 = vld [vmem:[%s2269_s5 + $0x30] ss:$8 sps:$4 sm:$0xff]   ;;  %v1796_v53 = vld [vmem:[%s2269_s5 + $0x24] ss:$8 sps:$4 sm:$0xff]   ;;  %v1800_v55 = vld [vmem:[%s2269_s5 + $0x20] ss:$8 sps:$4 sm:$0xff]  }
  0x62   : > { %1348 = vmatpush1.bf16.msra.mxu1 %v1777_v40  ;;  %1308 = vmatprep.subr.bf16.mxu0 %v1778_v41  ;;  %v1795_v52 = vld [vmem:[%s2269_s5 + $0x130] ss:$8 sps:$4 sm:$0xff]   ;;  %v1798_v54 = vld [vmem:[%s2269_s5 + $0x124] ss:$8 sps:$4 sm:$0xff]   ;;  %v1801_v56 = vld [vmem:[%s2269_s5 + $0x120] ss:$8 sps:$4 sm:$0xff]  }
  0x63   : > { %1349 = vmatprep.subr.bf16.mxu1 %v1780_v42  ;;  %v1802_v57 = vld [vmem:[%s2269_s5 + $0x14] ss:$8 sps:$4 sm:$0xff]   ;;  %v1806_v59 = vld [vmem:[%s2269_s5 + $0x10] ss:$8 sps:$4 sm:$0xff]   ;;  %v1808_v61 = vld [vmem:[%s2269_s5 + $0x4] ss:$8 sps:$4 sm:$0xff]  }
  0x64   : > { %v1804_v58 = vld [vmem:[%s2269_s5 + $0x114] ss:$8 sps:$4 sm:$0xff]   ;;  %v1807_v60 = vld [vmem:[%s2269_s5 + $0x110] ss:$8 sps:$4 sm:$0xff]   ;;  %v1810_v62 = vld [vmem:[%s2269_s5 + $0x104] ss:$8 sps:$4 sm:$0xff]  }
  0x65   : > { %1309 = vmatpush1.bf16.msra.mxu0 %v1782_v43  ;;  %v1812_v63 = vld [vmem:[%s2269_s5] ss:$8 sps:$4 sm:$0xff]   ;;  %v1814_v1 = vld [vmem:[%s2269_s5 + $0xf4] ss:$8 sps:$4 sm:$0xff]   ;;  %v1818_v3 = vld [vmem:[%s2269_s5 + $0xf0] ss:$8 sps:$4 sm:$0xff]  }
  0x66   : > { %1350 = vmatpush1.bf16.msra.mxu1 %v1783_v44  ;;  %1310 = vmatprep.subr.bf16.mxu0 %v1784_v45  ;;  %v1813_v0 = vld [vmem:[%s2269_s5 + $0x100] ss:$8 sps:$4 sm:$0xff]   ;;  %v1816_v2 = vld [vmem:[%s2269_s5 + $0x1f4] ss:$8 sps:$4 sm:$0xff]   ;;  %v1819_v4 = vld [vmem:[%s2269_s5 + $0x1f0] ss:$8 sps:$4 sm:$0xff]  }
  0x67   : > { %1351 = vmatprep.subr.bf16.mxu1 %v1786_v46  ;;  %v1820_v5 = vld [vmem:[%s2269_s5 + $0xe4] ss:$8 sps:$4 sm:$0xff]   ;;  %v1824_v7 = vld [vmem:[%s2269_s5 + $0xe0] ss:$8 sps:$4 sm:$0xff]   ;;  %v1826_v9 = vld [vmem:[%s2269_s5 + $0xd4] ss:$8 sps:$4 sm:$0xff]  }
  0x68   : > { %v1822_v6 = vld [vmem:[%s2269_s5 + $0x1e4] ss:$8 sps:$4 sm:$0xff]   ;;  %v1825_v8 = vld [vmem:[%s2269_s5 + $0x1e0] ss:$8 sps:$4 sm:$0xff]   ;;  %v1828_v10 = vld [vmem:[%s2269_s5 + $0x1d4] ss:$8 sps:$4 sm:$0xff]  }
  0x69   : > { %1311 = vmatpush1.bf16.msra.mxu0 %v1788_v47  ;;  %v1830_v11 = vld [vmem:[%s2269_s5 + $0xd0] ss:$8 sps:$4 sm:$0xff]   ;;  %v1832_v13 = vld [vmem:[%s2269_s5 + $0xc4] ss:$8 sps:$4 sm:$0xff]   ;;  %v1836_v18 = vld [vmem:[%s2269_s5 + $0xc0] ss:$8 sps:$4 sm:$0xff]  }
  0x6a   : > { %1352 = vmatpush1.bf16.msra.mxu1 %v1789_v48  ;;  %1312 = vmatprep.subr.bf16.mxu0 %v1790_v49  ;;  %v1831_v12 = vld [vmem:[%s2269_s5 + $0x1d0] ss:$8 sps:$4 sm:$0xff]   ;;  %v1834_v14 = vld [vmem:[%s2269_s5 + $0x1c4] ss:$8 sps:$4 sm:$0xff]   ;;  %v1837_v19 = vld [vmem:[%s2269_s5 + $0x1c0] ss:$8 sps:$4 sm:$0xff]  }
  0x6b   : > { %1353 = vmatprep.subr.bf16.mxu1 %v1792_v50  ;;  %v704_v15 = vld [vmem:[%s2257_s26] sm:$0xff]  ;;  %v705_v17 = vld [vmem:[%s2257_s26 + $0x8] sm:$0xff]  ;;  %v1844_v25 = vld [vmem:[%s2269_s5 + $0xa4] ss:$8 sps:$4 sm:$0xff]   ;;  %p1701_p13 = scmp.ne.s32.totalorder %s1954_s14, 5 }
  0x6c   : > { %v1600_v16 = vcombine.high %v704_v15, %v704_v15  ;;  %v1602_v20 = vcombine.high %v705_v17, %v705_v17  ;;  %v1838_v21 = vld [vmem:[%s2269_s5 + $0xb4] ss:$8 sps:$4 sm:$0xff]   ;;  %v1842_v23 = vld [vmem:[%s2269_s5 + $0xb0] ss:$8 sps:$4 sm:$0xff]   ;;  %v1846_v26 = vld [vmem:[%s2269_s5 + $0x1a4] ss:$8 sps:$4 sm:$0xff]   ;;  %v1599_v38 = vcombine.low %v704_v15, %v704_v15  ;;  %v1601_v39 = vcombine.low %v705_v17, %v705_v17 }
  0x6d   : > { %1313 = vmatpush1.bf16.msra.mxu0 %v1794_v51  ;;  %v1840_v22 = vld [vmem:[%s2269_s5 + $0x1b4] ss:$8 sps:$4 sm:$0xff]   ;;  %v1843_v24 = vld [vmem:[%s2269_s5 + $0x1b0] ss:$8 sps:$4 sm:$0xff]   ;;  %v1848_v27 = vld [vmem:[%s2269_s5 + $0xa0] ss:$8 sps:$4 sm:$0xff]  }
  0x6e   : > { %1354 = vmatpush1.bf16.msra.mxu1 %v1795_v52  ;;  %1314 = vmatprep.subr.bf16.mxu0 %v1796_v53  ;;  %v1849_v28 = vld [vmem:[%s2269_s5 + $0x1a0] ss:$8 sps:$4 sm:$0xff]   ;;  %v1850_v29 = vld [vmem:[%s2269_s5 + $0x94] ss:$8 sps:$4 sm:$0xff]   ;;  %v1854_v31 = vld [vmem:[%s2269_s5 + $0x90] ss:$8 sps:$4 sm:$0xff]  }
  0x6f   : > { %1355 = vmatprep.subr.bf16.mxu1 %v1798_v54  ;;  %1336 = vmatprep.mubr.bf16.mxu0 %v1600_v16  ;;  %v1852_v30 = vld [vmem:[%s2269_s5 + $0x194] ss:$8 sps:$4 sm:$0xff]   ;;  %v1855_v32 = vld [vmem:[%s2269_s5 + $0x190] ss:$8 sps:$4 sm:$0xff]   ;;  %v1856_v33 = vld [vmem:[%s2269_s5 + $0x84] ss:$8 sps:$4 sm:$0xff]  }
  0x70   : > { %1377 = vmatprep.mubr.bf16.mxu1 %v1602_v20  ;;  %v1858_v34 = vld [vmem:[%s2269_s5 + $0x184] ss:$8 sps:$4 sm:$0xff]   ;;  %v1860_v35 = vld [vmem:[%s2269_s5 + $0x80] ss:$8 sps:$4 sm:$0xff]   ;;  %v1868_v37 = vld [vmem:[%s2269_s5 + $0x274] ss:$8 sps:$4 sm:$0xff]  }
  0x71   : > { %1315 = vmatpush1.bf16.msra.mxu0 %v1800_v55  ;;  %v1861_v36 = vld [vmem:[%s2269_s5 + $0x180] ss:$8 sps:$4 sm:$0xff]   ;;  %v1866_v40 = vld [vmem:[%s2269_s5 + $0x270] ss:$8 sps:$4 sm:$0xff]   ;;  %v1871_v42 = vld [vmem:[%s2269_s5 + $0x264] ss:$8 sps:$4 sm:$0xff]  }
  0x72   : > { %1356 = vmatpush1.bf16.msra.mxu1 %v1801_v56  ;;  %1316 = vmatprep.subr.bf16.mxu0 %v1802_v57  ;;  %v2341_v41 = vld [vmem:[%s2257_s26 + $0x10] sm:$0xff]  ;;  %v1874_v45 = vld [vmem:[%s2269_s5 + $0x254] ss:$8 sps:$4 sm:$0xff]   ;;  %v1872_v46 = vld [vmem:[%s2269_s5 + $0x250] ss:$8 sps:$4 sm:$0xff]  }
  0x73   : > { %1357 = vmatprep.subr.bf16.mxu1 %v1804_v58  ;;  %v1604_v43 = vcombine.high %v2341_v41, %v2341_v41  ;;  %v1869_v44 = vld [vmem:[%s2269_s5 + $0x260] ss:$8 sps:$4 sm:$0xff]   ;;  %v1877_v47 = vld [vmem:[%s2269_s5 + $0x244] ss:$8 sps:$4 sm:$0xff]   ;;  %v1880_v49 = vld [vmem:[%s2269_s5 + $0x234] ss:$8 sps:$4 sm:$0xff]  }
  0x74   : > { %v1875_v48 = vld [vmem:[%s2269_s5 + $0x240] ss:$8 sps:$4 sm:$0xff]   ;;  %v1878_v50 = vld [vmem:[%s2269_s5 + $0x230] ss:$8 sps:$4 sm:$0xff]   ;;  %v1883_v51 = vld [vmem:[%s2269_s5 + $0x224] ss:$8 sps:$4 sm:$0xff]  }
  0x75   : > { %1317 = vmatpush1.bf16.msra.mxu0 %v1806_v59  ;;  %v1881_v52 = vld [vmem:[%s2269_s5 + $0x220] ss:$8 sps:$4 sm:$0xff]   ;;  %v1886_v53 = vld [vmem:[%s2269_s5 + $0x214] ss:$8 sps:$4 sm:$0xff]   ;;  %v1884_v54 = vld [vmem:[%s2269_s5 + $0x210] ss:$8 sps:$4 sm:$0xff]  }
  0x76   : > { %1358 = vmatpush1.bf16.msra.mxu1 %v1807_v60  ;;  %1318 = vmatprep.subr.bf16.mxu0 %v1808_v61  ;;  %v1889_v55 = vld [vmem:[%s2269_s5 + $0x204] ss:$8 sps:$4 sm:$0xff]   ;;  %v1887_v56 = vld [vmem:[%s2269_s5 + $0x200] ss:$8 sps:$4 sm:$0xff]   ;;  %v1892_v57 = vld [vmem:[%s2269_s5 + $0x2f4] ss:$8 sps:$4 sm:$0xff]  }
  0x77   : > { %1359 = vmatprep.subr.bf16.mxu1 %v1810_v62  ;;  %v1890_v58 = vld [vmem:[%s2269_s5 + $0x2f0] ss:$8 sps:$4 sm:$0xff]   ;;  %v1895_v59 = vld [vmem:[%s2269_s5 + $0x2e4] ss:$8 sps:$4 sm:$0xff]   ;;  %v1893_v60 = vld [vmem:[%s2269_s5 + $0x2e0] ss:$8 sps:$4 sm:$0xff]  }
  0x78   : > { %v1898_v61 = vld [vmem:[%s2269_s5 + $0x2d4] ss:$8 sps:$4 sm:$0xff]   ;;  %v1896_v62 = vld [vmem:[%s2269_s5 + $0x2d0] ss:$8 sps:$4 sm:$0xff]  }
  0x79   : > { %1319 = vmatpush1.bf16.msra.mxu0 %v1812_v63  ;;  %v1901_v63 = vld [vmem:[%s2269_s5 + $0x2c4] ss:$8 sps:$4 sm:$0xff]  }
  0x7a   : > { %1360 = vmatpush1.bf16.msra.mxu1 %v1813_v0  ;;  %1320 = vmatprep.subr.bf16.mxu0 %v1814_v1  ;;  %v1899_v0 = vld [vmem:[%s2269_s5 + $0x2c0] ss:$8 sps:$4 sm:$0xff]   ;;  %v1904_v1 = vld [vmem:[%s2269_s5 + $0x2b4] ss:$8 sps:$4 sm:$0xff]  }
  0x7b   : > { %1361 = vmatprep.subr.bf16.mxu1 %v1816_v2  ;;  %v1902_v2 = vld [vmem:[%s2269_s5 + $0x2b0] ss:$8 sps:$4 sm:$0xff]  }
  0x7d   : > { %1321 = vmatpush2.bf16.msra.mxu0 %v1818_v3  ;;  %v1907_v3 = vld [vmem:[%s2269_s5 + $0x2a4] ss:$8 sps:$4 sm:$0xff]  }
  0x7e   : > { %1362 = vmatpush2.bf16.msra.mxu1 %v1819_v4  ;;  %1322 = vmatprep.subr.bf16.mxu0 %v1820_v5  ;;  %v1905_v4 = vld [vmem:[%s2269_s5 + $0x2a0] ss:$8 sps:$4 sm:$0xff]   ;;  %v1910_v5 = vld [vmem:[%s2269_s5 + $0x294] ss:$8 sps:$4 sm:$0xff]  }
  0x7f   : > { %1363 = vmatprep.subr.bf16.mxu1 %v1822_v6  ;;  %v1908_v6 = vld [vmem:[%s2269_s5 + $0x290] ss:$8 sps:$4 sm:$0xff]  }
  0x81   : > { %1323 = vmatpush2.bf16.msra.mxu0 %v1824_v7  ;;  %v1913_v7 = vld [vmem:[%s2269_s5 + $0x284] ss:$8 sps:$4 sm:$0xff]  }
  0x82   : > { %1364 = vmatpush2.bf16.msra.mxu1 %v1825_v8  ;;  %1324 = vmatprep.subr.bf16.mxu0 %v1826_v9  ;;  %v1911_v8 = vld [vmem:[%s2269_s5 + $0x280] ss:$8 sps:$4 sm:$0xff]   ;;  %v1603_v9 = vcombine.low %v2341_v41, %v2341_v41 }
  0x83   : > { %1365 = vmatprep.subr.bf16.mxu1 %v1828_v10 }
  0x85   : > { %1325 = vmatpush2.bf16.msra.mxu0 %v1830_v11 }
  0x86   : > { %1366 = vmatpush2.bf16.msra.mxu1 %v1831_v12  ;;  %1326 = vmatprep.subr.bf16.mxu0 %v1832_v13 }
  0x87   : > { %1367 = vmatprep.subr.bf16.mxu1 %v1834_v14 }
  0x89   : > { %1327 = vmatpush2.bf16.msra.mxu0 %v1836_v18 }
  0x8a   : > { %1368 = vmatpush2.bf16.msra.mxu1 %v1837_v19  ;;  %1328 = vmatprep.subr.bf16.mxu0 %v1838_v21  ;;  %v702_v19 = vld [vmem:[#allocation2] sm:$0xff] }
  0x8b   : > { %1369 = vmatprep.subr.bf16.mxu1 %v1840_v22 }
  0x8d   : > { %1329 = vmatpush2.bf16.msra.mxu0 %v1842_v23  ;;  %v703_v23 = vld [vmem:[#allocation2 + $0x8] sm:$0xff] }
  0x8e   : > { %1370 = vmatpush2.bf16.msra.mxu1 %v1843_v24  ;;  %1330 = vmatprep.subr.bf16.mxu0 %v1844_v25 }
  0x8f   : > { %1371 = vmatprep.subr.bf16.mxu1 %v1846_v26 }
  0x91   : > { %1331 = vmatpush2.bf16.msra.mxu0 %v1848_v27 }
  0x92   : > { %1372 = vmatpush2.bf16.msra.mxu1 %v1849_v28  ;;  %1332 = vmatprep.subr.bf16.mxu0 %v1850_v29 }
  0x93   : > { %1373 = vmatprep.subr.bf16.mxu1 %v1852_v30 }
  0x95   : > { %1333 = vmatpush2.bf16.msra.mxu0 %v1854_v31 }
  0x96   : > { %1374 = vmatpush2.bf16.msra.mxu1 %v1855_v32  ;;  %1334 = vmatprep.subr.bf16.mxu0 %v1856_v33 }
  0x97   : > { %1375 = vmatprep.subr.bf16.mxu1 %v1858_v34 }
  0x99   : > { %1335 = vmatpush2.bf16.msra.mxu0 %v1860_v35 }
  0x9a   : > { %1376 = vmatpush2.bf16.msra.mxu1 %v1861_v36  ;;  %1386 = vmatprep.subr.bf16.mxu0 %v1868_v37 }
  0x9c   : > { %1337 = vmatmul.mubr.bf16.vlgmr.msra.gmra.mxu0 %v1599_v38 }
  0x9d   : > { %1378 = vmatmul.mubr.bf16.vlgmr.msra.gmra.mxu1 %v1601_v39  ;;  %1387 = vmatpush1.bf16.msra.mxu0 %v1866_v40 }
  0x9e   : > { %1418 = vmatprep.mubr.bf16.mxu0 %v1604_v43  ;;  %1388 = vmatprep.subr.bf16.mxu0 %v1871_v42 }
  0xa1   : > { %1389 = vmatpush1.bf16.msra.mxu0 %v1869_v44 }
  0xa2   : > { %1390 = vmatprep.subr.bf16.mxu0 %v1874_v45 }
  0xa5   : > { %1391 = vmatpush1.bf16.msra.mxu0 %v1872_v46 }
  0xa6   : > { %1392 = vmatprep.subr.bf16.mxu0 %v1877_v47 }
  0xa9   : > { %1393 = vmatpush1.bf16.msra.mxu0 %v1875_v48 }
  0xaa   : > { %1394 = vmatprep.subr.bf16.mxu0 %v1880_v49 }
  0xad   : > { %1395 = vmatpush1.bf16.msra.mxu0 %v1878_v50 }
  0xae   : > { %1396 = vmatprep.subr.bf16.mxu0 %v1883_v51 }
  0xb1   : > { %1397 = vmatpush1.bf16.msra.mxu0 %v1881_v52 }
  0xb2   : > { %1398 = vmatprep.subr.bf16.mxu0 %v1886_v53 }
  0xb5   : > { %1399 = vmatpush1.bf16.msra.mxu0 %v1884_v54 }
  0xb6   : > { %1400 = vmatprep.subr.bf16.mxu0 %v1889_v55 }
  0xb9   : > { %1401 = vmatpush1.bf16.msra.mxu0 %v1887_v56 }
  0xba   : > { %1402 = vmatprep.subr.bf16.mxu0 %v1892_v57 }
  0xbd   : > { %1403 = vmatpush2.bf16.msra.mxu0 %v1890_v58 }
  0xbe   : > { %1404 = vmatprep.subr.bf16.mxu0 %v1895_v59 }
  0xc1   : > { %1405 = vmatpush2.bf16.msra.mxu0 %v1893_v60 }
  0xc2   : > { %1406 = vmatprep.subr.bf16.mxu0 %v1898_v61 }
  0xc5   : > { %1407 = vmatpush2.bf16.msra.mxu0 %v1896_v62 }
  0xc6   : > { %1408 = vmatprep.subr.bf16.mxu0 %v1901_v63 }
  0xc9   : > { %1409 = vmatpush2.bf16.msra.mxu0 %v1899_v0 }
  0xca   : > { %1410 = vmatprep.subr.bf16.mxu0 %v1904_v1 }
  0xcd   : > { %1411 = vmatpush2.bf16.msra.mxu0 %v1902_v2 }
  0xce   : > { %1412 = vmatprep.subr.bf16.mxu0 %v1907_v3 }
  0xd1   : > { %1413 = vmatpush2.bf16.msra.mxu0 %v1905_v4 }
  0xd2   : > { %1414 = vmatprep.subr.bf16.mxu0 %v1910_v5 }
  0xd5   : > { %1415 = vmatpush2.bf16.msra.mxu0 %v1908_v6 }
  0xd6   : > { %1416 = vmatprep.subr.bf16.mxu0 %v1913_v7 }
  0xd9   : > { %1417 = vmatpush2.bf16.msra.mxu0 %v1911_v8 }
  0xdc   : > { %1419 = vmatmul.mubr.bf16.vlgmr.msra.gmra.mxu0 %v1603_v9 }
 0x15c   : > { %v1338_v10 = vpop.f32.mrf.mxu0 }
 0x15d   : > { %v1379_v11 = vpop.f32.mrf.mxu1 }
 0x15e   : > { %v1340_v12 = vpop.f32.mrf.mxu0  ;;  %v1380_v18 = vadd.f32 %v1379_v11, %v1338_v10 }
 0x15f   : > { %v1381_v13 = vpop.f32.mrf.mxu1 }
 0x160   : > { %v1342_v14 = vpop.f32.mrf.mxu0  ;;  %v1382_v21 = vadd.f32 %v1381_v13, %v1340_v12 }
 0x161   : > { %v1383_v15 = vpop.f32.mrf.mxu1 }
 0x162   : > { %v1343_v16 = vpop.f32.mrf.mxu0 }
 0x163   : > { %v1384_v17 = vpop.f32.mrf.mxu1 }
 0x19c   : > { %v1420_v20 = vpop.f32.mrf.mxu0 }
 0x19d   : > { %v1421_v22 = vadd.f32 %v1420_v20, %v1380_v18 }
 0x19e   : > { %v1422_v24 = vpop.f32.mrf.mxu0 }
 0x19f   : > { %v1427_v25 = vadd.f32 %v1421_v22, %v702_v19  ;;  %v1423_v26 = vadd.f32 %v1422_v24, %v1382_v21  ;;  %1434 = sbr.rel (%p1701_p13) target bundleno = 434 (0x1b2), region = 78 }
 0x1a0   : > { %v1424_v27 = vpop.f32.mrf.mxu0 }
 0x1a1   : > { %1429 = vst [vmem:[#allocation2] sm:$0xff] %v1427_v25  ;;  %v1428_v28 = vadd.f32 %v1423_v26, %v703_v23 }
 0x1a2   : > { %v1425_v29 = vpop.f32.mrf.mxu0 }
 0x1a3   : > { %1430 = vst [vmem:[#allocation2 + $0x8] sm:$0xff] %v1428_v28 }
 0x1a4   : > { %v1437_v32 = vld [vmem:[%s2262_s30] sm:$0xff] }
 0x1a5   : > { %v1438_v33 = vunpack.c.l.bf16 %v1437_v32  ;;  %v1439_v34 = vunpack.c.h.bf16 %v1437_v32 }
 0x1a8   : > { %v1435_v30 = vld [vmem:[#allocation2] sm:$0xff] }
 0x1a9   : > { %v1440_v35 = vadd.f32 %v1438_v33, %v1435_v30 }
 0x1aa   : > { %v1436_v31 = vld [vmem:[#allocation2 + $0x8] sm:$0xff] }
 0x1ab   : > { %v1441_v36 = vadd.f32 %v1439_v34, %v1436_v31  ;;  %v1442_v37 = vmax.f32 %v1440_v35, 0.0 }
 0x1ad   : > { %v1443_v38 = vmax.f32 %v1441_v36, 0.0 }
 0x1af   : > { %v1706_v39 = vpack.c.bf16 %v1443_v38, %v1442_v37 }
 0x1b1   : > { %1452 = vst [vmem:[%s2267_s15] sm:$0xff] %v1706_v39 }
 0x1b2 PF: > { %s13_s18 = sadd.s32 1, %s1970_s18   ;;  %s2405_s12 = smov %s1950_s13 }
 0x1b3   : > { %p10_p0 = scmp.ge.s32.totalorder %s13_s18, 14   ;;  %s2406_s13 = smov %s2044_s25 }
 0x1b4   : > { %s2407_s14 = smov %s1962_s16  ;;  %s2408_s15 = smov %s1966_s17 }
 0x1b5   : > { %s2409_s16 = smov %s2412_s19  ;;  %s2410_s17 = smov %s2416_s20 }
 0x1b6   :  { %12 = sbr.rel (!%p10_p0) target bundleno = 4 (0x4), region = 119 }

// kernel: resnet_forward.25
= control target key start
LH: loop header
LB: loop body
LE: loop exit
PB: predicated region body
PF: predicated region fallthrough
CT: control target
= control target key end

     0   :  { %s637_s1 = inlined_call_operand.vmem [shape: bf16[512,128], index: 1, kind: input, shape index: {}]   ;;  %s638_s0 = inlined_call_operand.vmem [shape: bf16[8,512], index: 0, kind: input, shape index: {}]   ;;  %s639_s2 = inlined_call_operand.vmem [shape: f32[1,128], index: 2, kind: input, shape index: {}]   ;;  %s640_s3 = inlined_call_operand.vmem [shape: f32[8,128], index: 3, kind: output, shape index: {}]  }
   0x1   :  { %v473_v0 = vld [vmem:[%s637_s1 + $0x78] sm:$0xff]   ;;  %v477_v4 = vld [vmem:[%s637_s1 + $0x70] sm:$0xff]   ;;  %v481_v8 = vld [vmem:[%s637_s1 + $0x68] sm:$0xff]  }
   0x2   :  { %v474_v1 = vld [vmem:[%s637_s1 + $0xf8] sm:$0xff]   ;;  %429 = vmatprep.subr.bf16.mxu0 %v473_v0  ;;  %v478_v5 = vld [vmem:[%s637_s1 + $0xf0] sm:$0xff]   ;;  %v482_v9 = vld [vmem:[%s637_s1 + $0xe8] sm:$0xff]  }
   0x3   :  { %v475_v2 = vld [vmem:[%s637_s1 + $0x38] sm:$0xff]   ;;  %451 = vmatprep.subr.bf16.mxu1 %v474_v1  ;;  %v479_v6 = vld [vmem:[%s637_s1 + $0x30] sm:$0xff]   ;;  %v483_v10 = vld [vmem:[%s637_s1 + $0x28] sm:$0xff]  }
   0x4   :  { %v476_v3 = vld [vmem:[%s637_s1 + $0xb8] sm:$0xff]   ;;  %430 = vmatpush3.bf16.msra.mxu0 %v475_v2  ;;  %v480_v7 = vld [vmem:[%s637_s1 + $0xb0] sm:$0xff]   ;;  %v484_v11 = vld [vmem:[%s637_s1 + $0xa8] sm:$0xff]  }
   0x5   :  { %452 = vmatpush3.bf16.msra.mxu1 %v476_v3  ;;  %431 = vmatprep.subr.bf16.mxu0 %v477_v4  ;;  %v485_v12 = vld [vmem:[%s637_s1 + $0x60] sm:$0xff]   ;;  %v489_v16 = vld [vmem:[%s637_s1 + $0x58] sm:$0xff]   ;;  %v493_v20 = vld [vmem:[%s637_s1 + $0x50] sm:$0xff]  }
   0x6   :  { %453 = vmatprep.subr.bf16.mxu1 %v478_v5  ;;  %v486_v13 = vld [vmem:[%s637_s1 + $0xe0] sm:$0xff]   ;;  %v490_v17 = vld [vmem:[%s637_s1 + $0xd8] sm:$0xff]   ;;  %v494_v21 = vld [vmem:[%s637_s1 + $0xd0] sm:$0xff]  }
   0x7   :  { %v487_v14 = vld [vmem:[%s637_s1 + $0x20] sm:$0xff]   ;;  %v491_v18 = vld [vmem:[%s637_s1 + $0x18] sm:$0xff]   ;;  %v495_v22 = vld [vmem:[%s637_s1 + $0x10] sm:$0xff]  }
   0x8   :  { %432 = vmatpush3.bf16.msra.mxu0 %v479_v6  ;;  %v488_v15 = vld [vmem:[%s637_s1 + $0xa0] sm:$0xff]   ;;  %v492_v19 = vld [vmem:[%s637_s1 + $0x98] sm:$0xff]   ;;  %v496_v23 = vld [vmem:[%s637_s1 + $0x90] sm:$0xff]  }
   0x9   :  { %454 = vmatpush3.bf16.msra.mxu1 %v480_v7  ;;  %433 = vmatprep.subr.bf16.mxu0 %v481_v8  ;;  %v497_v24 = vld [vmem:[%s637_s1 + $0x48] sm:$0xff]   ;;  %v501_v28 = vld [vmem:[%s637_s1 + $0x40] sm:$0xff]  }
   0xa   :  { %455 = vmatprep.subr.bf16.mxu1 %v482_v9  ;;  %v498_v25 = vld [vmem:[%s637_s1 + $0xc8] sm:$0xff]   ;;  %v502_v29 = vld [vmem:[%s637_s1 + $0xc0] sm:$0xff]  }
   0xb   :  { %v499_v26 = vld [vmem:[%s637_s1 + $0x8] sm:$0xff]   ;;  %v503_v30 = vld [vmem:[%s637_s1] sm:$0xff]  }
   0xc   :  { %434 = vmatpush3.bf16.msra.mxu0 %v483_v10  ;;  %v500_v27 = vld [vmem:[%s637_s1 + $0x88] sm:$0xff]   ;;  %v504_v31 = vld [vmem:[%s637_s1 + $0x80] sm:$0xff]  }
   0xd   :  { %456 = vmatpush3.bf16.msra.mxu1 %v484_v11  ;;  %435 = vmatprep.subr.bf16.mxu0 %v485_v12  ;;  %v21_v32 = vld [vmem:[%s638_s0] sm:$0xff]  ;;  %v22_v33 = vld [vmem:[%s638_s0 + $0x8] sm:$0xff] }
   0xe   :  { %457 = vmatprep.subr.bf16.mxu1 %v486_v13  ;;  %v392_v34 = vcombine.low %v21_v32, %v21_v32  ;;  %v393_v35 = vcombine.high %v21_v32, %v21_v32  ;;  %v394_v36 = vcombine.low %v22_v33, %v22_v33  ;;  %v395_v37 = vcombine.high %v22_v33, %v22_v33  ;;  %v428_v44 = vld [vmem:[%s639_s2] ss:$0 sm:$0xff] }
  0x10   :  { %436 = vmatpush3.bf16.msra.mxu0 %v487_v14  ;;  %325 = vmatprep.mubr.bf16.mxu0 %v393_v35 }
  0x11   :  { %458 = vmatpush3.bf16.msra.mxu1 %v488_v15  ;;  %437 = vmatprep.subr.bf16.mxu0 %v489_v16 }
  0x12   :  { %459 = vmatprep.subr.bf16.mxu1 %v490_v17  ;;  %365 = vmatprep.mubr.bf16.mxu1 %v395_v37 }
  0x14   :  { %438 = vmatpush3.bf16.msra.mxu0 %v491_v18 }
  0x15   :  { %460 = vmatpush3.bf16.msra.mxu1 %v492_v19  ;;  %439 = vmatprep.subr.bf16.mxu0 %v493_v20 }
  0x16   :  { %461 = vmatprep.subr.bf16.mxu1 %v494_v21 }
  0x18   :  { %440 = vmatpush3.bf16.msra.mxu0 %v495_v22 }
  0x19   :  { %462 = vmatpush3.bf16.msra.mxu1 %v496_v23  ;;  %441 = vmatprep.subr.bf16.mxu0 %v497_v24 }
  0x1a   :  { %463 = vmatprep.subr.bf16.mxu1 %v498_v25 }
  0x1c   :  { %442 = vmatpush3.bf16.msra.mxu0 %v499_v26 }
  0x1d   :  { %464 = vmatpush3.bf16.msra.mxu1 %v500_v27  ;;  %443 = vmatprep.subr.bf16.mxu0 %v501_v28 }
  0x1e   :  { %465 = vmatprep.subr.bf16.mxu1 %v502_v29 }
  0x20   :  { %444 = vmatpush3.bf16.msra.mxu0 %v503_v30 }
  0x21   :  { %466 = vmatpush3.bf16.msra.mxu1 %v504_v31 }
  0x23   :  { %326 = vmatmul.mubr.bf16.vlgmr.msra.gmra.mxu0 %v392_v34 }
  0x24   :  { %366 = vmatmul.mubr.bf16.vlgmr.msra.gmra.mxu1 %v394_v36 }
  0xe3   :  { %v445_v38 = vpop.f32.mrf.mxu0 }
  0xe4   :  { %v467_v39 = vpop.f32.mrf.mxu1 }
  0xe5   :  { %v446_v40 = vpop.f32.mrf.mxu0 }
  0xe6   :  { %v468_v41 = vpop.f32.mrf.mxu1  ;;  %v447_v42 = vadd.f32 %v446_v40, %v445_v38 }
  0xe7   :  { %v469_v43 = vadd.f32 %v468_v41, %v467_v39  ;;  %v448_v45 = vpop.f32.mrf.mxu0 }
  0xe8   :  { %v470_v46 = vpop.f32.mrf.mxu1 }
  0xe9   :  { %v368_v47 = vadd.f32 %v469_v43, %v447_v42  ;;  %v449_v48 = vpop.f32.mrf.mxu0 }
  0xea   :  { %v471_v49 = vpop.f32.mrf.mxu1 }
  0xeb   :  { %v386_v50 = vadd.f32 %v428_v44, %v368_v47 }
  0xed   :  { %387 = vst [vmem:[%s640_s3] sm:$0xff] %v386_v50 }

</bundles_post_ra>
